<compile_context>
chip_gen: v7x
topology: tpu7x:2x2x1
jax: 0.10.0
libtpu: 0.0.40
codegen_flags: <defaults>
</compile_context>

<pallas_src>
import functools

import jax
import jax.numpy as jnp
from jax.experimental import pallas as pl
from jax.experimental.pallas import tpu as pltpu


# ----------------------------------------------------------------------------
# Fused ST-LSTM cell kernel (one grid step == one batch element)
# ----------------------------------------------------------------------------
def _st_lstm_kernel(xhm_ref, cm_ref, mask_ref, wg_ref, wo_ref, out_ref,
                    xhm_ext_ref, mem_ext_ref, *, wp, ext, nh):
    """Flattened zero-padded spatial grid, R = (H+2)*(W+2) rows.

    xhm_ref : (1, R, Cp)        bf16  [x|h|m|1] channels (Cp lane-padded)
    cm_ref  : (1, R, 2*nh)      f32   [c_t | m_t]
    mask_ref: (R, 1)            f32   1 on real pixels, 0 on the padding ring
    wg_ref  : (9, Cp, 7*nh)     bf16  fused conv_x+conv_h+conv_m (+bias row),
                                       gate blocks ordered [i,i',f,f',g,g',o]
    wo_ref  : (9, 2*nh, 2*nh)   bf16  conv_o | conv_last (centre tap only)
    out_ref : (1, R, out_cp)    f32   packed [c_new | m_new | h_new | 0-pad]
    """
    f32, bf16 = jnp.float32, jnp.bfloat16
    r = cm_ref.shape[1]

    # One-time zeroing of the persistent scratch halo rows.  Interior rows
    # [ext:ext+r] are fully rewritten every grid step; ring positions are
    # additionally NaN-guarded by the select below, so real outputs never
    # depend on these rows.
    @pl.when(pl.program_id(0) == 0)
    def _():
        xhm_ext_ref[0:ext, :] = jnp.zeros((ext, xhm_ext_ref.shape[1]), bf16)
        xhm_ext_ref[ext + r:ext + r + ext, :] = jnp.zeros(
            (ext, xhm_ext_ref.shape[1]), bf16)
        mem_ext_ref[0:ext, :] = jnp.zeros((ext, mem_ext_ref.shape[1]), bf16)
        mem_ext_ref[ext + r:ext + r + ext, :] = jnp.zeros(
            (ext, mem_ext_ref.shape[1]), bf16)

    # Halo-extend [x|h|m|1] in VMEM (no extra HBM write+read of the extension).
    xhm_ext_ref[ext:ext + r, :] = xhm_ref[0]

    # Fused conv_x + conv_h + conv_m (+ forget-bias channel): 9 shifted slabs
    # times one block-structured weight; cross-path gate sums fall out of MXU.
    acc = jnp.zeros((r, 7 * nh), f32)
    for kh in range(3):
        for kw in range(3):
            off = ext + (kh - 1) * wp + (kw - 1)
            acc = acc + jnp.dot(xhm_ext_ref[off:off + r, :],
                                wg_ref[kh * 3 + kw],
                                preferred_element_type=f32)

    # Gate columns: [i, i' | f, f' | g, g' | o]  (bias already inside acc)
    sig = jax.nn.sigmoid(acc[:, :4 * nh])        # one lane-dense EUP pass
    g_pk = jnp.tanh(acc[:, 4 * nh:6 * nh])       # one EUP pass for [g, g']
    # Packed state update: [c_new | m_new] in one 2*nh-wide pass.
    mem_new = sig[:, 2 * nh:4 * nh] * cm_ref[0] + sig[:, :2 * nh] * g_pk
    # Zero the padding ring (NaN-safe select; conv_o must see SAME zero-pad).
    mem_new = jnp.where(mask_ref[...] > 0.5, mem_new, 0.0)

    # conv_o (3x3) + conv_last (1x1, folded into the centre tap) on the packed
    # bf16 mem scratch: 9 dots with K = 2*nh.
    mem_ext_ref[ext:ext + r, :] = mem_new.astype(bf16)
    acc_o = jnp.zeros((r, 2 * nh), f32)
    for kh in range(3):
        for kw in range(3):
            off = ext + (kh - 1) * wp + (kw - 1)
            acc_o = acc_o + jnp.dot(mem_ext_ref[off:off + r, :],
                                    wo_ref[kh * 3 + kw],
                                    preferred_element_type=f32)

    o_t = jax.nn.sigmoid(acc[:, 6 * nh:7 * nh] + acc_o[:, :nh])
    h_new = o_t * jnp.tanh(acc_o[:, nh:2 * nh])

    # Single lane-dense packed store: [c_new | m_new | h_new | 0-pad].
    pad_cols = out_ref.shape[-1] - 3 * nh
    pieces = [mem_new, h_new]
    if pad_cols:
        pieces.append(jnp.zeros((r, pad_cols), f32))
    out_ref[0] = jnp.concatenate(pieces, axis=-1)


# ----------------------------------------------------------------------------
# Wrapper (PyTorch NCHW convention in / out; conv weights in HWIO)
# ----------------------------------------------------------------------------
@jax.jit
def st_lstm_cell_forward(x_t, h_t, c_t, m_t, wx, wh, wm, wo, wlast):
    n, cin, hgt, wid = x_t.shape
    nh = h_t.shape[1]
    f32, bf16 = jnp.float32, jnp.bfloat16
    forget_bias = 1.0

    hp, wp = hgt + 2, wid + 2                 # zero-padded spatial grid
    r = hp * wp                               # flattened padded spatial size
    ext = (wp + 1 + 15) // 16 * 16            # bf16-tile-aligned halo extension
    ctot = cin + 2 * nh + 1                   # +1 constant-bias channel
    ctot_p = max(((ctot + 127) // 128) * 128, 128)
    out_cp = ((3 * nh + 127) // 128) * 128

    nhwc = lambda a: jnp.transpose(a, (0, 2, 3, 1)).astype(f32)
    x, h, c, m = nhwc(x_t), nhwc(h_t), nhwc(c_t), nhwc(m_t)

    # [x|h|m|1] -> spatial zero-pad -> flatten -> lane-pad -> bf16 (one pad op).
    ones = jnp.ones((n, hgt, wid, 1), f32)
    xhm = jnp.concatenate([x, h, m, ones], axis=-1)
    xhm = jnp.pad(xhm, ((0, 0), (1, 1), (1, 1), (0, ctot_p - ctot)))
    xhm = xhm.reshape(n, r, ctot_p).astype(bf16)

    # Packed f32 state [c|m] on the padded grid.
    cm = jnp.concatenate([c, m], axis=-1)
    cm = jnp.pad(cm, ((0, 0), (1, 1), (1, 1), (0, 0))).reshape(n, r, 2 * nh)

    mask = jnp.pad(jnp.ones((hgt, wid), f32), ((1, 1), (1, 1))).reshape(r, 1)

    # Fused block-structured gate weight (9, Cp, 7*nh); gate-block order
    # [i, i', f, f', g, g', o].  x feeds all 7; h feeds i,f,g,o; m feeds
    # i',f',g'; the bias channel's centre tap carries forget_bias on f,f'.
    wx_r = wx.astype(f32).reshape(9, cin, 7 * nh)   # torch order [i,f,g,i',f',g',o]
    bx = lambda k: wx_r[:, :, k * nh:(k + 1) * nh]
    wx_new = jnp.concatenate([bx(0), bx(3), bx(1), bx(4), bx(2), bx(5), bx(6)],
                             axis=2)

    wh_r = wh.astype(f32).reshape(9, nh, 4 * nh)    # [i,f,g,o]
    bh = lambda k: wh_r[:, :, k * nh:(k + 1) * nh]
    z_h = jnp.zeros((9, nh, nh), f32)
    wh_new = jnp.concatenate([bh(0), z_h, bh(1), z_h, bh(2), z_h, bh(3)], axis=2)

    wm_r = wm.astype(f32).reshape(9, nh, 3 * nh)    # [i',f',g']
    bm = lambda k: wm_r[:, :, k * nh:(k + 1) * nh]
    z_m = jnp.zeros((9, nh, nh), f32)
    wm_new = jnp.concatenate([z_m, bm(0), z_m, bm(1), z_m, bm(2), z_m], axis=2)

    bias_row = jnp.zeros((9, 1, 7 * nh), f32).at[4, 0, 2 * nh:4 * nh].set(
        forget_bias)

    w_gates = jnp.concatenate([wx_new, wh_new, wm_new, bias_row], axis=1)
    w_gates = jnp.pad(w_gates, ((0, 0), (0, ctot_p - ctot), (0, 0))).astype(bf16)

    # conv_o | conv_last fused weight (9, 2nh, 2nh): last nh output columns are
    # conv_last, present only at the centre tap.
    wo_r = wo.astype(f32).reshape(9, 2 * nh, nh)
    wl_blocks = jnp.zeros((9, 2 * nh, nh), f32).at[4].set(
        wlast[0, 0].astype(f32))
    wo_full = jnp.concatenate([wo_r, wl_blocks], axis=2).astype(bf16)

    kernel = functools.partial(_st_lstm_kernel, wp=wp, ext=ext, nh=nh)

    out = pl.pallas_call(
        kernel,
        out_shape=jax.ShapeDtypeStruct((n, r, out_cp), f32),
        grid=(n,),
        in_specs=[
            pl.BlockSpec((1, r, ctot_p), lambda b: (b, 0, 0)),
            pl.BlockSpec((1, r, 2 * nh), lambda b: (b, 0, 0)),
            pl.BlockSpec((r, 1), lambda b: (0, 0)),
            pl.BlockSpec((9, ctot_p, 7 * nh), lambda b: (0, 0, 0)),
            pl.BlockSpec((9, 2 * nh, 2 * nh), lambda b: (0, 0, 0)),
        ],
        out_specs=pl.BlockSpec((1, r, out_cp), lambda b: (b, 0, 0)),
        scratch_shapes=[pltpu.VMEM((r + 2 * ext, ctot_p), bf16),
                        pltpu.VMEM((r + 2 * ext, 2 * nh), bf16)],
        compiler_params=pltpu.CompilerParams(
            dimension_semantics=("parallel",)),
    )(xhm, cm, mask, w_gates, wo_full)

    # Crop the halo ring, unpack [c|m|h], return NCHW.
    out = out.reshape(n, hp, wp, out_cp)[:, 1:1 + hgt, 1:1 + wid, :]
    to_nchw = lambda a: jnp.transpose(a, (0, 3, 1, 2))
    c_new = to_nchw(out[..., :nh])
    m_new = to_nchw(out[..., nh:2 * nh])
    h_new = to_nchw(out[..., 2 * nh:3 * nh])
    return h_new, c_new, m_new


# ----------------------------------------------------------------------------
# Pure-JAX reference (lax conv) for correctness check
# ----------------------------------------------------------------------------
def _reference_forward(x_t, h_t, c_t, m_t, wx, wh, wm, wo, wlast, nh):
    def conv(a_nchw, w_hwio):
        a = jnp.transpose(a_nchw, (0, 2, 3, 1))
        out = jax.lax.conv_general_dilated(
            a, w_hwio, (1, 1), 'SAME',
            dimension_numbers=('NHWC', 'HWIO', 'NHWC'))
        return jnp.transpose(out, (0, 3, 1, 2))

    x_cat = conv(x_t, wx)
    h_cat = conv(h_t, wh)
    m_cat = conv(m_t, wm)
    sp = lambda a, i: a[:, i * nh:(i + 1) * nh]
    i_x, f_x, g_x, i_xp, f_xp, g_xp, o_x = [sp(x_cat, i) for i in range(7)]
    i_h, f_h, g_h, o_h = [sp(h_cat, i) for i in range(4)]
    i_m, f_m, g_m = [sp(m_cat, i) for i in range(3)]
    i_t = jax.nn.sigmoid(i_x + i_h)
    f_t = jax.nn.sigmoid(f_x + f_h + 1.0)
    g_t = jnp.tanh(g_x + g_h)
    c_new = f_t * c_t + i_t * g_t
    i_tp = jax.nn.sigmoid(i_xp + i_m)
    f_tp = jax.nn.sigmoid(f_xp + f_m + 1.0)
    g_tp = jnp.tanh(g_xp + g_m)
    m_new = f_tp * m_t + i_tp * g_tp
    mem = jnp.concatenate((c_new, m_new), axis=1)
    o_t = jax.nn.sigmoid(o_x + o_h + conv(mem, wo))
    h_new = o_t * jnp.tanh(conv(mem, wlast))
    return h_new, c_new, m_new


if __name__ == "__main__":
    N, CIN, NH, H, W = 2, 4, 32, 16, 16

    key = jax.random.PRNGKey(0)
    kx, kh_, kc, km, k1, k2, k3, k4, k5 = jax.random.split(key, 9)

    # inputs (PyTorch NCHW convention)
    x_t = jax.random.normal(kx, (N, CIN, H, W), jnp.float32)
    h_t = jax.random.normal(kh_, (N, NH, H, W), jnp.float32) * 0.5
    c_t = jax.random.normal(kc, (N, NH, H, W), jnp.float32) * 0.5
    m_t = jax.random.normal(km, (N, NH, H, W), jnp.float32) * 0.5

    # synthetic conv weights, HWIO layout, bias=False as in the module
    wx = jax.random.normal(k1, (3, 3, CIN, 7 * NH), jnp.float32) * 0.05
    wh = jax.random.normal(k2, (3, 3, NH, 4 * NH), jnp.float32) * 0.05
    wm = jax.random.normal(k3, (3, 3, NH, 3 * NH), jnp.float32) * 0.05
    wo = jax.random.normal(k4, (3, 3, 2 * NH, NH), jnp.float32) * 0.05
    wlast = jax.random.normal(k5, (1, 1, 2 * NH, NH), jnp.float32) * 0.05

    h_new, c_new, m_new = st_lstm_cell_forward(
        x_t, h_t, c_t, m_t, wx, wh, wm, wo, wlast)
    jax.block_until_ready((h_new, c_new, m_new))

    h_ref, c_ref, m_ref = _reference_forward(
        x_t, h_t, c_t, m_t, wx, wh, wm, wo, wlast, NH)

    assert h_new.shape == (N, NH, H, W)
    # bf16 MXU matmuls (f32 accumulation / gating) -> relaxed tolerance.
    tol = dict(atol=3e-2, rtol=3e-2)
    assert jnp.allclose(c_new, c_ref, **tol)
    assert jnp.allclose(m_new, m_ref, **tol)
    assert jnp.allclose(h_new, h_ref, **tol)

    print("KERNEL_OK")
</pallas_src>

<mosaic_0001>
module attributes {stable_mosaic.version = 11 : i64} {
  func.func @_st_lstm_kernel(%arg0: i32, %arg1: memref<1x324x128xbf16, #tpu.memory_space<vmem>>, %arg2: memref<1x324x64xf32, #tpu.memory_space<vmem>>, %arg3: memref<324x1xf32, #tpu.memory_space<vmem>>, %arg4: memref<9x128x224xbf16, #tpu.memory_space<vmem>>, %arg5: memref<9x64x64xbf16, #tpu.memory_space<vmem>>, %arg6: memref<1x324x128xf32, #tpu.memory_space<vmem>>, %arg7: memref<388x128xbf16, #tpu.memory_space<vmem>>, %arg8: memref<388x64xbf16, #tpu.memory_space<vmem>>) attributes {dimension_semantics = [#tpu.dimension_semantics<parallel>], iteration_bounds = array<i64: 2>, scalar_prefetch = 0 : i64, scratch_operands = 2 : i64, tpu.core_type = #tpu.core_type<tc>, window_params = [{transform_indices = @transform_0, window_bounds = array<i64: 1, 324, 128>}, {transform_indices = @transform_1, window_bounds = array<i64: 1, 324, 64>}, {pipeline_mode = #tpu.pipeline_mode<synchronous>, transform_indices = @transform_2, window_bounds = array<i64: 324, 1>}, {pipeline_mode = #tpu.pipeline_mode<synchronous>, transform_indices = @transform_3, window_bounds = array<i64: 9, 128, 224>}, {pipeline_mode = #tpu.pipeline_mode<synchronous>, transform_indices = @transform_4, window_bounds = array<i64: 9, 64, 64>}, {transform_indices = @transform_5, window_bounds = array<i64: 1, 324, 128>}]} {
    %c0_i32 = arith.constant 0 : i32
    %0 = arith.cmpi eq, %arg0, %c0_i32 : i32
    %1 = arith.extui %0 : i1 to i32
    %c0_i32_0 = arith.constant 0 : i32
    %2 = arith.cmpi ne, %1, %c0_i32_0 : i32
    scf.if %2 {
      %cst_112 = arith.constant 0.000000e+00 : bf16
      %138 = vector.broadcast %cst_112 : bf16 to vector<32x128xbf16>
      %c0_113 = arith.constant 0 : index
      %c0_114 = arith.constant 0 : index
      %139 = vector.load %arg7[%c0_113, %c0_114] : memref<388x128xbf16, #tpu.memory_space<vmem>>, vector<32x128xbf16>
      tpu.vector_store %arg7[%c0_113, %c0_114], %138 {strides = array<i32>} : memref<388x128xbf16, #tpu.memory_space<vmem>>, vector<32x128xbf16>,
      %cst_115 = arith.constant 0.000000e+00 : bf16
      %140 = vector.broadcast %cst_115 : bf16 to vector<32x128xbf16>
      %c356 = arith.constant 356 : index
      %c0_116 = arith.constant 0 : index
      %141 = vector.load %arg7[%c356, %c0_116] : memref<388x128xbf16, #tpu.memory_space<vmem>>, vector<32x128xbf16>
      tpu.vector_store %arg7[%c356, %c0_116], %140 {strides = array<i32>} : memref<388x128xbf16, #tpu.memory_space<vmem>>, vector<32x128xbf16>,
      %cst_117 = arith.constant 0.000000e+00 : bf16
      %142 = vector.broadcast %cst_117 : bf16 to vector<32x64xbf16>
      %c0_118 = arith.constant 0 : index
      %c0_119 = arith.constant 0 : index
      %143 = vector.load %arg8[%c0_118, %c0_119] : memref<388x64xbf16, #tpu.memory_space<vmem>>, vector<32x64xbf16>
      tpu.vector_store %arg8[%c0_118, %c0_119], %142 {strides = array<i32>} : memref<388x64xbf16, #tpu.memory_space<vmem>>, vector<32x64xbf16>,
      %cst_120 = arith.constant 0.000000e+00 : bf16
      %144 = vector.broadcast %cst_120 : bf16 to vector<32x64xbf16>
      %c356_121 = arith.constant 356 : index
      %c0_122 = arith.constant 0 : index
      %145 = vector.load %arg8[%c356_121, %c0_122] : memref<388x64xbf16, #tpu.memory_space<vmem>>, vector<32x64xbf16>
      tpu.vector_store %arg8[%c356_121, %c0_122], %144 {strides = array<i32>} : memref<388x64xbf16, #tpu.memory_space<vmem>>, vector<32x64xbf16>,
    } else {
    }
    %c0 = arith.constant 0 : index
    %c0_1 = arith.constant 0 : index
    %c0_2 = arith.constant 0 : index
    %3 = vector.load %arg1[%c0, %c0_1, %c0_2] : memref<1x324x128xbf16, #tpu.memory_space<vmem>>, vector<1x324x128xbf16>
    %4 = vector.shape_cast %3 : vector<1x324x128xbf16> to vector<324x128xbf16>
    %c32 = arith.constant 32 : index
    %c0_3 = arith.constant 0 : index
    %5 = vector.load %arg7[%c32, %c0_3] : memref<388x128xbf16, #tpu.memory_space<vmem>>, vector<324x128xbf16>
    tpu.vector_store %arg7[%c32, %c0_3], %4 {strides = array<i32>} : memref<388x128xbf16, #tpu.memory_space<vmem>>, vector<324x128xbf16>,
    %cst = arith.constant 0.000000e+00 : f32
    %6 = vector.broadcast %cst : f32 to vector<324x224xf32>
    %c13 = arith.constant 13 : index
    %c0_4 = arith.constant 0 : index
    %7 = vector.load %arg7[%c13, %c0_4] : memref<388x128xbf16, #tpu.memory_space<vmem>>, vector<324x128xbf16>
    %c0_5 = arith.constant 0 : index
    %c0_6 = arith.constant 0 : index
    %c0_7 = arith.constant 0 : index
    %8 = vector.load %arg4[%c0_5, %c0_6, %c0_7] : memref<9x128x224xbf16, #tpu.memory_space<vmem>>, vector<1x128x224xbf16>
    %9 = vector.shape_cast %8 : vector<1x128x224xbf16> to vector<128x224xbf16>
    %cst_8 = arith.constant dense<0.000000e+00> : vector<324x224xf32>
    %10 = tpu.matmul %7, %9, %cst_8 {dimension_numbers = #tpu.dot_dimension_numbers<[1], [0], [0], [1], [0, 0, 1, 1], [], []>} : vector<324x128xbf16>, vector<128x224xbf16>, vector<324x224xf32> -> vector<324x224xf32>
    %11 = arith.addf %6, %10 : vector<324x224xf32>
    %c14 = arith.constant 14 : index
    %c0_9 = arith.constant 0 : index
    %12 = vector.load %arg7[%c14, %c0_9] : memref<388x128xbf16, #tpu.memory_space<vmem>>, vector<324x128xbf16>
    %c1 = arith.constant 1 : index
    %c0_10 = arith.constant 0 : index
    %c0_11 = arith.constant 0 : index
    %13 = vector.load %arg4[%c1, %c0_10, %c0_11] : memref<9x128x224xbf16, #tpu.memory_space<vmem>>, vector<1x128x224xbf16>
    %14 = vector.shape_cast %13 : vector<1x128x224xbf16> to vector<128x224xbf16>
    %cst_12 = arith.constant dense<0.000000e+00> : vector<324x224xf32>
    %15 = tpu.matmul %12, %14, %cst_12 {dimension_numbers = #tpu.dot_dimension_numbers<[1], [0], [0], [1], [0, 0, 1, 1], [], []>} : vector<324x128xbf16>, vector<128x224xbf16>, vector<324x224xf32> -> vector<324x224xf32>
    %16 = arith.addf %11, %15 : vector<324x224xf32>
    %c15 = arith.constant 15 : index
    %c0_13 = arith.constant 0 : index
    %17 = vector.load %arg7[%c15, %c0_13] : memref<388x128xbf16, #tpu.memory_space<vmem>>, vector<324x128xbf16>
    %c2 = arith.constant 2 : index
    %c0_14 = arith.constant 0 : index
    %c0_15 = arith.constant 0 : index
    %18 = vector.load %arg4[%c2, %c0_14, %c0_15] : memref<9x128x224xbf16, #tpu.memory_space<vmem>>, vector<1x128x224xbf16>
    %19 = vector.shape_cast %18 : vector<1x128x224xbf16> to vector<128x224xbf16>
    %cst_16 = arith.constant dense<0.000000e+00> : vector<324x224xf32>
    %20 = tpu.matmul %17, %19, %cst_16 {dimension_numbers = #tpu.dot_dimension_numbers<[1], [0], [0], [1], [0, 0, 1, 1], [], []>} : vector<324x128xbf16>, vector<128x224xbf16>, vector<324x224xf32> -> vector<324x224xf32>
    %21 = arith.addf %16, %20 : vector<324x224xf32>
    %c31 = arith.constant 31 : index
    %c0_17 = arith.constant 0 : index
    %22 = vector.load %arg7[%c31, %c0_17] : memref<388x128xbf16, #tpu.memory_space<vmem>>, vector<324x128xbf16>
    %c3 = arith.constant 3 : index
    %c0_18 = arith.constant 0 : index
    %c0_19 = arith.constant 0 : index
    %23 = vector.load %arg4[%c3, %c0_18, %c0_19] : memref<9x128x224xbf16, #tpu.memory_space<vmem>>, vector<1x128x224xbf16>
    %24 = vector.shape_cast %23 : vector<1x128x224xbf16> to vector<128x224xbf16>
    %cst_20 = arith.constant dense<0.000000e+00> : vector<324x224xf32>
    %25 = tpu.matmul %22, %24, %cst_20 {dimension_numbers = #tpu.dot_dimension_numbers<[1], [0], [0], [1], [0, 0, 1, 1], [], []>} : vector<324x128xbf16>, vector<128x224xbf16>, vector<324x224xf32> -> vector<324x224xf32>
    %26 = arith.addf %21, %25 : vector<324x224xf32>
    %c32_21 = arith.constant 32 : index
    %c0_22 = arith.constant 0 : index
    %27 = vector.load %arg7[%c32_21, %c0_22] : memref<388x128xbf16, #tpu.memory_space<vmem>>, vector<324x128xbf16>
    %c4 = arith.constant 4 : index
    %c0_23 = arith.constant 0 : index
    %c0_24 = arith.constant 0 : index
    %28 = vector.load %arg4[%c4, %c0_23, %c0_24] : memref<9x128x224xbf16, #tpu.memory_space<vmem>>, vector<1x128x224xbf16>
    %29 = vector.shape_cast %28 : vector<1x128x224xbf16> to vector<128x224xbf16>
    %cst_25 = arith.constant dense<0.000000e+00> : vector<324x224xf32>
    %30 = tpu.matmul %27, %29, %cst_25 {dimension_numbers = #tpu.dot_dimension_numbers<[1], [0], [0], [1], [0, 0, 1, 1], [], []>} : vector<324x128xbf16>, vector<128x224xbf16>, vector<324x224xf32> -> vector<324x224xf32>
    %31 = arith.addf %26, %30 : vector<324x224xf32>
    %c33 = arith.constant 33 : index
    %c0_26 = arith.constant 0 : index
    %32 = vector.load %arg7[%c33, %c0_26] : memref<388x128xbf16, #tpu.memory_space<vmem>>, vector<324x128xbf16>
    %c5 = arith.constant 5 : index
    %c0_27 = arith.constant 0 : index
    %c0_28 = arith.constant 0 : index
    %33 = vector.load %arg4[%c5, %c0_27, %c0_28] : memref<9x128x224xbf16, #tpu.memory_space<vmem>>, vector<1x128x224xbf16>
    %34 = vector.shape_cast %33 : vector<1x128x224xbf16> to vector<128x224xbf16>
    %cst_29 = arith.constant dense<0.000000e+00> : vector<324x224xf32>
    %35 = tpu.matmul %32, %34, %cst_29 {dimension_numbers = #tpu.dot_dimension_numbers<[1], [0], [0], [1], [0, 0, 1, 1], [], []>} : vector<324x128xbf16>, vector<128x224xbf16>, vector<324x224xf32> -> vector<324x224xf32>
    %36 = arith.addf %31, %35 : vector<324x224xf32>
    %c49 = arith.constant 49 : index
    %c0_30 = arith.constant 0 : index
    %37 = vector.load %arg7[%c49, %c0_30] : memref<388x128xbf16, #tpu.memory_space<vmem>>, vector<324x128xbf16>
    %c6 = arith.constant 6 : index
    %c0_31 = arith.constant 0 : index
    %c0_32 = arith.constant 0 : index
    %38 = vector.load %arg4[%c6, %c0_31, %c0_32] : memref<9x128x224xbf16, #tpu.memory_space<vmem>>, vector<1x128x224xbf16>
    %39 = vector.shape_cast %38 : vector<1x128x224xbf16> to vector<128x224xbf16>
    %cst_33 = arith.constant dense<0.000000e+00> : vector<324x224xf32>
    %40 = tpu.matmul %37, %39, %cst_33 {dimension_numbers = #tpu.dot_dimension_numbers<[1], [0], [0], [1], [0, 0, 1, 1], [], []>} : vector<324x128xbf16>, vector<128x224xbf16>, vector<324x224xf32> -> vector<324x224xf32>
    %41 = arith.addf %36, %40 : vector<324x224xf32>
    %c50 = arith.constant 50 : index
    %c0_34 = arith.constant 0 : index
    %42 = vector.load %arg7[%c50, %c0_34] : memref<388x128xbf16, #tpu.memory_space<vmem>>, vector<324x128xbf16>
    %c7 = arith.constant 7 : index
    %c0_35 = arith.constant 0 : index
    %c0_36 = arith.constant 0 : index
    %43 = vector.load %arg4[%c7, %c0_35, %c0_36] : memref<9x128x224xbf16, #tpu.memory_space<vmem>>, vector<1x128x224xbf16>
    %44 = vector.shape_cast %43 : vector<1x128x224xbf16> to vector<128x224xbf16>
    %cst_37 = arith.constant dense<0.000000e+00> : vector<324x224xf32>
    %45 = tpu.matmul %42, %44, %cst_37 {dimension_numbers = #tpu.dot_dimension_numbers<[1], [0], [0], [1], [0, 0, 1, 1], [], []>} : vector<324x128xbf16>, vector<128x224xbf16>, vector<324x224xf32> -> vector<324x224xf32>
    %46 = arith.addf %41, %45 : vector<324x224xf32>
    %c51 = arith.constant 51 : index
    %c0_38 = arith.constant 0 : index
    %47 = vector.load %arg7[%c51, %c0_38] : memref<388x128xbf16, #tpu.memory_space<vmem>>, vector<324x128xbf16>
    %c8 = arith.constant 8 : index
    %c0_39 = arith.constant 0 : index
    %c0_40 = arith.constant 0 : index
    %48 = vector.load %arg4[%c8, %c0_39, %c0_40] : memref<9x128x224xbf16, #tpu.memory_space<vmem>>, vector<1x128x224xbf16>
    %49 = vector.shape_cast %48 : vector<1x128x224xbf16> to vector<128x224xbf16>
    %cst_41 = arith.constant dense<0.000000e+00> : vector<324x224xf32>
    %50 = tpu.matmul %47, %49, %cst_41 {dimension_numbers = #tpu.dot_dimension_numbers<[1], [0], [0], [1], [0, 0, 1, 1], [], []>} : vector<324x128xbf16>, vector<128x224xbf16>, vector<324x224xf32> -> vector<324x224xf32>
    %51 = arith.addf %46, %50 : vector<324x224xf32>
    %52 = vector.extract_strided_slice %51 {offsets = [0, 0], sizes = [324, 128], strides = [1, 1]} : vector<324x224xf32> to vector<324x128xf32>
    %53 = arith.negf %52 : vector<324x128xf32>
    %54 = math.exp %53 : vector<324x128xf32>
    %cst_42 = arith.constant 1.000000e+00 : f32
    %55 = vector.broadcast %cst_42 : f32 to vector<324x128xf32>
    %56 = arith.addf %55, %54 : vector<324x128xf32>
    %57 = arith.divf %55, %56 : vector<324x128xf32>
    %58 = vector.extract_strided_slice %51 {offsets = [0, 128], sizes = [324, 64], strides = [1, 1]} : vector<324x224xf32> to vector<324x64xf32>
    %59 = math.tanh %58 : vector<324x64xf32>
    %60 = vector.extract_strided_slice %57 {offsets = [0, 64], sizes = [324, 64], strides = [1, 1]} : vector<324x128xf32> to vector<324x64xf32>
    %c0_43 = arith.constant 0 : index
    %c0_44 = arith.constant 0 : index
    %c0_45 = arith.constant 0 : index
    %61 = vector.load %arg2[%c0_43, %c0_44, %c0_45] : memref<1x324x64xf32, #tpu.memory_space<vmem>>, vector<1x324x64xf32>
    %62 = vector.shape_cast %61 : vector<1x324x64xf32> to vector<324x64xf32>
    %63 = arith.mulf %60, %62 : vector<324x64xf32>
    %64 = vector.extract_strided_slice %57 {offsets = [0, 0], sizes = [324, 64], strides = [1, 1]} : vector<324x128xf32> to vector<324x64xf32>
    %65 = arith.mulf %64, %59 : vector<324x64xf32>
    %66 = arith.addf %63, %65 : vector<324x64xf32>
    %c0_46 = arith.constant 0 : index
    %c0_47 = arith.constant 0 : index
    %67 = vector.load %arg3[%c0_46, %c0_47] : memref<324x1xf32, #tpu.memory_space<vmem>>, vector<324x1xf32>
    %cst_48 = arith.constant 5.000000e-01 : f32
    %68 = vector.broadcast %cst_48 : f32 to vector<324x1xf32>
    %69 = arith.cmpf ogt, %67, %68 : vector<324x1xf32>
    %cst_49 = arith.constant 0.000000e+00 : f32
    %70 = vector.shape_cast %69 : vector<324x1xi1> to vector<324x1xi1>
    %71 = vector.broadcast %70 : vector<324x1xi1> to vector<324x64xi1>
    %72 = vector.broadcast %cst_49 : f32 to vector<324x64xf32>
    %73 = arith.select %71, %66, %72 : vector<324x64xi1>, vector<324x64xf32>
    %74 = arith.truncf %73 : vector<324x64xf32> to vector<324x64xbf16>
    %c32_50 = arith.constant 32 : index
    %c0_51 = arith.constant 0 : index
    %75 = vector.load %arg8[%c32_50, %c0_51] : memref<388x64xbf16, #tpu.memory_space<vmem>>, vector<324x64xbf16>
    tpu.vector_store %arg8[%c32_50, %c0_51], %74 {strides = array<i32>} : memref<388x64xbf16, #tpu.memory_space<vmem>>, vector<324x64xbf16>,
    %cst_52 = arith.constant 0.000000e+00 : f32
    %76 = vector.broadcast %cst_52 : f32 to vector<324x64xf32>
    %c13_53 = arith.constant 13 : index
    %c0_54 = arith.constant 0 : index
    %77 = vector.load %arg8[%c13_53, %c0_54] : memref<388x64xbf16, #tpu.memory_space<vmem>>, vector<324x64xbf16>
    %c0_55 = arith.constant 0 : index
    %c0_56 = arith.constant 0 : index
    %c0_57 = arith.constant 0 : index
    %78 = vector.load %arg5[%c0_55, %c0_56, %c0_57] : memref<9x64x64xbf16, #tpu.memory_space<vmem>>, vector<1x64x64xbf16>
    %79 = vector.shape_cast %78 : vector<1x64x64xbf16> to vector<64x64xbf16>
    %cst_58 = arith.constant dense<0.000000e+00> : vector<324x64xf32>
    %80 = tpu.matmul %77, %79, %cst_58 {dimension_numbers = #tpu.dot_dimension_numbers<[1], [0], [0], [1], [0, 0, 1, 1], [], []>} : vector<324x64xbf16>, vector<64x64xbf16>, vector<324x64xf32> -> vector<324x64xf32>
    %81 = arith.addf %76, %80 : vector<324x64xf32>
    %c14_59 = arith.constant 14 : index
    %c0_60 = arith.constant 0 : index
    %82 = vector.load %arg8[%c14_59, %c0_60] : memref<388x64xbf16, #tpu.memory_space<vmem>>, vector<324x64xbf16>
    %c1_61 = arith.constant 1 : index
    %c0_62 = arith.constant 0 : index
    %c0_63 = arith.constant 0 : index
    %83 = vector.load %arg5[%c1_61, %c0_62, %c0_63] : memref<9x64x64xbf16, #tpu.memory_space<vmem>>, vector<1x64x64xbf16>
    %84 = vector.shape_cast %83 : vector<1x64x64xbf16> to vector<64x64xbf16>
    %cst_64 = arith.constant dense<0.000000e+00> : vector<324x64xf32>
    %85 = tpu.matmul %82, %84, %cst_64 {dimension_numbers = #tpu.dot_dimension_numbers<[1], [0], [0], [1], [0, 0, 1, 1], [], []>} : vector<324x64xbf16>, vector<64x64xbf16>, vector<324x64xf32> -> vector<324x64xf32>
    %86 = arith.addf %81, %85 : vector<324x64xf32>
    %c15_65 = arith.constant 15 : index
    %c0_66 = arith.constant 0 : index
    %87 = vector.load %arg8[%c15_65, %c0_66] : memref<388x64xbf16, #tpu.memory_space<vmem>>, vector<324x64xbf16>
    %c2_67 = arith.constant 2 : index
    %c0_68 = arith.constant 0 : index
    %c0_69 = arith.constant 0 : index
    %88 = vector.load %arg5[%c2_67, %c0_68, %c0_69] : memref<9x64x64xbf16, #tpu.memory_space<vmem>>, vector<1x64x64xbf16>
    %89 = vector.shape_cast %88 : vector<1x64x64xbf16> to vector<64x64xbf16>
    %cst_70 = arith.constant dense<0.000000e+00> : vector<324x64xf32>
    %90 = tpu.matmul %87, %89, %cst_70 {dimension_numbers = #tpu.dot_dimension_numbers<[1], [0], [0], [1], [0, 0, 1, 1], [], []>} : vector<324x64xbf16>, vector<64x64xbf16>, vector<324x64xf32> -> vector<324x64xf32>
    %91 = arith.addf %86, %90 : vector<324x64xf32>
    %c31_71 = arith.constant 31 : index
    %c0_72 = arith.constant 0 : index
    %92 = vector.load %arg8[%c31_71, %c0_72] : memref<388x64xbf16, #tpu.memory_space<vmem>>, vector<324x64xbf16>
    %c3_73 = arith.constant 3 : index
    %c0_74 = arith.constant 0 : index
    %c0_75 = arith.constant 0 : index
    %93 = vector.load %arg5[%c3_73, %c0_74, %c0_75] : memref<9x64x64xbf16, #tpu.memory_space<vmem>>, vector<1x64x64xbf16>
    %94 = vector.shape_cast %93 : vector<1x64x64xbf16> to vector<64x64xbf16>
    %cst_76 = arith.constant dense<0.000000e+00> : vector<324x64xf32>
    %95 = tpu.matmul %92, %94, %cst_76 {dimension_numbers = #tpu.dot_dimension_numbers<[1], [0], [0], [1], [0, 0, 1, 1], [], []>} : vector<324x64xbf16>, vector<64x64xbf16>, vector<324x64xf32> -> vector<324x64xf32>
    %96 = arith.addf %91, %95 : vector<324x64xf32>
    %c32_77 = arith.constant 32 : index
    %c0_78 = arith.constant 0 : index
    %97 = vector.load %arg8[%c32_77, %c0_78] : memref<388x64xbf16, #tpu.memory_space<vmem>>, vector<324x64xbf16>
    %c4_79 = arith.constant 4 : index
    %c0_80 = arith.constant 0 : index
    %c0_81 = arith.constant 0 : index
    %98 = vector.load %arg5[%c4_79, %c0_80, %c0_81] : memref<9x64x64xbf16, #tpu.memory_space<vmem>>, vector<1x64x64xbf16>
    %99 = vector.shape_cast %98 : vector<1x64x64xbf16> to vector<64x64xbf16>
    %cst_82 = arith.constant dense<0.000000e+00> : vector<324x64xf32>
    %100 = tpu.matmul %97, %99, %cst_82 {dimension_numbers = #tpu.dot_dimension_numbers<[1], [0], [0], [1], [0, 0, 1, 1], [], []>} : vector<324x64xbf16>, vector<64x64xbf16>, vector<324x64xf32> -> vector<324x64xf32>
    %101 = arith.addf %96, %100 : vector<324x64xf32>
    %c33_83 = arith.constant 33 : index
    %c0_84 = arith.constant 0 : index
    %102 = vector.load %arg8[%c33_83, %c0_84] : memref<388x64xbf16, #tpu.memory_space<vmem>>, vector<324x64xbf16>
    %c5_85 = arith.constant 5 : index
    %c0_86 = arith.constant 0 : index
    %c0_87 = arith.constant 0 : index
    %103 = vector.load %arg5[%c5_85, %c0_86, %c0_87] : memref<9x64x64xbf16, #tpu.memory_space<vmem>>, vector<1x64x64xbf16>
    %104 = vector.shape_cast %103 : vector<1x64x64xbf16> to vector<64x64xbf16>
    %cst_88 = arith.constant dense<0.000000e+00> : vector<324x64xf32>
    %105 = tpu.matmul %102, %104, %cst_88 {dimension_numbers = #tpu.dot_dimension_numbers<[1], [0], [0], [1], [0, 0, 1, 1], [], []>} : vector<324x64xbf16>, vector<64x64xbf16>, vector<324x64xf32> -> vector<324x64xf32>
    %106 = arith.addf %101, %105 : vector<324x64xf32>
    %c49_89 = arith.constant 49 : index
    %c0_90 = arith.constant 0 : index
    %107 = vector.load %arg8[%c49_89, %c0_90] : memref<388x64xbf16, #tpu.memory_space<vmem>>, vector<324x64xbf16>
    %c6_91 = arith.constant 6 : index
    %c0_92 = arith.constant 0 : index
    %c0_93 = arith.constant 0 : index
    %108 = vector.load %arg5[%c6_91, %c0_92, %c0_93] : memref<9x64x64xbf16, #tpu.memory_space<vmem>>, vector<1x64x64xbf16>
    %109 = vector.shape_cast %108 : vector<1x64x64xbf16> to vector<64x64xbf16>
    %cst_94 = arith.constant dense<0.000000e+00> : vector<324x64xf32>
    %110 = tpu.matmul %107, %109, %cst_94 {dimension_numbers = #tpu.dot_dimension_numbers<[1], [0], [0], [1], [0, 0, 1, 1], [], []>} : vector<324x64xbf16>, vector<64x64xbf16>, vector<324x64xf32> -> vector<324x64xf32>
    %111 = arith.addf %106, %110 : vector<324x64xf32>
    %c50_95 = arith.constant 50 : index
    %c0_96 = arith.constant 0 : index
    %112 = vector.load %arg8[%c50_95, %c0_96] : memref<388x64xbf16, #tpu.memory_space<vmem>>, vector<324x64xbf16>
    %c7_97 = arith.constant 7 : index
    %c0_98 = arith.constant 0 : index
    %c0_99 = arith.constant 0 : index
    %113 = vector.load %arg5[%c7_97, %c0_98, %c0_99] : memref<9x64x64xbf16, #tpu.memory_space<vmem>>, vector<1x64x64xbf16>
    %114 = vector.shape_cast %113 : vector<1x64x64xbf16> to vector<64x64xbf16>
    %cst_100 = arith.constant dense<0.000000e+00> : vector<324x64xf32>
    %115 = tpu.matmul %112, %114, %cst_100 {dimension_numbers = #tpu.dot_dimension_numbers<[1], [0], [0], [1], [0, 0, 1, 1], [], []>} : vector<324x64xbf16>, vector<64x64xbf16>, vector<324x64xf32> -> vector<324x64xf32>
    %116 = arith.addf %111, %115 : vector<324x64xf32>
    %c51_101 = arith.constant 51 : index
    %c0_102 = arith.constant 0 : index
    %117 = vector.load %arg8[%c51_101, %c0_102] : memref<388x64xbf16, #tpu.memory_space<vmem>>, vector<324x64xbf16>
    %c8_103 = arith.constant 8 : index
    %c0_104 = arith.constant 0 : index
    %c0_105 = arith.constant 0 : index
    %118 = vector.load %arg5[%c8_103, %c0_104, %c0_105] : memref<9x64x64xbf16, #tpu.memory_space<vmem>>, vector<1x64x64xbf16>
    %119 = vector.shape_cast %118 : vector<1x64x64xbf16> to vector<64x64xbf16>
    %cst_106 = arith.constant dense<0.000000e+00> : vector<324x64xf32>
    %120 = tpu.matmul %117, %119, %cst_106 {dimension_numbers = #tpu.dot_dimension_numbers<[1], [0], [0], [1], [0, 0, 1, 1], [], []>} : vector<324x64xbf16>, vector<64x64xbf16>, vector<324x64xf32> -> vector<324x64xf32>
    %121 = arith.addf %116, %120 : vector<324x64xf32>
    %122 = vector.extract_strided_slice %51 {offsets = [0, 192], sizes = [324, 32], strides = [1, 1]} : vector<324x224xf32> to vector<324x32xf32>
    %123 = vector.extract_strided_slice %121 {offsets = [0, 0], sizes = [324, 32], strides = [1, 1]} : vector<324x64xf32> to vector<324x32xf32>
    %124 = arith.addf %122, %123 : vector<324x32xf32>
    %125 = arith.negf %124 : vector<324x32xf32>
    %126 = math.exp %125 : vector<324x32xf32>
    %cst_107 = arith.constant 1.000000e+00 : f32
    %127 = vector.broadcast %cst_107 : f32 to vector<324x32xf32>
    %128 = arith.addf %127, %126 : vector<324x32xf32>
    %129 = arith.divf %127, %128 : vector<324x32xf32>
    %130 = vector.extract_strided_slice %121 {offsets = [0, 32], sizes = [324, 32], strides = [1, 1]} : vector<324x64xf32> to vector<324x32xf32>
    %131 = math.tanh %130 : vector<324x32xf32>
    %132 = arith.mulf %129, %131 : vector<324x32xf32>
    %cst_108 = arith.constant 0.000000e+00 : f32
    %133 = vector.broadcast %cst_108 : f32 to vector<324x32xf32>
    %134 = tpu.concatenate %73, %132, %133 in 1 : vector<324x64xf32>, vector<324x32xf32>, vector<324x32xf32> -> vector<324x128xf32>
    %c0_109 = arith.constant 0 : index
    %c0_110 = arith.constant 0 : index
    %c0_111 = arith.constant 0 : index
    %135 = vector.load %arg6[%c0_109, %c0_110, %c0_111] : memref<1x324x128xf32, #tpu.memory_space<vmem>>, vector<1x324x128xf32>
    %136 = vector.shape_cast %135 : vector<1x324x128xf32> to vector<324x128xf32>
    %137 = vector.shape_cast %134 : vector<324x128xf32> to vector<1x324x128xf32>
    tpu.vector_store %arg6[%c0_109, %c0_110, %c0_111], %137 {strides = array<i32>} : memref<1x324x128xf32, #tpu.memory_space<vmem>>, vector<1x324x128xf32>,
    return
  }
  func.func @transform_0(%arg0: i32) -> (i32, i32, i32) {
    %c0_i32 = arith.constant 0 : i32
    %c0_i32_0 = arith.constant 0 : i32
    %c0_i32_1 = arith.constant 0 : i32
    return %arg0, %c0_i32, %c0_i32_0 : i32, i32, i32
  }
  func.func @transform_1(%arg0: i32) -> (i32, i32, i32) {
    %c0_i32 = arith.constant 0 : i32
    %c0_i32_0 = arith.constant 0 : i32
    %c0_i32_1 = arith.constant 0 : i32
    return %arg0, %c0_i32, %c0_i32_0 : i32, i32, i32
  }
  func.func @transform_2(%arg0: i32) -> (i32, i32) {
    %c0_i32 = arith.constant 0 : i32
    %c0_i32_0 = arith.constant 0 : i32
    %c0_i32_1 = arith.constant 0 : i32
    return %c0_i32, %c0_i32_0 : i32, i32
  }
  func.func @transform_3(%arg0: i32) -> (i32, i32, i32) {
    %c0_i32 = arith.constant 0 : i32
    %c0_i32_0 = arith.constant 0 : i32
    %c0_i32_1 = arith.constant 0 : i32
    %c0_i32_2 = arith.constant 0 : i32
    return %c0_i32, %c0_i32_0, %c0_i32_1 : i32, i32, i32
  }
  func.func @transform_4(%arg0: i32) -> (i32, i32, i32) {
    %c0_i32 = arith.constant 0 : i32
    %c0_i32_0 = arith.constant 0 : i32
    %c0_i32_1 = arith.constant 0 : i32
    %c0_i32_2 = arith.constant 0 : i32
    return %c0_i32, %c0_i32_0, %c0_i32_1 : i32, i32, i32
  }
  func.func @transform_5(%arg0: i32) -> (i32, i32, i32) {
    %c0_i32 = arith.constant 0 : i32
    %c0_i32_0 = arith.constant 0 : i32
    %c0_i32_1 = arith.constant 0 : i32
    return %arg0, %c0_i32, %c0_i32_0 : i32, i32, i32
  }
}

</mosaic_0001>

<bundles_post_ra>
// kernel: st_lstm_cell_forward.1
= control target key start
LH: loop header
LB: loop body
LE: loop exit
PB: predicated region body
PF: predicated region fallthrough
CT: control target
= control target key end

     0   :  { %s16785_s18 = smov 0   ;;  %s21447_s0 = inlined_call_operand.vmem [shape: bf16[2,324,128], index: 0, kind: input, shape index: {}]   ;;  %s21448_s1 = inlined_call_operand.vmem [shape: f32[2,324,64], index: 1, kind: input, shape index: {}]   ;;  %s21449_s2 = inlined_call_operand.vmem [shape: f32[324,1], index: 2, kind: input, shape index: {}]   ;;  %s21450_s3 = inlined_call_operand.vmem [shape: bf16[9,128,224], index: 3, kind: input, shape index: {}]   ;;  %s21451_s4 = inlined_call_operand.vmem [shape: bf16[9,64,64], index: 4, kind: input, shape index: {}]   ;;  %s21452_s5 = inlined_call_operand.vmem [shape: f32[2,324,128], index: 5, kind: output, shape index: {}]  }
   0x1 LB: > { %s12457_s19 = sadd.s32 4294967295, %s16747_s18   ;;  %p12461_p0 = scmp.ge.s32.totalorder %s16747_s18, 1  ;;  %s16747_s18 = sphi %s16785_s18, %s15_s18  }
   0x2   : > { %p197_p1 = scmp.lt.s32.totalorder %s16747_s18, 3 }
   0x4   : > { %p198_p2 = pnand %p12461_p0, %p197_p1 }
   0x6   : > { %201 = sbr.rel (%p198_p2) target bundleno = 3830 (0xef6), region = 40 }
   0xd   : > { %p230_p3 = scmp.lt.s32.totalorder %s12457_s19, 1  ;;  %p12465_p4 = scmp.ne.s32.totalorder %s12457_s19, 0 }
   0xe   : > { %vm259_vm0 = vcmask (!%p12465_p4), 519168   ;;  %vm264_vm1 = vcmask (!%p12465_p4), 519170   ;;  %v16749_v0 = vmov (!%p12465_p4), 0  }
   0xf   : > { %s231_s20 = scalar_select %p230_p3, %s12457_s19, 1 }
  0x10   : > { %249 = sbr.rel (%p12465_p4) target bundleno = 23 (0x17), region = 44  ;;  %251 = vst [vmem:[#allocation2 + $0x4] sm:$0xf] (!%p12465_p4), %v16749_v0  ;;  %252 = vst [vmem:[#allocation2 + $0x8] sm:$0xf] (!%p12465_p4), %v16749_v0 }
  0x11   : > { %s15768_s21 = smul.u32 164, %s231_s20  ;;  %253 = vst [vmem:[#allocation2 + $0xc] sm:$0xf] (!%p12465_p4), %v16749_v0  ;;  %254 = vst [vmem:[#allocation2 + $0xb0] sm:$0xc] (!%p12465_p4), %v16749_v0 }
  0x12   : > { %s15769_s22 = smul.u32 328, %s231_s20  ;;  %255 = vst [vmem:[#allocation2 + $0xb4] sm:$0xf] (!%p12465_p4), %v16749_v0  ;;  %256 = vst [vmem:[#allocation2 + $0xb8] sm:$0xf] (!%p12465_p4), %v16749_v0 }
  0x13   : > { %s16796_s25 = scalar_lea.vmem %s21447_s0, %s15768_s21  ;;  %261 = vst.msk [vmem:[#allocation3 + $0x4] sm:$0xf] (!%p12465_p4), %vm259_vm0, %v16749_v0  ;;  %262 = vst.msk [vmem:[#allocation3 + $0x8] sm:$0xf] (!%p12465_p4), %vm259_vm0, %v16749_v0 }
  0x14   : > { %s16801_s28 = scalar_lea.vmem %s21448_s1, %s15769_s22  ;;  %s16806_s6 = scalar_lea.vmem %s21452_s5, %s15769_s22  ;;  %263 = vst.msk [vmem:[#allocation3 + $0xc] sm:$0xf] (!%p12465_p4), %vm259_vm0, %v16749_v0  ;;  %266 = vst.msk [vmem:[#allocation3 + $0xb4] sm:$0xf] (!%p12465_p4), %vm259_vm0, %v16749_v0 }
  0x15   : > { %267 = vst.msk [vmem:[#allocation3 + $0xb8] sm:$0xf] (!%p12465_p4), %vm259_vm0, %v16749_v0 }
  0x16   : > { %265 = vst.msk [vmem:[#allocation3 + $0xb0] sm:$0xc] (!%p12465_p4), %vm264_vm1, %v16749_v0 }
  0x17 PF: > { %v15786_v1 = vld [vmem:[%s21450_s3 + $0x84] ss:$8 sps:$4 sm:$0xff]   ;;  %v15788_v2 = vld [vmem:[%s21450_s3 + $0x80] ss:$8 sps:$4 sm:$0xff]   ;;  %v21472_v3 = vmov 0   ;;  %v275_v13 = vld [vmem:[%s16796_s25 + $0x10] sm:$0xff]  }
  0x18   : > { %709 = vmatprep.mubr.bf16.mxu0 %v21472_v3  ;;  %15784 = vset.pattern.permute.xlu0 %v21472_v3  ;;  %v15789_v4 = vld [vmem:[%s21450_s3 + $0x94] ss:$8 sps:$4 sm:$0xff]   ;;  %v15791_v5 = vld [vmem:[%s21450_s3 + $0x90] ss:$8 sps:$4 sm:$0xff]   ;;  %v15792_v6 = vld [vmem:[%s21450_s3 + $0xa4] ss:$8 sps:$4 sm:$0xff]  }
  0x19   : > { %677 = vmatprep.subr.bf16.mxu0 %v15786_v1  ;;  %15785 = vset.pattern.permute.xlu1 %v21472_v3  ;;  %v15794_v7 = vld [vmem:[%s21450_s3 + $0xa0] ss:$8 sps:$4 sm:$0xff]   ;;  %v15795_v8 = vld [vmem:[%s21450_s3 + $0xb4] ss:$8 sps:$4 sm:$0xff]   ;;  %v15797_v10 = vld [vmem:[%s21450_s3 + $0xb0] ss:$8 sps:$4 sm:$0xff]  }
  0x1a   : > { %678 = vmatpush1.bf16.msra.mxu0 %v15788_v2  ;;  %v271_v9 = vld [vmem:[%s16796_s25] sm:$0xff]   ;;  %v273_v12 = vld [vmem:[%s16796_s25 + $0x8] sm:$0xff]   ;;  %v15801_v15 = vld [vmem:[%s21450_s3 + $0xd4] ss:$8 sps:$4 sm:$0xff]   ;;  %316 = vst [vmem:[#allocation2 + $0x20] sm:$0xff] %v275_v13   ;;  %vm534_vm2 = vcmask 1044480  }
  0x1b   : > { %679 = vmatprep.subr.bf16.mxu0 %v15789_v4  ;;  %312 = vst [vmem:[#allocation2 + $0x10] sm:$0xff] %v271_v9   ;;  %v15798_v11 = vld [vmem:[%s21450_s3 + $0xc4] ss:$8 sps:$4 sm:$0xff]   ;;  %314 = vst [vmem:[#allocation2 + $0x18] sm:$0xff] %v273_v12   ;;  %v15800_v14 = vld [vmem:[%s21450_s3 + $0xc0] ss:$8 sps:$4 sm:$0xff]  }
  0x1c   : > { %v277_v16 = vld [vmem:[%s16796_s25 + $0x18] sm:$0xff]   ;;  %v279_v17 = vld [vmem:[%s16796_s25 + $0x20] sm:$0xff]   ;;  %v281_v18 = vld [vmem:[%s16796_s25 + $0x28] sm:$0xff]   ;;  %vm921_vm3 = vsmask.f32 5376  ;;  %vm4615_vm6 = vcmask 1046528  }
  0x1d   : > { %318 = vst [vmem:[#allocation2 + $0x28] sm:$0xff] %v277_v16   ;;  %v15803_v19 = vld [vmem:[%s21450_s3 + $0xd0] ss:$8 sps:$4 sm:$0xff]   ;;  %320 = vst [vmem:[#allocation2 + $0x30] sm:$0xff] %v279_v17   ;;  %v15804_v20 = vld [vmem:[%s21450_s3 + $0xe4] ss:$8 sps:$4 sm:$0xff]  }
  0x1e   : > { %680 = vmatpush1.bf16.msra.mxu0 %v15791_v5  ;;  %322 = vst [vmem:[#allocation2 + $0x38] sm:$0xff] %v281_v18   ;;  %v283_v21 = vld [vmem:[%s16796_s25 + $0x30] sm:$0xff]   ;;  %v285_v22 = vld [vmem:[%s16796_s25 + $0x38] sm:$0xff]   ;;  %v16858_v23 = vld [vmem:[#allocation2 + $0x8] sm:$0xf]  ;;  %s16751_s15 = smov 64  }
  0x1f   : > { %681 = vmatprep.subr.bf16.mxu0 %v15792_v6  ;;  %v411_v24 = vld [vmem:[#allocation2 + $0x4] sm:$0x8]  ;;  %324 = vst [vmem:[#allocation2 + $0x40] sm:$0xff] %v283_v21   ;;  %326 = vst [vmem:[#allocation2 + $0x48] sm:$0xff] %v285_v22   ;;  %v15806_v25 = vld [vmem:[%s21450_s3 + $0xe0] ss:$8 sps:$4 sm:$0xff]  }
  0x20   : > { %v16864_v26 = vcombine.low %v411_v24, %v16858_v23  ;;  %v15807_v28 = vld [vmem:[%s21450_s3 + $0xf4] ss:$8 sps:$4 sm:$0xff]   ;;  %v15809_v29 = vld [vmem:[%s21450_s3 + $0xf0] ss:$8 sps:$4 sm:$0xff]   ;;  %v287_v30 = vld [vmem:[%s16796_s25 + $0x40] sm:$0xff]   ;;  %s16754_s21 = smov 32  }
  0x21   : > { %v289_v31 = vld [vmem:[%s16796_s25 + $0x48] sm:$0xff]   ;;  %v291_v32 = vld [vmem:[%s16796_s25 + $0x50] sm:$0xff]   ;;  %328 = vst [vmem:[#allocation2 + $0x50] sm:$0xff] %v287_v30   ;;  %v293_v38 = vld [vmem:[%s16796_s25 + $0x58] sm:$0xff]   ;;  %vm1473_vm4 = vsmask.f32 4352 }
  0x22   : > { %682 = vmatpush1.bf16.msra.mxu0 %v15794_v7  ;;  %v16866_v27 = vld [vmem:[#allocation2 + $0xc] sm:$0xff]   ;;  %v535_v33 = vrot.slane %v16864_v26, 3  ;;  %330 = vst [vmem:[#allocation2 + $0x58] sm:$0xff] %v289_v31   ;;  %332 = vst [vmem:[#allocation2 + $0x60] sm:$0xff] %v291_v32   ;;  %v15813_v36 = vld [vmem:[%s21450_s3] ss:$8 sps:$4 sm:$0xff]  }
  0x23   : > { %683 = vmatprep.subr.bf16.mxu0 %v15795_v8  ;;  %v536_v34 = vrot.slane %v16866_v27, 3  ;;  %v15815_v35 = vld [vmem:[%s21450_s3 + $0x4] ss:$8 sps:$4 sm:$0xff]   ;;  %v16885_v37 = vld [vmem:[#allocation2 + $0x14] sm:$0xff]   ;;  %334 = vst [vmem:[#allocation2 + $0x68] sm:$0xff] %v293_v38   ;;  %v16909_v51 = vld [vmem:[#allocation2 + $0x1c] sm:$0xff]  }
  0x24   : > { %v295_v39 = vld [vmem:[%s16796_s25 + $0x60] sm:$0xff]   ;;  %v297_v41 = vld [vmem:[%s16796_s25 + $0x68] sm:$0xff]   ;;  %v15820_v42 = vld [vmem:[%s21450_s3 + $0x14] ss:$8 sps:$4 sm:$0xff]   ;;  %v538_v46 = vrot.slane %v16885_v37, 3  ;;  %v540_v55 = vrot.slane %v16909_v51, 3 }
  0x25   : > { %v537_v40 = vsel %vm534_vm2, %v535_v33, %v536_v34  ;;  %336 = vst [vmem:[#allocation2 + $0x70] sm:$0xff] %v295_v39   ;;  %338 = vst [vmem:[#allocation2 + $0x78] sm:$0xff] %v297_v41   ;;  %v299_v43 = vld [vmem:[%s16796_s25 + $0x70] sm:$0xff]   ;;  %v301_v44 = vld [vmem:[%s16796_s25 + $0x78] sm:$0xff]   ;;  %vm3250_vm5 = vsmask.f32 7424 }
  0x26   : > { %684 = vmatpush1.bf16.msra.mxu0 %v15797_v10  ;;  %340 = vst [vmem:[#allocation2 + $0x80] sm:$0xff] %v299_v43   ;;  %v15818_v45 = vld [vmem:[%s21450_s3 + $0x10] ss:$8 sps:$4 sm:$0xff]   ;;  %342 = vst [vmem:[#allocation2 + $0x88] sm:$0xff] %v301_v44   ;;  %v15826_v47 = vld [vmem:[%s21450_s3 + $0x24] ss:$8 sps:$4 sm:$0xff]   ;;  %v539_v50 = vsel %vm534_vm2, %v536_v34, %v538_v46  ;;  %v541_v62 = vsel %vm534_vm2, %v538_v46, %v540_v55 }
  0x27   : > { %685 = vmatprep.subr.bf16.mxu0 %v15798_v11  ;;  %v303_v48 = vld [vmem:[%s16796_s25 + $0x80] sm:$0xff]   ;;  %v15831_v52 = vld [vmem:[%s21450_s3 + $0x34] ss:$8 sps:$4 sm:$0xff]   ;;  %v15829_v53 = vld [vmem:[%s21450_s3 + $0x30] ss:$8 sps:$4 sm:$0xff]  }
  0x28   : > { %v15824_v49 = vld [vmem:[%s21450_s3 + $0x20] ss:$8 sps:$4 sm:$0xff]   ;;  %344 = vst [vmem:[#allocation2 + $0x90] sm:$0xff] %v303_v48   ;;  %v15837_v54 = vld [vmem:[%s21450_s3 + $0x44] ss:$8 sps:$4 sm:$0xff]   ;;  %v307_v57 = vld [vmem:[%s16796_s25 + $0x90] sm:$0xff]  }
  0x29   : > { %v305_v56 = vld [vmem:[%s16796_s25 + $0x88] sm:$0xff]   ;;  %348 = vst [vmem:[#allocation2 + $0xa0] sm:$0xff] %v307_v57   ;;  %v309_v59 = vld [vmem:[%s16796_s25 + $0x98] sm:$0xf]  ;;  %v15843_v61 = vld [vmem:[%s21450_s3 + $0x54] ss:$8 sps:$4 sm:$0xff]  }
  0x2a   : > { %686 = vmatpush1.bf16.msra.mxu0 %v15800_v14  ;;  %v16924_v58 = vld [vmem:[#allocation2 + $0x24] sm:$0xff]   ;;  %346 = vst [vmem:[#allocation2 + $0x98] sm:$0xff] %v305_v56   ;;  %350 = vst [vmem:[#allocation2 + $0xa8] sm:$0xf] %v309_v59  ;;  %v15841_v0 = vld [vmem:[%s21450_s3 + $0x50] ss:$8 sps:$4 sm:$0xff]  }
  0x2b   : > { %687 = vmatprep.subr.bf16.mxu0 %v15801_v15  ;;  %v15835_v60 = vld [vmem:[%s21450_s3 + $0x40] ss:$8 sps:$4 sm:$0xff]   ;;  %v542_v63 = vrot.slane %v16924_v58, 3  ;;  %v15848_v1 = vld [vmem:[%s21450_s3 + $0x64] ss:$8 sps:$4 sm:$0xff]   ;;  %v16956_v9 = vld [vmem:[#allocation2 + $0x34] sm:$0xff]  }
  0x2c   : > { %v16942_v2 = vld [vmem:[#allocation2 + $0x2c] sm:$0xff]   ;;  %v15846_v4 = vld [vmem:[%s21450_s3 + $0x60] ss:$8 sps:$4 sm:$0xff]   ;;  %v15854_v5 = vld [vmem:[%s21450_s3 + $0x74] ss:$8 sps:$4 sm:$0xff]   ;;  %v546_v11 = vrot.slane %v16956_v9, 3 }
  0x2d   : > { %v543_v6 = vsel %vm534_vm2, %v540_v55, %v542_v63  ;;  %v15852_v7 = vld [vmem:[%s21450_s3 + $0x70] ss:$8 sps:$4 sm:$0xff]   ;;  %v544_v8 = vrot.slane %v16942_v2, 3  ;;  %v16961_v12 = vld [vmem:[#allocation2 + $0x3c] sm:$0xff]   ;;  %v15858_v14 = vld [vmem:[%s21450_s3 + $0x104] ss:$8 sps:$4 sm:$0xff]  }
  0x2e   : > { %688 = vmatpush1.bf16.msra.mxu0 %v15803_v19  ;;  %v548_v15 = vrot.slane %v16961_v12, 3  ;;  %v16969_v16 = vld [vmem:[#allocation2 + $0x44] sm:$0xff]   ;;  %v16974_v19 = vld [vmem:[#allocation2 + $0x4c] sm:$0xff]   ;;  %v16979_v22 = vld [vmem:[#allocation2 + $0x54] sm:$0xff]  }
  0x2f   : > { %689 = vmatprep.subr.bf16.mxu0 %v15804_v20  ;;  %v545_v10 = vsel %vm534_vm2, %v542_v63, %v544_v8  ;;  %v547_v13 = vsel %vm534_vm2, %v544_v8, %v546_v11  ;;  %v550_v18 = vrot.slane %v16969_v16, 3  ;;  %v552_v21 = vrot.slane %v16974_v19, 3  ;;  %v16989_v31 = vld [vmem:[#allocation2 + $0x64] sm:$0xff]   ;;  %v16994_v34 = vld [vmem:[#allocation2 + $0x6c] sm:$0xff]   ;;  %v16999_v38 = vld [vmem:[#allocation2 + $0x74] sm:$0xff]  }
  0x30   : > { %v549_v17 = vsel %vm534_vm2, %v546_v11, %v548_v15  ;;  %v558_v33 = vrot.slane %v16989_v31, 3  ;;  %v17015_v48 = vld [vmem:[#allocation2 + $0x8c] sm:$0xff]   ;;  %v17029_v57 = vld [vmem:[#allocation2 + $0xa4] sm:$0xf] }
  0x31   : > { %v551_v20 = vsel %vm534_vm2, %v548_v15, %v550_v18  ;;  %v553_v24 = vsel %vm534_vm2, %v550_v18, %v552_v21  ;;  %v17025_v55 = vld [vmem:[#allocation2 + $0x9c] sm:$0xff]   ;;  %v394_v59 = vld [vmem:[#allocation2 + $0xa8] sm:$0x1]  ;;  %v353_v63 = vld [vmem:[#allocation2 + $0x4] sm:$0xc]  ;;  %v940_v15 = vshrl.u32 %v16885_v37, 16 }
  0x32   : > { %690 = vmatpush1.bf16.msra.mxu0 %v15806_v25  ;;  %v554_v25 = vrot.slane %v16979_v22, 3  ;;  %v572_v56 = vrot.slane %v17025_v55, 3 }
  0x33   : > { %691 = vmatprep.subr.bf16.mxu0 %v15807_v28  ;;  %v16984_v28 = vld [vmem:[#allocation2 + $0x5c] sm:$0xff]  }
  0x34   : > { %v556_v30 = vrot.slane %v16984_v28, 3 }
  0x36   : > { %692 = vmatpush1.bf16.msra.mxu0 %v15809_v29  ;;  %v555_v29 = vsel %vm534_vm2, %v552_v21, %v554_v25  ;;  %v557_v32 = vsel %vm534_vm2, %v554_v25, %v556_v30  ;;  %v942_v21 = vrot.slane %v940_v15, 2  ;;  %v15861_v25 = vld [vmem:[%s21450_s3 + $0x114] ss:$8 sps:$4 sm:$0xff]  }
  0x37   : > { %1211 = vmatprep.subr.bf16.mxu0 %v15815_v35  ;;  %v559_v35 = vsel %vm534_vm2, %v556_v30, %v558_v33  ;;  %v949_v30 = vshrl.u32 %v16909_v51, 16 }
  0x39   : > { %710 = vmatmul.mubr.bf16.vlgmr.msra.gmra.mrb[0].mxu0 %v537_v40  ;;  %v562_v40 = vrot.slane %v16999_v38, 3 }
  0x3a   : > { %1212 = vmatpush1.bf16.msra.mxu0 %v15813_v36  ;;  %719 = vmatprep.mubr.bf16.mxu0 %v21472_v3  ;;  %v560_v36 = vrot.slane %v16994_v34, 3 }
  0x3b   : > { %1213 = vmatprep.subr.bf16.mxu0 %v15820_v42  ;;  %v17005_v42 = vld [vmem:[#allocation2 + $0x7c] sm:$0xff]  }
  0x3c   : > { %v561_v39 = vsel %vm534_vm2, %v558_v33, %v560_v36  ;;  %v563_v41 = vsel %vm534_vm2, %v560_v36, %v562_v40  ;;  %v564_v43 = vrot.slane %v17005_v42, 3  ;;  %v15859_v33 = vld [vmem:[%s21450_s3 + $0x110] ss:$8 sps:$4 sm:$0xff]  }
  0x3e   : > { %1214 = vmatpush1.bf16.msra.mxu0 %v15818_v45  ;;  %v565_v44 = vsel %vm534_vm2, %v562_v40, %v564_v43  ;;  %v17010_v45 = vld [vmem:[#allocation2 + $0x84] sm:$0xff]  }
  0x3f   : > { %1215 = vmatprep.subr.bf16.mxu0 %v15826_v47  ;;  %v566_v46 = vrot.slane %v17010_v45, 3 }
  0x41   : > { %720 = vmatmul.mubr.bf16.gmra.mrb[4].mxu0 %v539_v50  ;;  %v567_v47 = vsel %vm534_vm2, %v564_v43, %v566_v46  ;;  %v15867_v43 = vld [vmem:[%s21450_s3 + $0x134] ss:$8 sps:$4 sm:$0xff]  }
  0x42   : > { %729 = vmatprep.mubr.bf16.mxu0 %v21472_v3  ;;  %1216 = vmatpush1.bf16.msra.mxu0 %v15824_v49  ;;  %v568_v49 = vrot.slane %v17015_v48, 3 }
  0x43   : > { %1217 = vmatprep.subr.bf16.mxu0 %v15831_v52  ;;  %v17020_v52 = vld [vmem:[#allocation2 + $0x94] sm:$0xff]  }
  0x44   : > { %v569_v50 = vsel %vm534_vm2, %v566_v46, %v568_v49  ;;  %v958_v46 = vshrl.u32 %v16924_v58, 16 }
  0x46   : > { %1218 = vmatpush1.bf16.msra.mxu0 %v15829_v53  ;;  %v570_v53 = vrot.slane %v17020_v52, 3 }
  0x47   : > { %1219 = vmatprep.subr.bf16.mxu0 %v15837_v54 }
  0x48   : > { %v571_v54 = vsel %vm534_vm2, %v568_v49, %v570_v53  ;;  %v15865_v49 = vld [vmem:[%s21450_s3 + $0x130] ss:$8 sps:$4 sm:$0xff]  }
  0x49   : > { %730 = vmatmul.mubr.bf16.gmra.mrb[8].mxu0 %v541_v62 }
  0x4a   : > { %739 = vmatprep.mubr.bf16.mxu0 %v21472_v3  ;;  %1220 = vmatpush1.bf16.msra.mxu0 %v15835_v60  ;;  %v573_v60 = vsel %vm534_vm2, %v570_v53, %v572_v56 }
  0x4b   : > { %1221 = vmatprep.subr.bf16.mxu0 %v15843_v61  ;;  %v17033_v61 = vcombine.low %v17029_v57, %v394_v59  ;;  %v15868_v59 = vld [vmem:[%s21450_s3 + $0x140] ss:$8 sps:$4 sm:$0xff]  }
  0x4d   : > { %v574_v62 = vrot.slane %v17033_v61, 3 }
  0x4e   : > { %1222 = vmatpush1.bf16.msra.mxu0 %v15841_v0  ;;  %v12519_v0 = vcombine.low %v353_v63, %v16858_v23  ;;  %v967_v63 = vshrl.u32 %v16942_v2, 16 }
  0x4f   : > { %1223 = vmatprep.subr.bf16.mxu0 %v15848_v1  ;;  %v575_v1 = vsel %vm534_vm2, %v572_v56, %v574_v62 }
  0x51   : > { %740 = vmatmul.mubr.bf16.gmra.mrb[12].mxu0 %v543_v6  ;;  %v931_v6 = vshrl.u32 %v16866_v27, 16 }
  0x52   : > { %749 = vmatprep.mubr.bf16.mxu0 %v21472_v3  ;;  %1224 = vmatpush1.bf16.msra.mxu0 %v15846_v4  ;;  %v923_v4 = vshrl.u32 %v12519_v0, 16 }
  0x53   : > { %1225 = vmatprep.subr.bf16.mxu0 %v15854_v5  ;;  %v926_v5 = vshll.u32 %v12519_v0, 16  ;;  %v933_v11 = vrot.slane %v931_v6, 2  ;;  %v970_v0 = vshll.u32 %v16942_v2, 16  ;;  %v15901_v2 = vld [vmem:[%s21450_s3 + $0x1f0] ss:$8 sps:$4 sm:$0xff]  }
  0x54   : > { %v925_v8 = vrot.slane %v923_v4, 2  ;;  %v15876_v4 = vld [vmem:[%s21450_s3 + $0x164] ss:$8 sps:$4 sm:$0xff]  }
  0x56   : > { %1226 = vmatpush1.bf16.msra.mxu0 %v15852_v7  ;;  %v934_v7 = vshll.u32 %v16866_v27, 16  ;;  %v15885_v27 = vld [vmem:[%s21450_s3 + $0x194] ss:$8 sps:$4 sm:$0xff]  }
  0x57   : > { %1668 = vmatprep.subr.bf16.mxu0 %v15858_v14 }
  0x59   : > { %750 = vmatmul.mubr.bf16.gmra.mrb[16].mxu0 %v545_v10  ;;  %v928_v10 = vrot.slane %v926_v5, 3 }
  0x5a   : > { %759 = vmatprep.mubr.bf16.mxu0 %v21472_v3 }
  0x5b   : > { %v929_v23 = vor.u32 %v928_v10, %v925_v8  ;;  %v969_v8 = vrot.slane %v967_v63, 2  ;;  %v972_v10 = vrot.slane %v970_v0, 3 }
  0x61   : > { %760 = vmatmul.mubr.bf16.gmra.mrb[20].mxu0 %v547_v13  ;;  %v936_v13 = vrot.slane %v934_v7, 3 }
  0x62   : > { %769 = vmatprep.mubr.bf16.mxu0 %v21472_v3 }
  0x63   : > { %v937_v14 = vor.u32 %v936_v13, %v933_v11  ;;  %v15874_v11 = vld [vmem:[%s21450_s3 + $0x160] ss:$8 sps:$4 sm:$0xff]   ;;  %v15879_v13 = vld [vmem:[%s21450_s3 + $0x174] ss:$8 sps:$4 sm:$0xff]  }
  0x65   : > { %v938_v18 = vsel %vm921_vm3, %v929_v23, %v937_v14  ;;  %v973_v23 = vor.u32 %v972_v10, %v969_v8  ;;  %v1012_v8 = vshrl.u32 %v16979_v22, 16  ;;  %v1015_v10 = vshll.u32 %v16979_v22, 16 }
  0x69   : > { %770 = vmatmul.mubr.bf16.gmra.mrb[24].mxu0 %v549_v17  ;;  %v943_v17 = vshll.u32 %v16885_v37, 16 }
  0x6a   : > { %779 = vmatprep.mubr.bf16.mxu0 %v21472_v3 }
  0x71   : > { %780 = vmatmul.mubr.bf16.gmra.mrb[28].mxu0 %v551_v20  ;;  %v15856_v20 = vld [vmem:[%s21450_s3 + $0x100] ss:$8 sps:$4 sm:$0xff]  }
  0x72   : > { %789 = vmatprep.mubr.bf16.mxu0 %v21472_v3 }
  0x79   : > { %790 = vmatmul.mubr.bf16.gmra.mrb[32].mxu0 %v553_v24  ;;  %v945_v24 = vrot.slane %v943_v17, 3 }
  0x7a   : > { %799 = vmatprep.mubr.bf16.mxu0 %v21472_v3 }
  0x81   : > { %800 = vmatmul.mubr.bf16.gmra.mrb[36].mxu0 %v555_v29  ;;  %v946_v29 = vor.u32 %v945_v24, %v942_v21 }
  0x82   : > { %809 = vmatprep.mubr.bf16.mxu0 %v21472_v3 }
  0x83   : > { %v947_v36 = vsel %vm921_vm3, %v937_v14, %v946_v29  ;;  %v976_v14 = vshrl.u32 %v16956_v9, 16 }
  0x85   : > { %v978_v24 = vrot.slane %v976_v14, 2 }
  0x89   : > { %810 = vmatmul.mubr.bf16.gmra.mrb[40].mxu0 %v557_v32  ;;  %v952_v32 = vshll.u32 %v16909_v51, 16  ;;  %v15889_v51 = vld [vmem:[%s21450_s3 + $0x1b0] ss:$8 sps:$4 sm:$0xff]  }
  0x8a   : > { %819 = vmatprep.mubr.bf16.mxu0 %v21472_v3 }
  0x8b   : > { %v954_v40 = vrot.slane %v952_v32, 3 }
  0x91   : > { %820 = vmatmul.mubr.bf16.gmra.mrb[44].mxu0 %v559_v35  ;;  %v15864_v35 = vld [vmem:[%s21450_s3 + $0x124] ss:$8 sps:$4 sm:$0xff]  }
  0x92   : > { %829 = vmatprep.mubr.bf16.mxu0 %v21472_v3 }
  0x99   : > { %830 = vmatmul.mubr.bf16.gmra.mrb[48].mxu0 %v561_v39  ;;  %v951_v39 = vrot.slane %v949_v30, 2 }
  0x9a   : > { %839 = vmatprep.mubr.bf16.mxu0 %v21472_v3 }
  0xa1   : > { %840 = vmatmul.mubr.bf16.gmra.mrb[52].mxu0 %v563_v41  ;;  %v15862_v41 = vld [vmem:[%s21450_s3 + $0x120] ss:$8 sps:$4 sm:$0xff]  }
  0xa2   : > { %849 = vmatprep.mubr.bf16.mxu0 %v21472_v3 }
  0xa9   : > { %850 = vmatmul.mubr.bf16.gmra.mrb[56].mxu0 %v565_v44  ;;  %v955_v44 = vor.u32 %v954_v40, %v951_v39 }
  0xaa   : > { %859 = vmatprep.mubr.bf16.mxu0 %v21472_v3 }
  0xab   : > { %v956_v53 = vsel %vm921_vm3, %v946_v29, %v955_v44 }
  0xb1   : > { %860 = vmatmul.mubr.bf16.gmra.mrb[60].mxu0 %v567_v47  ;;  %v961_v47 = vshll.u32 %v16924_v58, 16  ;;  %v15895_v58 = vld [vmem:[%s21450_s3 + $0x1d0] ss:$8 sps:$4 sm:$0xff]  }
  0xb2   : > { %869 = vmatprep.mubr.bf16.mxu0 %v21472_v3 }
  0xb3   : > { %v963_v56 = vrot.slane %v961_v47, 3 }
  0xb9   : > { %870 = vmatmul.mubr.bf16.gmra.mrb[64].mxu0 %v569_v50  ;;  %v15870_v50 = vld [vmem:[%s21450_s3 + $0x144] ss:$8 sps:$4 sm:$0xff]  }
  0xba   : > { %879 = vmatprep.mubr.bf16.mxu0 %v21472_v3 }
  0xc1   : > { %880 = vmatmul.mubr.bf16.gmra.mrb[68].mxu0 %v571_v54  ;;  %v960_v54 = vrot.slane %v958_v46, 2 }
  0xc2   : > { %889 = vmatprep.mubr.bf16.mxu0 %v21472_v3 }
  0xc9   : > { %890 = vmatmul.mubr.bf16.gmra.mrb[72].mxu0 %v573_v60  ;;  %v15873_v60 = vld [vmem:[%s21450_s3 + $0x154] ss:$8 sps:$4 sm:$0xff]  }
  0xca   : > { %899 = vmatprep.mubr.bf16.mxu0 %v21472_v3 }
  0xd1   : > { %900 = vmatmul.mubr.bf16.gmra.mrb[76].mxu0 %v575_v1  ;;  %v15871_v1 = vld [vmem:[%s21450_s3 + $0x150] ss:$8 sps:$4 sm:$0xff]  }
  0xd2   : > { %909 = vmatprep.mubr.bf16.mxu0 %v21472_v3 }
  0xd9   : > { %910 = vmatmul.mubr.bf16.gmra.mrb[80].mxu0 %v574_v62  ;;  %v964_v62 = vor.u32 %v963_v56, %v960_v54 }
  0xda   : > { %1243 = vmatprep.mubr.bf16.mxu0 %v21472_v3 }
  0xdb   : > { %v965_v5 = vsel %vm921_vm3, %v955_v44, %v964_v62  ;;  %v974_v21 = vsel %vm921_vm3, %v964_v62, %v973_v23  ;;  %v994_v44 = vshrl.u32 %v16969_v16, 16 }
  0xe1   : > { %1244 = vmatmul.mubr.bf16.vlgmr.msra.gmra.mrb[0].mxu0 %v938_v18  ;;  %v979_v18 = vshll.u32 %v16956_v9, 16 }
  0xe2   : > { %1669 = vmatpush1.bf16.msra.mxu0 %v15856_v20  ;;  %1253 = vmatprep.mubr.bf16.mxu0 %v21472_v3  ;;  %v15877_v20 = vld [vmem:[%s21450_s3 + $0x170] ss:$8 sps:$4 sm:$0xff]  }
  0xe3   : > { %1670 = vmatprep.subr.bf16.mxu0 %v15861_v25  ;;  %v981_v25 = vrot.slane %v979_v18, 3 }
  0xe5   : > { %v982_v29 = vor.u32 %v981_v25, %v978_v24  ;;  %v1024_v24 = vshll.u32 %v16984_v28, 16 }
  0xe6   : > { %1671 = vmatpush1.bf16.msra.mxu0 %v15859_v33  ;;  %v985_v33 = vshrl.u32 %v16961_v12, 16 }
  0xe7   : > { %1672 = vmatprep.subr.bf16.mxu0 %v15864_v35  ;;  %v988_v35 = vshll.u32 %v16961_v12, 16 }
  0xe8   : > { %v987_v39 = vrot.slane %v985_v33, 2 }
  0xe9   : > { %1254 = vmatmul.mubr.bf16.gmra.mrb[4].mxu0 %v947_v36  ;;  %v983_v36 = vsel %vm921_vm3, %v973_v23, %v982_v29  ;;  %v990_v40 = vrot.slane %v988_v35, 3  ;;  %v1017_v23 = vrot.slane %v1015_v10, 3 }
  0xea   : > { %1263 = vmatprep.mubr.bf16.mxu0 %v21472_v3  ;;  %1673 = vmatpush1.bf16.msra.mxu0 %v15862_v41  ;;  %v15882_v41 = vld [vmem:[%s21450_s3 + $0x184] ss:$8 sps:$4 sm:$0xff]  }
  0xeb   : > { %1674 = vmatprep.subr.bf16.mxu0 %v15867_v43  ;;  %v991_v43 = vor.u32 %v990_v40, %v987_v39  ;;  %v1030_v40 = vshrl.u32 %v16989_v31, 16 }
  0xed   : > { %v1526_v22 = vrot.slane %v1030_v40, 3 }
  0xee   : > { %1675 = vmatpush1.bf16.msra.mxu0 %v15865_v49  ;;  %v997_v49 = vshll.u32 %v16969_v16, 16  ;;  %v1518_v16 = vrot.slane %v1012_v8, 3 }
  0xef   : > { %1676 = vmatprep.subr.bf16.mxu0 %v15870_v50  ;;  %v992_v50 = vsel %vm921_vm3, %v982_v29, %v991_v43 }
  0xf0   : > { %v999_v54 = vrot.slane %v997_v49, 3 }
  0xf1   : > { %1264 = vmatmul.mubr.bf16.gmra.mrb[8].mxu0 %v956_v53  ;;  %v996_v53 = vrot.slane %v994_v44, 2 }
  0xf2   : > { %1273 = vmatprep.mubr.bf16.mxu0 %v21472_v3  ;;  %1677 = vmatpush1.bf16.msra.mxu0 %v15868_v59  ;;  %v1003_v59 = vshrl.u32 %v16974_v19, 16 }
  0xf3   : > { %1678 = vmatprep.subr.bf16.mxu0 %v15873_v60  ;;  %v1000_v56 = vor.u32 %v999_v54, %v996_v53  ;;  %v1006_v60 = vshll.u32 %v16974_v19, 16 }
  0xf5   : > { %v1001_v62 = vsel %vm921_vm3, %v991_v43, %v1000_v56 }
  0xf6   : > { %1679 = vmatpush1.bf16.msra.mxu0 %v15871_v1  ;;  %v1005_v1 = vrot.slane %v1003_v59, 2 }
  0xf7   : > { %1680 = vmatprep.subr.bf16.mxu0 %v15876_v4  ;;  %v1008_v4 = vrot.slane %v1006_v60, 3 }
  0xf9   : > { %1274 = vmatmul.mubr.bf16.gmra.mrb[12].mxu0 %v965_v5  ;;  %v1009_v5 = vor.u32 %v1008_v4, %v1005_v1 }
  0xfa   : > { %1283 = vmatprep.mubr.bf16.mxu0 %v21472_v3  ;;  %1681 = vmatpush1.bf16.msra.mxu0 %v15874_v11 }
  0xfb   : > { %1682 = vmatprep.subr.bf16.mxu0 %v15879_v13  ;;  %v1010_v11 = vsel %vm921_vm3, %v1000_v56, %v1009_v5  ;;  %v1014_v13 = vrot.slane %v1012_v8, 2  ;;  %v1039_v56 = vshrl.u32 %v16994_v34, 16 }
  0xfd   : > { %v1041_v4 = vrot.slane %v1039_v56, 2 }
  0xfe   : > { %1683 = vmatpush1.bf16.msra.mxu0 %v15877_v20  ;;  %v1018_v20 = vor.u32 %v1017_v23, %v1014_v13  ;;  %v1048_v13 = vshrl.u32 %v16999_v38, 16  ;;  %v1051_v23 = vshll.u32 %v16999_v38, 16  ;;  %v21611_v38 = vshrl.u32 %v17010_v45, 16 }
  0xff   : > { %2444 = vmatprep.subr.bf16.mxu0 %v15882_v41  ;;  %v1033_v41 = vshll.u32 %v16989_v31, 16 }
 0x100   : > { %v1019_v25 = vsel %vm921_vm3, %v1009_v5, %v1018_v20  ;;  %v1534_v31 = vrot.slane %v1048_v13, 3 }
 0x101   : > { %1284 = vmatmul.mubr.bf16.gmra.mrb[16].mxu0 %v974_v21  ;;  %v1021_v21 = vshrl.u32 %v16984_v28, 16  ;;  %v1035_v53 = vrot.slane %v1033_v41, 3  ;;  %v1530_v28 = vrot.slane %v1039_v56, 3 }
 0x102   : > { %1293 = vmatprep.mubr.bf16.mxu0 %v21472_v3 }
 0x103   : > { %v1023_v29 = vrot.slane %v1021_v21, 2  ;;  %v1522_v19 = vrot.slane %v1021_v21, 3 }
 0x109   : > { %1294 = vmatmul.mubr.bf16.gmra.mrb[20].mxu0 %v983_v36  ;;  %v1026_v36 = vrot.slane %v1024_v24, 3 }
 0x10a   : > { %1303 = vmatprep.mubr.bf16.mxu0 %v21472_v3 }
 0x10b   : > { %v1027_v39 = vor.u32 %v1026_v36, %v1023_v29  ;;  %v1053_v29 = vrot.slane %v1051_v23, 3 }
 0x10d   : > { %v1028_v43 = vsel %vm921_vm3, %v1018_v20, %v1027_v39 }
 0x111   : > { %1304 = vmatmul.mubr.bf16.gmra.mrb[24].mxu0 %v992_v50  ;;  %v1032_v50 = vrot.slane %v1030_v40, 2 }
 0x112   : > { %1313 = vmatprep.mubr.bf16.mxu0 %v21472_v3 }
 0x113   : > { %v1036_v54 = vor.u32 %v1035_v53, %v1032_v50 }
 0x115   : > { %v1037_v1 = vsel %vm921_vm3, %v1027_v39, %v1036_v54  ;;  %v21460_v39 = vshrl.u32 %v17005_v42, 16 }
 0x117   : > { %v1059_v53 = vrot.slane %v21460_v39, 2 }
 0x119   : > { %1314 = vmatmul.mubr.bf16.gmra.mrb[28].mxu0 %v1001_v62  ;;  %v1042_v62 = vshll.u32 %v16994_v34, 16  ;;  %v21609_v34 = vshrl.u32 %v17005_v42, 16 }
 0x11a   : > { %1323 = vmatprep.mubr.bf16.mxu0 %v21472_v3 }
 0x11b   : > { %v1044_v5 = vrot.slane %v1042_v62, 3 }
 0x121   : > { %1324 = vmatmul.mubr.bf16.gmra.mrb[32].mxu0 %v1010_v11  ;;  %v1045_v11 = vor.u32 %v1044_v5, %v1041_v4  ;;  %v21455_v4 = vshrl.u32 %v17010_v45, 16  ;;  %v21454_v5 = vshll.u32 %v17010_v45, 16 }
 0x122   : > { %1333 = vmatprep.mubr.bf16.mxu0 %v21472_v3 }
 0x123   : > { %v1046_v20 = vsel %vm921_vm3, %v1036_v54, %v1045_v11 }
 0x129   : > { %1334 = vmatmul.mubr.bf16.gmra.mrb[36].mxu0 %v1019_v25  ;;  %v1050_v25 = vrot.slane %v1048_v13, 2 }
 0x12a   : > { %1343 = vmatprep.mubr.bf16.mxu0 %v21472_v3 }
 0x12b   : > { %v1054_v36 = vor.u32 %v1053_v29, %v1050_v25  ;;  %v1068_v25 = vrot.slane %v21455_v4, 2 }
 0x12d   : > { %v1055_v50 = vsel %vm921_vm3, %v1045_v11, %v1054_v36  ;;  %v1071_v11 = vrot.slane %v21454_v5, 3 }
 0x12f   : > { %v1072_v29 = vor.u32 %v1071_v11, %v1068_v25  ;;  %v21458_v25 = vshll.u32 %v17020_v52, 16 }
 0x131   : > { %1344 = vmatmul.mubr.bf16.gmra.mrb[40].mxu0 %v1028_v43  ;;  %v21453_v43 = vshll.u32 %v17005_v42, 16 }
 0x132   : > { %1353 = vmatprep.mubr.bf16.mxu0 %v21472_v3 }
 0x133   : > { %v1062_v54 = vrot.slane %v21453_v43, 3 }
 0x139   : > { %1354 = vmatmul.mubr.bf16.gmra.mrb[44].mxu0 %v1037_v1  ;;  %v1063_v1 = vor.u32 %v1062_v54, %v1059_v53  ;;  %v21456_v53 = vshll.u32 %v17015_v48, 16 }
 0x13a   : > { %1363 = vmatprep.mubr.bf16.mxu0 %v21472_v3 }
 0x13b   : > { %v1073_v54 = vsel %vm921_vm3, %v1063_v1, %v1072_v29 }
 0x141   : > { %1364 = vmatmul.mubr.bf16.gmra.mrb[48].mxu0 %v1046_v20  ;;  %v1064_v20 = vsel %vm921_vm3, %v1054_v36, %v1063_v1  ;;  %v1080_v36 = vrot.slane %v21456_v53, 3  ;;  %v1089_v1 = vrot.slane %v21458_v25, 3 }
 0x142   : > { %1373 = vmatprep.mubr.bf16.mxu0 %v21472_v3 }
 0x149   : > { %1374 = vmatmul.mubr.bf16.gmra.mrb[52].mxu0 %v1055_v50  ;;  %v21457_v50 = vshrl.u32 %v17015_v48, 16 }
 0x14a   : > { %1383 = vmatprep.mubr.bf16.mxu0 %v21472_v3 }
 0x14b   : > { %v1077_v43 = vrot.slane %v21457_v50, 2 }
 0x14d   : > { %v1081_v5 = vor.u32 %v1080_v36, %v1077_v43  ;;  %v21462_v43 = vshll.u32 %v17025_v55, 16 }
 0x14f   : > { %v1082_v11 = vsel %vm921_vm3, %v1072_v29, %v1081_v5  ;;  %v1098_v29 = vrot.slane %v21462_v43, 3 }
 0x151   : > { %1384 = vmatmul.mubr.bf16.gmra.mrb[56].mxu0 %v1064_v20  ;;  %v21459_v20 = vshrl.u32 %v17020_v52, 16 }
 0x152   : > { %1393 = vmatprep.mubr.bf16.mxu0 %v21472_v3 }
 0x153   : > { %v1086_v4 = vrot.slane %v21459_v20, 2 }
 0x155   : > { %v1090_v53 = vor.u32 %v1089_v1, %v1086_v4  ;;  %v1105_v4 = vshll.u32 %v17033_v61, 16 }
 0x157   : > { %v1091_v36 = vsel %vm921_vm3, %v1081_v5, %v1090_v53  ;;  %v1107_v39 = vrot.slane %v1105_v4, 3  ;;  %v15886_v4 = vld [vmem:[%s21450_s3 + $0x1a0] ss:$8 sps:$4 sm:$0xff]  }
 0x159   : > { %1394 = vmatmul.mubr.bf16.gmra.mrb[60].mxu0 %v1073_v54  ;;  %v21461_v54 = vshrl.u32 %v17025_v55, 16 }
 0x15a   : > { %1403 = vmatprep.mubr.bf16.mxu0 %v21472_v3 }
 0x15b   : > { %v1095_v50 = vrot.slane %v21461_v54, 2 }
 0x15d   : > { %v1099_v25 = vor.u32 %v1098_v29, %v1095_v50  ;;  %v1478_v50 = vshll.u32 %v16864_v26, 16 }
 0x15f   : > { %v1100_v1 = vsel %vm921_vm3, %v1090_v53, %v1099_v25  ;;  %v1480_v43 = vrot.slane %v1478_v50, 4  ;;  %v1483_v53 = vrot.slane %v934_v7, 4  ;;  %v1495_v50 = vrot.slane %v961_v47, 4 }
 0x161   : > { %1404 = vmatmul.mubr.bf16.gmra.mrb[64].mxu0 %v1082_v11  ;;  %v1102_v11 = vshrl.u32 %v17033_v61, 16  ;;  %v1482_v61 = vrot.slane %v931_v6, 3  ;;  %v1487_v6 = vrot.slane %v943_v17, 4  ;;  %v1490_v17 = vrot.slane %v949_v30, 3  ;;  %v15894_v30 = vld [vmem:[%s21450_s3 + $0x1c4] ss:$8 sps:$4 sm:$0xff]  }
 0x162   : > { %1413 = vmatprep.mubr.bf16.mxu0 %v21472_v3 }
 0x163   : > { %v1104_v20 = vrot.slane %v1102_v11, 2  ;;  %v1491_v11 = vrot.slane %v952_v32, 4 }
 0x165   : > { %v1108_v5 = vor.u32 %v1107_v39, %v1104_v20  ;;  %v1484_v20 = vor.u32 %v1483_v53, %v1482_v61  ;;  %v15897_v61 = vld [vmem:[%s21450_s3 + $0x1d4] ss:$8 sps:$4 sm:$0xff]  }
 0x167   : > { %v1109_v54 = vsel %vm921_vm3, %v1099_v25, %v1108_v5 }
 0x169   : > { %1414 = vmatmul.mubr.bf16.gmra.mrb[68].mxu0 %v1091_v36  ;;  %v1475_v36 = vshrl.u32 %v16864_v26, 16  ;;  %v15880_v26 = vld [vmem:[%s21450_s3 + $0x180] ss:$8 sps:$4 sm:$0xff]  }
 0x16a   : > { %1423 = vmatprep.mubr.bf16.mxu0 %v21472_v3 }
 0x16b   : > { %v1477_v29 = vrot.slane %v1475_v36, 3  ;;  %v1494_v36 = vrot.slane %v958_v46, 3  ;;  %v15900_v46 = vld [vmem:[%s21450_s3 + $0x1e4] ss:$8 sps:$4 sm:$0xff]  }
 0x16d   : > { %v1481_v39 = vor.u32 %v1480_v43, %v1477_v29  ;;  %v15883_v43 = vld [vmem:[%s21450_s3 + $0x190] ss:$8 sps:$4 sm:$0xff]   ;;  %v15892_v29 = vld [vmem:[%s21450_s3 + $0x1c0] ss:$8 sps:$4 sm:$0xff]   ;;  %v1496_v53 = vor.u32 %v1495_v50, %v1494_v36  ;;  %v21610_v36 = vshll.u32 %v17005_v42, 16  ;;  %v21613_v42 = vshrl.u32 %v17015_v48, 16 }
 0x16f   : > { %v1485_v25 = vsel %vm1473_vm4, %v1481_v39, %v1484_v20  ;;  %v1498_v39 = vrot.slane %v967_v63, 3  ;;  %v1539_v50 = vrot.slane %v21610_v36, 4 }
 0x171   : > { %1424 = vmatmul.mubr.bf16.gmra.mrb[72].mxu0 %v1100_v1  ;;  %v15891_v1 = vld [vmem:[%s21450_s3 + $0x1b4] ss:$8 sps:$4 sm:$0xff]  }
 0x172   : > { %1433 = vmatprep.mubr.bf16.mxu0 %v21472_v3 }
 0x179   : > { %1434 = vmatmul.mubr.bf16.gmra.mrb[76].mxu0 %v1109_v54  ;;  %v1486_v54 = vrot.slane %v940_v15, 3  ;;  %v15888_v15 = vld [vmem:[%s21450_s3 + $0x1a4] ss:$8 sps:$4 sm:$0xff]  }
 0x17a   : > { %1443 = vmatprep.mubr.bf16.mxu0 %v21472_v3 }
 0x17b   : > { %v1488_v7 = vor.u32 %v1487_v6, %v1486_v54  ;;  %v1503_v6 = vrot.slane %v979_v18, 4 }
 0x17d   : > { %v1489_v37 = vsel %vm1473_vm4, %v1484_v20, %v1488_v7  ;;  %v1499_v20 = vrot.slane %v970_v0, 4  ;;  %v1502_v0 = vrot.slane %v976_v14, 3  ;;  %v15909_v14 = vld [vmem:[%s21450_s3 + $0x204] ss:$8 sps:$4 sm:$0xff]  }
 0x17f   : > { %v1500_v54 = vor.u32 %v1499_v20, %v1498_v39  ;;  %v21614_v39 = vshll.u32 %v17015_v48, 16 }
 0x181   : > { %1444 = vmatmul.mubr.bf16.gmra.mrb[80].mxu0 %v1108_v5  ;;  %v1492_v5 = vor.u32 %v1491_v11, %v1490_v17  ;;  %v1501_v63 = vsel %vm1473_vm4, %v1496_v53, %v1500_v54  ;;  %v1514_v17 = vrot.slane %v1003_v59, 3  ;;  %v1515_v11 = vrot.slane %v1006_v60, 4 }
 0x182   : > { %1700 = vmatprep.mubr.bf16.mxu0 %v21472_v3  ;;  %v1523_v60 = vrot.slane %v1024_v24, 4  ;;  %v1531_v24 = vrot.slane %v1042_v62, 4  ;;  %v1538_v62 = vrot.slane %v21609_v34, 3  ;;  %v1547_v20 = vrot.slane %v21614_v39, 4 }
 0x183   : > { %v1493_v32 = vsel %vm1473_vm4, %v1488_v7, %v1492_v5  ;;  %v1497_v47 = vsel %vm1473_vm4, %v1492_v5, %v1496_v53 }
 0x184   : > { %v1524_v5 = vor.u32 %v1523_v60, %v1522_v19  ;;  %v17422_v60 = vld [vmem:[#allocation2 + $0x1c] sm:$0xf] }
 0x189   : > { %1701 = vmatmul.mubr.bf16.vlgmr.msra.gmra.mrb[0].mxu0 %v1485_v25  ;;  %v15898_v25 = vld [vmem:[%s21450_s3 + $0x1e0] ss:$8 sps:$4 sm:$0xff]  }
 0x18a   : > { %2445 = vmatpush1.bf16.msra.mxu0 %v15880_v26  ;;  %1710 = vmatprep.mubr.bf16.mxu0 %v21472_v3  ;;  %v15903_v26 = vld [vmem:[%s21450_s3 + $0x1f4] ss:$8 sps:$4 sm:$0xff]  }
 0x18b   : > { %2446 = vmatprep.subr.bf16.mxu0 %v15885_v27  ;;  %v1504_v27 = vor.u32 %v1503_v6, %v1502_v0  ;;  %v1452_v6 = vld [vmem:[#allocation2 + $0xa8] sm:$0x3] }
 0x18d   : > { %v1505_v7 = vsel %vm1473_vm4, %v1500_v54, %v1504_v27 }
 0x18e   : > { %2447 = vmatpush1.bf16.msra.mxu0 %v15883_v43  ;;  %v1506_v43 = vrot.slane %v985_v33, 3  ;;  %v1511_v33 = vrot.slane %v997_v49, 4  ;;  %v1519_v49 = vrot.slane %v1015_v10, 4  ;;  %v1527_v10 = vrot.slane %v1033_v41, 4 }
 0x18f   : > { %2448 = vmatprep.subr.bf16.mxu0 %v15888_v15  ;;  %v1507_v15 = vrot.slane %v988_v35, 4  ;;  %v1535_v41 = vrot.slane %v1051_v23, 4  ;;  %v1542_v23 = vrot.slane %v21611_v38, 3 }
 0x191   : > { %1711 = vmatmul.mubr.bf16.gmra.mrb[4].mxu0 %v1489_v37  ;;  %v1508_v9 = vor.u32 %v1507_v15, %v1506_v43  ;;  %v1510_v37 = vrot.slane %v994_v44, 3  ;;  %v21618_v43 = vshll.u32 %v17025_v55, 16 }
 0x192   : > { %1720 = vmatprep.mubr.bf16.mxu0 %v21472_v3  ;;  %2449 = vmatpush1.bf16.msra.mxu0 %v15886_v4  ;;  %v1516_v4 = vor.u32 %v1515_v11, %v1514_v17  ;;  %v1991_v17 = vld [vmem:[#allocation2 + $0xc] sm:$0x8]  ;;  %v17411_v11 = vld [vmem:[#allocation2 + $0x10] sm:$0xf] }
 0x193   : > { %2450 = vmatprep.subr.bf16.mxu0 %v15891_v1  ;;  %v1509_v18 = vsel %vm1473_vm4, %v1504_v27, %v1508_v9  ;;  %v1512_v12 = vor.u32 %v1511_v33, %v1510_v37  ;;  %v1520_v1 = vor.u32 %v1519_v49, %v1518_v16  ;;  %v21617_v27 = vshrl.u32 %v17025_v55, 16  ;;  %v17413_v55 = vld [vmem:[#allocation2 + $0x14] sm:$0xf] }
 0x194   : > { %v1555_v15 = vrot.slane %v21618_v43, 4 }
 0x195   : > { %v1513_v35 = vsel %vm1473_vm4, %v1508_v9, %v1512_v12  ;;  %v1517_v44 = vsel %vm1473_vm4, %v1512_v12, %v1516_v4  ;;  %v1521_v59 = vsel %vm1473_vm4, %v1516_v4, %v1520_v1  ;;  %v1525_v8 = vsel %vm1473_vm4, %v1520_v1, %v1524_v5 }
 0x196   : > { %2451 = vmatpush1.bf16.msra.mxu0 %v15889_v51  ;;  %v1528_v51 = vor.u32 %v1527_v10, %v1526_v22  ;;  %v12585_v4 = vcombine.low %v1991_v17, %v17411_v11  ;;  %v17490_v17 = vld [vmem:[#allocation2 + $0x40] sm:$0xf] }
 0x197   : > { %2452 = vmatprep.subr.bf16.mxu0 %v15894_v30  ;;  %v1532_v30 = vor.u32 %v1531_v24, %v1530_v28 }
 0x198   : > { %v1529_v21 = vsel %vm1473_vm4, %v1524_v5, %v1528_v51  ;;  %v2156_v49 = vshrl.u32 %v12585_v4, 16  ;;  %v2159_v1 = vshll.u32 %v12585_v4, 16  ;;  %v17424_v5 = vld [vmem:[#allocation2 + $0x20] sm:$0xf]  ;;  %v15942_v4 = vld [vmem:[%s21450_s3 + $0x264] ss:$8 sps:$4 sm:$0xff]  }
 0x199   : > { %1721 = vmatmul.mubr.bf16.gmra.mrb[8].mxu0 %v1493_v32  ;;  %v1533_v40 = vsel %vm1473_vm4, %v1528_v51, %v1532_v30  ;;  %v1536_v32 = vor.u32 %v1535_v41, %v1534_v31  ;;  %v17429_v31 = vld [vmem:[#allocation2 + $0x24] sm:$0xf]  ;;  %v17431_v41 = vld [vmem:[#allocation2 + $0x28] sm:$0xf] }
 0x19a   : > { %1730 = vmatprep.mubr.bf16.mxu0 %v21472_v3  ;;  %2453 = vmatpush1.bf16.msra.mxu0 %v15892_v29  ;;  %v1540_v29 = vor.u32 %v1539_v50, %v1538_v62  ;;  %v2161_v22 = vrot.slane %v2159_v1, 4  ;;  %v12588_v36 = vcombine.low %v17429_v31, %v17431_v41  ;;  %v15914_v50 = vld [vmem:[%s21450_s3 + $0x214] ss:$8 sps:$4 sm:$0xff]  }
 0x19b   : > { %2454 = vmatprep.subr.bf16.mxu0 %v15897_v61  ;;  %v1537_v56 = vsel %vm1473_vm4, %v1532_v30, %v1536_v32  ;;  %v21612_v61 = vshll.u32 %v17010_v45, 16  ;;  %v21615_v45 = vshrl.u32 %v17020_v52, 16 }
 0x19c   : > { %v1541_v13 = vsel %vm1473_vm4, %v1536_v32, %v1540_v29  ;;  %v2185_v38 = vshll.u32 %v12588_v36, 16 }
 0x19d   : > { %v1543_v53 = vrot.slane %v21612_v61, 4  ;;  %v1550_v54 = vrot.slane %v21615_v45, 3  ;;  %v17446_v61 = vld [vmem:[#allocation2 + $0x2c] sm:$0xf]  ;;  %v311_v45 = vld [vmem:[%s16796_s25 + $0xa0] sm:$0x3] }
 0x19e   : > { %2455 = vmatpush1.bf16.msra.mxu0 %v15895_v58  ;;  %352 = vst [vmem:[#allocation2 + $0xb0] sm:$0x3] %v311_v45 }
 0x19f   : > { %2456 = vmatprep.subr.bf16.mxu0 %v15900_v46  ;;  %v1544_v58 = vor.u32 %v1543_v53, %v1542_v23  ;;  %v15912_v23 = vld [vmem:[%s21450_s3 + $0x210] ss:$8 sps:$4 sm:$0xff]  }
 0x1a0   : > { %v17448_v53 = vld [vmem:[#allocation2 + $0x30] sm:$0xf] }
 0x1a1   : > { %1731 = vmatmul.mubr.bf16.gmra.mrb[12].mxu0 %v1497_v47  ;;  %v1545_v46 = vsel %vm1473_vm4, %v1540_v29, %v1544_v58  ;;  %v1546_v47 = vrot.slane %v21613_v42, 3  ;;  %v12589_v39 = vcombine.low %v17446_v61, %v17448_v53 }
 0x1a2   : > { %1740 = vmatprep.mubr.bf16.mxu0 %v21472_v3  ;;  %2457 = vmatpush1.bf16.msra.mxu0 %v15898_v25 }
 0x1a3   : > { %2458 = vmatprep.subr.bf16.mxu0 %v15903_v26  ;;  %v1548_v25 = vor.u32 %v1547_v20, %v1546_v47  ;;  %v2187_v47 = vrot.slane %v2185_v38, 4  ;;  %v15918_v20 = vld [vmem:[%s21450_s3 + $0x220] ss:$8 sps:$4 sm:$0xff]  }
 0x1a5   : > { %v1549_v26 = vsel %vm1473_vm4, %v1544_v58, %v1548_v25  ;;  %v15920_v58 = vld [vmem:[%s21450_s3 + $0x224] ss:$8 sps:$4 sm:$0xff]  }
 0x1a6   : > { %2459 = vmatpush1.bf16.msra.mxu0 %v15901_v2  ;;  %v21616_v2 = vshll.u32 %v17020_v52, 16 }
 0x1a7   : > { %2906 = vmatprep.subr.bf16.mxu0 %v15909_v14  ;;  %v12552_v14 = vcombine.low %v17029_v57, %v1452_v6  ;;  %v17415_v57 = vld [vmem:[#allocation2 + $0x18] sm:$0xf]  ;;  %v17468_v6 = vld [vmem:[#allocation2 + $0x34] sm:$0xf] }
 0x1a8   : > { %v12586_v16 = vcombine.low %v17413_v55, %v17415_v57 }
 0x1a9   : > { %1741 = vmatmul.mubr.bf16.gmra.mrb[16].mxu0 %v1501_v63  ;;  %v1551_v63 = vrot.slane %v21616_v2, 4  ;;  %v1559_v9 = vshrl.u32 %v12552_v14, 16  ;;  %v2191_v2 = vshrl.u32 %v12589_v39, 16 }
 0x1aa   : > { %1750 = vmatprep.mubr.bf16.mxu0 %v21472_v3  ;;  %v2167_v19 = vshll.u32 %v12586_v16, 16 }
 0x1ab   : > { %v1552_v0 = vor.u32 %v1551_v63, %v1550_v54  ;;  %v1561_v33 = vrot.slane %v1559_v9, 3  ;;  %v2194_v63 = vshll.u32 %v12589_v39, 16  ;;  %v2193_v43 = vrot.slane %v2191_v2, 3  ;;  %v15937_v9 = vld [vmem:[%s21450_s3 + $0x254] ss:$8 sps:$4 sm:$0xff]  }
 0x1ac   : > { %v2169_v51 = vrot.slane %v2167_v19, 4  ;;  %v15948_v19 = vld [vmem:[%s21450_s3 + $0x274] ss:$8 sps:$4 sm:$0xff]  }
 0x1ad   : > { %v1553_v48 = vsel %vm1473_vm4, %v1548_v25, %v1552_v0  ;;  %v15925_v25 = vld [vmem:[%s21450_s3 + $0x234] ss:$8 sps:$4 sm:$0xff]  }
 0x1ae   : > { %v17527_v39 = vld [vmem:[#allocation2 + $0x54] sm:$0xf] }
 0x1b1   : > { %1751 = vmatmul.mubr.bf16.gmra.mrb[20].mxu0 %v1505_v7  ;;  %v1554_v7 = vrot.slane %v21617_v27, 3  ;;  %v15931_v27 = vld [vmem:[%s21450_s3 + $0x244] ss:$8 sps:$4 sm:$0xff]  }
 0x1b2   : > { %1760 = vmatprep.mubr.bf16.mxu0 %v21472_v3 }
 0x1b3   : > { %v1556_v52 = vor.u32 %v1555_v15, %v1554_v7  ;;  %v2196_v15 = vrot.slane %v2194_v63, 4 }
 0x1b5   : > { %v1557_v37 = vsel %vm1473_vm4, %v1552_v0, %v1556_v52  ;;  %v15923_v0 = vld [vmem:[%s21450_s3 + $0x230] ss:$8 sps:$4 sm:$0xff]  }
 0x1b9   : > { %1761 = vmatmul.mubr.bf16.gmra.mrb[24].mxu0 %v1509_v18  ;;  %v1562_v18 = vshll.u32 %v12552_v14, 16 }
 0x1ba   : > { %1770 = vmatprep.mubr.bf16.mxu0 %v21472_v3 }
 0x1bb   : > { %v1564_v12 = vrot.slane %v1562_v18, 4  ;;  %v2197_v18 = vor.u32 %v2196_v15, %v2193_v43 }
 0x1c1   : > { %1771 = vmatmul.mubr.bf16.gmra.mrb[28].mxu0 %v1513_v35  ;;  %v1565_v35 = vor.u32 %v1564_v12, %v1561_v33  ;;  %v15935_v12 = vld [vmem:[%s21450_s3 + $0x250] ss:$8 sps:$4 sm:$0xff]  }
 0x1c2   : > { %1780 = vmatprep.mubr.bf16.mxu0 %v21472_v3 }
 0x1c9   : > { %1781 = vmatmul.mubr.bf16.gmra.mrb[32].mxu0 %v1517_v44  ;;  %v1566_v44 = vsel %vm1473_vm4, %v1556_v52, %v1565_v35  ;;  %v15929_v52 = vld [vmem:[%s21450_s3 + $0x240] ss:$8 sps:$4 sm:$0xff]  }
 0x1ca   : > { %1790 = vmatprep.mubr.bf16.mxu0 %v21472_v3 }
 0x1d1   : > { %1791 = vmatmul.mubr.bf16.gmra.mrb[36].mxu0 %v1521_v59  ;;  %v2164_v59 = vshrl.u32 %v12586_v16, 16 }
 0x1d2   : > { %1800 = vmatprep.mubr.bf16.mxu0 %v21472_v3 }
 0x1d3   : > { %v2166_v10 = vrot.slane %v2164_v59, 3  ;;  %v15940_v59 = vld [vmem:[%s21450_s3 + $0x260] ss:$8 sps:$4 sm:$0xff]  }
 0x1d5   : > { %v2170_v24 = vor.u32 %v2169_v51, %v2166_v10  ;;  %v15946_v51 = vld [vmem:[%s21450_s3 + $0x270] ss:$8 sps:$4 sm:$0xff]  }
 0x1d9   : > { %1801 = vmatmul.mubr.bf16.gmra.mrb[40].mxu0 %v1525_v8  ;;  %v2158_v8 = vrot.slane %v2156_v49, 3 }
 0x1da   : > { %1810 = vmatprep.mubr.bf16.mxu0 %v21472_v3 }
 0x1db   : > { %v2162_v28 = vor.u32 %v2161_v22, %v2158_v8 }
 0x1dd   : > { %v2171_v32 = vsel %vm1473_vm4, %v2162_v28, %v2170_v24  ;;  %v17510_v28 = vld [vmem:[#allocation2 + $0x48] sm:$0xf] }
 0x1e1   : > { %1811 = vmatmul.mubr.bf16.gmra.mrb[44].mxu0 %v1529_v21  ;;  %v12587_v21 = vcombine.low %v17422_v60, %v17424_v5 }
 0x1e2   : > { %1820 = vmatprep.mubr.bf16.mxu0 %v21472_v3 }
 0x1e3   : > { %v2173_v30 = vshrl.u32 %v12587_v21, 16 }
 0x1e5   : > { %v2175_v34 = vrot.slane %v2173_v30, 3 }
 0x1e9   : > { %1821 = vmatmul.mubr.bf16.gmra.mrb[48].mxu0 %v1533_v40  ;;  %v2176_v40 = vshll.u32 %v12587_v21, 16  ;;  %v17508_v21 = vld [vmem:[#allocation2 + $0x44] sm:$0xf] }
 0x1ea   : > { %1830 = vmatprep.mubr.bf16.mxu0 %v21472_v3 }
 0x1eb   : > { %v2178_v62 = vrot.slane %v2176_v40, 4 }
 0x1ed   : > { %v2179_v29 = vor.u32 %v2178_v62, %v2175_v34 }
 0x1f1   : > { %1831 = vmatmul.mubr.bf16.gmra.mrb[52].mxu0 %v1537_v56  ;;  %v15907_v56 = vld [vmem:[%s21450_s3 + $0x200] ss:$8 sps:$4 sm:$0xff]  }
 0x1f2   : > { %1840 = vmatprep.mubr.bf16.mxu0 %v21472_v3 }
 0x1f9   : > { %1841 = vmatmul.mubr.bf16.gmra.mrb[56].mxu0 %v1541_v13  ;;  %v2182_v13 = vshrl.u32 %v12588_v36, 16  ;;  %v17516_v36 = vld [vmem:[#allocation2 + $0x4c] sm:$0xf] }
 0x1fa   : > { %1850 = vmatprep.mubr.bf16.mxu0 %v21472_v3 }
 0x1fb   : > { %v2184_v42 = vrot.slane %v2182_v13, 3 }
 0x1fd   : > { %v2188_v54 = vor.u32 %v2187_v47, %v2184_v42 }
 0x1ff   : > { %v2189_v7 = vsel %vm1473_vm4, %v2179_v29, %v2188_v54 }
 0x201   : > { %1851 = vmatmul.mubr.bf16.gmra.mrb[60].mxu0 %v1545_v46  ;;  %v2180_v46 = vsel %vm1473_vm4, %v2170_v24, %v2179_v29 }
 0x202   : > { %1860 = vmatprep.mubr.bf16.mxu0 %v21472_v3 }
 0x209   : > { %1861 = vmatmul.mubr.bf16.gmra.mrb[64].mxu0 %v1549_v26  ;;  %v310_v26 = vld [vmem:[%s16796_s25 + $0x9c] sm:$0xf] }
 0x20a   : > { %1870 = vmatprep.mubr.bf16.mxu0 %v21472_v3  ;;  %351 = vst [vmem:[#allocation2 + $0xac] sm:$0xf] %v310_v26 }
 0x211   : > { %1871 = vmatmul.mubr.bf16.gmra.mrb[68].mxu0 %v1553_v48  ;;  %v17470_v48 = vld [vmem:[#allocation2 + $0x38] sm:$0xf] }
 0x212   : > { %1880 = vmatprep.mubr.bf16.mxu0 %v21472_v3  ;;  %v12590_v14 = vcombine.low %v17468_v6, %v17470_v48 }
 0x214   : > { %v2203_v33 = vshll.u32 %v12590_v14, 16 }
 0x216   : > { %v2205_v49 = vrot.slane %v2203_v33, 4  ;;  %v17543_v33 = vld [vmem:[#allocation2 + $0x64] sm:$0xf] }
 0x219   : > { %1881 = vmatmul.mubr.bf16.gmra.mrb[72].mxu0 %v1557_v37  ;;  %v2200_v37 = vshrl.u32 %v12590_v14, 16 }
 0x21a   : > { %1890 = vmatprep.mubr.bf16.mxu0 %v21472_v3 }
 0x21b   : > { %v2202_v16 = vrot.slane %v2200_v37, 3 }
 0x21d   : > { %v2206_v8 = vor.u32 %v2205_v49, %v2202_v16 }
 0x21f   : > { %v2207_v24 = vsel %vm1473_vm4, %v2197_v18, %v2206_v8 }
 0x221   : > { %1891 = vmatmul.mubr.bf16.gmra.mrb[76].mxu0 %v1566_v44  ;;  %v2198_v44 = vsel %vm1473_vm4, %v2188_v54, %v2197_v18 }
 0x222   : > { %1900 = vmatprep.mubr.bf16.mxu0 %v21472_v3 }
 0x229   : > { %1901 = vmatmul.mubr.bf16.gmra.mrb[80].mxu0 %v1565_v35  ;;  %v17488_v35 = vld [vmem:[#allocation2 + $0x3c] sm:$0xf] }
 0x22a   : > { %2476 = vmatprep.mubr.bf16.mxu0 %v21472_v3  ;;  %v12591_v1 = vcombine.low %v17488_v35, %v17490_v17 }
 0x22c   : > { %v2209_v22 = vshrl.u32 %v12591_v1, 16  ;;  %v2212_v10 = vshll.u32 %v12591_v1, 16 }
 0x22e   : > { %v2211_v30 = vrot.slane %v2209_v22, 3  ;;  %v2214_v40 = vrot.slane %v2212_v10, 4  ;;  %v17553_v22 = vld [vmem:[#allocation2 + $0x70] sm:$0xf] }
 0x231   : > { %2477 = vmatmul.mubr.bf16.vlgmr.msra.gmra.mrb[0].mxu0 %v2171_v32  ;;  %v12592_v32 = vcombine.low %v17508_v21, %v17510_v28 }
 0x232   : > { %2907 = vmatpush1.bf16.msra.mxu0 %v15907_v56  ;;  %2486 = vmatprep.mubr.bf16.mxu0 %v21472_v3  ;;  %v2215_v56 = vor.u32 %v2214_v40, %v2211_v30 }
 0x233   : > { %2908 = vmatprep.subr.bf16.mxu0 %v15914_v50  ;;  %v2218_v34 = vshrl.u32 %v12592_v32, 16  ;;  %v2221_v62 = vshll.u32 %v12592_v32, 16  ;;  %v17518_v50 = vld [vmem:[#allocation2 + $0x50] sm:$0xf] }
 0x234   : > { %v2216_v29 = vsel %vm1473_vm4, %v2206_v8, %v2215_v56  ;;  %v17551_v8 = vld [vmem:[#allocation2 + $0x6c] sm:$0xf] }
 0x235   : > { %v2220_v13 = vrot.slane %v2218_v34, 3  ;;  %v2223_v38 = vrot.slane %v2221_v62, 4  ;;  %v12597_v30 = vcombine.low %v17551_v8, %v17553_v22  ;;  %v17559_v34 = vld [vmem:[#allocation2 + $0x74] sm:$0xf]  ;;  %v17561_v62 = vld [vmem:[#allocation2 + $0x78] sm:$0xf] }
 0x236   : > { %2909 = vmatpush1.bf16.msra.mxu0 %v15912_v23  ;;  %v12593_v23 = vcombine.low %v17516_v36, %v17518_v50 }
 0x237   : > { %2910 = vmatprep.subr.bf16.mxu0 %v15920_v58  ;;  %v15953_v58 = vld [vmem:[%s21450_s3 + $0x284] ss:$8 sps:$4 sm:$0xff]   ;;  %v2263_v32 = vshrl.u32 %v12597_v30, 16 }
 0x238   : > { %v2227_v42 = vshrl.u32 %v12593_v23, 16  ;;  %v2230_v47 = vshll.u32 %v12593_v23, 16  ;;  %v12598_v23 = vcombine.low %v17559_v34, %v17561_v62 }
 0x239   : > { %2487 = vmatmul.mubr.bf16.gmra.mrb[4].mxu0 %v2180_v46  ;;  %v2224_v46 = vor.u32 %v2223_v38, %v2220_v13  ;;  %v2265_v13 = vrot.slane %v2263_v32, 3  ;;  %v17591_v32 = vld [vmem:[#allocation2 + $0x94] sm:$0xf] }
 0x23a   : > { %2496 = vmatprep.mubr.bf16.mxu0 %v21472_v3  ;;  %2911 = vmatpush1.bf16.msra.mxu0 %v15918_v20  ;;  %v17529_v20 = vld [vmem:[#allocation2 + $0x58] sm:$0xf]  ;;  %v2229_v26 = vrot.slane %v2227_v42, 3  ;;  %v2232_v45 = vrot.slane %v2230_v47, 4  ;;  %v2275_v42 = vshll.u32 %v12598_v23, 16 }
 0x23b   : > { %2912 = vmatprep.subr.bf16.mxu0 %v15925_v25  ;;  %v2225_v25 = vsel %vm1473_vm4, %v2215_v56, %v2224_v46  ;;  %v12594_v54 = vcombine.low %v17527_v39, %v17529_v20  ;;  %v2266_v56 = vshll.u32 %v12597_v30, 16  ;;  %v17567_v47 = vld [vmem:[#allocation2 + $0x7c] sm:$0xf] }
 0x23c   : > { %v2233_v2 = vor.u32 %v2232_v45, %v2229_v26 }
 0x23d   : > { %v2236_v63 = vshrl.u32 %v12594_v54, 16  ;;  %v2268_v38 = vrot.slane %v2266_v56, 4  ;;  %v17593_v56 = vld [vmem:[#allocation2 + $0x98] sm:$0xf] }
 0x23e   : > { %2913 = vmatpush1.bf16.msra.mxu0 %v15923_v0  ;;  %v2239_v0 = vshll.u32 %v12594_v54, 16  ;;  %v2234_v43 = vsel %vm1473_vm4, %v2224_v46, %v2233_v2  ;;  %v2272_v46 = vshrl.u32 %v12598_v23, 16  ;;  %v2277_v54 = vrot.slane %v2275_v42, 4 }
 0x23f   : > { %2914 = vmatprep.subr.bf16.mxu0 %v15931_v27  ;;  %v17535_v27 = vld [vmem:[#allocation2 + $0x5c] sm:$0xf]  ;;  %v2238_v15 = vrot.slane %v2236_v63, 3  ;;  %v12602_v23 = vcombine.low %v17591_v32, %v17593_v56 }
 0x240   : > { %v2241_v14 = vrot.slane %v2239_v0, 4  ;;  %v2274_v45 = vrot.slane %v2272_v46, 3 }
 0x241   : > { %2497 = vmatmul.mubr.bf16.gmra.mrb[8].mxu0 %v2189_v7  ;;  %v17537_v7 = vld [vmem:[#allocation2 + $0x60] sm:$0xf]  ;;  %v2308_v46 = vshrl.u32 %v12602_v23, 16  ;;  %v2311_v42 = vshll.u32 %v12602_v23, 16 }
 0x242   : > { %2506 = vmatprep.mubr.bf16.mxu0 %v21472_v3  ;;  %2915 = vmatpush1.bf16.msra.mxu0 %v15929_v52  ;;  %v12595_v52 = vcombine.low %v17535_v27, %v17537_v7  ;;  %v2278_v63 = vor.u32 %v2277_v54, %v2274_v45  ;;  %v17601_v45 = vld [vmem:[#allocation2 + $0xa0] sm:$0xf] }
 0x243   : > { %2916 = vmatprep.subr.bf16.mxu0 %v15937_v9  ;;  %v2242_v9 = vor.u32 %v2241_v14, %v2238_v15  ;;  %v17575_v15 = vld [vmem:[#allocation2 + $0x84] sm:$0xf]  ;;  %v17577_v14 = vld [vmem:[#allocation2 + $0x88] sm:$0xf] }
 0x244   : > { %v2245_v18 = vshrl.u32 %v12595_v52, 16  ;;  %v2248_v37 = vshll.u32 %v12595_v52, 16 }
 0x246   : > { %2917 = vmatpush1.bf16.msra.mxu0 %v15935_v12  ;;  %v17545_v12 = vld [vmem:[#allocation2 + $0x68] sm:$0xf]  ;;  %v2250_v16 = vrot.slane %v2248_v37, 4  ;;  %v12600_v37 = vcombine.low %v17575_v15, %v17577_v14 }
 0x247   : > { %2918 = vmatprep.subr.bf16.mxu0 %v15942_v4  ;;  %v2243_v4 = vsel %vm1473_vm4, %v2233_v2, %v2242_v9  ;;  %v12596_v49 = vcombine.low %v17543_v33, %v17545_v12 }
 0x249   : > { %2507 = vmatmul.mubr.bf16.gmra.mrb[12].mxu0 %v2198_v44  ;;  %v2247_v44 = vrot.slane %v2245_v18, 3 }
 0x24a   : > { %2516 = vmatprep.mubr.bf16.mxu0 %v21472_v3  ;;  %2919 = vmatpush1.bf16.msra.mxu0 %v15940_v59  ;;  %v2254_v59 = vshrl.u32 %v12596_v49, 16 }
 0x24b   : > { %2920 = vmatprep.subr.bf16.mxu0 %v15948_v19  ;;  %v2251_v1 = vor.u32 %v2250_v16, %v2247_v44  ;;  %v2257_v19 = vshll.u32 %v12596_v49, 16  ;;  %v2290_v44 = vshrl.u32 %v12600_v37, 16  ;;  %v2293_v16 = vshll.u32 %v12600_v37, 16  ;;  %v17583_v49 = vld [vmem:[#allocation2 + $0x8c] sm:$0xf] }
 0x24c   : > { %v17609_v37 = vld [vmem:[#allocation2 + $0xa8] sm:$0xf] }
 0x24d   : > { %v2252_v10 = vsel %vm1473_vm4, %v2242_v9, %v2251_v1 }
 0x24e   : > { %2921 = vmatpush1.bf16.msra.mxu0 %v15946_v51  ;;  %v2256_v51 = vrot.slane %v2254_v59, 3 }
 0x24f   : > { %3519 = vmatprep.subr.bf16.mxu0 %v15953_v58  ;;  %v2269_v58 = vor.u32 %v2268_v38, %v2265_v13 }
 0x251   : > { %2517 = vmatmul.mubr.bf16.gmra.mrb[16].mxu0 %v2207_v24  ;;  %v2259_v24 = vrot.slane %v2257_v19, 4  ;;  %v2279_v52 = vsel %vm1473_vm4, %v2269_v58, %v2278_v63  ;;  %v2292_v19 = vrot.slane %v2290_v44, 3 }
 0x252   : > { %2526 = vmatprep.mubr.bf16.mxu0 %v21472_v3 }
 0x253   : > { %v2260_v40 = vor.u32 %v2259_v24, %v2256_v51 }
 0x255   : > { %v2270_v26 = vsel %vm1473_vm4, %v2260_v40, %v2269_v58 }
 0x259   : > { %2527 = vmatmul.mubr.bf16.gmra.mrb[20].mxu0 %v2216_v29  ;;  %v2261_v29 = vsel %vm1473_vm4, %v2251_v1, %v2260_v40  ;;  %v17585_v1 = vld [vmem:[#allocation2 + $0x90] sm:$0xf] }
 0x25a   : > { %2536 = vmatprep.mubr.bf16.mxu0 %v21472_v3  ;;  %v12601_v51 = vcombine.low %v17583_v49, %v17585_v1 }
 0x25c   : > { %v2299_v30 = vshrl.u32 %v12601_v51, 16  ;;  %v2302_v40 = vshll.u32 %v12601_v51, 16 }
 0x25e   : > { %v2301_v13 = vrot.slane %v2299_v30, 3  ;;  %v2304_v38 = vrot.slane %v2302_v40, 4  ;;  %v17617_v30 = vld [vmem:[#allocation2 + $0xb0] sm:$0x3] }
 0x260   : > { %v2305_v58 = vor.u32 %v2304_v38, %v2301_v13 }
 0x261   : > { %2537 = vmatmul.mubr.bf16.gmra.mrb[24].mxu0 %v2225_v25  ;;  %v17569_v25 = vld [vmem:[#allocation2 + $0x80] sm:$0xf] }
 0x262   : > { %2546 = vmatprep.mubr.bf16.mxu0 %v21472_v3  ;;  %v12599_v2 = vcombine.low %v17567_v47, %v17569_v25 }
 0x264   : > { %v2281_v0 = vshrl.u32 %v12599_v2, 16 }
 0x266   : > { %v2283_v9 = vrot.slane %v2281_v0, 3 }
 0x269   : > { %2547 = vmatmul.mubr.bf16.gmra.mrb[28].mxu0 %v2234_v43  ;;  %v2284_v43 = vshll.u32 %v12599_v2, 16  ;;  %v2310_v2 = vrot.slane %v2308_v46, 3 }
 0x26a   : > { %2556 = vmatprep.mubr.bf16.mxu0 %v21472_v3 }
 0x26b   : > { %v2286_v18 = vrot.slane %v2284_v43, 4 }
 0x271   : > { %2557 = vmatmul.mubr.bf16.gmra.mrb[32].mxu0 %v2243_v4  ;;  %v2287_v4 = vor.u32 %v2286_v18, %v2283_v9  ;;  %v17607_v18 = vld [vmem:[#allocation2 + $0xa4] sm:$0xf] }
 0x272   : > { %2566 = vmatprep.mubr.bf16.mxu0 %v21472_v3 }
 0x273   : > { %v2288_v59 = vsel %vm1473_vm4, %v2278_v63, %v2287_v4  ;;  %v2313_v63 = vrot.slane %v2311_v42, 4 }
 0x275   : > { %v2314_v43 = vor.u32 %v2313_v63, %v2310_v2 }
 0x279   : > { %2567 = vmatmul.mubr.bf16.gmra.mrb[36].mxu0 %v2252_v10  ;;  %v2295_v10 = vrot.slane %v2293_v16, 4 }
 0x27a   : > { %2576 = vmatprep.mubr.bf16.mxu0 %v21472_v3 }
 0x27b   : > { %v2296_v24 = vor.u32 %v2295_v10, %v2292_v19 }
 0x27d   : > { %v2306_v54 = vsel %vm1473_vm4, %v2296_v24, %v2305_v58 }
 0x281   : > { %2577 = vmatmul.mubr.bf16.gmra.mrb[40].mxu0 %v2261_v29  ;;  %v2297_v29 = vsel %vm1473_vm4, %v2287_v4, %v2296_v24  ;;  %v2315_v4 = vsel %vm1473_vm4, %v2305_v58, %v2314_v43  ;;  %v17615_v24 = vld [vmem:[#allocation2 + $0xac] sm:$0xf] }
 0x282   : > { %2586 = vmatprep.mubr.bf16.mxu0 %v21472_v3  ;;  %v12605_v38 = vcombine.low %v17615_v24, %v17617_v30 }
 0x284   : > { %v2335_v58 = vshrl.u32 %v12605_v38, 16  ;;  %v2338_v46 = vshll.u32 %v12605_v38, 16  ;;  %v15996_v38 = vld [vmem:[%s21450_s3 + $0x304] ss:$8 sps:$4 sm:$0xff]  }
 0x286   : > { %v2340_v2 = vrot.slane %v2338_v46, 4 }
 0x289   : > { %2587 = vmatmul.mubr.bf16.gmra.mrb[44].mxu0 %v2270_v26  ;;  %v17599_v26 = vld [vmem:[#allocation2 + $0x9c] sm:$0xf] }
 0x28a   : > { %2596 = vmatprep.mubr.bf16.mxu0 %v21472_v3  ;;  %v12603_v0 = vcombine.low %v17599_v26, %v17601_v45 }
 0x28c   : > { %v2320_v9 = vshll.u32 %v12603_v0, 16 }
 0x28e   : > { %v2322_v16 = vrot.slane %v2320_v9, 4  ;;  %v15958_v9 = vld [vmem:[%s21450_s3 + $0x294] ss:$8 sps:$4 sm:$0xff]  }
 0x291   : > { %2597 = vmatmul.mubr.bf16.gmra.mrb[48].mxu0 %v2279_v52  ;;  %v2317_v52 = vshrl.u32 %v12603_v0, 16 }
 0x292   : > { %2606 = vmatprep.mubr.bf16.mxu0 %v21472_v3 }
 0x293   : > { %v2319_v44 = vrot.slane %v2317_v52, 3  ;;  %v15951_v52 = vld [vmem:[%s21450_s3 + $0x280] ss:$8 sps:$4 sm:$0xff]  }
 0x295   : > { %v2323_v19 = vor.u32 %v2322_v16, %v2319_v44  ;;  %v15962_v44 = vld [vmem:[%s21450_s3 + $0x2a0] ss:$8 sps:$4 sm:$0xff]   ;;  %v15969_v16 = vld [vmem:[%s21450_s3 + $0x2b4] ss:$8 sps:$4 sm:$0xff]  }
 0x297   : > { %v2324_v40 = vsel %vm1473_vm4, %v2314_v43, %v2323_v19  ;;  %v17630_v43 = vcombine.low %v17411_v11, %v17413_v55  ;;  %v15964_v11 = vld [vmem:[%s21450_s3 + $0x2a4] ss:$8 sps:$4 sm:$0xff]   ;;  %v17648_v55 = vcombine.low %v17415_v57, %v17422_v60  ;;  %v15967_v57 = vld [vmem:[%s21450_s3 + $0x2b0] ss:$8 sps:$4 sm:$0xff]  }
 0x298   : > { %v15975_v60 = vld [vmem:[%s21450_s3 + $0x2c4] ss:$8 sps:$4 sm:$0xff]  }
 0x299   : > { %2607 = vmatmul.mubr.bf16.gmra.mrb[52].mxu0 %v2288_v59  ;;  %v12604_v59 = vcombine.low %v17607_v18, %v17609_v37 }
 0x29a   : > { %2616 = vmatprep.mubr.bf16.mxu0 %v21472_v3 }
 0x29b   : > { %v2326_v10 = vshrl.u32 %v12604_v59, 16  ;;  %v2329_v51 = vshll.u32 %v12604_v59, 16  ;;  %v12640_v59 = vcombine.low %v17424_v5, %v17429_v31  ;;  %v15986_v5 = vld [vmem:[%s21450_s3 + $0x2e4] ss:$8 sps:$4 sm:$0xff]   ;;  %v12641_v31 = vcombine.low %v17431_v41, %v17446_v61 }
 0x29c   : > { %v12642_v41 = vcombine.low %v17448_v53, %v17468_v6  ;;  %v12643_v61 = vcombine.low %v17470_v48, %v17488_v35 }
 0x29d   : > { %v2331_v13 = vrot.slane %v2329_v51, 4  ;;  %v15979_v51 = vld [vmem:[%s21450_s3 + $0x2d0] ss:$8 sps:$4 sm:$0xff]   ;;  %v3271_v6 = vshrl.u32 %v12640_v59, 16  ;;  %v3275_v46 = vshll.u32 %v12641_v31, 16 }
 0x29f   : > { %v3277_v35 = vrot.slane %v3275_v46, 1  ;;  %v12652_v46 = vcombine.low %v17569_v25, %v17575_v15 }
 0x2a1   : > { %2617 = vmatmul.mubr.bf16.gmra.mrb[56].mxu0 %v2297_v29  ;;  %v2328_v29 = vrot.slane %v2326_v10, 3  ;;  %v15981_v10 = vld [vmem:[%s21450_s3 + $0x2d4] ss:$8 sps:$4 sm:$0xff]  }
 0x2a2   : > { %2626 = vmatprep.mubr.bf16.mxu0 %v21472_v3 }
 0x2a3   : > { %v2332_v23 = vor.u32 %v2331_v13, %v2328_v29  ;;  %v15992_v29 = vld [vmem:[%s21450_s3 + $0x2f4] ss:$8 sps:$4 sm:$0xff]   ;;  %v15990_v13 = vld [vmem:[%s21450_s3 + $0x2f0] ss:$8 sps:$4 sm:$0xff]  }
 0x2a5   : > { %v2333_v42 = vsel %vm1473_vm4, %v2323_v19, %v2332_v23  ;;  %v15973_v19 = vld [vmem:[%s21450_s3 + $0x2c0] ss:$8 sps:$4 sm:$0xff]  }
 0x2a9   : > { %2627 = vmatmul.mubr.bf16.gmra.mrb[60].mxu0 %v2306_v54  ;;  %v2337_v54 = vrot.slane %v2335_v58, 3  ;;  %v3267_v58 = vshll.u32 %v12640_v59, 16 }
 0x2aa   : > { %2636 = vmatprep.mubr.bf16.mxu0 %v21472_v3 }
 0x2ab   : > { %v2341_v63 = vor.u32 %v2340_v2, %v2337_v54  ;;  %v17703_v53 = vrot.slane %v3267_v58, 1 }
 0x2ad   : > { %v2342_v0 = vsel %vm1473_vm4, %v2332_v23, %v2341_v63  ;;  %v12644_v23 = vcombine.low %v17490_v17, %v17508_v21  ;;  %v3273_v48 = vor.u32 %v3271_v6, %v17703_v53  ;;  %v3279_v17 = vshrl.u32 %v12641_v31, 16 }
 0x2ae   : > { %v3283_v21 = vshll.u32 %v12642_v41, 16 }
 0x2af   : > { %v17709_v54 = vsel %vm3250_vm5, %v3273_v48, %v3277_v35  ;;  %v3281_v2 = vor.u32 %v3279_v17, %v3277_v35  ;;  %v12653_v17 = vcombine.low %v17577_v14, %v17583_v49 }
 0x2b1   : > { %2637 = vmatmul.mubr.bf16.gmra.mrb[64].mxu0 %v2315_v4  ;;  %v15956_v4 = vld [vmem:[%s21450_s3 + $0x290] ss:$8 sps:$4 sm:$0xff]  }
 0x2b2   : > { %2646 = vmatprep.mubr.bf16.mxu0 %v21472_v3 }
 0x2b9   : > { %2647 = vmatmul.mubr.bf16.gmra.mrb[68].mxu0 %v2324_v40  ;;  %v15984_v40 = vld [vmem:[%s21450_s3 + $0x2e0] ss:$8 sps:$4 sm:$0xff]  }
 0x2ba   : > { %2656 = vmatprep.mubr.bf16.mxu0 %v21472_v3 }
 0x2c1   : > { %2657 = vmatmul.mubr.bf16.gmra.mrb[72].mxu0 %v2333_v42  ;;  %v12645_v42 = vcombine.low %v17510_v28, %v17516_v36  ;;  %v3287_v28 = vshrl.u32 %v12642_v41, 16  ;;  %v3291_v36 = vshll.u32 %v12643_v61, 16 }
 0x2c2   : > { %2666 = vmatprep.mubr.bf16.mxu0 %v21472_v3 }
 0x2c9   : > { %2667 = vmatmul.mubr.bf16.gmra.mrb[76].mxu0 %v2342_v0  ;;  %v12646_v0 = vcombine.low %v17518_v50, %v17527_v39  ;;  %v3295_v50 = vshrl.u32 %v12643_v61, 16  ;;  %v3299_v39 = vshll.u32 %v12644_v23, 16 }
 0x2ca   : > { %2676 = vmatprep.mubr.bf16.mxu0 %v21472_v3 }
 0x2d1   : > { %2677 = vmatmul.mubr.bf16.gmra.mrb[80].mxu0 %v2341_v63  ;;  %v3285_v63 = vrot.slane %v3283_v21, 1 }
 0x2d2   : > { %2938 = vmatprep.mubr.bf16.mxu0 %v21472_v3 }
 0x2d9   : > { %2939 = vmatmul.mubr.bf16.vlgmr.msra.gmra.mrb[0].mxu0 %v17630_v43 }
 0x2da   : > { %3520 = vmatpush1.bf16.msra.mxu0 %v15951_v52  ;;  %2948 = vmatprep.mubr.bf16.mxu0 %v21472_v3  ;;  %v17715_v52 = vsel %vm3250_vm5, %v3281_v2, %v3285_v63 }
 0x2db   : > { %3521 = vmatprep.subr.bf16.mxu0 %v15958_v9  ;;  %v3289_v9 = vor.u32 %v3287_v28, %v3285_v63 }
 0x2de   : > { %3522 = vmatpush1.bf16.msra.mxu0 %v15956_v4  ;;  %v3293_v4 = vrot.slane %v3291_v36, 1 }
 0x2df   : > { %3523 = vmatprep.subr.bf16.mxu0 %v15964_v11  ;;  %v12647_v11 = vcombine.low %v17529_v20, %v17535_v27  ;;  %v3303_v20 = vshrl.u32 %v12644_v23, 16  ;;  %v3307_v27 = vshll.u32 %v12645_v42, 16 }
 0x2e1   : > { %2949 = vmatmul.mubr.bf16.gmra.mrb[4].mxu0 %v17648_v55 }
 0x2e2   : > { %2958 = vmatprep.mubr.bf16.mxu0 %v21472_v3  ;;  %3524 = vmatpush1.bf16.msra.mxu0 %v15962_v44  ;;  %v17721_v44 = vsel %vm3250_vm5, %v3289_v9, %v3293_v4 }
 0x2e3   : > { %3525 = vmatprep.subr.bf16.mxu0 %v15969_v16  ;;  %v3297_v16 = vor.u32 %v3295_v50, %v3293_v4  ;;  %v12655_v4 = vcombine.low %v17593_v56, %v17599_v26  ;;  %v3367_v56 = vshrl.u32 %v12652_v46, 16  ;;  %v3371_v26 = vshll.u32 %v12653_v17, 16 }
 0x2e6   : > { %3526 = vmatpush1.bf16.msra.mxu0 %v15967_v57  ;;  %v3301_v57 = vrot.slane %v3299_v39, 1 }
 0x2e7   : > { %3527 = vmatprep.subr.bf16.mxu0 %v15975_v60  ;;  %v12648_v60 = vcombine.low %v17537_v7, %v17543_v33  ;;  %v3311_v7 = vshrl.u32 %v12645_v42, 16  ;;  %v3315_v33 = vshll.u32 %v12646_v0, 16 }
 0x2e9   : > { %2959 = vmatmul.mubr.bf16.gmra.mrb[8].mxu0 %v12640_v59  ;;  %v17727_v59 = vsel %vm3250_vm5, %v3297_v16, %v3301_v57  ;;  %v12656_v16 = vcombine.low %v17601_v45, %v17607_v18  ;;  %v3254_v45 = vshll.u32 %v17630_v43, 16  ;;  %v3375_v18 = vshrl.u32 %v12653_v17, 16 }
 0x2ea   : > { %2968 = vmatprep.mubr.bf16.mxu0 %v21472_v3  ;;  %3528 = vmatpush1.bf16.msra.mxu0 %v15973_v19  ;;  %v3305_v19 = vor.u32 %v3303_v20, %v3301_v57  ;;  %v3373_v20 = vrot.slane %v3371_v26, 1 }
 0x2eb   : > { %3529 = vmatprep.subr.bf16.mxu0 %v15981_v10  ;;  %v3309_v10 = vrot.slane %v3307_v27, 1  ;;  %v17780_v27 = vcombine.low %v17609_v37, %v17615_v24  ;;  %v3252_v37 = vshrl.u32 %v17630_v43, 16  ;;  %v3256_v24 = vrot.slane %v3254_v45, 1 }
 0x2ec   : > { %v3263_v43 = vshrl.u32 %v17648_v55, 16 }
 0x2ee   : > { %3530 = vmatpush1.bf16.msra.mxu0 %v15979_v51  ;;  %v12649_v51 = vcombine.low %v17545_v12, %v17551_v8  ;;  %v3319_v12 = vshrl.u32 %v12646_v0, 16  ;;  %v3323_v8 = vshll.u32 %v12647_v11, 16 }
 0x2ef   : > { %3531 = vmatprep.subr.bf16.mxu0 %v15986_v5  ;;  %v17733_v5 = vsel %vm3250_vm5, %v3305_v19, %v3309_v10 }
 0x2f0   : > { %v3343_v25 = vshrl.u32 %v12649_v51, 16 }
 0x2f1   : > { %2969 = vmatmul.mubr.bf16.gmra.mrb[12].mxu0 %v12641_v31  ;;  %v3313_v31 = vor.u32 %v3311_v7, %v3309_v10 }
 0x2f2   : > { %2978 = vmatprep.mubr.bf16.mxu0 %v21472_v3  ;;  %3532 = vmatpush1.bf16.msra.mxu0 %v15984_v40  ;;  %v3317_v40 = vrot.slane %v3315_v33, 1  ;;  %v12658_v33 = vcombine.low %v17617_v30, %v17617_v30  ;;  %v15994_v30 = vld [vmem:[%s21450_s3 + $0x300] ss:$8 sps:$4 sm:$0xff]  }
 0x2f3   : > { %3533 = vmatprep.subr.bf16.mxu0 %v15992_v29  ;;  %v12650_v29 = vcombine.low %v17553_v22, %v17559_v34  ;;  %v3327_v22 = vshrl.u32 %v12647_v11, 16  ;;  %v3331_v34 = vshll.u32 %v12648_v60, 16 }
 0x2f5   : > { %v3333_v6 = vrot.slane %v3331_v34, 1  ;;  %v3347_v15 = vshll.u32 %v12650_v29, 16  ;;  %v3351_v14 = vshrl.u32 %v12650_v29, 16 }
 0x2f6   : > { %3534 = vmatpush1.bf16.msra.mxu0 %v15990_v13  ;;  %v17739_v13 = vsel %vm3250_vm5, %v3313_v31, %v3317_v40  ;;  %v3259_v31 = vshll.u32 %v17648_v55, 16  ;;  %v16002_v55 = vld [vmem:[%s21450_s3 + $0x324] ss:$8 sps:$4 sm:$0xff]  }
 0x2f7   : > { %4271 = vmatprep.subr.bf16.mxu0 %v15996_v38  ;;  %v12651_v38 = vcombine.low %v17561_v62, %v17567_v47  ;;  %v3335_v62 = vshrl.u32 %v12648_v60, 16  ;;  %v3339_v47 = vshll.u32 %v12649_v51, 16  ;;  %v3349_v63 = vrot.slane %v3347_v15, 1 }
 0x2f9   : > { %2979 = vmatmul.mubr.bf16.gmra.mrb[16].mxu0 %v12642_v41  ;;  %v3321_v41 = vor.u32 %v3319_v12, %v3317_v40  ;;  %v3337_v35 = vor.u32 %v3335_v62, %v3333_v6  ;;  %v3355_v49 = vshll.u32 %v12651_v38, 16  ;;  %v3353_v36 = vor.u32 %v3351_v14, %v3349_v63  ;;  %v16008_v14 = vld [vmem:[%s21450_s3 + $0x344] ss:$8 sps:$4 sm:$0xff]  }
 0x2fa   : > { %2988 = vmatprep.mubr.bf16.mxu0 %v21472_v3  ;;  %v3257_v12 = vor.u32 %v3256_v24, %v3252_v37  ;;  %v3391_v62 = vshrl.u32 %v12655_v4, 16  ;;  %v16028_v37 = vld [vmem:[%s21450_s3 + $0x394] ss:$8 sps:$4 sm:$0xff]  }
 0x2fb   : > { %v3357_v9 = vrot.slane %v3355_v49, 1 }
 0x301   : > { %2989 = vmatmul.mubr.bf16.gmra.mrb[20].mxu0 %v12643_v61  ;;  %v3325_v61 = vrot.slane %v3323_v8, 1 }
 0x302   : > { %2998 = vmatprep.mubr.bf16.mxu0 %v21472_v3 }
 0x303   : > { %v3329_v58 = vor.u32 %v3327_v22, %v3325_v61 }
 0x305   : > { %v17751_v48 = vsel %vm3250_vm5, %v3329_v58, %v3333_v6  ;;  %v15999_v58 = vld [vmem:[%s21450_s3 + $0x314] ss:$8 sps:$4 sm:$0xff]  }
 0x309   : > { %2999 = vmatmul.mubr.bf16.gmra.mrb[24].mxu0 %v12644_v23  ;;  %v17745_v23 = vsel %vm3250_vm5, %v3321_v41, %v3325_v61  ;;  %v3387_v41 = vshll.u32 %v12655_v4, 16 }
 0x30a   : > { %3008 = vmatprep.mubr.bf16.mxu0 %v21472_v3 }
 0x311   : > { %3009 = vmatmul.mubr.bf16.gmra.mrb[28].mxu0 %v12645_v42  ;;  %v3341_v42 = vrot.slane %v3339_v47, 1  ;;  %v3395_v47 = vshll.u32 %v12656_v16, 16 }
 0x312   : > { %3018 = vmatprep.mubr.bf16.mxu0 %v21472_v3 }
 0x313   : > { %v17757_v21 = vsel %vm3250_vm5, %v3337_v35, %v3341_v42  ;;  %v3345_v2 = vor.u32 %v3343_v25, %v3341_v42  ;;  %v3397_v42 = vrot.slane %v3395_v47, 1  ;;  %v16000_v25 = vld [vmem:[%s21450_s3 + $0x320] ss:$8 sps:$4 sm:$0xff]  }
 0x315   : > { %v17763_v28 = vsel %vm3250_vm5, %v3345_v2, %v3349_v63  ;;  %v16005_v2 = vld [vmem:[%s21450_s3 + $0x334] ss:$8 sps:$4 sm:$0xff]   ;;  %v3399_v63 = vshrl.u32 %v12656_v16, 16 }
 0x317   : > { %v3401_v49 = vor.u32 %v3399_v63, %v3397_v42 }
 0x319   : > { %3019 = vmatmul.mubr.bf16.gmra.mrb[32].mxu0 %v12646_v0  ;;  %v12654_v0 = vcombine.low %v17585_v1, %v17591_v32  ;;  %v3359_v1 = vshrl.u32 %v12651_v38, 16  ;;  %v3363_v32 = vshll.u32 %v12652_v46, 16 }
 0x31a   : > { %3028 = vmatprep.mubr.bf16.mxu0 %v21472_v3 }
 0x31b   : > { %v3361_v50 = vor.u32 %v3359_v1, %v3357_v9  ;;  %v3365_v39 = vrot.slane %v3363_v32, 1  ;;  %v3379_v10 = vshll.u32 %v12654_v0, 16  ;;  %v3383_v8 = vshrl.u32 %v12654_v0, 16  ;;  %v16011_v1 = vld [vmem:[%s21450_s3 + $0x354] ss:$8 sps:$4 sm:$0xff]  }
 0x31c   : > { %v16009_v32 = vld [vmem:[%s21450_s3 + $0x350] ss:$8 sps:$4 sm:$0xff]  }
 0x31d   : > { %v17775_v57 = vsel %vm3250_vm5, %v3361_v50, %v3365_v39  ;;  %v3381_v7 = vrot.slane %v3379_v10, 1  ;;  %v16014_v50 = vld [vmem:[%s21450_s3 + $0x364] ss:$8 sps:$4 sm:$0xff]  }
 0x31e   : > { %v17900_v10 = vld [vmem:[#allocation2 + $0x28] sm:$0xff]  }
 0x31f   : > { %v3385_v61 = vor.u32 %v3383_v8, %v3381_v7  ;;  %v16034_v8 = vld [vmem:[%s21450_s3 + $0x3a4] ss:$8 sps:$4 sm:$0xff]  }
 0x321   : > { %3029 = vmatmul.mubr.bf16.gmra.mrb[36].mxu0 %v12647_v11  ;;  %v17769_v11 = vsel %vm3250_vm5, %v3353_v36, %v3357_v9  ;;  %v16006_v9 = vld [vmem:[%s21450_s3 + $0x340] ss:$8 sps:$4 sm:$0xff]  }
 0x322   : > { %3038 = vmatprep.mubr.bf16.mxu0 %v21472_v3 }
 0x329   : > { %3039 = vmatmul.mubr.bf16.gmra.mrb[40].mxu0 %v12648_v60  ;;  %v3369_v60 = vor.u32 %v3367_v56, %v3365_v39  ;;  %v16012_v39 = vld [vmem:[%s21450_s3 + $0x360] ss:$8 sps:$4 sm:$0xff]   ;;  %v16023_v56 = vld [vmem:[%s21450_s3 + $0x384] ss:$8 sps:$4 sm:$0xff]  }
 0x32a   : > { %3048 = vmatprep.mubr.bf16.mxu0 %v21472_v3 }
 0x32b   : > { %v17783_v19 = vsel %vm3250_vm5, %v3369_v60, %v3373_v20 }
 0x331   : > { %3049 = vmatmul.mubr.bf16.gmra.mrb[44].mxu0 %v12649_v51  ;;  %v3377_v51 = vor.u32 %v3375_v18, %v3373_v20 }
 0x332   : > { %3058 = vmatprep.mubr.bf16.mxu0 %v21472_v3 }
 0x333   : > { %v17793_v40 = vsel %vm3250_vm5, %v3377_v51, %v3381_v7  ;;  %v16021_v7 = vld [vmem:[%s21450_s3 + $0x380] ss:$8 sps:$4 sm:$0xff]  }
 0x339   : > { %3059 = vmatmul.mubr.bf16.gmra.mrb[48].mxu0 %v12650_v29  ;;  %v3261_v29 = vrot.slane %v3259_v31, 1  ;;  %v4019_v31 = vshll.u32 %v17900_v10, 16 }
 0x33a   : > { %3068 = vmatprep.mubr.bf16.mxu0 %v21472_v3 }
 0x33b   : > { %v3262_v22 = vsel %vm3250_vm5, %v3257_v12, %v3261_v29  ;;  %v3265_v6 = vor.u32 %v3263_v43, %v3261_v29  ;;  %v17916_v29 = vld [vmem:[#allocation2 + $0x30] sm:$0xff]  }
 0x33c   : > { %v16026_v12 = vld [vmem:[%s21450_s3 + $0x390] ss:$8 sps:$4 sm:$0xff]   ;;  %v4031_v47 = vshrl.u32 %v17916_v29, 16 }
 0x341   : > { %3069 = vmatmul.mubr.bf16.gmra.mrb[52].mxu0 %v12651_v38  ;;  %v3389_v38 = vrot.slane %v3387_v41, 1 }
 0x342   : > { %3078 = vmatprep.mubr.bf16.mxu0 %v21472_v3 }
 0x343   : > { %v17802_v34 = vsel %vm3250_vm5, %v3385_v61, %v3389_v38  ;;  %v3393_v35 = vor.u32 %v3391_v62, %v3389_v38  ;;  %v4023_v61 = vshrl.u32 %v17900_v10, 16  ;;  %v4027_v38 = vshll.u32 %v17916_v29, 16 }
 0x345   : > { %v3398_v15 = vsel %vm3250_vm5, %v3393_v35, %v3397_v42  ;;  %v16043_v35 = vld [vmem:[%s21450_s3 + $0x3c0] ss:$8 sps:$4 sm:$0xff]   ;;  %v16051_v42 = vld [vmem:[%s21450_s3 + $0x3d4] ss:$8 sps:$4 sm:$0xff]  }
 0x349   : > { %3079 = vmatmul.mubr.bf16.gmra.mrb[56].mxu0 %v12652_v46  ;;  %v15997_v46 = vld [vmem:[%s21450_s3 + $0x310] ss:$8 sps:$4 sm:$0xff]  }
 0x34a   : > { %3088 = vmatprep.mubr.bf16.mxu0 %v21472_v3 }
 0x351   : > { %3089 = vmatmul.mubr.bf16.gmra.mrb[60].mxu0 %v12653_v17  ;;  %v3270_v17 = vsel %vm3250_vm5, %v3265_v6, %v17703_v53  ;;  %v16003_v53 = vld [vmem:[%s21450_s3 + $0x330] ss:$8 sps:$4 sm:$0xff]  }
 0x352   : > { %3098 = vmatprep.mubr.bf16.mxu0 %v21472_v3  ;;  %v16037_v6 = vld [vmem:[%s21450_s3 + $0x3b0] ss:$8 sps:$4 sm:$0xff]  }
 0x359   : > { %3099 = vmatmul.mubr.bf16.gmra.mrb[64].mxu0 %v12654_v0  ;;  %v3403_v0 = vshll.u32 %v17780_v27, 16 }
 0x35a   : > { %3108 = vmatprep.mubr.bf16.mxu0 %v21472_v3 }
 0x35b   : > { %v3405_v36 = vrot.slane %v3403_v0, 1 }
 0x361   : > { %3109 = vmatmul.mubr.bf16.gmra.mrb[68].mxu0 %v12655_v4  ;;  %v3406_v4 = vsel %vm3250_vm5, %v3401_v49, %v3405_v36  ;;  %v16054_v49 = vld [vmem:[%s21450_s3 + $0x3e0] ss:$8 sps:$4 sm:$0xff]  }
 0x362   : > { %3118 = vmatprep.mubr.bf16.mxu0 %v21472_v3 }
 0x369   : > { %3119 = vmatmul.mubr.bf16.gmra.mrb[72].mxu0 %v12656_v16  ;;  %v16015_v16 = vld [vmem:[%s21450_s3 + $0x370] ss:$8 sps:$4 sm:$0xff]  }
 0x36a   : > { %3128 = vmatprep.mubr.bf16.mxu0 %v21472_v3 }
 0x371   : > { %3129 = vmatmul.mubr.bf16.gmra.mrb[76].mxu0 %v17780_v27 }
 0x372   : > { %3138 = vmatprep.mubr.bf16.mxu0 %v21472_v3 }
 0x379   : > { %3139 = vmatmul.mubr.bf16.gmra.mrb[80].mxu0 %v12658_v33 }
 0x37a   : > { %3551 = vmatprep.mubr.bf16.mxu0 %v21472_v3 }
 0x381   : > { %3552 = vmatmul.mubr.bf16.vlgmr.msra.gmra.mrb[0].mxu0 %v3262_v22  ;;  %v16032_v22 = vld [vmem:[%s21450_s3 + $0x3a0] ss:$8 sps:$4 sm:$0xff]  }
 0x382   : > { %4272 = vmatpush1.bf16.msra.mxu0 %v15994_v30  ;;  %3561 = vmatprep.mubr.bf16.mxu0 %v21472_v3  ;;  %v16039_v30 = vld [vmem:[%s21450_s3 + $0x3b4] ss:$8 sps:$4 sm:$0xff]  }
 0x383   : > { %4273 = vmatprep.subr.bf16.mxu0 %v15999_v58  ;;  %v17938_v58 = vld [vmem:[#allocation2 + $0x38] sm:$0xff]  }
 0x384   : > { %v4039_v0 = vshrl.u32 %v17938_v58, 16 }
 0x386   : > { %4274 = vmatpush1.bf16.msra.mxu0 %v15997_v46  ;;  %v16045_v46 = vld [vmem:[%s21450_s3 + $0x3c4] ss:$8 sps:$4 sm:$0xff]  }
 0x387   : > { %4275 = vmatprep.subr.bf16.mxu0 %v16002_v55  ;;  %v4035_v55 = vshll.u32 %v17938_v58, 16 }
 0x389   : > { %3562 = vmatmul.mubr.bf16.gmra.mrb[4].mxu0 %v3270_v17 }
 0x38a   : > { %3571 = vmatprep.mubr.bf16.mxu0 %v21472_v3  ;;  %4276 = vmatpush1.bf16.msra.mxu0 %v16000_v25  ;;  %v4037_v25 = vrot.slane %v4035_v55, 1 }
 0x38b   : > { %4277 = vmatprep.subr.bf16.mxu0 %v16005_v2  ;;  %v16049_v2 = vld [vmem:[%s21450_s3 + $0x3d0] ss:$8 sps:$4 sm:$0xff]  }
 0x38e   : > { %4278 = vmatpush1.bf16.msra.mxu0 %v16003_v53  ;;  %v16056_v53 = vld [vmem:[%s21450_s3 + $0x3e4] ss:$8 sps:$4 sm:$0xff]  }
 0x38f   : > { %4279 = vmatprep.subr.bf16.mxu0 %v16008_v14 }
 0x391   : > { %3572 = vmatmul.mubr.bf16.gmra.mrb[8].mxu0 %v17709_v54  ;;  %v16017_v54 = vld [vmem:[%s21450_s3 + $0x374] ss:$8 sps:$4 sm:$0xff]  }
 0x392   : > { %3581 = vmatprep.mubr.bf16.mxu0 %v21472_v3  ;;  %4280 = vmatpush1.bf16.msra.mxu0 %v16006_v9  ;;  %v4041_v9 = vor.u32 %v4039_v0, %v4037_v25 }
 0x393   : > { %4281 = vmatprep.subr.bf16.mxu0 %v16011_v1  ;;  %v17982_v1 = vld [vmem:[#allocation2 + $0x48] sm:$0xff]  }
 0x396   : > { %4282 = vmatpush1.bf16.msra.mxu0 %v16009_v32  ;;  %v16060_v32 = vld [vmem:[%s21450_s3 + $0x3f0] ss:$8 sps:$4 sm:$0xff]  }
 0x397   : > { %4283 = vmatprep.subr.bf16.mxu0 %v16014_v50 }
 0x399   : > { %3582 = vmatmul.mubr.bf16.gmra.mrb[12].mxu0 %v17715_v52  ;;  %v16018_v52 = vld [vmem:[#allocation2 + $0xb0] ss:$0 sps:$4 sm:$0x77]  }
 0x39a   : > { %3591 = vmatprep.mubr.bf16.mxu0 %v21472_v3  ;;  %4284 = vmatpush1.bf16.msra.mxu0 %v16012_v39 }
 0x39b   : > { %4285 = vmatprep.subr.bf16.mxu0 %v16017_v54  ;;  %v4051_v54 = vshll.u32 %v17982_v1, 16 }
 0x39e   : > { %4286 = vmatpush1.bf16.msra.mxu0 %v16015_v16 }
 0x39f   : > { %4758 = vmatprep.subr.bf16.mxu0 %v16023_v56  ;;  %v4053_v56 = vrot.slane %v4051_v54, 1 }
 0x3a1   : > { %3592 = vmatmul.mubr.bf16.gmra.mrb[16].mxu0 %v17721_v44  ;;  %v3407_v44 = vshrl.u32 %v17780_v27, 16 }
 0x3a2   : > { %3601 = vmatprep.mubr.bf16.mxu0 %v21472_v3 }
 0x3a9   : > { %3602 = vmatmul.mubr.bf16.gmra.mrb[20].mxu0 %v17727_v59  ;;  %v3411_v59 = vshll.u32 %v16018_v52, 16 }
 0x3aa   : > { %3611 = vmatprep.mubr.bf16.mxu0 %v21472_v3 }
 0x3b1   : > { %3612 = vmatmul.mubr.bf16.gmra.mrb[24].mxu0 %v17733_v5  ;;  %v3409_v5 = vor.u32 %v3407_v44, %v3405_v36  ;;  %v16062_v36 = vld [vmem:[%s21450_s3 + $0x3f4] ss:$8 sps:$4 sm:$0xff]  }
 0x3b2   : > { %3621 = vmatprep.mubr.bf16.mxu0 %v21472_v3 }
 0x3b9   : > { %3622 = vmatmul.mubr.bf16.gmra.mrb[28].mxu0 %v17739_v13  ;;  %v3413_v13 = vrot.slane %v3411_v59, 1  ;;  %v4055_v59 = vshrl.u32 %v17982_v1, 16 }
 0x3ba   : > { %3631 = vmatprep.mubr.bf16.mxu0 %v21472_v3 }
 0x3c1   : > { %3632 = vmatmul.mubr.bf16.gmra.mrb[32].mxu0 %v17745_v23  ;;  %v3842_v23 = vld [vmem:[#allocation2 + $0x18] sm:$0xf] }
 0x3c2   : > { %3641 = vmatprep.mubr.bf16.mxu0 %v21472_v3 }
 0x3c9   : > { %3642 = vmatmul.mubr.bf16.gmra.mrb[36].mxu0 %v17751_v48  ;;  %v17889_v48 = vld [vmem:[#allocation2 + $0x1c] sm:$0xf] }
 0x3ca   : > { %3651 = vmatprep.mubr.bf16.mxu0 %v21472_v3 }
 0x3d1   : > { %3652 = vmatmul.mubr.bf16.gmra.mrb[40].mxu0 %v17757_v21  ;;  %v3414_v21 = vsel %vm3250_vm5, %v3409_v5, %v3413_v13 }
 0x3d2   : > { %3661 = vmatprep.mubr.bf16.mxu0 %v21472_v3 }
 0x3d9   : > { %3662 = vmatmul.mubr.bf16.gmra.mrb[44].mxu0 %v17763_v28  ;;  %v12724_v28 = vcombine.low %v3842_v23, %v17889_v48  ;;  %v4057_v23 = vor.u32 %v4055_v59, %v4053_v56 }
 0x3da   : > { %3671 = vmatprep.mubr.bf16.mxu0 %v21472_v3 }
 0x3db   : > { %v4006_v26 = vshll.u32 %v12724_v28, 16  ;;  %v4004_v20 = vshrl.u32 %v12724_v28, 16  ;;  %v18008_v28 = vld [vmem:[#allocation2 + $0x58] sm:$0xff]  }
 0x3dd   : > { %v4008_v27 = vrot.slane %v4006_v26, 1 }
 0x3df   : > { %v4009_v45 = vor.u32 %v4008_v27, %v4004_v20 }
 0x3e1   : > { %3672 = vmatmul.mubr.bf16.gmra.mrb[48].mxu0 %v17769_v11  ;;  %v3415_v11 = vshrl.u32 %v16018_v52, 16  ;;  %v17995_v52 = vld [vmem:[#allocation2 + $0x50] sm:$0xff]  }
 0x3e2   : > { %3681 = vmatprep.mubr.bf16.mxu0 %v21472_v3  ;;  %v4059_v5 = vshll.u32 %v17995_v52, 16  ;;  %v4063_v26 = vshrl.u32 %v17995_v52, 16 }
 0x3e3   : > { %v3417_v60 = vor.u32 %v3415_v11, %v3413_v13  ;;  %v16067_v13 = vld [vmem:[%s21450_s3 + $0x404] ss:$8 sps:$4 sm:$0xff]  }
 0x3e9   : > { %3682 = vmatmul.mubr.bf16.gmra.mrb[52].mxu0 %v17775_v57  ;;  %v17894_v57 = vld [vmem:[#allocation2 + $0x20] sm:$0xff]  }
 0x3ea   : > { %3691 = vmatprep.mubr.bf16.mxu0 %v21472_v3  ;;  %v4015_v33 = vshrl.u32 %v17894_v57, 16 }
 0x3f1   : > { %3692 = vmatmul.mubr.bf16.gmra.mrb[56].mxu0 %v17783_v19  ;;  %v4011_v19 = vshll.u32 %v17894_v57, 16 }
 0x3f2   : > { %3701 = vmatprep.mubr.bf16.mxu0 %v21472_v3 }
 0x3f3   : > { %v4013_v18 = vrot.slane %v4011_v19, 1 }
 0x3f5   : > { %v4014_v51 = vsel %vm3250_vm5, %v4009_v45, %v4013_v18  ;;  %v4017_v24 = vor.u32 %v4015_v33, %v4013_v18  ;;  %v18018_v45 = vld [vmem:[#allocation2 + $0x60] sm:$0xff]  }
 0x3f9   : > { %3702 = vmatmul.mubr.bf16.gmra.mrb[60].mxu0 %v17793_v40  ;;  %v4021_v40 = vrot.slane %v4019_v31, 1 }
 0x3fa   : > { %3711 = vmatprep.mubr.bf16.mxu0 %v21472_v3 }
 0x3fb   : > { %v4022_v41 = vsel %vm3250_vm5, %v4017_v24, %v4021_v40  ;;  %v4025_v43 = vor.u32 %v4023_v61, %v4021_v40  ;;  %v18028_v40 = vld [vmem:[#allocation2 + $0x68] sm:$0xff]  }
 0x401   : > { %3712 = vmatmul.mubr.bf16.gmra.mrb[64].mxu0 %v17802_v34  ;;  %v4029_v34 = vrot.slane %v4027_v38, 1 }
 0x402   : > { %3721 = vmatprep.mubr.bf16.mxu0 %v21472_v3 }
 0x403   : > { %v4030_v62 = vsel %vm3250_vm5, %v4025_v43, %v4029_v34  ;;  %v4033_v17 = vor.u32 %v4031_v47, %v4029_v34  ;;  %v18038_v43 = vld [vmem:[#allocation2 + $0x70] sm:$0xff]  }
 0x405   : > { %v4038_v63 = vsel %vm3250_vm5, %v4033_v17, %v4037_v25  ;;  %v4095_v25 = vshrl.u32 %v18038_v43, 16 }
 0x409   : > { %3722 = vmatmul.mubr.bf16.gmra.mrb[68].mxu0 %v3398_v15  ;;  %v17960_v15 = vld [vmem:[#allocation2 + $0x40] sm:$0xff]  }
 0x40a   : > { %3731 = vmatprep.mubr.bf16.mxu0 %v21472_v3  ;;  %v4043_v14 = vshll.u32 %v17960_v15, 16  ;;  %v4047_v39 = vshrl.u32 %v17960_v15, 16 }
 0x411   : > { %3732 = vmatmul.mubr.bf16.gmra.mrb[72].mxu0 %v3406_v4  ;;  %v4045_v4 = vrot.slane %v4043_v14, 1 }
 0x412   : > { %3741 = vmatprep.mubr.bf16.mxu0 %v21472_v3 }
 0x413   : > { %v4046_v50 = vsel %vm3250_vm5, %v4041_v9, %v4045_v4  ;;  %v4049_v16 = vor.u32 %v4047_v39, %v4045_v4 }
 0x415   : > { %v4054_v44 = vsel %vm3250_vm5, %v4049_v16, %v4053_v56  ;;  %v18068_v16 = vld [vmem:[#allocation2 + $0x88] sm:$0xff]  }
 0x419   : > { %3742 = vmatmul.mubr.bf16.gmra.mrb[76].mxu0 %v3414_v21  ;;  %v4061_v21 = vrot.slane %v4059_v5, 1 }
 0x41a   : > { %3751 = vmatprep.mubr.bf16.mxu0 %v21472_v3 }
 0x41b   : > { %v4062_v11 = vsel %vm3250_vm5, %v4057_v23, %v4061_v21  ;;  %v4065_v20 = vor.u32 %v4063_v26, %v4061_v21 }
 0x421   : > { %3752 = vmatmul.mubr.bf16.gmra.mrb[80].mxu0 %v3417_v60  ;;  %v4067_v60 = vshll.u32 %v18008_v28, 16 }
 0x422   : > { %4303 = vmatprep.mubr.bf16.mxu0 %v21472_v3 }
 0x423   : > { %v4069_v27 = vrot.slane %v4067_v60, 1 }
 0x425   : > { %v4070_v18 = vsel %vm3250_vm5, %v4065_v20, %v4069_v27 }
 0x429   : > { %4304 = vmatmul.mubr.bf16.vlgmr.msra.gmra.mrb[0].mxu0 %v4014_v51  ;;  %v4071_v51 = vshrl.u32 %v18008_v28, 16 }
 0x42a   : > { %4759 = vmatpush1.bf16.msra.mxu0 %v16021_v7  ;;  %4313 = vmatprep.mubr.bf16.mxu0 %v21472_v3  ;;  %v4075_v7 = vshll.u32 %v18018_v45, 16 }
 0x42b   : > { %4760 = vmatprep.subr.bf16.mxu0 %v16028_v37  ;;  %v4073_v37 = vor.u32 %v4071_v51, %v4069_v27  ;;  %v4119_v27 = vshrl.u32 %v18068_v16, 16 }
 0x42c   : > { %v4077_v24 = vrot.slane %v4075_v7, 1 }
 0x42e   : > { %4761 = vmatpush1.bf16.msra.mxu0 %v16026_v12  ;;  %v4078_v12 = vsel %vm3250_vm5, %v4073_v37, %v4077_v24 }
 0x42f   : > { %4762 = vmatprep.subr.bf16.mxu0 %v16034_v8  ;;  %v4079_v8 = vshrl.u32 %v18018_v45, 16 }
 0x431   : > { %4314 = vmatmul.mubr.bf16.gmra.mrb[4].mxu0 %v4022_v41  ;;  %v4083_v41 = vshll.u32 %v18028_v40, 16 }
 0x432   : > { %4323 = vmatprep.mubr.bf16.mxu0 %v21472_v3  ;;  %4763 = vmatpush1.bf16.msra.mxu0 %v16032_v22  ;;  %v4081_v22 = vor.u32 %v4079_v8, %v4077_v24 }
 0x433   : > { %4764 = vmatprep.subr.bf16.mxu0 %v16039_v30  ;;  %v4085_v30 = vrot.slane %v4083_v41, 1 }
 0x435   : > { %v4086_v34 = vsel %vm3250_vm5, %v4081_v22, %v4085_v30 }
 0x436   : > { %4765 = vmatpush1.bf16.msra.mxu0 %v16037_v6  ;;  %v4087_v6 = vshrl.u32 %v18028_v40, 16 }
 0x437   : > { %4766 = vmatprep.subr.bf16.mxu0 %v16045_v46  ;;  %v4091_v46 = vshll.u32 %v18038_v43, 16 }
 0x439   : > { %4324 = vmatmul.mubr.bf16.gmra.mrb[8].mxu0 %v4030_v62  ;;  %v4089_v62 = vor.u32 %v4087_v6, %v4085_v30 }
 0x43a   : > { %4333 = vmatprep.mubr.bf16.mxu0 %v21472_v3  ;;  %4767 = vmatpush1.bf16.msra.mxu0 %v16043_v35  ;;  %v4093_v35 = vrot.slane %v4091_v46, 1 }
 0x43b   : > { %4768 = vmatprep.subr.bf16.mxu0 %v16051_v42  ;;  %v18048_v42 = vld [vmem:[#allocation2 + $0x78] sm:$0xff]  }
 0x43c   : > { %v4094_v17 = vsel %vm3250_vm5, %v4089_v62, %v4093_v35  ;;  %v4103_v9 = vshrl.u32 %v18048_v42, 16 }
 0x43e   : > { %4769 = vmatpush1.bf16.msra.mxu0 %v16049_v2  ;;  %v4099_v2 = vshll.u32 %v18048_v42, 16 }
 0x43f   : > { %4770 = vmatprep.subr.bf16.mxu0 %v16056_v53  ;;  %v4097_v53 = vor.u32 %v4095_v25, %v4093_v35 }
 0x441   : > { %4334 = vmatmul.mubr.bf16.gmra.mrb[12].mxu0 %v4038_v63  ;;  %v4101_v63 = vrot.slane %v4099_v2, 1 }
 0x442   : > { %4343 = vmatprep.mubr.bf16.mxu0 %v21472_v3  ;;  %4771 = vmatpush1.bf16.msra.mxu0 %v16054_v49  ;;  %v18058_v49 = vld [vmem:[#allocation2 + $0x80] sm:$0xff]  }
 0x443   : > { %4772 = vmatprep.subr.bf16.mxu0 %v16062_v36  ;;  %v4102_v36 = vsel %vm3250_vm5, %v4097_v53, %v4101_v63  ;;  %v4107_v4 = vshll.u32 %v18058_v49, 16 }
 0x446   : > { %4773 = vmatpush1.bf16.msra.mxu0 %v16060_v32  ;;  %v4105_v32 = vor.u32 %v4103_v9, %v4101_v63 }
 0x447   : > { %5297 = vmatprep.subr.bf16.mxu0 %v16067_v13  ;;  %v4115_v13 = vshll.u32 %v18068_v16, 16 }
 0x449   : > { %4344 = vmatmul.mubr.bf16.gmra.mrb[16].mxu0 %v4046_v50  ;;  %v4109_v50 = vrot.slane %v4107_v4, 1  ;;  %v4117_v21 = vrot.slane %v4115_v13, 1 }
 0x44a   : > { %4353 = vmatprep.mubr.bf16.mxu0 %v21472_v3 }
 0x44b   : > { %v4110_v56 = vsel %vm3250_vm5, %v4105_v32, %v4109_v50  ;;  %v4121_v37 = vor.u32 %v4119_v27, %v4117_v21 }
 0x451   : > { %4354 = vmatmul.mubr.bf16.gmra.mrb[20].mxu0 %v4054_v44  ;;  %v4111_v44 = vshrl.u32 %v18058_v49, 16 }
 0x452   : > { %4363 = vmatprep.mubr.bf16.mxu0 %v21472_v3 }
 0x453   : > { %v4113_v23 = vor.u32 %v4111_v44, %v4109_v50 }
 0x455   : > { %v4118_v20 = vsel %vm3250_vm5, %v4113_v23, %v4117_v21 }
 0x459   : > { %4364 = vmatmul.mubr.bf16.gmra.mrb[24].mxu0 %v4062_v11  ;;  %v18078_v11 = vld [vmem:[#allocation2 + $0x90] sm:$0xff]  }
 0x45a   : > { %4373 = vmatprep.mubr.bf16.mxu0 %v21472_v3  ;;  %v4127_v30 = vshrl.u32 %v18078_v11, 16 }
 0x461   : > { %4374 = vmatmul.mubr.bf16.gmra.mrb[28].mxu0 %v4070_v18  ;;  %v21471_v18 = vshll.u32 %v18078_v11, 16 }
 0x462   : > { %4383 = vmatprep.mubr.bf16.mxu0 %v21472_v3 }
 0x463   : > { %v4125_v24 = vrot.slane %v21471_v18, 1  ;;  %v5911_v18 = vld [vmem:[%s16801_s28 + $0x20] sm:$0xff] }
 0x465   : > { %v4126_v22 = vsel %vm3250_vm5, %v4121_v37, %v4125_v24  ;;  %v4129_v62 = vor.u32 %v4127_v30, %v4125_v24 }
 0x469   : > { %4384 = vmatmul.mubr.bf16.gmra.mrb[32].mxu0 %v4078_v12  ;;  %v18088_v12 = vld [vmem:[#allocation2 + $0x98] sm:$0xff]  }
 0x46a   : > { %4393 = vmatprep.mubr.bf16.mxu0 %v21472_v3  ;;  %v21470_v63 = vshrl.u32 %v18088_v12, 16 }
 0x471   : > { %4394 = vmatmul.mubr.bf16.gmra.mrb[36].mxu0 %v4086_v34  ;;  %v21468_v34 = vshll.u32 %v18088_v12, 16 }
 0x472   : > { %4403 = vmatprep.mubr.bf16.mxu0 %v21472_v3 }
 0x473   : > { %v4133_v35 = vrot.slane %v21468_v34, 1 }
 0x475   : > { %v4134_v53 = vsel %vm3250_vm5, %v4129_v62, %v4133_v35  ;;  %v4137_v32 = vor.u32 %v21470_v63, %v4133_v35  ;;  %v16088_v63 = vld [vmem:[%s21450_s3 + $0x474] ss:$8 sps:$4 sm:$0xff]  }
 0x479   : > { %4404 = vmatmul.mubr.bf16.gmra.mrb[40].mxu0 %v4094_v17  ;;  %v18098_v17 = vld [vmem:[#allocation2 + $0xa0] sm:$0xff]  }
 0x47a   : > { %4413 = vmatprep.mubr.bf16.mxu0 %v21472_v3  ;;  %v21465_v21 = vshrl.u32 %v18098_v17, 16 }
 0x481   : > { %4414 = vmatmul.mubr.bf16.gmra.mrb[44].mxu0 %v4102_v36  ;;  %v21464_v36 = vshll.u32 %v18098_v17, 16 }
 0x482   : > { %4423 = vmatprep.mubr.bf16.mxu0 %v21472_v3 }
 0x483   : > { %v4141_v50 = vrot.slane %v21464_v36, 1 }
 0x485   : > { %v4142_v23 = vsel %vm3250_vm5, %v4137_v32, %v4141_v50  ;;  %v4145_v37 = vor.u32 %v21465_v21, %v4141_v50 }
 0x489   : > { %4424 = vmatmul.mubr.bf16.gmra.mrb[48].mxu0 %v4110_v56  ;;  %v18108_v56 = vld [vmem:[#allocation2 + $0xa8] sm:$0xff]  }
 0x48a   : > { %4433 = vmatprep.mubr.bf16.mxu0 %v21472_v3  ;;  %v21467_v35 = vshrl.u32 %v18108_v56, 16 }
 0x491   : > { %4434 = vmatmul.mubr.bf16.gmra.mrb[52].mxu0 %v4118_v20  ;;  %v21463_v20 = vshll.u32 %v18108_v56, 16 }
 0x492   : > { %4443 = vmatprep.mubr.bf16.mxu0 %v21472_v3 }
 0x493   : > { %v4149_v24 = vrot.slane %v21463_v20, 1 }
 0x495   : > { %v4150_v62 = vsel %vm3250_vm5, %v4145_v37, %v4149_v24  ;;  %v4153_v32 = vor.u32 %v21467_v35, %v4149_v24  ;;  %v4594_v35 = vld [vmem:[#allocation2 + $0x18] sm:$0xe] }
 0x496   : > { %v18140_v34 = vcombine.low %v4594_v35, %v17889_v48  ;;  %v4619_v48 = vrot.slane %v17900_v10, 1  ;;  %v16068_v35 = vld [vmem:[%s21450_s3 + $0x410] ss:$8 sps:$4 sm:$0xff]   ;;  %v5123_v10 = vrot.slane %v4039_v0, 1 }
 0x499   : > { %4444 = vmatmul.mubr.bf16.gmra.mrb[56].mxu0 %v4126_v22  ;;  %v18118_v22 = vld [vmem:[#allocation2 + $0xb0] sm:$0xff]  }
 0x49a   : > { %4453 = vmatprep.mubr.bf16.mxu0 %v21472_v3  ;;  %v21469_v36 = vshrl.u32 %v18118_v22, 16 }
 0x4a1   : > { %4454 = vmatmul.mubr.bf16.gmra.mrb[60].mxu0 %v4134_v53  ;;  %v21466_v53 = vshll.u32 %v18118_v22, 16 }
 0x4a2   : > { %4463 = vmatprep.mubr.bf16.mxu0 %v21472_v3 }
 0x4a3   : > { %v4157_v50 = vrot.slane %v21466_v53, 1 }
 0x4a5   : > { %v4158_v20 = vsel %vm3250_vm5, %v4153_v32, %v4157_v50 }
 0x4a9   : > { %4464 = vmatmul.mubr.bf16.gmra.mrb[64].mxu0 %v4142_v23  ;;  %v18128_v23 = vld [vmem:[#allocation2 + $0xb8] ss:$0 sps:$4 sm:$0x77]  }
 0x4aa   : > { %4473 = vmatprep.mubr.bf16.mxu0 %v21472_v3  ;;  %v4163_v37 = vshll.u32 %v18128_v23, 16  ;;  %v4167_v53 = vshrl.u32 %v18128_v23, 16 }
 0x4ac   : > { %v4165_v21 = vrot.slane %v4163_v37, 1 }
 0x4ae   : > { %v4169_v32 = vor.u32 %v4167_v53, %v4165_v21  ;;  %v16073_v53 = vld [vmem:[%s21450_s3 + $0x424] ss:$8 sps:$4 sm:$0xff]  }
 0x4b1   : > { %4474 = vmatmul.mubr.bf16.gmra.mrb[68].mxu0 %v4150_v62  ;;  %v4161_v62 = vor.u32 %v21469_v36, %v4157_v50  ;;  %v4617_v50 = vrot.slane %v17894_v57, 1 }
 0x4b2   : > { %4483 = vmatprep.mubr.bf16.mxu0 %v21472_v3 }
 0x4b3   : > { %v4166_v24 = vsel %vm3250_vm5, %v4161_v62, %v4165_v21  ;;  %v16065_v62 = vld [vmem:[%s21450_s3 + $0x400] ss:$8 sps:$4 sm:$0xff]   ;;  %v16070_v21 = vld [vmem:[%s21450_s3 + $0x414] ss:$8 sps:$4 sm:$0xff]  }
 0x4b9   : > { %4484 = vmatmul.mubr.bf16.gmra.mrb[72].mxu0 %v4158_v20  ;;  %v4616_v20 = vrot.slane %v18140_v34, 1 }
 0x4ba   : > { %4493 = vmatprep.mubr.bf16.mxu0 %v21472_v3 }
 0x4bb   : > { %v4618_v37 = vsel %vm4615_vm6, %v4616_v20, %v4617_v50  ;;  %v16076_v20 = vld [vmem:[%s21450_s3 + $0x434] ss:$8 sps:$4 sm:$0xff]  }
 0x4c1   : > { %4494 = vmatmul.mubr.bf16.gmra.mrb[76].mxu0 %v4166_v24  ;;  %v4620_v24 = vsel %vm4615_vm6, %v4617_v50, %v4619_v48  ;;  %v16074_v50 = vld [vmem:[%s21450_s3 + $0x430] ss:$8 sps:$4 sm:$0xff]  }
 0x4c2   : > { %4503 = vmatprep.mubr.bf16.mxu0 %v21472_v3 }
 0x4c9   : > { %4504 = vmatmul.mubr.bf16.gmra.mrb[80].mxu0 %v4169_v32  ;;  %v16071_v32 = vld [vmem:[%s21450_s3 + $0x420] ss:$8 sps:$4 sm:$0xff]  }
 0x4ca   : > { %4790 = vmatprep.mubr.bf16.mxu0 %v21472_v3 }
 0x4d1   : > { %4791 = vmatmul.mubr.bf16.vlgmr.msra.gmra.mrb[0].mxu0 %v4618_v37  ;;  %v4621_v37 = vrot.slane %v17916_v29, 1  ;;  %v5127_v29 = vrot.slane %v4047_v39, 1 }
 0x4d2   : > { %5298 = vmatpush1.bf16.msra.mxu0 %v16065_v62  ;;  %4800 = vmatprep.mubr.bf16.mxu0 %v21472_v3  ;;  %v6399_v62 = vld [vmem:[%s21449_s2] sm:$0xff] }
 0x4d3   : > { %5299 = vmatprep.subr.bf16.mxu0 %v16070_v21  ;;  %v16079_v21 = vld [vmem:[%s21450_s3 + $0x444] ss:$8 sps:$4 sm:$0xff]   ;;  %vm6440_vm7 = vcmp.gt.f32.partialorder %v6399_v62, 0.5  ;;  %v4623_v62 = vrot.slane %v17938_v58, 1  ;;  %v5131_v58 = vrot.slane %v4055_v59, 1 }
 0x4d5   : > { %v4624_v36 = vsel %vm4615_vm6, %v4621_v37, %v4623_v62 }
 0x4d6   : > { %5300 = vmatpush1.bf16.msra.mxu0 %v16068_v35  ;;  %v6481_v35 = vsel %vm6440_vm7, 1, %v21472_v3 }
 0x4d7   : > { %5301 = vmatprep.subr.bf16.mxu0 %v16073_v53  ;;  %6523 = vperm.xlu0 %15784, %v6481_v35   ;;  %v4622_v53 = vsel %vm4615_vm6, %v4619_v48, %v4621_v37  ;;  %v16080_v48 = vld [vmem:[%s21450_s3 + $0x450] ss:$8 sps:$4 sm:$0xff]   ;;  %v16085_v35 = vld [vmem:[%s21450_s3 + $0x464] ss:$8 sps:$4 sm:$0xff]  }
 0x4d8   : > { %v16086_v37 = vld [vmem:[%s21450_s3 + $0x470] ss:$8 sps:$4 sm:$0xff]  }
 0x4d9   : > { %4801 = vmatmul.mubr.bf16.gmra.mrb[4].mxu0 %v4620_v24  ;;  %v16077_v24 = vld [vmem:[%s21450_s3 + $0x440] ss:$8 sps:$4 sm:$0xff]  }
 0x4da   : > { %4810 = vmatprep.mubr.bf16.mxu0 %v21472_v3  ;;  %5302 = vmatpush1.bf16.msra.mxu0 %v16071_v32  ;;  %v16082_v32 = vld [vmem:[%s21450_s3 + $0x454] ss:$8 sps:$4 sm:$0xff]  }
 0x4db   : > { %5303 = vmatprep.subr.bf16.mxu0 %v16076_v20  ;;  %v5907_v20 = vld [vmem:[%s16801_s28] sm:$0xff] }
 0x4dc   : > { %5989 = vrot.lane.b32.xlu0 %v5907_v20, %s16751_s15  ;;  %v5908_v20 = vld [vmem:[%s16801_s28 + $0x8] sm:$0xff] }
 0x4de   : > { %5304 = vmatpush1.bf16.msra.mxu0 %v16074_v50  ;;  %v6400_v50 = vld [vmem:[%s21449_s2 + $0x8] sm:$0xff] }
 0x4df   : > { %5305 = vmatprep.subr.bf16.mxu0 %v16079_v21  ;;  %v6401_v21 = vld [vmem:[%s21449_s2 + $0x10] sm:$0xff]  ;;  %vm6441_vm8 = vcmp.gt.f32.partialorder %v6400_v50, 0.5 }
 0x4e0   : > { %vm6442_vm9 = vcmp.gt.f32.partialorder %v6401_v21, 0.5  ;;  %v5909_v50 = vld [vmem:[%s16801_s28 + $0x10] sm:$0xff]  ;;  %v4625_v21 = vrot.slane %v17960_v15, 1  ;;  %v5135_v15 = vrot.slane %v4063_v26, 1 }
 0x4e1   : > { %4811 = vmatmul.mubr.bf16.gmra.mrb[8].mxu0 %v4622_v53  ;;  %v6482_v53 = vsel %vm6441_vm8, 1, %v21472_v3 }
 0x4e2   : > { %4820 = vmatprep.mubr.bf16.mxu0 %v21472_v3  ;;  %5306 = vmatpush1.bf16.msra.mxu0 %v16077_v24  ;;  %v6483_v24 = vsel %vm6442_vm9, 1, %v21472_v3 }
 0x4e3   : > { %5307 = vmatprep.subr.bf16.mxu0 %v16082_v32  ;;  %6526 = vperm.xlu1 %15785, %v6482_v53   ;;  %v16083_v32 = vld [vmem:[%s21450_s3 + $0x460] ss:$8 sps:$4 sm:$0xff]  }
 0x4e4   : > { %6529 = vperm.xlu0 %15784, %v6483_v24   ;;  %v4626_v24 = vsel %vm4615_vm6, %v4623_v62, %v4625_v21  ;;  %v6405_v62 = vld [vmem:[%s21449_s2 + $0x30] sm:$0xff] }
 0x4e5   : > { %vm6446_vm13 = vcmp.gt.f32.partialorder %v6405_v62, 0.5  ;;  %v5914_v62 = vld [vmem:[%s16801_s28 + $0x38] sm:$0xff] }
 0x4e6   : > { %5308 = vmatpush1.bf16.msra.mxu0 %v16080_v48  ;;  %v6402_v48 = vld [vmem:[%s21449_s2 + $0x18] sm:$0xff] }
 0x4e7   : > { %5309 = vmatprep.subr.bf16.mxu0 %v16085_v35  ;;  %5991 = vrot.lane.b32.xlu1 %v5908_v20, %s16751_s15  ;;  %vm6443_vm10 = vcmp.gt.f32.partialorder %v6402_v48, 0.5  ;;  %v6404_v20 = vld [vmem:[%s21449_s2 + $0x28] sm:$0xff] }
 0x4e8   : > { %5993 = vrot.lane.b32.xlu0 %v5909_v50, %s16751_s15  ;;  %v6484_v35 = vsel %vm6443_vm10, 1, %v21472_v3  ;;  %vm6445_vm12 = vcmp.gt.f32.partialorder %v6404_v20, 0.5 }
 0x4e9   : > { %4821 = vmatmul.mubr.bf16.gmra.mrb[12].mxu0 %v4624_v36  ;;  %v6403_v36 = vld [vmem:[%s21449_s2 + $0x20] sm:$0xff]  ;;  %v6486_v50 = vsel %vm6445_vm12, 1, %v21472_v3 }
 0x4ea   : > { %4830 = vmatprep.mubr.bf16.mxu0 %v21472_v3  ;;  %5310 = vmatpush1.bf16.msra.mxu0 %v16083_v32  ;;  %vm6444_vm11 = vcmp.gt.f32.partialorder %v6403_v36, 0.5  ;;  %v5910_v32 = vld [vmem:[%s16801_s28 + $0x18] sm:$0xff]  ;;  %v5912_v36 = vld [vmem:[%s16801_s28 + $0x28] sm:$0xff] }
 0x4eb   : > { %5311 = vmatprep.subr.bf16.mxu0 %v16088_v63  ;;  %v6485_v53 = vsel %vm6444_vm11, 1, %v21472_v3  ;;  %6532 = vperm.xlu1 %15785, %v6484_v35   ;;  %v4627_v63 = vrot.slane %v17982_v1, 1  ;;  %v5913_v35 = vld [vmem:[%s16801_s28 + $0x30] sm:$0xff]  ;;  %v5139_v1 = vrot.slane %v4071_v51, 1 }
 0x4ec   : > { %6535 = vperm.xlu0 %15784, %v6485_v53   ;;  %v4629_v53 = vrot.slane %v17995_v52, 1  ;;  %v5143_v52 = vrot.slane %v4079_v8, 1 }
 0x4ed   : > { %v4628_v48 = vsel %vm4615_vm6, %v4625_v21, %v4627_v63 }
 0x4ee   : > { %5312 = vmatpush1.bf16.msra.mxu0 %v16086_v37  ;;  %v6487_v37 = vsel %vm6446_vm13, 1, %v21472_v3  ;;  %v4630_v20 = vsel %vm4615_vm6, %v4627_v63, %v4629_v53 }
 0x4ef   : > { %5995 = vrot.lane.b32.xlu1 %v5910_v32, %s16751_s15 }
 0x4f0   : > { %5997 = vrot.lane.b32.xlu0 %v5911_v18, %s16751_s15  ;;  %v6406_v18 = vld [vmem:[%s21449_s2 + $0x38] sm:$0xff] }
 0x4f1   : > { %4831 = vmatmul.mubr.bf16.gmra.mrb[16].mxu0 %v4626_v24  ;;  %v6407_v24 = vld [vmem:[%s21449_s2 + $0x40] sm:$0xff]  ;;  %vm6447_vm14 = vcmp.gt.f32.partialorder %v6406_v18, 0.5 }
 0x4f2   : > { %4840 = vmatprep.mubr.bf16.mxu0 %v21472_v3  ;;  %vm6448_vm15 = vcmp.gt.f32.partialorder %v6407_v24, 0.5  ;;  %v6488_v21 = vsel %vm6447_vm14, 1, %v21472_v3  ;;  %v5916_v24 = vld [vmem:[%s16801_s28 + $0x48] sm:$0xff] }
 0x4f3   : > { %6538 = vperm.xlu1 %15785, %v6486_v50   ;;  %v6489_v32 = vsel %vm6448_vm15, 1, %v21472_v3  ;;  %v5915_v50 = vld [vmem:[%s16801_s28 + $0x40] sm:$0xff] }
 0x4f4   : > { %6541 = vperm.xlu0 %15784, %v6487_v37   ;;  %v4631_v37 = vrot.slane %v18008_v28, 1  ;;  %v5147_v28 = vrot.slane %v4087_v6, 1 }
 0x4f6   : > { %v4632_v18 = vsel %vm4615_vm6, %v4629_v53, %v4631_v37 }
 0x4f7   : > { %5999 = vrot.lane.b32.xlu1 %v5912_v36, %s16751_s15  ;;  %v6409_v36 = vld [vmem:[%s21449_s2 + $0x50] sm:$0xff] }
 0x4f8   : > { %6001 = vrot.lane.b32.xlu0 %v5913_v35, %s16751_s15  ;;  %vm6450_vm1 = vcmp.gt.f32.partialorder %v6409_v36, 0.5  ;;  %v5918_v36 = vld [vmem:[%s16801_s28 + $0x58] sm:$0xff] }
 0x4f9   : > { %4841 = vmatmul.mubr.bf16.gmra.mrb[20].mxu0 %v4628_v48  ;;  %v6408_v48 = vld [vmem:[%s21449_s2 + $0x48] sm:$0xff]  ;;  %v6491_v35 = vsel %vm6450_vm1, 1, %v21472_v3 }
 0x4fa   : > { %4850 = vmatprep.mubr.bf16.mxu0 %v21472_v3  ;;  %vm6449_vm0 = vcmp.gt.f32.partialorder %v6408_v48, 0.5 }
 0x4fb   : > { %6544 = vperm.xlu1 %15785, %v6488_v21   ;;  %v6490_v63 = vsel %vm6449_vm0, 1, %v21472_v3  ;;  %v5917_v21 = vld [vmem:[%s16801_s28 + $0x50] sm:$0xff] }
 0x4fc   : > { %6547 = vperm.xlu0 %15784, %v6489_v32   ;;  %v4633_v32 = vrot.slane %v18018_v45, 1  ;;  %v5151_v45 = vrot.slane %v4095_v25, 1 }
 0x4fe   : > { %v4634_v48 = vsel %vm4615_vm6, %v4631_v37, %v4633_v32 }
 0x4ff   : > { %6003 = vrot.lane.b32.xlu1 %v5914_v62, %s16751_s15  ;;  %v6411_v62 = vld [vmem:[%s21449_s2 + $0x60] sm:$0xff] }
 0x500   : > { %6005 = vrot.lane.b32.xlu0 %v5915_v50, %s16751_s15  ;;  %vm6452_vm8 = vcmp.gt.f32.partialorder %v6411_v62, 0.5  ;;  %v5920_v62 = vld [vmem:[%s16801_s28 + $0x68] sm:$0xff] }
 0x501   : > { %4851 = vmatmul.mubr.bf16.gmra.mrb[24].mxu0 %v4630_v20  ;;  %v6410_v20 = vld [vmem:[%s21449_s2 + $0x58] sm:$0xff]  ;;  %v6493_v50 = vsel %vm6452_vm8, 1, %v21472_v3 }
 0x502   : > { %4860 = vmatprep.mubr.bf16.mxu0 %v21472_v3  ;;  %vm6451_vm7 = vcmp.gt.f32.partialorder %v6410_v20, 0.5 }
 0x503   : > { %6550 = vperm.xlu1 %15785, %v6490_v63   ;;  %v6492_v53 = vsel %vm6451_vm7, 1, %v21472_v3  ;;  %v5919_v63 = vld [vmem:[%s16801_s28 + $0x60] sm:$0xff] }
 0x504   : > { %6553 = vperm.xlu0 %15784, %v6491_v35   ;;  %v4635_v35 = vrot.slane %v18028_v40, 1  ;;  %v5155_v40 = vrot.slane %v4103_v9, 1 }
 0x506   : > { %v4636_v20 = vsel %vm4615_vm6, %v4633_v32, %v4635_v35 }
 0x507   : > { %6007 = vrot.lane.b32.xlu1 %v5916_v24, %s16751_s15  ;;  %v6413_v24 = vld [vmem:[%s21449_s2 + $0x70] sm:$0xff] }
 0x508   : > { %6009 = vrot.lane.b32.xlu0 %v5917_v21, %s16751_s15  ;;  %vm6454_vm10 = vcmp.gt.f32.partialorder %v6413_v24, 0.5  ;;  %v5922_v24 = vld [vmem:[%s16801_s28 + $0x78] sm:$0xff] }
 0x509   : > { %4861 = vmatmul.mubr.bf16.gmra.mrb[28].mxu0 %v4632_v18  ;;  %v6412_v18 = vld [vmem:[%s21449_s2 + $0x68] sm:$0xff]  ;;  %v6495_v21 = vsel %vm6454_vm10, 1, %v21472_v3 }
 0x50a   : > { %4870 = vmatprep.mubr.bf16.mxu0 %v21472_v3  ;;  %vm6453_vm9 = vcmp.gt.f32.partialorder %v6412_v18, 0.5 }
 0x50b   : > { %6556 = vperm.xlu1 %15785, %v6492_v53   ;;  %v6494_v37 = vsel %vm6453_vm9, 1, %v21472_v3  ;;  %v5921_v53 = vld [vmem:[%s16801_s28 + $0x70] sm:$0xff] }
 0x50c   : > { %6559 = vperm.xlu0 %15784, %v6493_v50   ;;  %v4637_v50 = vrot.slane %v18038_v43, 1  ;;  %v5159_v43 = vrot.slane %v4111_v44, 1 }
 0x50e   : > { %v4638_v18 = vsel %vm4615_vm6, %v4635_v35, %v4637_v50 }
 0x50f   : > { %6011 = vrot.lane.b32.xlu1 %v5918_v36, %s16751_s15  ;;  %v6415_v36 = vld [vmem:[%s21449_s2 + $0x80] sm:$0xff] }
 0x510   : > { %6013 = vrot.lane.b32.xlu0 %v5919_v63, %s16751_s15  ;;  %vm6456_vm12 = vcmp.gt.f32.partialorder %v6415_v36, 0.5  ;;  %v5925_v36 = vld [vmem:[%s16801_s28 + $0x90] sm:$0xff] }
 0x511   : > { %4871 = vmatmul.mubr.bf16.gmra.mrb[32].mxu0 %v4634_v48  ;;  %v6414_v48 = vld [vmem:[%s21449_s2 + $0x78] sm:$0xff]  ;;  %v6497_v63 = vsel %vm6456_vm12, 1, %v21472_v3 }
 0x512   : > { %4880 = vmatprep.mubr.bf16.mxu0 %v21472_v3  ;;  %vm6455_vm11 = vcmp.gt.f32.partialorder %v6414_v48, 0.5 }
 0x513   : > { %6562 = vperm.xlu1 %15785, %v6494_v37   ;;  %v6496_v32 = vsel %vm6455_vm11, 1, %v21472_v3  ;;  %v5923_v37 = vld [vmem:[%s16801_s28 + $0x80] sm:$0xff] }
 0x514   : > { %6565 = vperm.xlu0 %15784, %v6495_v21   ;;  %v4639_v21 = vrot.slane %v18048_v42, 1  ;;  %v5163_v42 = vrot.slane %v4119_v27, 1 }
 0x516   : > { %v4640_v48 = vsel %vm4615_vm6, %v4637_v50, %v4639_v21 }
 0x517   : > { %6015 = vrot.lane.b32.xlu1 %v5920_v62, %s16751_s15  ;;  %v6416_v62 = vld [vmem:[%s21449_s2 + $0x88] sm:$0xff] }
 0x518   : > { %6017 = vrot.lane.b32.xlu0 %v5921_v53, %s16751_s15  ;;  %vm6457_vm14 = vcmp.gt.f32.partialorder %v6416_v62, 0.5  ;;  %v5927_v62 = vld [vmem:[%s16801_s28 + $0xa0] sm:$0xff] }
 0x519   : > { %4881 = vmatmul.mubr.bf16.gmra.mrb[36].mxu0 %v4636_v20  ;;  %v6417_v20 = vld [vmem:[%s21449_s2 + $0x90] sm:$0xff]  ;;  %v6498_v53 = vsel %vm6457_vm14, 1, %v21472_v3 }
 0x51a   : > { %4890 = vmatprep.mubr.bf16.mxu0 %v21472_v3  ;;  %vm6458_vm13 = vcmp.gt.f32.partialorder %v6417_v20, 0.5 }
 0x51b   : > { %6568 = vperm.xlu1 %15785, %v6496_v32   ;;  %v6499_v35 = vsel %vm6458_vm13, 1, %v21472_v3  ;;  %v5924_v32 = vld [vmem:[%s16801_s28 + $0x88] sm:$0xff] }
 0x51c   : > { %6571 = vperm.xlu0 %15784, %v6497_v63   ;;  %v4641_v63 = vrot.slane %v18058_v49, 1  ;;  %v5167_v49 = vrot.slane %v4127_v30, 1 }
 0x51e   : > { %v4642_v20 = vsel %vm4615_vm6, %v4639_v21, %v4641_v63 }
 0x51f   : > { %6019 = vrot.lane.b32.xlu1 %v5922_v24, %s16751_s15  ;;  %v6418_v24 = vld [vmem:[%s21449_s2 + $0x98] sm:$0xff] }
 0x520   : > { %6021 = vrot.lane.b32.xlu0 %v5923_v37, %s16751_s15  ;;  %vm6459_vm0 = vcmp.gt.f32.partialorder %v6418_v24, 0.5  ;;  %v5929_v24 = vld [vmem:[%s16801_s28 + $0xb0] sm:$0xff] }
 0x521   : > { %4891 = vmatmul.mubr.bf16.gmra.mrb[40].mxu0 %v4638_v18  ;;  %v6419_v18 = vld [vmem:[%s21449_s2 + $0xa0] sm:$0xff]  ;;  %v6500_v37 = vsel %vm6459_vm0, 1, %v21472_v3 }
 0x522   : > { %4900 = vmatprep.mubr.bf16.mxu0 %v21472_v3  ;;  %vm6460_vm15 = vcmp.gt.f32.partialorder %v6419_v18, 0.5 }
 0x523   : > { %6577 = vperm.xlu1 %15785, %v6499_v35   ;;  %v6501_v50 = vsel %vm6460_vm15, 1, %v21472_v3  ;;  %v5926_v35 = vld [vmem:[%s16801_s28 + $0x98] sm:$0xff] }
 0x524   : > { %6574 = vperm.xlu0 %15784, %v6498_v53   ;;  %v4643_v53 = vrot.slane %v18068_v16, 1  ;;  %v21620_v16 = vshrl.u32 %v18088_v12, 16 }
 0x526   : > { %v4644_v18 = vsel %vm4615_vm6, %v4641_v63, %v4643_v53 }
 0x527   : > { %6025 = vrot.lane.b32.xlu1 %v5925_v36, %s16751_s15  ;;  %v6420_v36 = vld [vmem:[%s21449_s2 + $0xa8] sm:$0xff] }
 0x528   : > { %6023 = vrot.lane.b32.xlu0 %v5924_v32, %s16751_s15  ;;  %vm6461_vm7 = vcmp.gt.f32.partialorder %v6420_v36, 0.5  ;;  %v5931_v36 = vld [vmem:[%s16801_s28 + $0xc0] sm:$0xff] }
 0x529   : > { %4901 = vmatmul.mubr.bf16.gmra.mrb[44].mxu0 %v4640_v48  ;;  %v6421_v48 = vld [vmem:[%s21449_s2 + $0xb0] sm:$0xff]  ;;  %v6502_v32 = vsel %vm6461_vm7, 1, %v21472_v3  ;;  %vm5102_vm7 = vsmask.f32 6400 }
 0x52a   : > { %4910 = vmatprep.mubr.bf16.mxu0 %v21472_v3  ;;  %vm6462_vm1 = vcmp.gt.f32.partialorder %v6421_v48, 0.5 }
 0x52b   : > { %6583 = vperm.xlu1 %15785, %v6501_v50   ;;  %v6503_v21 = vsel %vm6462_vm1, 1, %v21472_v3  ;;  %v5928_v50 = vld [vmem:[%s16801_s28 + $0xa8] sm:$0xff] }
 0x52c   : > { %6580 = vperm.xlu0 %15784, %v6500_v37   ;;  %v4645_v37 = vrot.slane %v18078_v11, 1 }
 0x52e   : > { %v4646_v48 = vsel %vm4615_vm6, %v4643_v53, %v4645_v37 }
 0x52f   : > { %6029 = vrot.lane.b32.xlu1 %v5927_v62, %s16751_s15  ;;  %v6422_v62 = vld [vmem:[%s21449_s2 + $0xb8] sm:$0xff] }
 0x530   : > { %6027 = vrot.lane.b32.xlu0 %v5926_v35, %s16751_s15  ;;  %vm6463_vm9 = vcmp.gt.f32.partialorder %v6422_v62, 0.5  ;;  %v5933_v62 = vld [vmem:[%s16801_s28 + $0xd0] sm:$0xff] }
 0x531   : > { %4911 = vmatmul.mubr.bf16.gmra.mrb[48].mxu0 %v4642_v20  ;;  %v6423_v20 = vld [vmem:[%s21449_s2 + $0xc0] sm:$0xff]  ;;  %v6504_v35 = vsel %vm6463_vm9, 1, %v21472_v3 }
 0x532   : > { %4920 = vmatprep.mubr.bf16.mxu0 %v21472_v3  ;;  %vm6464_vm8 = vcmp.gt.f32.partialorder %v6423_v20, 0.5 }
 0x533   : > { %6589 = vperm.xlu1 %15785, %v6503_v21   ;;  %v6505_v63 = vsel %vm6464_vm8, 1, %v21472_v3  ;;  %v5930_v21 = vld [vmem:[%s16801_s28 + $0xb8] sm:$0xff] }
 0x534   : > { %6586 = vperm.xlu0 %15784, %v6502_v32   ;;  %v4647_v32 = vrot.slane %v18088_v12, 1 }
 0x536   : > { %v4648_v20 = vsel %vm4615_vm6, %v4645_v37, %v4647_v32 }
 0x537   : > { %6033 = vrot.lane.b32.xlu1 %v5929_v24, %s16751_s15  ;;  %v6424_v24 = vld [vmem:[%s21449_s2 + $0xc8] sm:$0xff] }
 0x538   : > { %6031 = vrot.lane.b32.xlu0 %v5928_v50, %s16751_s15  ;;  %vm6465_vm11 = vcmp.gt.f32.partialorder %v6424_v24, 0.5  ;;  %v5935_v24 = vld [vmem:[%s16801_s28 + $0xe0] sm:$0xff] }
 0x539   : > { %4921 = vmatmul.mubr.bf16.gmra.mrb[52].mxu0 %v4644_v18  ;;  %v6425_v18 = vld [vmem:[%s21449_s2 + $0xd0] sm:$0xff]  ;;  %v6506_v50 = vsel %vm6465_vm11, 1, %v21472_v3 }
 0x53a   : > { %4930 = vmatprep.mubr.bf16.mxu0 %v21472_v3  ;;  %vm6466_vm10 = vcmp.gt.f32.partialorder %v6425_v18, 0.5 }
 0x53b   : > { %6595 = vperm.xlu1 %15785, %v6505_v63   ;;  %v6507_v53 = vsel %vm6466_vm10, 1, %v21472_v3  ;;  %v5932_v63 = vld [vmem:[%s16801_s28 + $0xc8] sm:$0xff]  ;;  %vm16753_vm10 = vmmov 0  }
 0x53c   : > { %6592 = vperm.xlu0 %15784, %v6504_v35   ;;  %v4649_v35 = vrot.slane %v18098_v17, 1 }
 0x53e   : > { %v4650_v18 = vsel %vm4615_vm6, %v4647_v32, %v4649_v35 }
 0x53f   : > { %6037 = vrot.lane.b32.xlu1 %v5931_v36, %s16751_s15  ;;  %v6426_v36 = vld [vmem:[%s21449_s2 + $0xd8] sm:$0xff] }
 0x540   : > { %6035 = vrot.lane.b32.xlu0 %v5930_v21, %s16751_s15  ;;  %vm6467_vm13 = vcmp.gt.f32.partialorder %v6426_v36, 0.5  ;;  %v5937_v36 = vld [vmem:[%s16801_s28 + $0xf0] sm:$0xff] }
 0x541   : > { %4931 = vmatmul.mubr.bf16.gmra.mrb[56].mxu0 %v4646_v48  ;;  %v6427_v48 = vld [vmem:[%s21449_s2 + $0xe0] sm:$0xff]  ;;  %v6508_v21 = vsel %vm6467_vm13, 1, %v21472_v3 }
 0x542   : > { %4940 = vmatprep.mubr.bf16.mxu0 %v21472_v3  ;;  %vm6468_vm12 = vcmp.gt.f32.partialorder %v6427_v48, 0.5 }
 0x543   : > { %6601 = vperm.xlu1 %15785, %v6507_v53   ;;  %v6509_v37 = vsel %vm6468_vm12, 1, %v21472_v3  ;;  %v5934_v53 = vld [vmem:[%s16801_s28 + $0xd8] sm:$0xff] }
 0x544   : > { %6598 = vperm.xlu0 %15784, %v6506_v50   ;;  %v4651_v50 = vrot.slane %v18108_v56, 1 }
 0x546   : > { %v4652_v48 = vsel %vm4615_vm6, %v4649_v35, %v4651_v50 }
 0x547   : > { %6041 = vrot.lane.b32.xlu1 %v5933_v62, %s16751_s15  ;;  %v6428_v62 = vld [vmem:[%s21449_s2 + $0xe8] sm:$0xff] }
 0x548   : > { %6039 = vrot.lane.b32.xlu0 %v5932_v63, %s16751_s15  ;;  %vm6469_vm15 = vcmp.gt.f32.partialorder %v6428_v62, 0.5  ;;  %v4655_v62 = vrot.slane %v18128_v23, 1 }
 0x549   : > { %4941 = vmatmul.mubr.bf16.gmra.mrb[60].mxu0 %v4648_v20  ;;  %v6429_v20 = vld [vmem:[%s21449_s2 + $0xf0] sm:$0xff]  ;;  %v6510_v63 = vsel %vm6469_vm15, 1, %v21472_v3 }
 0x54a   : > { %4950 = vmatprep.mubr.bf16.mxu0 %v21472_v3  ;;  %vm6470_vm14 = vcmp.gt.f32.partialorder %v6429_v20, 0.5 }
 0x54b   : > { %6607 = vperm.xlu1 %15785, %v6509_v37   ;;  %v6511_v32 = vsel %vm6470_vm14, 1, %v21472_v3  ;;  %v5936_v37 = vld [vmem:[%s16801_s28 + $0xe8] sm:$0xff] }
 0x54c   : > { %6604 = vperm.xlu0 %15784, %v6508_v21   ;;  %v4653_v21 = vrot.slane %v18118_v22, 1 }
 0x54e   : > { %v4654_v20 = vsel %vm4615_vm6, %v4651_v50, %v4653_v21 }
 0x54f   : > { %6045 = vrot.lane.b32.xlu1 %v5935_v24, %s16751_s15  ;;  %v6430_v24 = vld [vmem:[%s21449_s2 + $0xf8] sm:$0xff] }
 0x550   : > { %6043 = vrot.lane.b32.xlu0 %v5934_v53, %s16751_s15  ;;  %vm6471_vm1 = vcmp.gt.f32.partialorder %v6430_v24, 0.5 }
 0x551   : > { %4951 = vmatmul.mubr.bf16.gmra.mrb[64].mxu0 %v4650_v18  ;;  %v6431_v18 = vld [vmem:[%s21449_s2 + $0x100] sm:$0xff]  ;;  %v6512_v53 = vsel %vm6471_vm1, 1, %v21472_v3 }
 0x552   : > { %4960 = vmatprep.mubr.bf16.mxu0 %v21472_v3  ;;  %vm6472_vm0 = vcmp.gt.f32.partialorder %v6431_v18, 0.5  ;;  %v5112_v18 = vrot.slane %v4011_v19, 2  ;;  %v5119_v19 = vrot.slane %v4031_v47, 1 }
 0x553   : > { %6613 = vperm.xlu1 %15785, %v6511_v32   ;;  %v6513_v35 = vsel %vm6472_vm0, 1, %v21472_v3  ;;  %v4656_v32 = vsel %vm4615_vm6, %v4653_v21, %v4655_v62 }
 0x554   : > { %6610 = vperm.xlu0 %15784, %v6510_v63   ;;  %v5104_v63 = vshrl.u32 %v18140_v34, 16 }
 0x556   : > { %v5106_v50 = vrot.slane %v5104_v63, 1 }
 0x557   : > { %6049 = vrot.lane.b32.xlu1 %v5937_v36, %s16751_s15  ;;  %v5111_v36 = vrot.slane %v4015_v33, 1 }
 0x558   : > { %6047 = vrot.lane.b32.xlu0 %v5936_v37, %s16751_s15 }
 0x559   : > { %4961 = vmatmul.mubr.bf16.gmra.mrb[68].mxu0 %v4652_v48  ;;  %v5107_v48 = vshll.u32 %v18140_v34, 16  ;;  %v5113_v21 = vor.u32 %v5112_v18, %v5111_v36  ;;  %v5116_v34 = vrot.slane %v4019_v31, 2  ;;  %v5124_v31 = vrot.slane %v4035_v55, 2 }
 0x55a   : > { %4970 = vmatprep.mubr.bf16.mxu0 %v21472_v3  ;;  %v5132_v55 = vrot.slane %v4051_v54, 2  ;;  %v5140_v54 = vrot.slane %v4067_v60, 2  ;;  %v5148_v60 = vrot.slane %v4083_v41, 2  ;;  %v5156_v41 = vrot.slane %v4099_v2, 2 }
 0x55b   : > { %6619 = vperm.xlu1 %15785, %v6513_v35   ;;  %v5109_v37 = vrot.slane %v5107_v48, 2  ;;  %v5115_v35 = vrot.slane %v4023_v61, 1  ;;  %v5164_v2 = vrot.slane %v4115_v13, 2  ;;  %v5171_v13 = vrot.slane %v21620_v16, 1 }
 0x55c   : > { %6616 = vperm.xlu0 %15784, %v6512_v53   ;;  %v5120_v53 = vrot.slane %v4027_v38, 2  ;;  %v5128_v38 = vrot.slane %v4043_v14, 2  ;;  %v5133_v63 = vor.u32 %v5132_v55, %v5131_v58  ;;  %v5136_v14 = vrot.slane %v4059_v5, 2 }
 0x55d   : > { %v5110_v23 = vor.u32 %v5109_v37, %v5106_v50  ;;  %v5117_v33 = vor.u32 %v5116_v34, %v5115_v35  ;;  %v5141_v36 = vor.u32 %v5140_v54, %v5139_v1  ;;  %v5144_v5 = vrot.slane %v4075_v7, 2 }
 0x55e   : > { %v5137_v48 = vor.u32 %v5136_v14, %v5135_v15  ;;  %v5149_v37 = vor.u32 %v5148_v60, %v5147_v28  ;;  %v5152_v7 = vrot.slane %v4091_v46, 2  ;;  %v5160_v46 = vrot.slane %v4107_v4, 2 }
 0x55f   : > { %v5114_v24 = vsel %vm5102_vm7, %v5110_v23, %v5113_v21  ;;  %v5118_v57 = vsel %vm5102_vm7, %v5113_v21, %v5117_v33  ;;  %v5145_v50 = vor.u32 %v5144_v5, %v5143_v52  ;;  %v5157_v23 = vor.u32 %v5156_v41, %v5155_v40 }
 0x560   : > { %v5138_v59 = vsel %vm5102_vm7, %v5133_v63, %v5137_v48  ;;  %v5142_v26 = vsel %vm5102_vm7, %v5137_v48, %v5141_v36  ;;  %v5153_v18 = vor.u32 %v5152_v7, %v5151_v45  ;;  %v5161_v21 = vor.u32 %v5160_v46, %v5159_v43 }
 0x561   : > { %4971 = vmatmul.mubr.bf16.gmra.mrb[72].mxu0 %v4654_v20  ;;  %v5121_v20 = vor.u32 %v5120_v53, %v5119_v19  ;;  %v5146_v51 = vsel %vm5102_vm7, %v5141_v36, %v5145_v50  ;;  %v5150_v8 = vsel %vm5102_vm7, %v5145_v50, %v5149_v37  ;;  %v21619_v4 = vshll.u32 %v18078_v11, 16 }
 0x562   : > { %4980 = vmatprep.mubr.bf16.mxu0 %v21472_v3  ;;  %v5154_v6 = vsel %vm5102_vm7, %v5149_v37, %v5153_v18  ;;  %v5158_v25 = vsel %vm5102_vm7, %v5153_v18, %v5157_v23  ;;  %v5162_v9 = vsel %vm5102_vm7, %v5157_v23, %v5161_v21  ;;  %v21622_v11 = vshrl.u32 %v18098_v17, 16  ;;  %v18564_v36 = vpop.permute.xlu1 %6526 }
 0x563   : > { %v5122_v61 = vsel %vm5102_vm7, %v5117_v33, %v5121_v20  ;;  %v5168_v35 = vrot.slane %v21619_v4, 2  ;;  %v21621_v33 = vshll.u32 %v18088_v12, 16  ;;  %v21624_v12 = vshrl.u32 %v18108_v56, 16 }
 0x564   : > { %v5175_v53 = vrot.slane %v21622_v11, 1  ;;  %v21627_v58 = vshll.u32 %v18118_v22, 16  ;;  %vm6646_vm9 = vcmp.eq.s32.totalorder %v18564_v36, 1 }
 0x565   : > { %v5169_v34 = vor.u32 %v5168_v35, %v5167_v49 }
 0x566   : > { %v5184_v55 = vrot.slane %v21627_v58, 2  ;;  %v18568_v52 = vpop.permute.xlu1 %5991 }
 0x569   : > { %4981 = vmatmul.mubr.bf16.gmra.mrb[76].mxu0 %v4656_v32  ;;  %v5129_v32 = vor.u32 %v5128_v38, %v5127_v29 }
 0x56a   : > { %4990 = vmatprep.mubr.bf16.mxu0 %v21472_v3  ;;  %v18572_v50 = vpop.permute.xlu1 %6532 }
 0x56b   : > { %v5134_v39 = vsel %vm5102_vm7, %v5129_v32, %v5133_v63  ;;  %v16089_v63 = vld [vmem:[#allocation2 + $0xb8] ss:$0 sps:$4 sm:$0xff]   ;;  %vm6648_vm12 = vcmp.eq.s32.totalorder %v18572_v50, 1  ;;  %v5939_v50 = vld [vmem:[%s16801_s28 + $0x100] sm:$0xff] }
 0x56c   : > { %v5188_v15 = vshrl.u32 %v16089_v63, 16 }
 0x56e   : > { %v5190_v48 = vrot.slane %v5188_v15, 1  ;;  %v18576_v28 = vpop.permute.xlu1 %5995 }
 0x571   : > { %4991 = vmatmul.mubr.bf16.gmra.mrb[80].mxu0 %v4655_v62  ;;  %v5125_v62 = vor.u32 %v5124_v31, %v5123_v10 }
 0x572   : > { %5329 = vmatprep.mubr.bf16.mxu0 %v21472_v3  ;;  %v18580_v37 = vpop.permute.xlu1 %6538 }
 0x573   : > { %v5126_v47 = vsel %vm5102_vm7, %v5121_v20, %v5125_v62  ;;  %v5130_v0 = vsel %vm5102_vm7, %v5125_v62, %v5129_v32  ;;  %v21623_v20 = vshll.u32 %v18098_v17, 16  ;;  %v5179_v62 = vrot.slane %v21624_v12, 1 }
 0x574   : > { %v21626_v17 = vshrl.u32 %v18118_v22, 16  ;;  %v18562_v22 = vpop.permute.xlu0 %6523  ;;  %vm6650_vm14 = vcmp.eq.s32.totalorder %v18580_v37, 1 }
 0x575   : > { %vm6645_vm8 = vcmp.eq.s32.totalorder %v18562_v22, 1 }
 0x576   : > { %v18584_v45 = vpop.permute.xlu1 %5999 }
 0x579   : > { %5330 = vmatmul.mubr.bf16.vlgmr.msra.gmra.mrb[0].mxu0 %v5114_v24  ;;  %v5165_v24 = vor.u32 %v5164_v2, %v5163_v42 }
 0x57a   : > { %5339 = vmatprep.mubr.bf16.mxu0 %v21472_v3  ;;  %v18588_v18 = vpop.permute.xlu1 %6544 }
 0x57b   : > { %v5166_v44 = vsel %vm5102_vm7, %v5161_v21, %v5165_v24  ;;  %v5170_v27 = vsel %vm5102_vm7, %v5165_v24, %v5169_v34  ;;  %vm6652_vm1 = vcmp.eq.s32.totalorder %v18588_v18, 1 }
 0x57e   : > { %v18592_v41 = vpop.permute.xlu1 %6003 }
 0x581   : > { %5340 = vmatmul.mubr.bf16.gmra.mrb[4].mxu0 %v5118_v57  ;;  %v5172_v57 = vrot.slane %v21621_v33, 2 }
 0x582   : > { %5349 = vmatprep.mubr.bf16.mxu0 %v21472_v3  ;;  %v18600_v42 = vpop.permute.xlu1 %6550 }
 0x583   : > { %v5173_v19 = vor.u32 %v5172_v57, %v5171_v13 }
 0x585   : > { %v5174_v30 = vsel %vm5102_vm7, %v5169_v34, %v5173_v19 }
 0x586   : > { %v18608_v16 = vpop.permute.xlu1 %6007 }
 0x589   : > { %5350 = vmatmul.mubr.bf16.gmra.mrb[8].mxu0 %v5122_v61  ;;  %v5176_v61 = vrot.slane %v21623_v20, 2 }
 0x58a   : > { %5359 = vmatprep.mubr.bf16.mxu0 %v21472_v3 }
 0x58b   : > { %v5177_v10 = vor.u32 %v5176_v61, %v5175_v53  ;;  %v18616_v61 = vpop.permute.xlu1 %6556 }
 0x58d   : > { %v5178_v31 = vsel %vm5102_vm7, %v5173_v19, %v5177_v10 }
 0x591   : > { %5360 = vmatmul.mubr.bf16.gmra.mrb[12].mxu0 %v5126_v47  ;;  %v21625_v47 = vshll.u32 %v18108_v56, 16  ;;  %v5191_v56 = vshll.u32 %v16089_v63, 16 }
 0x592   : > { %5369 = vmatprep.mubr.bf16.mxu0 %v21472_v3 }
 0x593   : > { %v5180_v29 = vrot.slane %v21625_v47, 2 }
 0x595   : > { %v5181_v38 = vor.u32 %v5180_v29, %v5179_v62 }
 0x597   : > { %v5182_v32 = vsel %vm5102_vm7, %v5177_v10, %v5181_v38 }
 0x599   : > { %5370 = vmatmul.mubr.bf16.gmra.mrb[16].mxu0 %v5130_v0  ;;  %v5183_v0 = vrot.slane %v21626_v17, 1 }
 0x59a   : > { %5379 = vmatprep.mubr.bf16.mxu0 %v21472_v3 }
 0x5a1   : > { %5380 = vmatmul.mubr.bf16.gmra.mrb[20].mxu0 %v5134_v39  ;;  %v5185_v39 = vor.u32 %v5184_v55, %v5183_v0  ;;  %v18623_v0 = vpop.permute.xlu1 %6011 }
 0x5a2   : > { %5389 = vmatprep.mubr.bf16.mxu0 %v21472_v3 }
 0x5a3   : > { %v5186_v14 = vsel %vm5102_vm7, %v5181_v38, %v5185_v39 }
 0x5a9   : > { %5390 = vmatmul.mubr.bf16.gmra.mrb[24].mxu0 %v5138_v59  ;;  %v5193_v59 = vrot.slane %v5191_v56, 2 }
 0x5aa   : > { %5399 = vmatprep.mubr.bf16.mxu0 %v21472_v3 }
 0x5ab   : > { %v5194_v1 = vor.u32 %v5193_v59, %v5190_v48 }
 0x5ad   : > { %v5195_v54 = vsel %vm5102_vm7, %v5185_v39, %v5194_v1 }
 0x5b1   : > { %5400 = vmatmul.mubr.bf16.gmra.mrb[28].mxu0 %v5142_v26  ;;  %v18566_v26 = vpop.permute.xlu0 %5989 }
 0x5b2   : > { %5409 = vmatprep.mubr.bf16.mxu0 %v21472_v3 }
 0x5b5   : > { %v18570_v5 = vpop.permute.xlu0 %6529 }
 0x5b6   : > { %vm6647_vm11 = vcmp.eq.s32.totalorder %v18570_v5, 1 }
 0x5b9   : > { %5410 = vmatmul.mubr.bf16.gmra.mrb[32].mxu0 %v5146_v51  ;;  %v18574_v51 = vpop.permute.xlu0 %5993 }
 0x5ba   : > { %5419 = vmatprep.mubr.bf16.mxu0 %v21472_v3 }
 0x5bd   : > { %v18578_v60 = vpop.permute.xlu0 %6535 }
 0x5be   : > { %vm6649_vm13 = vcmp.eq.s32.totalorder %v18578_v60, 1 }
 0x5c1   : > { %5420 = vmatmul.mubr.bf16.gmra.mrb[36].mxu0 %v5150_v8  ;;  %v18582_v8 = vpop.permute.xlu0 %5997 }
 0x5c2   : > { %5429 = vmatprep.mubr.bf16.mxu0 %v21472_v3 }
 0x5c5   : > { %v18586_v7 = vpop.permute.xlu0 %6541 }
 0x5c6   : > { %vm6651_vm0 = vcmp.eq.s32.totalorder %v18586_v7, 1 }
 0x5c9   : > { %5430 = vmatmul.mubr.bf16.gmra.mrb[40].mxu0 %v5154_v6  ;;  %v18590_v6 = vpop.permute.xlu0 %6001 }
 0x5ca   : > { %5439 = vmatprep.mubr.bf16.mxu0 %v21472_v3 }
 0x5cd   : > { %v18596_v43 = vpop.permute.xlu0 %6547 }
 0x5d1   : > { %5440 = vmatmul.mubr.bf16.gmra.mrb[44].mxu0 %v5158_v25  ;;  %v18602_v2 = vpop.permute.xlu0 %6005 }
 0x5d2   : > { %5449 = vmatprep.mubr.bf16.mxu0 %v21472_v3 }
 0x5d5   : > { %v18610_v13 = vpop.permute.xlu0 %6553 }
 0x5d9   : > { %5450 = vmatmul.mubr.bf16.gmra.mrb[48].mxu0 %v5162_v9  ;;  %v18620_v12 = vpop.permute.xlu0 %6009 }
 0x5da   : > { %5459 = vmatprep.mubr.bf16.mxu0 %v21472_v3 }
 0x5dd   : > { %v18630_v39 = vpop.permute.xlu0 %6559 }
 0x5e1   : > { %5460 = vmatmul.mubr.bf16.gmra.mrb[52].mxu0 %v5166_v44 }
 0x5e2   : > { %5469 = vmatprep.mubr.bf16.mxu0 %v21472_v3 }
 0x5e9   : > { %5470 = vmatmul.mubr.bf16.gmra.mrb[56].mxu0 %v5170_v27 }
 0x5ea   : > { %5479 = vmatprep.mubr.bf16.mxu0 %v21472_v3 }
 0x5f1   : > { %5480 = vmatmul.mubr.bf16.gmra.mrb[60].mxu0 %v5174_v30 }
 0x5f2   : > { %5489 = vmatprep.mubr.bf16.mxu0 %v21472_v3 }
 0x5f9   : > { %5490 = vmatmul.mubr.bf16.gmra.mrb[64].mxu0 %v5178_v31 }
 0x5fa   : > { %5499 = vmatprep.mubr.bf16.mxu0 %v21472_v3 }
 0x601   : > { %5500 = vmatmul.mubr.bf16.gmra.mrb[68].mxu0 %v5182_v32 }
 0x602   : > { %5509 = vmatprep.mubr.bf16.mxu0 %v21472_v3 }
 0x609   : > { %5510 = vmatmul.mubr.bf16.gmra.mrb[72].mxu0 %v5186_v14 }
 0x60a   : > { %5519 = vmatprep.mubr.bf16.mxu0 %v21472_v3 }
 0x611   : > { %5520 = vmatmul.mubr.bf16.gmra.mrb[76].mxu0 %v5195_v54 }
 0x612   : > { %5529 = vmatprep.mubr.bf16.mxu0 %v21472_v3 }
 0x619   : > { %5530 = vmatmul.mubr.bf16.gmra.mrb[80].mxu0 %v5194_v1 }
 0x64c   : > { %v5331_v40 = vpop.f32.mrb[0].mxu0 }
 0x64d   : > { %v12827_v23 = vmul.f32 -1.442695, %v5331_v40  ;;  %v18594_v25 = vpop.f32.mrb[1].mxu0 }
 0x64e   : > { %21628 = vst [vmem:[#allocation4_spill] sm:$0xff] %v18594_v25  ;;  %v5335_v46 = vpop.f32.mrb[2].mxu0 }
 0x64f   : > { %16214 = vpow2.f32 %v12827_v23  ;;  %v12828_v21 = vmul.f32 -1.442695, %v5335_v46  ;;  %v18598_v9 = vpop.f32.mrb[3].mxu0 }
 0x650   : > { %21629 = vst [vmem:[#allocation5_spill] sm:$0xff] %v18598_v9 }
 0x651   : > { %16216 = vpow2.f32 %v12828_v21  ;;  %v18639_v21 = vpop.permute.xlu1 %6562 }
 0x654   : > { %v5341_v24 = vpop.f32.mrb[4].mxu0 }
 0x655   : > { %v12829_v44 = vmul.f32 -1.442695, %v5341_v24  ;;  %v18604_v49 = vpop.f32.mrb[5].mxu0  ;;  %v18642_v24 = vpop.permute.xlu0 %6013 }
 0x656   : > { %21630 = vst [vmem:[#allocation6_spill] sm:$0xff] %v18604_v49  ;;  %v5345_v4 = vpop.f32.mrb[6].mxu0 }
 0x657   : > { %16218 = vpow2.f32 %v12829_v44  ;;  %v12830_v35 = vmul.f32 -1.442695, %v5345_v4  ;;  %v18606_v34 = vpop.f32.mrb[7].mxu0 }
 0x658   : > { %21631 = vst [vmem:[#allocation7_spill] sm:$0xff] %v18606_v34 }
 0x659   : > { %v16215_v27 = vpop.eup %16214  ;;  %16220 = vpow2.f32 %v12830_v35 }
 0x65a   : > { %v5743_v33 = vadd.f32 1.0, %v16215_v27  ;;  %16222 = vtanh.f32 %v18594_v25 }
 0x65b   : > { %v16217_v57 = vpop.eup %16216 }
 0x65c   : > { %16224 = vrcp.f32 %v5743_v33  ;;  %v5744_v19 = vadd.f32 1.0, %v16217_v57  ;;  %v5351_v30 = vpop.f32.mrb[8].mxu0 }
 0x65d   : > { %16226 = vtanh.f32 %v18598_v9  ;;  %v12831_v11 = vmul.f32 -1.442695, %v5351_v30  ;;  %v18614_v53 = vpop.f32.mrb[9].mxu0 }
 0x65e   : > { %21632 = vst [vmem:[#allocation8_spill] sm:$0xff] %v18614_v53  ;;  %16228 = vrcp.f32 %v5744_v19  ;;  %v5355_v20 = vpop.f32.mrb[10].mxu0 }
 0x65f   : > { %16230 = vpow2.f32 %v12831_v11  ;;  %v12832_v10 = vmul.f32 -1.442695, %v5355_v20  ;;  %v18618_v31 = vpop.f32.mrb[11].mxu0 }
 0x660   : > { %21633 = vst [vmem:[#allocation9_spill] sm:$0xff] %v18618_v31 }
 0x661   : > { %v16219_v62 = vpop.eup %16218  ;;  %16232 = vpow2.f32 %v12832_v10 }
 0x662   : > { %v5745_v47 = vadd.f32 1.0, %v16219_v62  ;;  %16234 = vtanh.f32 %v18604_v49 }
 0x663   : > { %v16221_v29 = vpop.eup %16220 }
 0x664   : > { %16236 = vrcp.f32 %v5745_v47  ;;  %v5746_v38 = vadd.f32 1.0, %v16221_v29  ;;  %v5361_v32 = vpop.f32.mrb[12].mxu0  ;;  %v16223_v17 = vpop.eup %16222 }
 0x665   : > { %16238 = vtanh.f32 %v18606_v34  ;;  %v12833_v58 = vmul.f32 -1.442695, %v5361_v32  ;;  %v18626_v55 = vpop.f32.mrb[13].mxu0  ;;  %v18655_v29 = vpop.permute.xlu1 %6015 }
 0x666   : > { %21634 = vst [vmem:[#allocation10_spill] sm:$0xff] %v18626_v55  ;;  %v18628_v63 = vpop.eup %16224  ;;  %16240 = vrcp.f32 %v5746_v38  ;;  %v5365_v15 = vpop.f32.mrb[14].mxu0 }
 0x667   : > { %v16227_v56 = vpop.eup %16226  ;;  %16242 = vpow2.f32 %v12833_v58  ;;  %v12834_v14 = vmul.f32 -1.442695, %v5365_v15  ;;  %v18632_v48 = vpop.f32.mrb[15].mxu0  ;;  %v6153_v59 = vmul.f32 %v18628_v63, %v16223_v17 }
 0x668   : > { %21635 = vst [vmem:[#allocation11_spill] sm:$0xff] %v18632_v48  ;;  %v18635_v1 = vpop.eup %16228  ;;  %v18659_v32 = vpop.permute.xlu0 %6565 }
 0x669   : > { %v16231_v54 = vpop.eup %16230  ;;  %16244 = vpow2.f32 %v12834_v14  ;;  %6235 = vrot.lane.b32.xlu1 %v6153_v59, %s16751_s15  ;;  %v6154_v40 = vmul.f32 %v18635_v1, %v16227_v56  ;;  %21638 = vst [vmem:[#allocation14_spill] sm:$0xff] %v18659_v32  ;;  %v21516_v32 = vmov 0.0  }
 0x66a   : > { %v5747_v23 = vadd.f32 1.0, %v16231_v54  ;;  %16246 = vtanh.f32 %v18614_v53  ;;  %13596 = vmatprep.subr.bf16.mxu1 %v21516_v32 }
 0x66b   : > { %v16233_v46 = vpop.eup %16232 }
 0x66c   : > { %16248 = vrcp.f32 %v5747_v23  ;;  %v5748_v44 = vadd.f32 1.0, %v16233_v46  ;;  %v5371_v4 = vpop.f32.mrb[16].mxu0  ;;  %v16235_v35 = vpop.eup %16234 }
 0x66d   : > { %16250 = vtanh.f32 %v18618_v31  ;;  %v12835_v27 = vmul.f32 -1.442695, %v5371_v4  ;;  %6237 = vrot.lane.b32.xlu1 %v6154_v40, %s16751_s15  ;;  %v18646_v33 = vpop.f32.mrb[17].mxu0 }
 0x66e   : > { %21636 = vst [vmem:[#allocation12_spill] sm:$0xff] %v18646_v33  ;;  %v18648_v57 = vpop.eup %16236  ;;  %16252 = vrcp.f32 %v5748_v44  ;;  %v5375_v19 = vpop.f32.mrb[18].mxu0 }
 0x66f   : > { %v16239_v30 = vpop.eup %16238  ;;  %16254 = vpow2.f32 %v12835_v27  ;;  %v12836_v11 = vmul.f32 -1.442695, %v5375_v19  ;;  %v18650_v20 = vpop.f32.mrb[19].mxu0  ;;  %v6155_v10 = vmul.f32 %v18648_v57, %v16235_v35 }
 0x670   : > { %21637 = vst [vmem:[#allocation13_spill] sm:$0xff] %v18650_v20  ;;  %v18653_v62 = vpop.eup %16240  ;;  %v18668_v44 = vpop.permute.xlu1 %6568 }
 0x671   : > { %v16243_v47 = vpop.eup %16242  ;;  %16256 = vpow2.f32 %v12836_v11  ;;  %6239 = vrot.lane.b32.xlu0 %v6155_v10, %s16751_s15  ;;  %v6156_v38 = vmul.f32 %v18653_v62, %v16239_v30  ;;  %21640 = vst [vmem:[#allocation16_spill] sm:$0xff] %v18668_v44  ;;  %v18675_v30 = vpop.permute.xlu0 %6017 }
 0x672   : > { %v5749_v17 = vadd.f32 1.0, %v16243_v47  ;;  %16258 = vtanh.f32 %v18626_v55  ;;  %21642 = vst [vmem:[#allocation18_spill] sm:$0xff] %v18675_v30 }
 0x673   : > { %v16245_v58 = vpop.eup %16244  ;;  %6241 = vrot.lane.b32.xlu1 %v6156_v38, %s16751_s15 }
 0x674   : > { %16260 = vrcp.f32 %v5749_v17  ;;  %v5750_v15 = vadd.f32 1.0, %v16245_v58  ;;  %v5381_v56 = vpop.f32.mrb[20].mxu0  ;;  %v16247_v14 = vpop.eup %16246 }
 0x675   : > { %16262 = vtanh.f32 %v18632_v48  ;;  %v12837_v59 = vmul.f32 -1.442695, %v5381_v56  ;;  %v18664_v54 = vpop.f32.mrb[21].mxu0  ;;  %v18681_v56 = vpop.permute.xlu1 %6019 }
 0x676   : > { %21639 = vst [vmem:[#allocation15_spill] sm:$0xff] %v18664_v54  ;;  %v18666_v40 = vpop.eup %16248  ;;  %16264 = vrcp.f32 %v5750_v15  ;;  %v5385_v23 = vpop.f32.mrb[22].mxu0  ;;  %21643 = vst [vmem:[#allocation19_spill] sm:$0xff] %v18681_v56 }
 0x677   : > { %v16251_v46 = vpop.eup %16250  ;;  %16266 = vpow2.f32 %v12837_v59  ;;  %v12838_v4 = vmul.f32 -1.442695, %v5385_v23  ;;  %v18670_v35 = vpop.f32.mrb[23].mxu0  ;;  %v6157_v27 = vmul.f32 %v18666_v40, %v16247_v14 }
 0x678   : > { %21641 = vst [vmem:[#allocation17_spill] sm:$0xff] %v18670_v35  ;;  %v18673_v19 = vpop.eup %16252 }
 0x679   : > { %v16255_v11 = vpop.eup %16254  ;;  %16268 = vpow2.f32 %v12838_v4  ;;  %6243 = vrot.lane.b32.xlu0 %v6157_v27, %s16751_s15  ;;  %v6158_v10 = vmul.f32 %v18673_v19, %v16251_v46  ;;  %v18688_v46 = vpop.permute.xlu0 %6571 }
 0x67a   : > { %v5751_v47 = vadd.f32 1.0, %v16255_v11  ;;  %16270 = vtanh.f32 %v18646_v33  ;;  %21645 = vst [vmem:[#allocation21_spill] sm:$0xff] %v18688_v46  ;;  %v18697_v48 = vpop.permute.xlu1 %6577 }
 0x67b   : > { %v16257_v38 = vpop.eup %16256  ;;  %6245 = vrot.lane.b32.xlu1 %v6158_v10, %s16751_s15  ;;  %21647 = vst [vmem:[#allocation23_spill] sm:$0xff] %v18697_v48 }
 0x67c   : > { %16272 = vrcp.f32 %v5751_v47  ;;  %v5752_v17 = vadd.f32 1.0, %v16257_v38  ;;  %v5391_v58 = vpop.f32.mrb[24].mxu0  ;;  %v16259_v15 = vpop.eup %16258 }
 0x67d   : > { %16274 = vtanh.f32 %v18650_v20  ;;  %v12839_v14 = vmul.f32 -1.442695, %v5391_v58  ;;  %v18684_v59 = vpop.f32.mrb[25].mxu0 }
 0x67e   : > { %21644 = vst [vmem:[#allocation20_spill] sm:$0xff] %v18684_v59  ;;  %v18686_v23 = vpop.eup %16260  ;;  %16276 = vrcp.f32 %v5752_v17  ;;  %v5395_v4 = vpop.f32.mrb[26].mxu0 }
 0x67f   : > { %v16263_v27 = vpop.eup %16262  ;;  %16278 = vpow2.f32 %v12839_v14  ;;  %v12840_v11 = vmul.f32 -1.442695, %v5395_v4  ;;  %v18690_v10 = vpop.f32.mrb[27].mxu0  ;;  %v6159_v47 = vmul.f32 %v18686_v23, %v16259_v15  ;;  %v6118_v37 = vmul.f32 %v18686_v23, %v18590_v6 }
 0x680   : > { %21646 = vst [vmem:[#allocation22_spill] sm:$0xff] %v18690_v10  ;;  %v18693_v38 = vpop.eup %16264  ;;  %v18701_v17 = vpop.permute.xlu0 %6021 }
 0x681   : > { %v16267_v3 = vpop.eup %16266  ;;  %16280 = vpow2.f32 %v12840_v11  ;;  %6247 = vrot.lane.b32.xlu0 %v6159_v47, %s16751_s15  ;;  %v6160_v58 = vmul.f32 %v18693_v38, %v16263_v27  ;;  %21648 = vst [vmem:[#allocation24_spill] sm:$0xff] %v18701_v17  ;;  %v18713_v53 = vpop.permute.xlu1 %6025 }
 0x682   : > { %v5753_v20 = vadd.f32 1.0, %v16267_v3  ;;  %16282 = vtanh.f32 %v18664_v54  ;;  %21651 = vst [vmem:[#allocation27_spill] sm:$0xff] %v18713_v53 }
 0x683   : > { %v16269_v33 = vpop.eup %16268  ;;  %6249 = vrot.lane.b32.xlu1 %v6160_v58, %s16751_s15 }
 0x684   : > { %16284 = vrcp.f32 %v5753_v20  ;;  %v5754_v15 = vadd.f32 1.0, %v16269_v33  ;;  %v5401_v14 = vpop.f32.mrb[28].mxu0  ;;  %v16271_v4 = vpop.eup %16270 }
 0x685   : > { %16286 = vtanh.f32 %v18670_v35  ;;  %v12841_v11 = vmul.f32 -1.442695, %v5401_v14  ;;  %v18704_v47 = vpop.f32.mrb[29].mxu0  ;;  %v18717_v35 = vpop.permute.xlu0 %6574 }
 0x686   : > { %21649 = vst [vmem:[#allocation25_spill] sm:$0xff] %v18704_v47  ;;  %v18706_v27 = vpop.eup %16272  ;;  %16288 = vrcp.f32 %v5754_v15  ;;  %v5405_v3 = vpop.f32.mrb[30].mxu0  ;;  %21652 = vst [vmem:[#allocation28_spill] sm:$0xff] %v18717_v35 }
 0x687   : > { %v16275_v55 = vpop.eup %16274  ;;  %16290 = vpow2.f32 %v12841_v11  ;;  %v12842_v54 = vmul.f32 -1.442695, %v5405_v3  ;;  %v18708_v31 = vpop.f32.mrb[31].mxu0  ;;  %v6161_v58 = vmul.f32 %v18706_v27, %v16271_v4 }
 0x688   : > { %21650 = vst [vmem:[#allocation26_spill] sm:$0xff] %v18708_v31  ;;  %v18711_v20 = vpop.eup %16276 }
 0x689   : > { %v16279_v33 = vpop.eup %16278  ;;  %16292 = vpow2.f32 %v12842_v54  ;;  %6251 = vrot.lane.b32.xlu0 %v6161_v58, %s16751_s15  ;;  %v6162_v14 = vmul.f32 %v18711_v20, %v16275_v55 }
 0x68a   : > { %v5755_v15 = vadd.f32 1.0, %v16279_v33  ;;  %16294 = vtanh.f32 %v18684_v59  ;;  %v18726_v33 = vpop.permute.xlu1 %6583 }
 0x68b   : > { %v16281_v34 = vpop.eup %16280  ;;  %6253 = vrot.lane.b32.xlu1 %v6162_v14, %s16751_s15  ;;  %21654 = vst [vmem:[#allocation30_spill] sm:$0xff] %v18726_v33 }
 0x68c   : > { %16296 = vrcp.f32 %v5755_v15  ;;  %v5756_v4 = vadd.f32 1.0, %v16281_v34  ;;  %v5411_v11 = vpop.f32.mrb[32].mxu0  ;;  %v16283_v3 = vpop.eup %16282 }
 0x68d   : > { %16298 = vtanh.f32 %v18690_v10  ;;  %v12843_v49 = vmul.f32 -1.442695, %v5411_v11  ;;  %v18722_v54 = vpop.f32.mrb[33].mxu0  ;;  %v18733_v15 = vpop.permute.xlu0 %6023 }
 0x68e   : > { %21653 = vst [vmem:[#allocation29_spill] sm:$0xff] %v18722_v54  ;;  %v18724_v58 = vpop.eup %16284  ;;  %16300 = vrcp.f32 %v5756_v4  ;;  %v5415_v55 = vpop.f32.mrb[34].mxu0  ;;  %21656 = vst [vmem:[#allocation32_spill] sm:$0xff] %v18733_v15 }
 0x68f   : > { %v16287_v9 = vpop.eup %16286  ;;  %16302 = vpow2.f32 %v12843_v49  ;;  %v12844_v59 = vmul.f32 -1.442695, %v5415_v55  ;;  %v18728_v25 = vpop.f32.mrb[35].mxu0  ;;  %v6163_v34 = vmul.f32 %v18724_v58, %v16283_v3 }
 0x690   : > { %21655 = vst [vmem:[#allocation31_spill] sm:$0xff] %v18728_v25  ;;  %v18731_v14 = vpop.eup %16288  ;;  %v18739_v33 = vpop.permute.xlu1 %6029 }
 0x691   : > { %v16291_v11 = vpop.eup %16290  ;;  %16304 = vpow2.f32 %v12844_v59  ;;  %6255 = vrot.lane.b32.xlu0 %v6163_v34, %s16751_s15  ;;  %v6164_v4 = vmul.f32 %v18731_v14, %v16287_v9  ;;  %21657 = vst [vmem:[#allocation33_spill] sm:$0xff] %v18739_v33  ;;  %v18746_v9 = vpop.permute.xlu0 %6580 }
 0x692   : > { %v5757_v10 = vadd.f32 1.0, %v16291_v11  ;;  %16306 = vtanh.f32 %v18704_v47  ;;  %21659 = vst [vmem:[#allocation35_spill] sm:$0xff] %v18746_v9 }
 0x693   : > { %v16293_v48 = vpop.eup %16292  ;;  %6257 = vrot.lane.b32.xlu1 %v6164_v4, %s16751_s15 }
 0x694   : > { %16308 = vrcp.f32 %v5757_v10  ;;  %v5758_v49 = vadd.f32 1.0, %v16293_v48  ;;  %v5421_v55 = vpop.f32.mrb[36].mxu0  ;;  %v16295_v3 = vpop.eup %16294 }
 0x695   : > { %16310 = vtanh.f32 %v18708_v31  ;;  %v12845_v53 = vmul.f32 -1.442695, %v5421_v55  ;;  %v18742_v59 = vpop.f32.mrb[37].mxu0  ;;  %v18755_v9 = vpop.permute.xlu1 %6589 }
 0x696   : > { %21658 = vst [vmem:[#allocation34_spill] sm:$0xff] %v18742_v59  ;;  %v18744_v34 = vpop.eup %16296  ;;  %16312 = vrcp.f32 %v5758_v49  ;;  %v5425_v11 = vpop.f32.mrb[38].mxu0  ;;  %21661 = vst [vmem:[#allocation37_spill] sm:$0xff] %v18755_v9 }
 0x697   : > { %v16299_v47 = vpop.eup %16298  ;;  %16314 = vpow2.f32 %v12845_v53  ;;  %v12846_v4 = vmul.f32 -1.442695, %v5425_v11  ;;  %v18748_v10 = vpop.f32.mrb[39].mxu0  ;;  %v6165_v48 = vmul.f32 %v18744_v34, %v16295_v3 }
 0x698   : > { %21660 = vst [vmem:[#allocation36_spill] sm:$0xff] %v18748_v10  ;;  %v18751_v35 = vpop.eup %16300  ;;  %v18759_v53 = vpop.permute.xlu0 %6027 }
 0x699   : > { %v16303_v33 = vpop.eup %16302  ;;  %16316 = vpow2.f32 %v12846_v4  ;;  %6259 = vrot.lane.b32.xlu0 %v6165_v48, %s16751_s15  ;;  %v6166_v55 = vmul.f32 %v18751_v35, %v16299_v47  ;;  %21662 = vst [vmem:[#allocation38_spill] sm:$0xff] %v18759_v53  ;;  %v18771_v53 = vpop.permute.xlu1 %6033 }
 0x69a   : > { %v5759_v31 = vadd.f32 1.0, %v16303_v33  ;;  %16318 = vtanh.f32 %v18722_v54  ;;  %21667 = vst [vmem:[#allocation43_spill] sm:$0xff] %v18771_v53 }
 0x69b   : > { %v16305_v46 = vpop.eup %16304  ;;  %6261 = vrot.lane.b32.xlu1 %v6166_v55, %s16751_s15 }
 0x69c   : > { %16320 = vrcp.f32 %v5759_v31  ;;  %v5760_v49 = vadd.f32 1.0, %v16305_v46  ;;  %v5431_v3 = vpop.f32.mrb[40].mxu0  ;;  %v16307_v11 = vpop.eup %16306 }
 0x69d   : > { %16322 = vtanh.f32 %v18728_v25  ;;  %v12847_v4 = vmul.f32 -1.442695, %v5431_v3  ;;  %v18762_v48 = vpop.f32.mrb[41].mxu0  ;;  %v18775_v25 = vpop.permute.xlu0 %6586 }
 0x69e   : > { %21663 = vst [vmem:[#allocation39_spill] sm:$0xff] %v18762_v48  ;;  %v18764_v47 = vpop.eup %16308  ;;  %16324 = vrcp.f32 %v5760_v49  ;;  %v5435_v33 = vpop.f32.mrb[42].mxu0  ;;  %21668 = vst [vmem:[#allocation44_spill] sm:$0xff] %v18775_v25 }
 0x69f   : > { %21664 = vst [vmem:[#allocation40_spill] sm:$0xff] %v18764_v47  ;;  %v16311_v9 = vpop.eup %16310  ;;  %16326 = vpow2.f32 %v12847_v4  ;;  %v12848_v54 = vmul.f32 -1.442695, %v5435_v33  ;;  %v18766_v15 = vpop.f32.mrb[43].mxu0  ;;  %v6167_v55 = vmul.f32 %v18764_v47, %v16307_v11 }
 0x6a0   : > { %21665 = vst [vmem:[#allocation41_spill] sm:$0xff] %v18766_v15  ;;  %v18769_v31 = vpop.eup %16312 }
 0x6a1   : > { %21666 = vst [vmem:[#allocation42_spill] sm:$0xff] %v18769_v31  ;;  %v16315_v46 = vpop.eup %16314  ;;  %16328 = vpow2.f32 %v12848_v54  ;;  %6263 = vrot.lane.b32.xlu0 %v6167_v55, %s16751_s15  ;;  %v6168_v3 = vmul.f32 %v18769_v31, %v16311_v9 }
 0x6a2   : > { %v5761_v49 = vadd.f32 1.0, %v16315_v46  ;;  %16330 = vtanh.f32 %v18742_v59  ;;  %v18784_v46 = vpop.permute.xlu1 %6595 }
 0x6a3   : > { %v16317_v17 = vpop.eup %16316  ;;  %21671 = vst [vmem:[#allocation47_spill] sm:$0xff] %v18784_v46 }
 0x6a4   : > { %16332 = vrcp.f32 %v5761_v49  ;;  %v5762_v4 = vadd.f32 1.0, %v16317_v17  ;;  %v5441_v33 = vpop.f32.mrb[44].mxu0  ;;  %v16319_v11 = vpop.eup %16318 }
 0x6a5   : > { %16334 = vtanh.f32 %v18748_v10  ;;  %v12849_v44 = vmul.f32 -1.442695, %v5441_v33  ;;  %6265 = vrot.lane.b32.xlu0 %v6168_v3, %s16751_s15  ;;  %v18780_v54 = vpop.f32.mrb[45].mxu0  ;;  %v18791_v33 = vpop.permute.xlu0 %6031 }
 0x6a6   : > { %21669 = vst [vmem:[#allocation45_spill] sm:$0xff] %v18780_v54  ;;  %v18782_v55 = vpop.eup %16320  ;;  %16336 = vrcp.f32 %v5762_v4  ;;  %v5445_v9 = vpop.f32.mrb[46].mxu0  ;;  %21674 = vst [vmem:[#allocation50_spill] sm:$0xff] %v18791_v33 }
 0x6a7   : > { %21670 = vst [vmem:[#allocation46_spill] sm:$0xff] %v18782_v55  ;;  %v16323_v53 = vpop.eup %16322  ;;  %16338 = vpow2.f32 %v12849_v44  ;;  %v12850_v59 = vmul.f32 -1.442695, %v5445_v9  ;;  %v18786_v49 = vpop.f32.mrb[47].mxu0  ;;  %v6169_v17 = vmul.f32 %v18782_v55, %v16319_v11 }
 0x6a8   : > { %21672 = vst [vmem:[#allocation48_spill] sm:$0xff] %v18786_v49  ;;  %v18789_v25 = vpop.eup %16324  ;;  %v18797_v46 = vpop.permute.xlu1 %6037 }
 0x6a9   : > { %21673 = vst [vmem:[#allocation49_spill] sm:$0xff] %v18789_v25  ;;  %v16327_v3 = vpop.eup %16326  ;;  %16340 = vpow2.f32 %v12850_v59  ;;  %6267 = vrot.lane.b32.xlu1 %v6169_v17, %s16751_s15  ;;  %v6170_v4 = vmul.f32 %v18789_v25, %v16323_v53  ;;  %21675 = vst [vmem:[#allocation51_spill] sm:$0xff] %v18797_v46  ;;  %v18804_v53 = vpop.permute.xlu0 %6592 }
 0x6aa   : > { %v5763_v10 = vadd.f32 1.0, %v16327_v3  ;;  %16342 = vtanh.f32 %v18762_v48  ;;  %21678 = vst [vmem:[#allocation54_spill] sm:$0xff] %v18804_v53 }
 0x6ab   : > { %v16329_v31 = vpop.eup %16328  ;;  %6269 = vrot.lane.b32.xlu0 %v6170_v4, %s16751_s15 }
 0x6ac   : > { %16344 = vrcp.f32 %v5763_v10  ;;  %v5764_v44 = vadd.f32 1.0, %v16329_v31  ;;  %v5451_v9 = vpop.f32.mrb[48].mxu0  ;;  %v16331_v11 = vpop.eup %16330 }
 0x6ad   : > { %16346 = vtanh.f32 %v18766_v15  ;;  %v12851_v33 = vmul.f32 -1.442695, %v5451_v9  ;;  %v18800_v59 = vpop.f32.mrb[49].mxu0  ;;  %v18813_v53 = vpop.permute.xlu1 %6601 }
 0x6ae   : > { %21676 = vst [vmem:[#allocation52_spill] sm:$0xff] %v18800_v59  ;;  %v18802_v17 = vpop.eup %16332  ;;  %16348 = vrcp.f32 %v5764_v44  ;;  %v5455_v3 = vpop.f32.mrb[50].mxu0  ;;  %21681 = vst [vmem:[#allocation57_spill] sm:$0xff] %v18813_v53 }
 0x6af   : > { %21677 = vst [vmem:[#allocation53_spill] sm:$0xff] %v18802_v17  ;;  %v16335_v48 = vpop.eup %16334  ;;  %16350 = vpow2.f32 %v12851_v33  ;;  %v12852_v4 = vmul.f32 -1.442695, %v5455_v3  ;;  %v18806_v10 = vpop.f32.mrb[51].mxu0  ;;  %v6171_v31 = vmul.f32 %v18802_v17, %v16331_v11 }
 0x6b0   : > { %21679 = vst [vmem:[#allocation55_spill] sm:$0xff] %v18806_v10  ;;  %v18809_v25 = vpop.eup %16336  ;;  %v18817_v33 = vpop.permute.xlu0 %6035 }
 0x6b1   : > { %21680 = vst [vmem:[#allocation56_spill] sm:$0xff] %v18809_v25  ;;  %v16339_v46 = vpop.eup %16338  ;;  %16352 = vpow2.f32 %v12852_v4  ;;  %6271 = vrot.lane.b32.xlu1 %v6171_v31, %s16751_s15  ;;  %v6172_v9 = vmul.f32 %v18809_v25, %v16335_v48  ;;  %21682 = vst [vmem:[#allocation58_spill] sm:$0xff] %v18817_v33  ;;  %v18829_v33 = vpop.permute.xlu1 %6041 }
 0x6b2   : > { %v5765_v15 = vadd.f32 1.0, %v16339_v46  ;;  %16354 = vtanh.f32 %v18780_v54  ;;  %21687 = vst [vmem:[#allocation63_spill] sm:$0xff] %v18829_v33 }
 0x6b3   : > { %v16341_v55 = vpop.eup %16340  ;;  %6273 = vrot.lane.b32.xlu0 %v6172_v9, %s16751_s15 }
 0x6b4   : > { %16356 = vrcp.f32 %v5765_v15  ;;  %v5766_v44 = vadd.f32 1.0, %v16341_v55  ;;  %v5461_v11 = vpop.f32.mrb[52].mxu0  ;;  %v16343_v3 = vpop.eup %16342 }
 0x6b5   : > { %16358 = vtanh.f32 %v18786_v49  ;;  %v12853_v4 = vmul.f32 -1.442695, %v5461_v11  ;;  %v18820_v31 = vpop.f32.mrb[53].mxu0  ;;  %v18833_v49 = vpop.permute.xlu0 %6598 }
 0x6b6   : > { %21683 = vst [vmem:[#allocation59_spill] sm:$0xff] %v18820_v31  ;;  %v18822_v48 = vpop.eup %16344  ;;  %16360 = vrcp.f32 %v5766_v44  ;;  %v5465_v46 = vpop.f32.mrb[54].mxu0  ;;  %21688 = vst [vmem:[#allocation64_spill] sm:$0xff] %v18833_v49 }
 0x6b7   : > { %21684 = vst [vmem:[#allocation60_spill] sm:$0xff] %v18822_v48  ;;  %v16347_v53 = vpop.eup %16346  ;;  %16362 = vpow2.f32 %v12853_v4  ;;  %v12854_v54 = vmul.f32 -1.442695, %v5465_v46  ;;  %v18824_v25 = vpop.f32.mrb[55].mxu0  ;;  %v6173_v9 = vmul.f32 %v18822_v48, %v16343_v3 }
 0x6b8   : > { %21685 = vst [vmem:[#allocation61_spill] sm:$0xff] %v18824_v25  ;;  %v18827_v15 = vpop.eup %16348 }
 0x6b9   : > { %21686 = vst [vmem:[#allocation62_spill] sm:$0xff] %v18827_v15  ;;  %v16351_v55 = vpop.eup %16350  ;;  %16364 = vpow2.f32 %v12854_v54  ;;  %6275 = vrot.lane.b32.xlu1 %v6173_v9, %s16751_s15  ;;  %v6174_v11 = vmul.f32 %v18827_v15, %v16347_v53 }
 0x6ba   : > { %v5767_v44 = vadd.f32 1.0, %v16351_v55  ;;  %16366 = vtanh.f32 %v18800_v59  ;;  %v18842_v55 = vpop.permute.xlu1 %6607 }
 0x6bb   : > { %v16353_v17 = vpop.eup %16352  ;;  %6277 = vrot.lane.b32.xlu0 %v6174_v11, %s16751_s15  ;;  %21691 = vst [vmem:[#allocation67_spill] sm:$0xff] %v18842_v55 }
 0x6bc   : > { %16368 = vrcp.f32 %v5767_v44  ;;  %v5768_v3 = vadd.f32 1.0, %v16353_v17  ;;  %v5471_v4 = vpop.f32.mrb[56].mxu0  ;;  %v16355_v46 = vpop.eup %16354 }
 0x6bd   : > { %16370 = vtanh.f32 %v18806_v10  ;;  %v12855_v33 = vmul.f32 -1.442695, %v5471_v4  ;;  %v18838_v54 = vpop.f32.mrb[57].mxu0  ;;  %v18849_v44 = vpop.permute.xlu0 %6039 }
 0x6be   : > { %21689 = vst [vmem:[#allocation65_spill] sm:$0xff] %v18838_v54  ;;  %v18840_v9 = vpop.eup %16356  ;;  %16372 = vrcp.f32 %v5768_v3  ;;  %v5475_v53 = vpop.f32.mrb[58].mxu0  ;;  %21694 = vst [vmem:[#allocation70_spill] sm:$0xff] %v18849_v44 }
 0x6bf   : > { %21690 = vst [vmem:[#allocation66_spill] sm:$0xff] %v18840_v9  ;;  %v16359_v49 = vpop.eup %16358  ;;  %16374 = vpow2.f32 %v12855_v33  ;;  %v12856_v59 = vmul.f32 -1.442695, %v5475_v53  ;;  %v18844_v15 = vpop.f32.mrb[59].mxu0  ;;  %v6175_v17 = vmul.f32 %v18840_v9, %v16355_v46 }
 0x6c0   : > { %21692 = vst [vmem:[#allocation68_spill] sm:$0xff] %v18844_v15  ;;  %v18847_v11 = vpop.eup %16360  ;;  %v18855_v55 = vpop.permute.xlu1 %6045 }
 0x6c1   : > { %21693 = vst [vmem:[#allocation69_spill] sm:$0xff] %v18847_v11  ;;  %v16363_v4 = vpop.eup %16362  ;;  %16376 = vpow2.f32 %v12856_v59  ;;  %6279 = vrot.lane.b32.xlu1 %v6175_v17, %s16751_s15  ;;  %v6176_v3 = vmul.f32 %v18847_v11, %v16359_v49  ;;  %21695 = vst [vmem:[#allocation71_spill] sm:$0xff] %v18855_v55  ;;  %v18862_v49 = vpop.permute.xlu0 %6604 }
 0x6c2   : > { %v5769_v10 = vadd.f32 1.0, %v16363_v4  ;;  %16378 = vtanh.f32 %v18820_v31  ;;  %21698 = vst [vmem:[#allocation74_spill] sm:$0xff] %v18862_v49 }
 0x6c3   : > { %v16365_v48 = vpop.eup %16364  ;;  %6281 = vrot.lane.b32.xlu0 %v6176_v3, %s16751_s15 }
 0x6c4   : > { %16380 = vrcp.f32 %v5769_v10  ;;  %v5770_v33 = vadd.f32 1.0, %v16365_v48  ;;  %v5481_v53 = vpop.f32.mrb[60].mxu0  ;;  %v16367_v46 = vpop.eup %16366 }
 0x6c5   : > { %16382 = vtanh.f32 %v18824_v25  ;;  %v12857_v44 = vmul.f32 -1.442695, %v5481_v53  ;;  %v18858_v59 = vpop.f32.mrb[61].mxu0  ;;  %v18871_v9 = vpop.permute.xlu1 %6613 }
 0x6c6   : > { %21696 = vst [vmem:[#allocation72_spill] sm:$0xff] %v18858_v59  ;;  %v18860_v17 = vpop.eup %16368  ;;  %16384 = vrcp.f32 %v5770_v33  ;;  %v5485_v4 = vpop.f32.mrb[62].mxu0  ;;  %21701 = vst [vmem:[#allocation77_spill] sm:$0xff] %v18871_v9 }
 0x6c7   : > { %21697 = vst [vmem:[#allocation73_spill] sm:$0xff] %v18860_v17  ;;  %v16371_v31 = vpop.eup %16370  ;;  %16386 = vpow2.f32 %v12857_v44  ;;  %v18864_v3 = vpop.f32.mrb[63].mxu0  ;;  %v6177_v10 = vmul.f32 %v18860_v17, %v16367_v46  ;;  %v12858_v17 = vmul.f32 -1.442695, %v5485_v4 }
 0x6c8   : > { %21699 = vst [vmem:[#allocation75_spill] sm:$0xff] %v18864_v3  ;;  %v18867_v48 = vpop.eup %16372  ;;  %16388 = vtanh.f32 %v18838_v54  ;;  %v18875_v44 = vpop.permute.xlu0 %6043 }
 0x6c9   : > { %21700 = vst [vmem:[#allocation76_spill] sm:$0xff] %v18867_v48  ;;  %v16375_v55 = vpop.eup %16374  ;;  %6283 = vrot.lane.b32.xlu1 %v6177_v10, %s16751_s15  ;;  %v6178_v53 = vmul.f32 %v18867_v48, %v16371_v31  ;;  %21702 = vst [vmem:[#allocation78_spill] sm:$0xff] %v18875_v44 }
 0x6ca   : > { %v5771_v25 = vadd.f32 1.0, %v16375_v55 }
 0x6cb   : > { %v16377_v11 = vpop.eup %16376  ;;  %6285 = vrot.lane.b32.xlu0 %v6178_v53, %s16751_s15 }
 0x6cc   : > { %16390 = vrcp.f32 %v5771_v25  ;;  %v5772_v33 = vadd.f32 1.0, %v16377_v11  ;;  %v5491_v46 = vpop.f32.mrb[64].mxu0  ;;  %v16379_v49 = vpop.eup %16378 }
 0x6cd   : > { %16392 = vtanh.f32 %v18844_v15  ;;  %v18878_v10 = vpop.f32.mrb[65].mxu0  ;;  %v18889_v11 = vpop.permute.xlu1 %6049  ;;  %v12859_v15 = vmul.f32 -1.442695, %v5491_v46 }
 0x6ce   : > { %21703 = vst [vmem:[#allocation79_spill] sm:$0xff] %v18878_v10  ;;  %v18880_v31 = vpop.eup %16380  ;;  %16394 = vrcp.f32 %v5772_v33  ;;  %v18882_v55 = vpop.f32.mrb[66].mxu0  ;;  %21707 = vst [vmem:[#allocation83_spill] sm:$0xff] %v18889_v11  ;;  %v16090_v33 = vld [vmem:[%s21451_s4 + $0x20] sm:$0xff]  }
 0x6cf   : > { %21704 = vst [vmem:[#allocation80_spill] sm:$0xff] %v18880_v31  ;;  %v16383_v9 = vpop.eup %16382  ;;  %v18884_v54 = vpop.f32.mrb[67].mxu0  ;;  %v6179_v53 = vmul.f32 %v18880_v31, %v16379_v49  ;;  %16396 = vpow2.f32 %v12858_v17  ;;  %13597 = vmatpush3.bf16.msra.mxu1 %v16090_v33 }
 0x6d0   : > { %21705 = vst [vmem:[#allocation81_spill] sm:$0xff] %v18884_v54  ;;  %v18887_v44 = vpop.eup %16384  ;;  %v18896_v48 = vpop.permute.xlu0 %6610  ;;  %16398 = vtanh.f32 %v18858_v59  ;;  %13598 = vmatprep.subr.bf16.mxu1 %v21516_v32 }
 0x6d1   : > { %21706 = vst [vmem:[#allocation82_spill] sm:$0xff] %v18887_v44  ;;  %v16387_v25 = vpop.eup %16386  ;;  %6287 = vrot.lane.b32.xlu1 %v6179_v53, %s16751_s15  ;;  %v6180_v4 = vmul.f32 %v18887_v44, %v16383_v9  ;;  %21708 = vst [vmem:[#allocation84_spill] sm:$0xff] %v18896_v48  ;;  %v16091_v9 = vld [vmem:[%s21451_s4 + $0x28] sm:$0xff]   ;;  %v21715_v48 = vmov 0.0   ;;  %v16092_v44 = vld [vmem:[%s21451_s4 + $0x30] sm:$0xff]  }
 0x6d2   : > { %v5773_v56 = vadd.f32 1.0, %v16387_v25  ;;  %v16389_v49 = vpop.eup %16388  ;;  %13604 = vmatprep.mubr.msk.bf16.mxu1 %vm16753_vm10, %v21715_v48 }
 0x6d3   : > { %6289 = vrot.lane.b32.xlu0 %v6180_v4, %s16751_s15  ;;  %v18913_v4 = vpop.permute.xlu1 %6619  ;;  %13599 = vmatpush3.bf16.msra.mxu1 %v16091_v9 }
 0x6d4   : > { %16400 = vrcp.f32 %v5773_v56  ;;  %v18901_v17 = vpop.f32.mrb[68].mxu0  ;;  %21711 = vst [vmem:[#allocation87_spill] sm:$0xff] %v18913_v4  ;;  %v18920_v11 = vpop.permute.xlu0 %6047  ;;  %13600 = vmatprep.subr.bf16.mxu1 %v21715_v48  ;;  %v6112_v4 = vmul.f32 %v18628_v63, %v18566_v26 }
 0x6d5   : > { %16402 = vpow2.f32 %v12859_v15  ;;  %v18907_v46 = vpop.f32.mrb[69].mxu0  ;;  %21714 = vst [vmem:[#allocation90_spill] sm:$0xff] %v18920_v11 }
 0x6d6   : > { %21709 = vst [vmem:[#allocation85_spill] sm:$0xff] %v18907_v46  ;;  %v18909_v53 = vpop.eup %16390  ;;  %v18911_v25 = vpop.f32.mrb[70].mxu0 }
 0x6d7   : > { %21710 = vst [vmem:[#allocation86_spill] sm:$0xff] %v18909_v53  ;;  %v16393_v59 = vpop.eup %16392  ;;  %v18915_v56 = vpop.f32.mrb[71].mxu0  ;;  %v6181_v33 = vmul.f32 %v18909_v53, %v16389_v49  ;;  %13601 = vmatpush3.bf16.msra.mxu1 %v16092_v44 }
 0x6d8   : > { %21712 = vst [vmem:[#allocation88_spill] sm:$0xff] %v18915_v56  ;;  %v18918_v32 = vpop.eup %16394  ;;  %13602 = vmatprep.subr.bf16.mxu1 %v21715_v48  ;;  %v18942_v63 = vpop.permute.xlu0 %6616 }
 0x6d9   : > { %21713 = vst [vmem:[#allocation89_spill] sm:$0xff] %v18918_v32  ;;  %6291 = vrot.lane.b32.xlu1 %v6181_v33, %s16751_s15  ;;  %v6182_v15 = vmul.f32 %v18918_v32, %v16393_v59  ;;  %v16397_v31 = vpop.eup %16396  ;;  %v16093_v32 = vld [vmem:[%s21451_s4 + $0x38] sm:$0xff]  }
 0x6da   : > { %v16399_v33 = vpop.eup %16398 }
 0x6db   : > { %v6236_v49 = vpop.permute.xlu1 %6235  ;;  %6293 = vrot.lane.b32.xlu0 %v6182_v15, %s16751_s15  ;;  %v5774_v15 = vadd.f32 1.0, %v16397_v31  ;;  %13603 = vmatpush3.bf16.msra.mxu1 %v16093_v32  ;;  %v6114_v31 = vmul.f32 %v18648_v57, %v18574_v51 }
 0x6dc   : > { %v6358_v9 = vadd.f32 %v6236_v49, %v6112_v4  ;;  %v18931_v11 = vpop.f32.mrb[72].mxu0  ;;  %v6113_v49 = vmul.f32 %v18635_v1, %v18568_v52  ;;  %13688 = vmatprep.subr.bf16.mxu1 %v21715_v48 }
 0x6dd   : > { %v18935_v59 = vpop.f32.mrb[73].mxu0  ;;  %16404 = vrcp.f32 %v5774_v15 }
 0x6de   : > { %21716 = vst [vmem:[#allocation91_spill] sm:$0xff] %v18935_v59  ;;  %v18940_v26 = vpop.eup %16400  ;;  %v18944_v44 = vsel %vm6645_vm8, %v6358_v9, 0.0  ;;  %v18946_v4 = vpop.f32.mrb[74].mxu0  ;;  %16406 = vtanh.f32 %v18864_v3 }
 0x6df   : > { %v16403_v53 = vpop.eup %16402  ;;  %v6238_v22 = vpop.permute.xlu1 %6237  ;;  %v13330_v59 = vpack.c.bf16 %v18944_v44, %v18944_v44  ;;  %v6183_v47 = vmul.f32 %v18940_v26, %v16399_v33 }
 0x6e0   : > { %v18950_v56 = vpop.f32.mrb[75].mxu0  ;;  %v6359_v30 = vadd.f32 %v6238_v22, %v6113_v49  ;;  %v5775_v52 = vadd.f32 1.0, %v16403_v53  ;;  %v5938_v22 = vld [vmem:[%s16801_s28 + $0xf8] sm:$0xff] }
 0x6e1   : > { %21717 = vst [vmem:[#allocation92_spill] sm:$0xff] %v18950_v56  ;;  %6851 = vrot.lane.b32.xlu1 %v13330_v59, %s16751_s15  ;;  %v6115_v59 = vmul.f32 %v18653_v62, %v18576_v28 }
 0x6e2   : > { %v18960_v1 = vsel %vm6646_vm9, %v6359_v30, 0.0  ;;  %v12860_v30 = vmul.f32 -1.442695, %v18882_v55  ;;  %16408 = vrcp.f32 %v5775_v52  ;;  %v6116_v55 = vmul.f32 %v18666_v40, %v18582_v8 }
 0x6e3   : > { %v6240_v9 = vpop.permute.xlu0 %6239  ;;  %v13331_v32 = vpack.c.bf16 %v18960_v1, %v18960_v1  ;;  %16410 = vtanh.f32 %v18878_v10  ;;  %vm6653_vm9 = vcmp.eq.s32.totalorder %v18596_v43, 1 }
 0x6e4   : > { %v6360_v36 = vadd.f32 %v6240_v9, %v6114_v31  ;;  %v18967_v33 = vpop.f32.mrb[76].mxu0  ;;  %16412 = vpow2.f32 %v12860_v30 }
 0x6e5   : > { %v6242_v53 = vpop.permute.xlu1 %6241  ;;  %6853 = vrot.lane.b32.xlu0 %v13331_v32, %s16751_s15  ;;  %6295 = vrot.lane.b32.xlu1 %v6183_v47, %s16751_s15  ;;  %v18975_v51 = vpop.f32.mrb[77].mxu0  ;;  %v12861_v47 = vmul.f32 -1.442695, %v18901_v17  ;;  %v6117_v17 = vmul.f32 %v18673_v19, %v18584_v45 }
 0x6e6   : > { %21718 = vst [vmem:[#allocation93_spill] sm:$0xff] %v18975_v51  ;;  %v18977_v57 = vsel %vm6647_vm11, %v6360_v36, 0.0  ;;  %v6361_v15 = vadd.f32 %v6242_v53, %v6115_v59  ;;  %v18979_v49 = vpop.f32.mrb[78].mxu0  ;;  %vm6654_vm11 = vcmp.eq.s32.totalorder %v18600_v42, 1 }
 0x6e7   : > { %v18983_v5 = vpop.f32.mrb[79].mxu0  ;;  %v13332_v28 = vpack.c.bf16 %v18977_v57, %v18977_v57  ;;  %v18998_v9 = vpop.eup %16404  ;;  %16414 = vpow2.f32 %v12861_v47  ;;  %v6432_v47 = vld [vmem:[%s21449_s2 + $0x108] sm:$0xff] }
 0x6e8   : > { %21719 = vst [vmem:[#allocation94_spill] sm:$0xff] %v18983_v5  ;;  %v18988_v62 = vsel %vm6648_vm12, %v6361_v15, 0.0  ;;  %v16407_v40 = vpop.eup %16406  ;;  %vm6473_vm15 = vcmp.gt.f32.partialorder %v6432_v47, 0.5  ;;  %v6120_v47 = vmul.f32 %v18706_v27, %v18602_v2  ;;  %vm6655_vm12 = vcmp.eq.s32.totalorder %v18610_v13, 1 }
 0x6e9   : > { %6051 = vrot.lane.b32.xlu0 %v5938_v22, %s16751_s15  ;;  %6855 = vrot.lane.b32.xlu1 %v13332_v28, %s16751_s15  ;;  %v13333_v52 = vpack.c.bf16 %v18988_v62, %v18988_v62  ;;  %v6184_v60 = vmul.f32 %v16407_v40, %v18998_v9  ;;  %v6433_v40 = vld [vmem:[%s21449_s2 + $0x110] sm:$0xff] }
 0x6ea   : > { %vm6474_vm8 = vcmp.gt.f32.partialorder %v6433_v40, 0.5 }
 0x6eb   : > { %v6244_v31 = vpop.permute.xlu0 %6243 }
 0x6ec   : > { %v6362_v32 = vadd.f32 %v6244_v31, %v6116_v55  ;;  %v19000_v36 = vpop.f32.mrb[80].mxu0  ;;  %v19015_v22 = vpop.eup %16408 }
 0x6ed   : > { %v6246_v59 = vpop.permute.xlu1 %6245  ;;  %6857 = vrot.lane.b32.xlu0 %v13333_v52, %s16751_s15  ;;  %6053 = vrot.lane.b32.xlu1 %v5939_v50, %s16751_s15  ;;  %v19007_v8 = vpop.f32.mrb[81].mxu0 }
 0x6ee   : > { %21720 = vst [vmem:[#allocation95_spill] sm:$0xff] %v19007_v8  ;;  %v19009_v30 = vsel %vm6649_vm13, %v6362_v32, 0.0  ;;  %v6363_v53 = vadd.f32 %v6246_v59, %v6117_v17  ;;  %v5535_v15 = vpop.f32.mrb[82].mxu0  ;;  %v16411_v55 = vpop.eup %16410  ;;  %v6119_v59 = vmul.f32 %v18693_v38, %v18592_v41  ;;  %vm6656_vm13 = vcmp.eq.s32.totalorder %v18616_v61, 1 }
 0x6ef   : > { %v13334_v45 = vpack.c.bf16 %v19009_v30, %v19009_v30  ;;  %v5536_v19 = vpop.f32.mrb[83].mxu0  ;;  %v16413_v50 = vpop.eup %16412  ;;  %v6185_v32 = vmul.f32 %v16411_v55, %v19015_v22  ;;  %v6124_v61 = vmul.f32 %v18744_v34, %v18642_v24 }
 0x6f0   : > { %v19017_v28 = vsel %vm6650_vm14, %v6363_v53, 0.0  ;;  %v5776_v6 = vadd.f32 1.0, %v16413_v50 }
 0x6f1   : > { %6859 = vrot.lane.b32.xlu1 %v13334_v45, %s16751_s15  ;;  %6297 = vrot.lane.b32.xlu0 %v6184_v60, %s16751_s15  ;;  %v13335_v52 = vpack.c.bf16 %v19017_v28, %v19017_v28  ;;  %v21721_v45 = vmov 0   ;;  %v16415_v60 = vpop.eup %16414 }
 0x6f2   : > { %v6514_v19 = vsel %vm6473_vm15, 1, %v21721_v45  ;;  %16416 = vrcp.f32 %v5776_v6  ;;  %v5777_v7 = vadd.f32 1.0, %v16415_v60  ;;  %v6515_v55 = vsel %vm6474_vm8, 1, %v21721_v45 }
 0x6f3   : > { %v6248_v31 = vpop.permute.xlu0 %6247  ;;  %16418 = vtanh.f32 %v18884_v54  ;;  %vm6657_vm15 = vcmp.eq.s32.totalorder %v18630_v39, 1  ;;  %v21779_v54 = vld [vmem:[#allocation77_spill] sm:$0xff] }
 0x6f4   : > { %v6364_v17 = vadd.f32 %v6248_v31, %v6118_v37  ;;  %v12862_v31 = vmul.f32 -1.442695, %v18911_v25  ;;  %16420 = vrcp.f32 %v5777_v7  ;;  %v5941_v25 = vld [vmem:[%s16801_s28 + $0x110] sm:$0xff] }
 0x6f5   : > { %v6250_v53 = vpop.permute.xlu1 %6249  ;;  %6861 = vrot.lane.b32.xlu0 %v13335_v52, %s16751_s15  ;;  %6299 = vrot.lane.b32.xlu1 %v6185_v32, %s16751_s15  ;;  %v6121_v52 = vmul.f32 %v18711_v20, %v18608_v16  ;;  %16422 = vtanh.f32 %v18907_v46  ;;  %v12863_v16 = vmul.f32 -1.442695, %v18931_v11  ;;  %v6122_v20 = vmul.f32 %v18724_v58, %v18620_v12 }
 0x6f6   : > { %v19037_v23 = vsel %vm6651_vm0, %v6364_v17, 0.0  ;;  %v6365_v15 = vadd.f32 %v6250_v53, %v6119_v59  ;;  %v5940_v17 = vld [vmem:[%s16801_s28 + $0x108] sm:$0xff]  ;;  %16424 = vpow2.f32 %v12862_v31  ;;  %v6435_v31 = vld [vmem:[%s21449_s2 + $0x120] sm:$0xff]  ;;  %vm6658_vm0 = vcmp.eq.s32.totalorder %v18639_v21, 1 }
 0x6f7   : > { %v13336_v41 = vpack.c.bf16 %v19037_v23, %v19037_v23  ;;  %16426 = vpow2.f32 %v12863_v16  ;;  %v21722_v16 = vld [vmem:[#allocation18_spill] sm:$0xff] }
 0x6f8   : > { %v19043_v38 = vsel %vm6652_vm1, %v6365_v15, 0.0  ;;  %v6123_v15 = vmul.f32 %v18731_v14, %v18623_v0  ;;  %v6434_v14 = vld [vmem:[%s21449_s2 + $0x118] sm:$0xff]  ;;  %vm6476_vm1 = vcmp.gt.f32.partialorder %v6435_v31, 0.5 }
 0x6f9   : > { %6622 = vperm.xlu0 %15784, %v6514_v19   ;;  %6863 = vrot.lane.b32.xlu1 %v13336_v41, %s16751_s15  ;;  %v13337_v18 = vpack.c.bf16 %v19043_v38, %v19043_v38  ;;  %vm6475_vm14 = vcmp.gt.f32.partialorder %v6434_v14, 0.5  ;;  %v21731_v31 = vld [vmem:[#allocation46_spill] sm:$0xff] }
 0x6fb   : > { %v6252_v37 = vpop.permute.xlu0 %6251 }
 0x6fc   : > { %v6366_v50 = vadd.f32 %v6252_v37, %v6120_v47  ;;  %v19074_v53 = vpop.eup %16416 }
 0x6fd   : > { %v6254_v32 = vpop.permute.xlu1 %6253  ;;  %6865 = vrot.lane.b32.xlu0 %v13337_v18, %s16751_s15  ;;  %6625 = vperm.xlu1 %15785, %v6515_v55   ;;  %v16419_v12 = vpop.eup %16418 }
 0x6fe   : > { %v19057_v2 = vsel %vm6653_vm9, %v6366_v50, 0.0  ;;  %v6367_v27 = vadd.f32 %v6254_v32, %v6121_v52  ;;  %v6186_v41 = vmul.f32 %v16419_v12, %v19074_v53  ;;  %v19087_v0 = vpop.eup %16420  ;;  %v6125_v52 = vmul.f32 %v18751_v35, %v18655_v29 }
 0x6ff   : > { %v13338_v59 = vpack.c.bf16 %v19057_v2, %v19057_v2  ;;  %v16423_v7 = vpop.eup %16422  ;;  %v12864_v12 = vmul.f32 -1.442695, %v18946_v4  ;;  %v12865_v4 = vmul.f32 -1.442695, %v18967_v33 }
 0x700   : > { %v19064_v43 = vsel %vm6654_vm11, %v6367_v27, 0.0  ;;  %v16425_v47 = vpop.eup %16424  ;;  %v6187_v37 = vmul.f32 %v16423_v7, %v19087_v0  ;;  %v5942_v7 = vld [vmem:[%s16801_s28 + $0x118] sm:$0xff] }
 0x701   : > { %6055 = vrot.lane.b32.xlu0 %v5940_v17, %s16751_s15  ;;  %6867 = vrot.lane.b32.xlu1 %v13338_v59, %s16751_s15  ;;  %v13339_v42 = vpack.c.bf16 %v19064_v43, %v19064_v43  ;;  %v5778_v24 = vadd.f32 1.0, %v16425_v47  ;;  %v6516_v17 = vsel %vm6475_vm14, 1, %v21721_v45  ;;  %v16427_v59 = vpop.eup %16426 }
 0x702   : > { %v5779_v39 = vadd.f32 1.0, %v16427_v59 }
 0x703   : > { %v6256_v40 = vpop.permute.xlu0 %6255  ;;  %16428 = vrcp.f32 %v5778_v24  ;;  %v5943_v24 = vld [vmem:[%s16801_s28 + $0x120] sm:$0xff] }
 0x704   : > { %v6368_v6 = vadd.f32 %v6256_v40, %v6122_v20  ;;  %v21723_v20 = vld [vmem:[#allocation40_spill] sm:$0xff] }
 0x705   : > { %v6258_v11 = vpop.permute.xlu1 %6257  ;;  %6869 = vrot.lane.b32.xlu0 %v13339_v42, %s16751_s15  ;;  %6057 = vrot.lane.b32.xlu1 %v5941_v25, %s16751_s15  ;;  %v6126_v25 = vmul.f32 %v21723_v20, %v21722_v16  ;;  %v6517_v42 = vsel %vm6476_vm1, 1, %v21721_v45  ;;  %v21733_v16 = vld [vmem:[#allocation49_spill] sm:$0xff] }
 0x706   : > { %v19081_v58 = vsel %vm6655_vm12, %v6368_v6, 0.0  ;;  %v6369_v19 = vadd.f32 %v6258_v11, %v6123_v15  ;;  %v21724_v6 = vld [vmem:[#allocation88_spill] sm:$0xff]  ;;  %v21725_v11 = vld [vmem:[#allocation14_spill] sm:$0xff]  ;;  %v21734_v20 = vld [vmem:[#allocation21_spill] sm:$0xff] }
 0x707   : > { %v13340_v60 = vpack.c.bf16 %v19081_v58, %v19081_v58  ;;  %16430 = vtanh.f32 %v21724_v6  ;;  %vm6659_vm8 = vcmp.eq.s32.totalorder %v21725_v11, 1  ;;  %vm6661_vm11 = vcmp.eq.s32.totalorder %v21734_v20, 1  ;;  %v7017_v6 = vld [vmem:[#allocation3 + $0x4] sm:$0xc] }
 0x708   : > { %v19089_v13 = vsel %vm6656_vm13, %v6369_v19, 0.0  ;;  %16432 = vrcp.f32 %v5779_v39  ;;  %v21732_v39 = vld [vmem:[#allocation32_spill] sm:$0xff] }
 0x709   : > { %6871 = vrot.lane.b32.xlu1 %v13340_v60, %s16751_s15  ;;  %6301 = vrot.lane.b32.xlu0 %v6186_v41, %s16751_s15  ;;  %v13341_v55 = vpack.c.bf16 %v19089_v13, %v19089_v13  ;;  %v21726_v60 = vld [vmem:[#allocation19_spill] sm:$0xff]  ;;  %v21727_v41 = vld [vmem:[#allocation42_spill] sm:$0xff]  ;;  %v6129_v33 = vmul.f32 %v21733_v16, %v21732_v39 }
 0x70a   : > { %v6127_v14 = vmul.f32 %v21727_v41, %v21726_v60  ;;  %v21740_v39 = vld [vmem:[#allocation23_spill] sm:$0xff] }
 0x70b   : > { %v6260_v18 = vpop.permute.xlu0 %6259  ;;  %vm6663_vm14 = vcmp.eq.s32.totalorder %v21740_v39, 1 }
 0x70c   : > { %v6370_v50 = vadd.f32 %v6260_v18, %v6124_v61 }
 0x70d   : > { %v6262_v32 = vpop.permute.xlu1 %6261  ;;  %6873 = vrot.lane.b32.xlu0 %v13341_v55, %s16751_s15  ;;  %6303 = vrot.lane.b32.xlu1 %v6187_v37, %s16751_s15  ;;  %v21728_v55 = vld [vmem:[#allocation91_spill] sm:$0xff]  ;;  %v21729_v37 = vld [vmem:[#allocation16_spill] sm:$0xff]  ;;  %v19146_v59 = vpop.eup %16428 }
 0x70e   : > { %v19109_v34 = vsel %vm6657_vm15, %v6370_v50, 0.0  ;;  %v6371_v27 = vadd.f32 %v6262_v32, %v6125_v52  ;;  %16434 = vtanh.f32 %v21728_v55  ;;  %vm6660_vm9 = vcmp.eq.s32.totalorder %v21729_v37, 1  ;;  %v21730_v52 = vld [vmem:[#allocation24_spill] sm:$0xff] }
 0x70f   : > { %v13342_v29 = vpack.c.bf16 %v19109_v34, %v19109_v34  ;;  %16436 = vpow2.f32 %v12864_v12  ;;  %v6128_v32 = vmul.f32 %v21731_v31, %v21730_v52  ;;  %v21776_v55 = vld [vmem:[#allocation84_spill] sm:$0xff] }
 0x710   : > { %v19115_v35 = vsel %vm6658_vm0, %v6371_v27, 0.0  ;;  %16438 = vpow2.f32 %v12865_v4 }
 0x711   : > { %6628 = vperm.xlu0 %15784, %v6516_v17   ;;  %6875 = vrot.lane.b32.xlu1 %v13342_v29, %s16751_s15  ;;  %v13343_v21 = vpack.c.bf16 %v19115_v35, %v19115_v35 }
 0x713   : > { %v6264_v40 = vpop.permute.xlu0 %6263 }
 0x714   : > { %v6372_v15 = vadd.f32 %v6264_v40, %v6126_v25 }
 0x715   : > { %6877 = vrot.lane.b32.xlu0 %v13343_v21, %s16751_s15  ;;  %6631 = vperm.xlu1 %15785, %v6517_v42   ;;  %v16431_v42 = vpop.eup %16430 }
 0x716   : > { %v19127_v19 = vsel %vm6659_vm8, %v6372_v15, 0.0  ;;  %v21735_v15 = vld [vmem:[#allocation28_spill] sm:$0xff]  ;;  %v6188_v12 = vmul.f32 %v16431_v42, %v19146_v59  ;;  %v19159_v60 = vpop.eup %16432 }
 0x717   : > { %v13344_v61 = vpack.c.bf16 %v19127_v19, %v19127_v19  ;;  %v6266_v47 = vpop.permute.xlu0 %6265  ;;  %vm6662_vm12 = vcmp.eq.s32.totalorder %v21735_v15, 1  ;;  %v21741_v15 = vld [vmem:[#allocation35_spill] sm:$0xff] }
 0x718   : > { %v6373_v18 = vadd.f32 %v6266_v47, %v6127_v14  ;;  %v6436_v14 = vld [vmem:[%s21449_s2 + $0x128] sm:$0xff]  ;;  %v21737_v47 = vld [vmem:[#allocation53_spill] sm:$0xff]  ;;  %vm6664_vm15 = vcmp.eq.s32.totalorder %v21741_v15, 1  ;;  %v21749_v15 = vld [vmem:[#allocation66_spill] sm:$0xff] }
 0x719   : > { %6059 = vrot.lane.b32.xlu0 %v5942_v7, %s16751_s15  ;;  %6879 = vrot.lane.b32.xlu1 %v13344_v61, %s16751_s15  ;;  %v16435_v7 = vpop.eup %16434  ;;  %v21736_v61 = vld [vmem:[#allocation27_spill] sm:$0xff]  ;;  %vm6477_vm13 = vcmp.gt.f32.partialorder %v6436_v14, 0.5 }
 0x71a   : > { %v19139_v50 = vsel %vm6660_vm9, %v6373_v18, 0.0  ;;  %v6130_v18 = vmul.f32 %v21737_v47, %v21736_v61  ;;  %v16437_v37 = vpop.eup %16436  ;;  %v6189_v31 = vmul.f32 %v16435_v7, %v19159_v60  ;;  %v6518_v42 = vsel %vm6477_vm13, 1, %v21721_v45  ;;  %v21742_v7 = vld [vmem:[#allocation33_spill] sm:$0xff]  ;;  %v21743_v61 = vld [vmem:[#allocation60_spill] sm:$0xff] }
 0x71b   : > { %v13345_v27 = vpack.c.bf16 %v19139_v50, %v19139_v50  ;;  %v6268_v17 = vpop.permute.xlu1 %6267  ;;  %v6132_v47 = vmul.f32 %v21743_v61, %v21742_v7 }
 0x71c   : > { %v6374_v29 = vadd.f32 %v6268_v17, %v6128_v32 }
 0x71d   : > { %v6270_v25 = vpop.permute.xlu0 %6269  ;;  %6881 = vrot.lane.b32.xlu0 %v13345_v27, %s16751_s15  ;;  %6061 = vrot.lane.b32.xlu1 %v5943_v24, %s16751_s15  ;;  %v21738_v24 = vld [vmem:[#allocation38_spill] sm:$0xff]  ;;  %v21739_v27 = vld [vmem:[#allocation56_spill] sm:$0xff] }
 0x71e   : > { %v19153_v21 = vsel %vm6661_vm11, %v6374_v29, 0.0  ;;  %v6375_v40 = vadd.f32 %v6270_v25, %v6129_v33  ;;  %v6131_v17 = vmul.f32 %v21739_v27, %v21738_v24  ;;  %v6437_v29 = vld [vmem:[%s21449_s2 + $0x130] sm:$0xff]  ;;  %v5780_v33 = vadd.f32 1.0, %v16437_v37  ;;  %v21746_v27 = vld [vmem:[#allocation30_spill] sm:$0xff] }
 0x71f   : > { %v13346_v11 = vpack.c.bf16 %v19153_v21, %v19153_v21  ;;  %vm6478_vm0 = vcmp.gt.f32.partialorder %v6437_v29, 0.5  ;;  %vm6665_vm1 = vcmp.eq.s32.totalorder %v21746_v27, 1 }
 0x720   : > { %v19161_v41 = vsel %vm6662_vm12, %v6375_v40, 0.0  ;;  %v16439_v40 = vpop.eup %16438  ;;  %16440 = vrcp.f32 %v5780_v33  ;;  %v21747_v33 = vld [vmem:[#allocation44_spill] sm:$0xff] }
 0x721   : > { %6883 = vrot.lane.b32.xlu1 %v13346_v11, %s16751_s15  ;;  %6305 = vrot.lane.b32.xlu0 %v6188_v12, %s16751_s15  ;;  %v13347_v4 = vpack.c.bf16 %v19161_v41, %v19161_v41  ;;  %v5781_v14 = vadd.f32 1.0, %v16439_v40  ;;  %16442 = vtanh.f32 %v18950_v56  ;;  %vm6666_vm8 = vcmp.eq.s32.totalorder %v21747_v33, 1  ;;  %v21748_v40 = vld [vmem:[#allocation43_spill] sm:$0xff] }
 0x723   : > { %v6272_v52 = vpop.permute.xlu1 %6271  ;;  %16444 = vrcp.f32 %v5781_v14  ;;  %v5945_v14 = vld [vmem:[%s16801_s28 + $0x130] sm:$0xff] }
 0x724   : > { %v6376_v32 = vadd.f32 %v6272_v52, %v6130_v18  ;;  %v6519_v18 = vsel %vm6478_vm0, 1, %v21721_v45  ;;  %16446 = vtanh.f32 %v18975_v51  ;;  %v21768_v51 = vld [vmem:[#allocation74_spill] sm:$0xff] }
 0x725   : > { %v6274_v16 = vpop.permute.xlu0 %6273  ;;  %6885 = vrot.lane.b32.xlu0 %v13347_v4, %s16751_s15  ;;  %6307 = vrot.lane.b32.xlu1 %v6189_v31, %s16751_s15  ;;  %v21744_v31 = vld [vmem:[#allocation50_spill] sm:$0xff] }
 0x726   : > { %v19181_v20 = vsel %vm6663_vm14, %v6376_v32, 0.0  ;;  %v6377_v25 = vadd.f32 %v6274_v16, %v6131_v17  ;;  %v21745_v32 = vld [vmem:[#allocation62_spill] sm:$0xff]  ;;  %v5944_v16 = vld [vmem:[%s16801_s28 + $0x128] sm:$0xff] }
 0x727   : > { %v13348_v11 = vpack.c.bf16 %v19181_v20, %v19181_v20  ;;  %v6133_v24 = vmul.f32 %v21745_v32, %v21744_v31  ;;  %v21752_v31 = vld [vmem:[#allocation37_spill] sm:$0xff] }
 0x728   : > { %v19187_v12 = vsel %vm6664_vm15, %v6377_v25, 0.0  ;;  %vm6667_vm9 = vcmp.eq.s32.totalorder %v21752_v31, 1  ;;  %v21758_v31 = vld [vmem:[#allocation76_spill] sm:$0xff]  ;;  %vm6672_vm15 = vcmp.eq.s32.totalorder %v21768_v51, 1 }
 0x729   : > { %6634 = vperm.xlu0 %15784, %v6518_v42   ;;  %6887 = vrot.lane.b32.xlu1 %v13348_v11, %s16751_s15  ;;  %v13349_v37 = vpack.c.bf16 %v19187_v12, %v19187_v12  ;;  %v6134_v11 = vmul.f32 %v21749_v15, %v21748_v40 }
 0x72b   : > { %v6276_v4 = vpop.permute.xlu1 %6275 }
 0x72c   : > { %v6378_v52 = vadd.f32 %v6276_v4, %v6132_v47  ;;  %v19216_v47 = vpop.eup %16440  ;;  %v21751_v4 = vld [vmem:[#allocation69_spill] sm:$0xff] }
 0x72d   : > { %v6278_v17 = vpop.permute.xlu0 %6277  ;;  %6889 = vrot.lane.b32.xlu0 %v13349_v37, %s16751_s15  ;;  %6637 = vperm.xlu1 %15785, %v6519_v18   ;;  %v21750_v37 = vld [vmem:[#allocation58_spill] sm:$0xff] }
 0x72e   : > { %v19200_v29 = vsel %vm6665_vm1, %v6378_v52, 0.0  ;;  %v6379_v39 = vadd.f32 %v6278_v17, %v6133_v24  ;;  %v6135_v52 = vmul.f32 %v21751_v4, %v21750_v37  ;;  %v16443_v24 = vpop.eup %16442  ;;  %vm6674_vm1 = vcmp.eq.s32.totalorder %v21776_v55, 1 }
 0x72f   : > { %v13350_v25 = vpack.c.bf16 %v19200_v29, %v19200_v29  ;;  %v6190_v33 = vmul.f32 %v16443_v24, %v19216_v47  ;;  %v21759_v24 = vld [vmem:[#allocation47_spill] sm:$0xff] }
 0x730   : > { %v19207_v42 = vsel %vm6666_vm8, %v6379_v39, 0.0  ;;  %v21753_v39 = vld [vmem:[#allocation54_spill] sm:$0xff]  ;;  %vm6669_vm12 = vcmp.eq.s32.totalorder %v21759_v24, 1  ;;  %v21766_v24 = vld [vmem:[#allocation57_spill] sm:$0xff]  ;;  %vm6974_vm8 = vcmask 519168  }
 0x731   : > { %6063 = vrot.lane.b32.xlu0 %v5944_v16, %s16751_s15  ;;  %6891 = vrot.lane.b32.xlu1 %v13350_v25, %s16751_s15  ;;  %v13351_v7 = vpack.c.bf16 %v19207_v42, %v19207_v42  ;;  %vm6668_vm11 = vcmp.eq.s32.totalorder %v21753_v39, 1  ;;  %v19229_v25 = vpop.eup %16444  ;;  %vm6671_vm14 = vcmp.eq.s32.totalorder %v21766_v24, 1 }
 0x732   : > { %v16447_v15 = vpop.eup %16446 }
 0x733   : > { %v6280_v61 = vpop.permute.xlu1 %6279  ;;  %v6191_v37 = vmul.f32 %v16447_v15, %v19229_v25 }
 0x734   : > { %v6380_v18 = vadd.f32 %v6280_v61, %v6134_v11  ;;  %v21755_v11 = vld [vmem:[#allocation51_spill] sm:$0xff] }
 0x735   : > { %v6282_v32 = vpop.permute.xlu0 %6281  ;;  %6893 = vrot.lane.b32.xlu0 %v13351_v7, %s16751_s15  ;;  %6065 = vrot.lane.b32.xlu1 %v5945_v14, %s16751_s15  ;;  %v21756_v14 = vld [vmem:[#allocation73_spill] sm:$0xff] }
 0x736   : > { %v19223_v27 = vsel %vm6667_vm9, %v6380_v18, 0.0  ;;  %v6381_v17 = vadd.f32 %v6282_v32, %v6135_v52  ;;  %v6136_v7 = vmul.f32 %v21756_v14, %v21755_v11  ;;  %v21757_v52 = vld [vmem:[#allocation70_spill] sm:$0xff]  ;;  %vm6675_vm9 = vcmp.eq.s32.totalorder %v21779_v54, 1  ;;  %v16104_v54 = vld [vmem:[%s21451_s4] sm:$0xff]  }
 0x737   : > { %v13352_v16 = vpack.c.bf16 %v19223_v27, %v19223_v27  ;;  %v6137_v32 = vmul.f32 %v21758_v31, %v21757_v52  ;;  %v21765_v31 = vld [vmem:[#allocation82_spill] sm:$0xff] }
 0x738   : > { %v19231_v40 = vsel %vm6668_vm11, %v6381_v17, 0.0  ;;  %vm7247_vm11 = vcmask 523264  }
 0x739   : > { %21754 = vst [vmem:[#allocation18_spill] sm:$0xff] %v19231_v40  ;;  %6895 = vrot.lane.b32.xlu1 %v13352_v16, %s16751_s15  ;;  %6309 = vrot.lane.b32.xlu0 %v6190_v33, %s16751_s15  ;;  %v13353_v61 = vpack.c.bf16 %v19231_v40, %v19231_v40  ;;  %v21760_v33 = vld [vmem:[#allocation64_spill] sm:$0xff] }
 0x73a   : > { %vm6670_vm13 = vcmp.eq.s32.totalorder %v21760_v33, 1 }
 0x73b   : > { %v6284_v18 = vpop.permute.xlu1 %6283 }
 0x73c   : > { %v6382_v4 = vadd.f32 %v6284_v18, %v6136_v7  ;;  %v21762_v7 = vld [vmem:[#allocation63_spill] sm:$0xff]  ;;  %v21763_v18 = vld [vmem:[#allocation80_spill] sm:$0xff] }
 0x73d   : > { %v6286_v17 = vpop.permute.xlu0 %6285  ;;  %6897 = vrot.lane.b32.xlu0 %v13353_v61, %s16751_s15  ;;  %6311 = vrot.lane.b32.xlu1 %v6191_v37, %s16751_s15  ;;  %v6138_v61 = vmul.f32 %v21763_v18, %v21762_v7  ;;  %v21770_v7 = vld [vmem:[#allocation71_spill] sm:$0xff]  ;;  %v21771_v18 = vld [vmem:[#allocation86_spill] sm:$0xff] }
 0x73e   : > { %v19245_v39 = vsel %vm6669_vm12, %v6382_v4, 0.0  ;;  %v6383_v16 = vadd.f32 %v6286_v17, %v6137_v32  ;;  %v21764_v4 = vld [vmem:[#allocation78_spill] sm:$0xff]  ;;  %vm6676_vm12 = vcmp.eq.s32.totalorder %v18942_v63, 1 }
 0x73f   : > { %v13354_v11 = vpack.c.bf16 %v19245_v39, %v19245_v39  ;;  %v6139_v32 = vmul.f32 %v21765_v31, %v21764_v4  ;;  %v21772_v4 = vld [vmem:[#allocation90_spill] sm:$0xff]  ;;  %v21773_v31 = vld [vmem:[#allocation89_spill] sm:$0xff] }
 0x740   : > { %v19250_v15 = vsel %vm6670_vm13, %v6383_v16, 0.0  ;;  %v6141_v51 = vmul.f32 %v21773_v31, %v21772_v4  ;;  %v21778_v4 = vld [vmem:[#allocation83_spill] sm:$0xff] }
 0x741   : > { %21761 = vst [vmem:[#allocation40_spill] sm:$0xff] %v19250_v15  ;;  %v13355_v14 = vpack.c.bf16 %v19250_v15, %v19250_v15  ;;  %6899 = vrot.lane.b32.xlu1 %v13354_v11, %s16751_s15  ;;  %v6142_v31 = vmul.f32 %v18940_v26, %v21778_v4 }
 0x743   : > { %v6288_v52 = vpop.permute.xlu1 %6287  ;;  %6901 = vrot.lane.b32.xlu0 %v13355_v14, %s16751_s15 }
 0x744   : > { %v6384_v37 = vadd.f32 %v6288_v52, %v6138_v61  ;;  %v6140_v61 = vmul.f32 %v21771_v18, %v21770_v7  ;;  %v7018_v7 = vld [vmem:[#allocation3 + $0x8] sm:$0xf] }
 0x745   : > { %v6290_v17 = vpop.permute.xlu0 %6289 }
 0x746   : > { %v19261_v16 = vsel %vm6671_vm14, %v6384_v37, 0.0  ;;  %v6385_v33 = vadd.f32 %v6290_v17, %v6139_v32  ;;  %v21774_v32 = vld [vmem:[#allocation67_spill] sm:$0xff] }
 0x747   : > { %21767 = vst [vmem:[#allocation14_spill] sm:$0xff] %v19261_v16  ;;  %v13356_v11 = vpack.c.bf16 %v19261_v16, %v19261_v16  ;;  %vm6673_vm0 = vcmp.eq.s32.totalorder %v21774_v32, 1 }
 0x748   : > { %v19266_v56 = vsel %vm6672_vm15, %v6385_v33, 0.0 }
 0x749   : > { %21769 = vst [vmem:[#allocation19_spill] sm:$0xff] %v19266_v56  ;;  %v13357_v14 = vpack.c.bf16 %v19266_v56, %v19266_v56  ;;  %6903 = vrot.lane.b32.xlu1 %v13356_v11, %s16751_s15 }
 0x74b   : > { %v6292_v52 = vpop.permute.xlu1 %6291  ;;  %6905 = vrot.lane.b32.xlu0 %v13357_v14, %s16751_s15 }
 0x74c   : > { %v6386_v37 = vadd.f32 %v6292_v52, %v6140_v61  ;;  %v7067_v61 = vld [vmem:[#allocation3 + $0x4] sm:$0x8]  ;;  %v12963_v52 = vcombine.low %v7017_v6, %v7018_v7 }
 0x74d   : > { %v6294_v24 = vpop.permute.xlu0 %6293  ;;  %v12917_v55 = vcombine.low %v7067_v61, %v7018_v7 }
 0x74e   : > { %v19277_v17 = vsel %vm6673_vm0, %v6386_v37, 0.0  ;;  %v6387_v33 = vadd.f32 %v6294_v24, %v6141_v51  ;;  %v7515_v51 = vshrl.u32 %v12963_v52, 16  ;;  %v7518_v32 = vshll.u32 %v12963_v52, 16 }
 0x74f   : > { %21775 = vst [vmem:[#allocation42_spill] sm:$0xff] %v19277_v17  ;;  %v13358_v11 = vpack.c.bf16 %v19277_v17, %v19277_v17  ;;  %v8006_v10 = vshll.u32 %v12917_v55, 16  ;;  %v7182_v52 = vrot.slane %v12917_v55, 3 }
 0x750   : > { %v19282_v18 = vsel %vm6674_vm1, %v6387_v33, 0.0  ;;  %v7520_v3 = vrot.slane %v7518_v32, 3 }
 0x751   : > { %21777 = vst [vmem:[#allocation16_spill] sm:$0xff] %v19282_v18  ;;  %v13359_v14 = vpack.c.bf16 %v19282_v18, %v19282_v18  ;;  %6907 = vrot.lane.b32.xlu1 %v13358_v11, %s16751_s15  ;;  %v8003_v11 = vshrl.u32 %v12917_v55, 16 }
 0x753   : > { %v6852_v37 = vpop.permute.xlu1 %6851  ;;  %6909 = vrot.lane.b32.xlu0 %v13359_v14, %s16751_s15  ;;  %v7517_v14 = vrot.slane %v7515_v51, 2  ;;  %v8005_v4 = vrot.slane %v8003_v11, 3 }
 0x754   : > { %6975 = vst.msk [vmem:[#allocation3 + $0x10] sm:$0xf] %vm6974_vm8, %v6852_v37 }
 0x755   : > { %v7521_v32 = vor.u32 %v7520_v3, %v7517_v14  ;;  %v16110_v3 = vld [vmem:[%s21451_s4 + $0x8] sm:$0xff]  }
 0x757   : > { %v6854_v24 = vpop.permute.xlu0 %6853  ;;  %v6296_v33 = vpop.permute.xlu1 %6295 }
 0x758   : > { %6976 = vst.msk [vmem:[#allocation3 + $0x14] sm:$0xf] %vm6974_vm8, %v6854_v24  ;;  %v6388_v46 = vadd.f32 %v6296_v33, %v6142_v31  ;;  %v8008_v24 = vrot.slane %v8006_v10, 4 }
 0x75a   : > { %v19293_v6 = vsel %vm6675_vm9, %v6388_v46, 0.0  ;;  %v8009_v10 = vor.u32 %v8008_v24, %v8005_v4 }
 0x75b   : > { %21780 = vst [vmem:[#allocation24_spill] sm:$0xff] %v19293_v6  ;;  %v13360_v7 = vpack.c.bf16 %v19293_v6, %v19293_v6  ;;  %v6052_v61 = vpop.permute.xlu0 %6051  ;;  %v6856_v26 = vpop.permute.xlu1 %6855  ;;  %v16095_v37 = vld [vmem:[#allocation3 + $0xc] sm:$0xff]  }
 0x75c   : > { %6977 = vst.msk [vmem:[#allocation3 + $0x18] sm:$0xf] %vm6974_vm8, %v6856_v26  ;;  %v7183_v31 = vrot.slane %v16095_v37, 3  ;;  %v7523_v46 = vshrl.u32 %v16095_v37, 16  ;;  %v7526_v51 = vshll.u32 %v16095_v37, 16 }
 0x75d   : > { %6911 = vrot.lane.b32.xlu1 %v13360_v7, %s16751_s15  ;;  %v8424_v7 = vld [vmem:[#allocation3 + $0x10] sm:$0xf] }
 0x75e   : > { %v7184_v17 = vsel %vm534_vm2, %v7182_v52, %v7183_v31  ;;  %v7525_v55 = vrot.slane %v7523_v46, 2  ;;  %v7528_v18 = vrot.slane %v7526_v51, 3  ;;  %v8010_v26 = vrot.slane %v7523_v46, 3 }
 0x75f   : > { %v6858_v33 = vpop.permute.xlu0 %6857  ;;  %v6054_v6 = vpop.permute.xlu1 %6053  ;;  %13605 = vmatmul.mubr.msk.bf16.vlgmr.msra.gmra.mrb[0].mxu1 %vm7247_vm11, %v7184_v17  ;;  %v8011_v11 = vrot.slane %v7526_v51, 4  ;;  %v8425_v56 = vld [vmem:[#allocation3 + $0x14] sm:$0xf]  ;;  %v6143_v52 = vmul.f32 %v18998_v9, %v6052_v61 }
 0x760   : > { %6978 = vst.msk [vmem:[#allocation3 + $0x1c] sm:$0xf] %vm6974_vm8, %v6858_v33  ;;  %13608 = vmatprep.mubr.msk.bf16.mxu1 %vm16753_vm10, %v21715_v48  ;;  %13689 = vmatpush3.bf16.msra.mxu1 %v16104_v54  ;;  %v7529_v14 = vor.u32 %v7528_v18, %v7525_v55  ;;  %v19310_v37 = vcombine.low %v8424_v7, %v8425_v56 }
 0x761   : > { %13690 = vmatprep.subr.bf16.mxu1 %v21715_v48  ;;  %v8012_v17 = vor.u32 %v8011_v11, %v8010_v26  ;;  %v6144_v61 = vmul.f32 %v19015_v22, %v6054_v6 }
 0x762   : > { %21781 = vst [vmem:[#allocation46_spill] sm:$0xff] %v19310_v37  ;;  %v19315_v51 = vsel %vm921_vm3, %v7521_v32, %v7529_v14 }
 0x763   : > { %v6860_v4 = vpop.permute.xlu1 %6859  ;;  %v6298_v24 = vpop.permute.xlu0 %6297  ;;  %v16097_v46 = vld [vmem:[#allocation3 + $0x14] sm:$0xff]   ;;  %v19319_v33 = vsel %vm1473_vm4, %v8009_v10, %v8012_v17 }
 0x764   : > { %6979 = vst.msk [vmem:[#allocation3 + $0x20] sm:$0xf] %vm6974_vm8, %v6860_v4  ;;  %v6389_v54 = vadd.f32 %v6298_v24, %v6143_v52  ;;  %21782 = vst [vmem:[#allocation32_spill] sm:$0xff] %v19319_v33  ;;  %v7185_v56 = vrot.slane %v16097_v46, 3  ;;  %13691 = vmatpush3.bf16.msra.mxu1 %v16110_v3  ;;  %v7532_v9 = vshrl.u32 %v16097_v46, 16  ;;  %v7535_v18 = vshll.u32 %v16097_v46, 16 }
 0x765   : > { %13692 = vmatprep.subr.bf16.mxu1 %v21715_v48  ;;  %v8426_v4 = vld [vmem:[#allocation3 + $0x18] sm:$0xf]  ;;  %v21784_v24 = vld [vmem:[#allocation87_spill] sm:$0xff] }
 0x766   : > { %v19323_v55 = vsel %vm6676_vm12, %v6389_v54, 0.0  ;;  %v7186_v10 = vsel %vm534_vm2, %v7183_v31, %v7185_v56  ;;  %v7534_v7 = vrot.slane %v7532_v9, 2  ;;  %v7537_v52 = vrot.slane %v7535_v18, 3 }
 0x767   : > { %21783 = vst [vmem:[#allocation49_spill] sm:$0xff] %v19323_v55  ;;  %v13361_v32 = vpack.c.bf16 %v19323_v55, %v19323_v55  ;;  %v6862_v26 = vpop.permute.xlu0 %6861  ;;  %v6300_v11 = vpop.permute.xlu1 %6299  ;;  %v8427_v63 = vld [vmem:[#allocation3 + $0x1c] sm:$0xf]  ;;  %13609 = vmatmul.mubr.msk.bf16.gmra.mrb[4].mxu1 %vm7247_vm11, %v7186_v10  ;;  %v8014_v22 = vrot.slane %v7532_v9, 3  ;;  %v8015_v6 = vrot.slane %v7535_v18, 4  ;;  %vm6677_vm13 = vcmp.eq.s32.totalorder %v21784_v24, 1 }
 0x768   : > { %6980 = vst.msk [vmem:[#allocation3 + $0x24] sm:$0xf] %vm6974_vm8, %v6862_v26  ;;  %v6390_v3 = vadd.f32 %v6300_v11, %v6144_v61  ;;  %13612 = vmatprep.mubr.msk.bf16.mxu1 %vm16753_vm10, %v21715_v48  ;;  %v7538_v46 = vor.u32 %v7537_v52, %v7534_v7  ;;  %v19335_v31 = vcombine.low %v8426_v4, %v8427_v63  ;;  %v16115_v10 = vld [vmem:[%s21451_s4 + $0x10] sm:$0xff]  }
 0x769   : > { %6913 = vrot.lane.b32.xlu0 %v13361_v32, %s16751_s15  ;;  %v8016_v55 = vor.u32 %v8015_v6, %v8014_v22  ;;  %13693 = vmatpush3.bf16.msra.mxu1 %v16115_v10 }
 0x76a   : > { %21785 = vst [vmem:[#allocation21_spill] sm:$0xff] %v19335_v31  ;;  %v19337_v54 = vsel %vm6677_vm13, %v6390_v3, 0.0  ;;  %v19342_v18 = vsel %vm921_vm3, %v7529_v14, %v7538_v46  ;;  %13694 = vmatprep.subr.bf16.mxu1 %v21715_v48 }
 0x76b   : > { %21786 = vst [vmem:[#allocation28_spill] sm:$0xff] %v19337_v54  ;;  %v13362_v61 = vpack.c.bf16 %v19337_v54, %v19337_v54  ;;  %v6864_v26 = vpop.permute.xlu1 %6863  ;;  %v16098_v9 = vld [vmem:[#allocation3 + $0x1c] sm:$0xff]   ;;  %v19346_v32 = vsel %vm1473_vm4, %v8012_v17, %v8016_v55 }
 0x76c   : > { %6981 = vst.msk [vmem:[#allocation3 + $0x28] sm:$0xf] %vm6974_vm8, %v6864_v26  ;;  %21787 = vst [vmem:[#allocation27_spill] sm:$0xff] %v19346_v32  ;;  %v7187_v11 = vrot.slane %v16098_v9, 3  ;;  %v7541_v7 = vshrl.u32 %v16098_v9, 16  ;;  %v7544_v52 = vshll.u32 %v16098_v9, 16 }
 0x76d   : > { %6915 = vrot.lane.b32.xlu1 %v13362_v61, %s16751_s15  ;;  %v8428_v6 = vld [vmem:[#allocation3 + $0x20] sm:$0xf] }
 0x76e   : > { %v7188_v63 = vsel %vm534_vm2, %v7185_v56, %v7187_v11  ;;  %v7543_v3 = vrot.slane %v7541_v7, 2  ;;  %v7546_v14 = vrot.slane %v7544_v52, 3  ;;  %v8018_v22 = vrot.slane %v7541_v7, 3  ;;  %v9942_v7 = vld [vmem:[#allocation3 + $0x1c] sm:$0xf] }
 0x76f   : > { %13613 = vmatmul.mubr.msk.bf16.gmra.mrb[8].mxu1 %vm7247_vm11, %v7188_v63  ;;  %v8019_v17 = vrot.slane %v7544_v52, 4  ;;  %v8429_v4 = vld [vmem:[#allocation3 + $0x24] sm:$0xf] }
 0x770   : > { %13616 = vmatprep.mubr.msk.bf16.mxu1 %vm16753_vm10, %v21715_v48  ;;  %v7547_v24 = vor.u32 %v7546_v14, %v7543_v3  ;;  %v19357_v61 = vcombine.low %v8428_v6, %v8429_v4  ;;  %v19359_v9 = vld [vmem:[#allocation3 + $0x20] sm:$0xff]   ;;  %v10589_v14 = vld [vmem:[#allocation3 + $0x18] sm:$0xe] }
 0x771   : > { %v8020_v26 = vor.u32 %v8019_v17, %v8018_v22  ;;  %21789 = vst [vmem:[#allocation38_spill] sm:$0xff] %v19359_v9  ;;  %v21540_v22 = vshrl.u32 %v19359_v9, 16  ;;  %v13227_v17 = vcombine.low %v10589_v14, %v9942_v7  ;;  %v10603_v14 = vrot.slane %v19359_v9, 1 }
 0x772   : > { %21788 = vst [vmem:[#allocation53_spill] sm:$0xff] %v19357_v61  ;;  %v19364_v10 = vsel %vm921_vm3, %v7538_v46, %v7547_v24 }
 0x773   : > { %v19361_v56 = vld [vmem:[#allocation3 + $0x24] sm:$0xff]   ;;  %v19367_v63 = vsel %vm1473_vm4, %v8016_v55, %v8020_v26  ;;  %v10992_v7 = vrot.slane %v21540_v22, 1 }
 0x774   : > { %21790 = vst [vmem:[#allocation56_spill] sm:$0xff] %v19367_v63  ;;  %v7189_v52 = vrot.slane %v19361_v56, 3  ;;  %v7550_v54 = vshrl.u32 %v19361_v56, 16  ;;  %v7553_v3 = vshll.u32 %v19361_v56, 16 }
 0x776   : > { %v7190_v6 = vsel %vm534_vm2, %v7187_v11, %v7189_v52  ;;  %v7552_v4 = vrot.slane %v7550_v54, 2  ;;  %v7555_v61 = vrot.slane %v7553_v3, 3  ;;  %v8022_v46 = vrot.slane %v7550_v54, 3 }
 0x777   : > { %13617 = vmatmul.mubr.msk.bf16.gmra.mrb[12].mxu1 %vm7247_vm11, %v7190_v6  ;;  %v8023_v55 = vrot.slane %v7553_v3, 4  ;;  %v10602_v11 = vrot.slane %v13227_v17, 1  ;;  %v10985_v3 = vshrl.u32 %v13227_v17, 16  ;;  %v10988_v6 = vshll.u32 %v13227_v17, 16 }
 0x778   : > { %v6623_v31 = vpop.permute.xlu0 %6622  ;;  %13620 = vmatprep.mubr.msk.bf16.mxu1 %vm16753_vm10, %v21715_v48  ;;  %v19378_v63 = vor.u32 %v7555_v61, %v7552_v4  ;;  %v21792_v4 = vshll.u32 %v19359_v9, 16  ;;  %v8430_v9 = vld [vmem:[#allocation3 + $0x28] sm:$0xf] }
 0x779   : > { %v19380_v56 = vor.u32 %v8023_v55, %v8022_v46  ;;  %v19397_v55 = vsel %vm4615_vm6, %v10602_v11, %v10603_v14  ;;  %v10990_v22 = vrot.slane %v10988_v6, 2  ;;  %vm6678_vm14 = vcmp.eq.s32.totalorder %v6623_v31, 1 }
 0x77a   : > { %v19386_v54 = vsel %vm921_vm3, %v7547_v24, %v19378_v63  ;;  %v10993_v46 = vrot.slane %v21792_v4, 2  ;;  %21793 = vst [vmem:[#allocation35_spill] sm:$0xff] %v19397_v55  ;;  %v10987_v24 = vrot.slane %v10985_v3, 1 }
 0x77b   : > { %v19391_v61 = vsel %vm1473_vm4, %v8020_v26, %v19380_v56 }
 0x77c   : > { %v6866_v37 = vpop.permute.xlu0 %6865  ;;  %v6626_v32 = vpop.permute.xlu1 %6625  ;;  %21791 = vst [vmem:[#allocation23_spill] sm:$0xff] %v19391_v61  ;;  %v19399_v33 = vor.u32 %v10993_v46, %v10992_v7  ;;  %v10991_v15 = vor.u32 %v10990_v22, %v10987_v24 }
 0x77d   : > { %6982 = vst.msk [vmem:[#allocation3 + $0x2c] sm:$0xf] %vm6974_vm8, %v6866_v37  ;;  %vm6679_vm15 = vcmp.eq.s32.totalorder %v6626_v32, 1 }
 0x77e   : > { %21794 = vst [vmem:[#allocation33_spill] sm:$0xff] %v19399_v33  ;;  %v19404_v26 = vsel %vm5102_vm7, %v10991_v15, %v19399_v33 }
 0x77f   : > { %21795 = vst [vmem:[#allocation60_spill] sm:$0xff] %v19404_v26 }
 0x780   : > { %v6056_v17 = vpop.permute.xlu0 %6055  ;;  %v6868_v16 = vpop.permute.xlu1 %6867 }
 0x781   : > { %6983 = vst.msk [vmem:[#allocation3 + $0x30] sm:$0xf] %vm6974_vm8, %v6868_v16  ;;  %v6145_v22 = vmul.f32 %v19074_v53, %v6056_v17 }
 0x784   : > { %v6870_v4 = vpop.permute.xlu0 %6869  ;;  %v6058_v61 = vpop.permute.xlu1 %6057  ;;  %v8431_v37 = vld [vmem:[#allocation3 + $0x2c] sm:$0xf] }
 0x785   : > { %6984 = vst.msk [vmem:[#allocation3 + $0x34] sm:$0xf] %vm6974_vm8, %v6870_v4  ;;  %v19407_v11 = vcombine.low %v8430_v9, %v8431_v37  ;;  %v19409_v3 = vld [vmem:[#allocation3 + $0x28] sm:$0xff]   ;;  %v6146_v4 = vmul.f32 %v19087_v0, %v6058_v61 }
 0x786   : > { %21797 = vst [vmem:[#allocation62_spill] sm:$0xff] %v19409_v3  ;;  %v21546_v16 = vrot.slane %v19409_v3, 1 }
 0x787   : > { %21796 = vst [vmem:[#allocation50_spill] sm:$0xff] %v19407_v11 }
 0x788   : > { %v6872_v7 = vpop.permute.xlu1 %6871  ;;  %v6302_v6 = vpop.permute.xlu0 %6301  ;;  %v16100_v46 = vld [vmem:[#allocation3 + $0x2c] sm:$0xff]   ;;  %v19417_v9 = vsel %vm4615_vm6, %v10603_v14, %v21546_v16 }
 0x789   : > { %6985 = vst.msk [vmem:[#allocation3 + $0x38] sm:$0xf] %vm6974_vm8, %v6872_v7  ;;  %v6391_v15 = vadd.f32 %v6302_v6, %v6145_v22  ;;  %v7191_v24 = vrot.slane %v16100_v46, 3  ;;  %v7559_v33 = vshrl.u32 %v16100_v46, 16  ;;  %v7562_v26 = vshll.u32 %v16100_v46, 16  ;;  %21798 = vst [vmem:[#allocation30_spill] sm:$0xff] %v19417_v9 }
 0x78a   : > { %v8432_v0 = vld [vmem:[#allocation3 + $0x30] sm:$0xf] }
 0x78b   : > { %v19420_v53 = vsel %vm6678_vm14, %v6391_v15, 0.0  ;;  %v7192_v7 = vsel %vm534_vm2, %v7189_v52, %v7191_v24  ;;  %v7561_v22 = vrot.slane %v7559_v33, 2  ;;  %v7564_v6 = vrot.slane %v7562_v26, 3 }
 0x78c   : > { %21799 = vst [vmem:[#allocation44_spill] sm:$0xff] %v19420_v53  ;;  %v13363_v17 = vpack.c.bf16 %v19420_v53, %v19420_v53  ;;  %v6874_v37 = vpop.permute.xlu0 %6873  ;;  %v6304_v31 = vpop.permute.xlu1 %6303  ;;  %v8433_v55 = vld [vmem:[#allocation3 + $0x34] sm:$0xf]  ;;  %13621 = vmatmul.mubr.msk.bf16.gmra.mrb[16].mxu1 %vm7247_vm11, %v7192_v7  ;;  %v8026_v14 = vrot.slane %v7559_v33, 3  ;;  %v8027_v16 = vrot.slane %v7562_v26, 4 }
 0x78d   : > { %6986 = vst.msk [vmem:[#allocation3 + $0x3c] sm:$0xf] %vm6974_vm8, %v6874_v37  ;;  %v6392_v46 = vadd.f32 %v6304_v31, %v6146_v4  ;;  %13624 = vmatprep.mubr.msk.bf16.mxu1 %vm16753_vm10, %v21715_v48  ;;  %v7565_v61 = vor.u32 %v7564_v6, %v7561_v22  ;;  %v19430_v15 = vcombine.low %v8432_v0, %v8433_v55 }
 0x78e   : > { %6917 = vrot.lane.b32.xlu0 %v13363_v17, %s16751_s15  ;;  %v8028_v53 = vor.u32 %v8027_v16, %v8026_v14 }
 0x78f   : > { %21800 = vst [vmem:[#allocation43_spill] sm:$0xff] %v19430_v15  ;;  %v19432_v52 = vsel %vm6679_vm15, %v6392_v46, 0.0  ;;  %v19440_v32 = vsel %vm921_vm3, %v19378_v63, %v7565_v61  ;;  %vm7015_vm15 = vcmask 517120  }
 0x790   : > { %21801 = vst [vmem:[#allocation66_spill] sm:$0xff] %v19432_v52  ;;  %v13364_v4 = vpack.c.bf16 %v19432_v52, %v19432_v52  ;;  %v19436_v37 = vpop.permute.xlu0 %6628  ;;  %v6876_v33 = vpop.permute.xlu1 %6875  ;;  %v16101_v26 = vld [vmem:[#allocation3 + $0x34] sm:$0xff]   ;;  %v19445_v55 = vsel %vm1473_vm4, %v19380_v56, %v8028_v53 }
 0x791   : > { %6987 = vst.msk [vmem:[#allocation3 + $0x40] sm:$0xf] %vm6974_vm8, %v6876_v33  ;;  %21802 = vst [vmem:[#allocation58_spill] sm:$0xff] %v19445_v55  ;;  %v7193_v16 = vrot.slane %v16101_v26, 3  ;;  %v7568_v17 = vshrl.u32 %v16101_v26, 16  ;;  %v7571_v31 = vshll.u32 %v16101_v26, 16 }
 0x792   : > { %6919 = vrot.lane.b32.xlu1 %v13364_v4, %s16751_s15  ;;  %v8434_v56 = vld [vmem:[#allocation3 + $0x38] sm:$0xf]  ;;  %vm6680_vm0 = vcmp.eq.s32.totalorder %v19436_v37, 1 }
 0x793   : > { %v7194_v6 = vsel %vm534_vm2, %v7191_v24, %v7193_v16  ;;  %v7570_v46 = vrot.slane %v7568_v17, 2  ;;  %v7573_v14 = vrot.slane %v7571_v31, 3  ;;  %v8030_v63 = vrot.slane %v7568_v17, 3 }
 0x794   : > { %v6878_v7 = vpop.permute.xlu0 %6877  ;;  %v19448_v22 = vpop.permute.xlu1 %6631  ;;  %13625 = vmatmul.mubr.msk.bf16.gmra.mrb[20].mxu1 %vm7247_vm11, %v7194_v6  ;;  %v8031_v0 = vrot.slane %v7571_v31, 4  ;;  %v8435_v33 = vld [vmem:[#allocation3 + $0x3c] sm:$0xf] }
 0x795   : > { %6988 = vst.msk [vmem:[#allocation3 + $0x44] sm:$0xf] %vm6974_vm8, %v6878_v7  ;;  %13628 = vmatprep.mubr.msk.bf16.mxu1 %vm16753_vm10, %v21715_v48  ;;  %v7574_v4 = vor.u32 %v7573_v14, %v7570_v46  ;;  %v19455_v26 = vcombine.low %v8434_v56, %v8435_v33  ;;  %vm6681_vm1 = vcmp.eq.s32.totalorder %v19448_v22, 1 }
 0x796   : > { %v8032_v52 = vor.u32 %v8031_v0, %v8030_v63 }
 0x797   : > { %21803 = vst [vmem:[#allocation69_spill] sm:$0xff] %v19455_v26  ;;  %v19458_v15 = vsel %vm921_vm3, %v7565_v61, %v7574_v4 }
 0x798   : > { %v6060_v3 = vpop.permute.xlu0 %6059  ;;  %v6880_v9 = vpop.permute.xlu1 %6879  ;;  %v16102_v24 = vld [vmem:[#allocation3 + $0x3c] sm:$0xff]   ;;  %v19462_v17 = vsel %vm1473_vm4, %v8028_v53, %v8032_v52 }
 0x799   : > { %6989 = vst.msk [vmem:[#allocation3 + $0x48] sm:$0xf] %vm6974_vm8, %v6880_v9  ;;  %21804 = vst [vmem:[#allocation37_spill] sm:$0xff] %v19462_v17  ;;  %v7195_v31 = vrot.slane %v16102_v24, 3  ;;  %v7577_v7 = vshrl.u32 %v16102_v24, 16  ;;  %v7580_v6 = vshll.u32 %v16102_v24, 16 }
 0x79a   : > { %v16117_v9 = vld [vmem:[%s21451_s4 + $0x18] sm:$0xff]   ;;  %v8436_v61 = vld [vmem:[#allocation3 + $0x40] sm:$0xf] }
 0x79b   : > { %v7196_v46 = vsel %vm534_vm2, %v7193_v16, %v7195_v31  ;;  %v7579_v14 = vrot.slane %v7577_v7, 2  ;;  %v7582_v63 = vrot.slane %v7580_v6, 3  ;;  %v8034_v0 = vrot.slane %v7577_v7, 3  ;;  %13695 = vmatpush3.bf16.msra.mxu1 %v16117_v9 }
 0x79c   : > { %v6882_v11 = vpop.permute.xlu0 %6881  ;;  %v6062_v55 = vpop.permute.xlu1 %6061  ;;  %13629 = vmatmul.mubr.msk.bf16.gmra.mrb[24].mxu1 %vm7247_vm11, %v7196_v46  ;;  %v8035_v53 = vrot.slane %v7580_v6, 4  ;;  %v8437_v56 = vld [vmem:[#allocation3 + $0x44] sm:$0xf]  ;;  %v6147_v16 = vmul.f32 %v19146_v59, %v6060_v3  ;;  %13780 = vmatprep.subr.bf16.mxu1 %v21715_v48 }
 0x79d   : > { %6990 = vst.msk [vmem:[#allocation3 + $0x4c] sm:$0xf] %vm6974_vm8, %v6882_v11  ;;  %13632 = vmatprep.mubr.msk.bf16.mxu1 %vm16753_vm10, %v21715_v48  ;;  %v7583_v33 = vor.u32 %v7582_v63, %v7579_v14  ;;  %v19472_v24 = vcombine.low %v8436_v61, %v8437_v56  ;;  %v12866_v63 = vmul.f32 -1.442695, %v18979_v49 }
 0x79e   : > { %v8036_v7 = vor.u32 %v8035_v53, %v8034_v0  ;;  %v6148_v0 = vmul.f32 %v19159_v60, %v6062_v55 }
 0x79f   : > { %21805 = vst [vmem:[#allocation54_spill] sm:$0xff] %v19472_v24  ;;  %v19477_v17 = vsel %vm921_vm3, %v7574_v4, %v7583_v33  ;;  %16448 = vpow2.f32 %v12866_v63 }
 0x7a0   : > { %v6884_v11 = vpop.permute.xlu1 %6883  ;;  %v6306_v26 = vpop.permute.xlu0 %6305  ;;  %v16103_v46 = vld [vmem:[#allocation3 + $0x44] sm:$0xff]   ;;  %v19481_v40 = vsel %vm1473_vm4, %v8032_v52, %v8036_v7 }
 0x7a1   : > { %6991 = vst.msk [vmem:[#allocation3 + $0x50] sm:$0xf] %vm6974_vm8, %v6884_v11  ;;  %v6393_v6 = vadd.f32 %v6306_v26, %v6147_v16  ;;  %21806 = vst [vmem:[#allocation51_spill] sm:$0xff] %v19481_v40  ;;  %v7197_v14 = vrot.slane %v16103_v46, 3  ;;  %v7586_v59 = vshrl.u32 %v16103_v46, 16  ;;  %v7589_v3 = vshll.u32 %v16103_v46, 16 }
 0x7a2   : > { %v8438_v60 = vld [vmem:[#allocation3 + $0x48] sm:$0xf] }
 0x7a3   : > { %v19486_v9 = vsel %vm6680_vm0, %v6393_v6, 0.0  ;;  %v7198_v26 = vsel %vm534_vm2, %v7195_v31, %v7197_v14  ;;  %v7588_v52 = vrot.slane %v7586_v59, 2  ;;  %v7591_v56 = vrot.slane %v7589_v3, 3 }
 0x7a4   : > { %21807 = vst [vmem:[#allocation73_spill] sm:$0xff] %v19486_v9  ;;  %v13365_v4 = vpack.c.bf16 %v19486_v9, %v19486_v9  ;;  %v6886_v53 = vpop.permute.xlu0 %6885  ;;  %v6308_v61 = vpop.permute.xlu1 %6307  ;;  %v8439_v16 = vld [vmem:[#allocation3 + $0x4c] sm:$0xf]  ;;  %13633 = vmatmul.mubr.msk.bf16.gmra.mrb[28].mxu1 %vm7247_vm11, %v7198_v26  ;;  %v8038_v49 = vrot.slane %v7586_v59, 3  ;;  %v8039_v11 = vrot.slane %v7589_v3, 4 }
 0x7a5   : > { %6992 = vst.msk [vmem:[#allocation3 + $0x54] sm:$0xf] %vm6974_vm8, %v6886_v53  ;;  %v6394_v37 = vadd.f32 %v6308_v61, %v6148_v0  ;;  %13636 = vmatprep.mubr.msk.bf16.mxu1 %vm16753_vm10, %v21715_v48  ;;  %v7592_v55 = vor.u32 %v7591_v56, %v7588_v52  ;;  %v19497_v31 = vcombine.low %v8438_v60, %v8439_v16  ;;  %v12867_v61 = vmul.f32 -1.442695, %v19000_v36 }
 0x7a6   : > { %6921 = vrot.lane.b32.xlu0 %v13365_v4, %s16751_s15  ;;  %v8040_v6 = vor.u32 %v8039_v11, %v8038_v49 }
 0x7a7   : > { %21808 = vst [vmem:[#allocation70_spill] sm:$0xff] %v19497_v31  ;;  %v19499_v46 = vsel %vm6681_vm1, %v6394_v37, 0.0  ;;  %v19506_v22 = vsel %vm921_vm3, %v7583_v33, %v7592_v55  ;;  %16450 = vpow2.f32 %v12867_v61 }
 0x7a8   : > { %21809 = vst [vmem:[#allocation76_spill] sm:$0xff] %v19499_v46  ;;  %v13366_v0 = vpack.c.bf16 %v19499_v46, %v19499_v46  ;;  %v19503_v59 = vpop.permute.xlu0 %6634  ;;  %v6888_v3 = vpop.permute.xlu1 %6887  ;;  %v16105_v53 = vld [vmem:[#allocation3 + $0x4c] sm:$0xff]   ;;  %21810 = vst [vmem:[#allocation47_spill] sm:$0xff] %v19506_v22  ;;  %v19510_v4 = vsel %vm1473_vm4, %v8036_v7, %v8040_v6 }
 0x7a9   : > { %6993 = vst.msk [vmem:[#allocation3 + $0x58] sm:$0xf] %vm6974_vm8, %v6888_v3  ;;  %21811 = vst [vmem:[#allocation64_spill] sm:$0xff] %v19510_v4  ;;  %v7199_v63 = vrot.slane %v16105_v53, 3  ;;  %v7595_v26 = vshrl.u32 %v16105_v53, 16  ;;  %v7598_v52 = vshll.u32 %v16105_v53, 16 }
 0x7aa   : > { %6923 = vrot.lane.b32.xlu1 %v13366_v0, %s16751_s15  ;;  %v8440_v60 = vld [vmem:[#allocation3 + $0x50] sm:$0xf]  ;;  %vm6682_vm9 = vcmp.eq.s32.totalorder %v19503_v59, 1 }
 0x7ab   : > { %v7200_v37 = vsel %vm534_vm2, %v7197_v14, %v7199_v63  ;;  %v7597_v49 = vrot.slane %v7595_v26, 2  ;;  %v7600_v33 = vrot.slane %v7598_v52, 3  ;;  %v8042_v11 = vrot.slane %v7595_v26, 3 }
 0x7ac   : > { %v6890_v56 = vpop.permute.xlu0 %6889  ;;  %v19514_v16 = vpop.permute.xlu1 %6637  ;;  %13637 = vmatmul.mubr.msk.bf16.gmra.mrb[32].mxu1 %vm7247_vm11, %v7200_v37  ;;  %v8043_v7 = vrot.slane %v7598_v52, 4  ;;  %v8441_v36 = vld [vmem:[#allocation3 + $0x54] sm:$0xf] }
 0x7ad   : > { %6994 = vst.msk [vmem:[#allocation3 + $0x5c] sm:$0xf] %vm6974_vm8, %v6890_v56  ;;  %13640 = vmatprep.mubr.msk.bf16.mxu1 %vm16753_vm10, %v21715_v48  ;;  %v7601_v0 = vor.u32 %v7600_v33, %v7597_v49  ;;  %v19521_v3 = vcombine.low %v8440_v60, %v8441_v36  ;;  %v16449_v56 = vpop.eup %16448  ;;  %vm6683_vm13 = vcmp.eq.s32.totalorder %v19514_v16, 1 }
 0x7ae   : > { %v8044_v53 = vor.u32 %v8043_v7, %v8042_v11  ;;  %v5782_v36 = vadd.f32 1.0, %v16449_v56 }
 0x7af   : > { %21812 = vst [vmem:[#allocation63_spill] sm:$0xff] %v19521_v3  ;;  %v19524_v26 = vsel %vm921_vm3, %v7592_v55, %v7601_v0 }
 0x7b0   : > { %v6064_v46 = vpop.permute.xlu0 %6063  ;;  %v6892_v14 = vpop.permute.xlu1 %6891  ;;  %v16106_v9 = vld [vmem:[#allocation3 + $0x54] sm:$0xff]   ;;  %21813 = vst [vmem:[#allocation80_spill] sm:$0xff] %v19524_v26  ;;  %v19528_v52 = vsel %vm1473_vm4, %v8040_v6, %v8044_v53  ;;  %16452 = vrcp.f32 %v5782_v36 }
 0x7b1   : > { %6995 = vst.msk [vmem:[#allocation3 + $0x60] sm:$0xf] %vm6974_vm8, %v6892_v14  ;;  %21814 = vst [vmem:[#allocation78_spill] sm:$0xff] %v19528_v52  ;;  %v7201_v61 = vrot.slane %v16106_v9, 3  ;;  %v7604_v37 = vshrl.u32 %v16106_v9, 16  ;;  %v7607_v31 = vshll.u32 %v16106_v9, 16  ;;  %v6149_v52 = vmul.f32 %v19216_v47, %v6064_v46  ;;  %v16451_v4 = vpop.eup %16450 }
 0x7b2   : > { %v8442_v14 = vld [vmem:[#allocation3 + $0x58] sm:$0xf]  ;;  %16454 = vtanh.f32 %v18983_v5 }
 0x7b3   : > { %v7202_v33 = vsel %vm534_vm2, %v7199_v63, %v7201_v61  ;;  %v7606_v11 = vrot.slane %v7604_v37, 2  ;;  %v7609_v7 = vrot.slane %v7607_v31, 3  ;;  %v8046_v60 = vrot.slane %v7604_v37, 3 }
 0x7b4   : > { %v6894_v24 = vpop.permute.xlu0 %6893  ;;  %v6066_v49 = vpop.permute.xlu1 %6065  ;;  %13641 = vmatmul.mubr.msk.bf16.gmra.mrb[36].mxu1 %vm7247_vm11, %v7202_v33  ;;  %v8047_v55 = vrot.slane %v7607_v31, 4  ;;  %v8443_v6 = vld [vmem:[#allocation3 + $0x5c] sm:$0xf] }
 0x7b5   : > { %6996 = vst.msk [vmem:[#allocation3 + $0x64] sm:$0xf] %vm6974_vm8, %v6894_v24  ;;  %13644 = vmatprep.mubr.msk.bf16.mxu1 %vm16753_vm10, %v21715_v48  ;;  %v7610_v3 = vor.u32 %v7609_v7, %v7606_v11  ;;  %v19535_v9 = vcombine.low %v8442_v14, %v8443_v6  ;;  %v6438_v24 = vld [vmem:[%s21449_s2 + $0x138] sm:$0xff] }
 0x7b6   : > { %v8048_v63 = vor.u32 %v8047_v55, %v8046_v60  ;;  %v5783_v60 = vadd.f32 1.0, %v16451_v4  ;;  %v6150_v55 = vmul.f32 %v19229_v25, %v6066_v49  ;;  %vm6479_vm12 = vcmp.gt.f32.partialorder %v6438_v24, 0.5 }
 0x7b7   : > { %21815 = vst [vmem:[#allocation82_spill] sm:$0xff] %v19535_v9  ;;  %v19542_v31 = vsel %vm921_vm3, %v7601_v0, %v7610_v3  ;;  %v6439_v0 = vld [vmem:[%s21449_s2 + $0x140] sm:$0xf] }
 0x7b8   : > { %v6896_v40 = vpop.permute.xlu1 %6895  ;;  %v6310_v37 = vpop.permute.xlu0 %6309  ;;  %v16107_v56 = vld [vmem:[#allocation3 + $0x5c] sm:$0xff]   ;;  %21816 = vst [vmem:[#allocation57_spill] sm:$0xff] %v19542_v31  ;;  %v19546_v11 = vsel %vm1473_vm4, %v8044_v53, %v8048_v63  ;;  %16456 = vrcp.f32 %v5783_v60  ;;  %vm6480_vm14 = vcmp.gt.f32.partialorder %v6439_v0, 0.5  ;;  %v5946_v0 = vld [vmem:[%s16801_s28 + $0x138] sm:$0xff] }
 0x7b9   : > { %6997 = vst.msk [vmem:[#allocation3 + $0x68] sm:$0xf] %vm6974_vm8, %v6896_v40  ;;  %v6395_v33 = vadd.f32 %v6310_v37, %v6149_v52  ;;  %21817 = vst [vmem:[#allocation74_spill] sm:$0xff] %v19546_v11  ;;  %v7203_v47 = vrot.slane %v16107_v56, 3  ;;  %v7613_v46 = vshrl.u32 %v16107_v56, 16  ;;  %v7616_v7 = vshll.u32 %v16107_v56, 16 }
 0x7ba   : > { %v8444_v56 = vld [vmem:[#allocation3 + $0x60] sm:$0xf]  ;;  %16458 = vtanh.f32 %v19007_v8 }
 0x7bb   : > { %v19550_v14 = vsel %vm6682_vm9, %v6395_v33, 0.0  ;;  %v7204_v59 = vsel %vm534_vm2, %v7201_v61, %v7203_v47  ;;  %v7615_v36 = vrot.slane %v7613_v46, 2  ;;  %v7618_v6 = vrot.slane %v7616_v7, 3 }
 0x7bc   : > { %21818 = vst [vmem:[#allocation71_spill] sm:$0xff] %v19550_v14  ;;  %v13367_v40 = vpack.c.bf16 %v19550_v14, %v19550_v14  ;;  %v6898_v53 = vpop.permute.xlu0 %6897  ;;  %v6312_v52 = vpop.permute.xlu1 %6311  ;;  %v8445_v37 = vld [vmem:[#allocation3 + $0x64] sm:$0xf]  ;;  %13645 = vmatmul.mubr.msk.bf16.gmra.mrb[40].mxu1 %vm7247_vm11, %v7204_v59  ;;  %v8050_v4 = vrot.slane %v7613_v46, 3  ;;  %v8051_v49 = vrot.slane %v7616_v7, 4 }
 0x7bd   : > { %6998 = vst.msk [vmem:[#allocation3 + $0x6c] sm:$0xf] %vm6974_vm8, %v6898_v53  ;;  %v6396_v25 = vadd.f32 %v6312_v52, %v6150_v55  ;;  %13648 = vmatprep.mubr.msk.bf16.mxu1 %vm16753_vm10, %v21715_v48  ;;  %v7619_v61 = vor.u32 %v7618_v6, %v7615_v36  ;;  %v19565_v33 = vcombine.low %v8444_v56, %v8445_v37  ;;  %v6520_v55 = vsel %vm6479_vm12, 1, %v21721_v45  ;;  %v19583_v6 = vpop.eup %16452 }
 0x7be   : > { %6925 = vrot.lane.b32.xlu0 %v13367_v40, %s16751_s15  ;;  %v8052_v53 = vor.u32 %v8051_v49, %v8050_v4 }
 0x7bf   : > { %21819 = vst [vmem:[#allocation86_spill] sm:$0xff] %v19565_v33  ;;  %v19567_v5 = vsel %vm6683_vm13, %v6396_v25, 0.0  ;;  %v19574_v52 = vsel %vm921_vm3, %v7610_v3, %v7619_v61  ;;  %v6521_v3 = vsel %vm6480_vm14, 1, %v21721_v45 }
 0x7c0   : > { %21820 = vst [vmem:[#allocation90_spill] sm:$0xff] %v19567_v5  ;;  %v13368_v46 = vpack.c.bf16 %v19567_v5, %v19567_v5  ;;  %v6902_v16 = vpop.permute.xlu0 %6901  ;;  %v6900_v7 = vpop.permute.xlu1 %6899  ;;  %v16108_v40 = vld [vmem:[#allocation3 + $0x64] sm:$0xff]   ;;  %21821 = vst [vmem:[#allocation89_spill] sm:$0xff] %v19574_v52  ;;  %v19580_v24 = vsel %vm1473_vm4, %v8048_v63, %v8052_v53 }
 0x7c1   : > { %7000 = vst.msk [vmem:[#allocation3 + $0x74] sm:$0xf] %vm6974_vm8, %v6902_v16  ;;  %6999 = vst.msk [vmem:[#allocation3 + $0x70] sm:$0xf] %vm6974_vm8, %v6900_v7  ;;  %v7205_v60 = vrot.slane %v16108_v40, 3  ;;  %v7622_v59 = vshrl.u32 %v16108_v40, 16 }
 0x7c2   : > { %21822 = vst [vmem:[#allocation67_spill] sm:$0xff] %v19580_v24  ;;  %6640 = vperm.xlu0 %15784, %v6520_v55   ;;  %6927 = vrot.lane.b32.xlu1 %v13368_v46, %s16751_s15  ;;  %v7625_v36 = vshll.u32 %v16108_v40, 16  ;;  %v8446_v46 = vld [vmem:[#allocation3 + $0x68] sm:$0xf]  ;;  %v16455_v40 = vpop.eup %16454 }
 0x7c3   : > { %v7206_v4 = vsel %vm534_vm2, %v7203_v47, %v7205_v60  ;;  %v7624_v49 = vrot.slane %v7622_v59, 2  ;;  %v8054_v63 = vrot.slane %v7622_v59, 3  ;;  %v5947_v47 = vld [vmem:[%s16801_s28 + $0x140] sm:$0xf]  ;;  %v19601_v5 = vpop.eup %16456 }
 0x7c4   : > { %v6906_v37 = vpop.permute.xlu0 %6905  ;;  %v6904_v25 = vpop.permute.xlu1 %6903  ;;  %v7627_v56 = vrot.slane %v7625_v36, 3  ;;  %13649 = vmatmul.mubr.msk.bf16.gmra.mrb[44].mxu1 %vm7247_vm11, %v7206_v4  ;;  %v8055_v55 = vrot.slane %v7625_v36, 4  ;;  %v8447_v16 = vld [vmem:[#allocation3 + $0x6c] sm:$0xf] }
 0x7c5   : > { %7002 = vst.msk [vmem:[#allocation3 + $0x7c] sm:$0xf] %vm6974_vm8, %v6906_v37  ;;  %7001 = vst.msk [vmem:[#allocation3 + $0x78] sm:$0xf] %vm6974_vm8, %v6904_v25  ;;  %v19592_v7 = vcombine.low %v8446_v46, %v8447_v16  ;;  %13652 = vmatprep.mubr.msk.bf16.mxu1 %vm16753_vm10, %v21715_v48  ;;  %v6192_v25 = vmul.f32 %v16455_v40, %v19583_v6 }
 0x7c6   : > { %6067 = vrot.lane.b32.xlu0 %v5946_v0, %s16751_s15  ;;  %6643 = vperm.xlu1 %15785, %v6521_v3   ;;  %v7628_v45 = vor.u32 %v7627_v56, %v7624_v49  ;;  %v8056_v59 = vor.u32 %v8055_v55, %v8054_v63 }
 0x7c7   : > { %21823 = vst [vmem:[#allocation84_spill] sm:$0xff] %v19592_v7 }
 0x7c8   : > { %v6910_v37 = vpop.permute.xlu0 %6909  ;;  %v6908_v8 = vpop.permute.xlu1 %6907  ;;  %v16109_v4 = vld [vmem:[#allocation3 + $0x6c] sm:$0xff]   ;;  %v19599_v36 = vsel %vm921_vm3, %v7619_v61, %v7628_v45  ;;  %v19606_v0 = vsel %vm1473_vm4, %v8052_v53, %v8056_v59  ;;  %v8449_v49 = vld [vmem:[#allocation3 + $0x74] sm:$0xf] }
 0x7c9   : > { %21824 = vst [vmem:[#allocation83_spill] sm:$0xff] %v19599_v36  ;;  %7004 = vst.msk [vmem:[#allocation3 + $0x84] sm:$0xf] %vm6974_vm8, %v6910_v37  ;;  %v8448_v3 = vld [vmem:[#allocation3 + $0x70] sm:$0xf]  ;;  %v7207_v56 = vrot.slane %v16109_v4, 3  ;;  %v16459_v61 = vpop.eup %16458 }
 0x7ca   : > { %7003 = vst.msk [vmem:[#allocation3 + $0x80] sm:$0xf] %vm6974_vm8, %v6908_v8  ;;  %21825 = vst [vmem:[#allocation77_spill] sm:$0xff] %v19606_v0  ;;  %6069 = vrot.lane.b32.xlu1 %v5947_v47, %s16751_s15  ;;  %6313 = vrot.lane.b32.xlu0 %v6192_v25, %s16751_s15  ;;  %v7631_v63 = vshrl.u32 %v16109_v4, 16  ;;  %v7634_v55 = vshll.u32 %v16109_v4, 16  ;;  %v19610_v46 = vcombine.low %v8448_v3, %v8449_v49 }
 0x7cb   : > { %v7208_v16 = vsel %vm534_vm2, %v7205_v60, %v7207_v56  ;;  %v6193_v40 = vmul.f32 %v16459_v61, %v19601_v5 }
 0x7cc   : > { %21826 = vst [vmem:[#allocation87_spill] sm:$0xff] %v19610_v46  ;;  %v16111_v8 = vld [vmem:[#allocation3 + $0x74] sm:$0xff]   ;;  %v7633_v37 = vrot.slane %v7631_v63, 2  ;;  %13653 = vmatmul.mubr.msk.bf16.gmra.mrb[48].mxu1 %vm7247_vm11, %v7208_v16  ;;  %v7636_v53 = vrot.slane %v7634_v55, 3  ;;  %v8058_v14 = vrot.slane %v7631_v63, 3  ;;  %v8059_v7 = vrot.slane %v7634_v55, 4 }
 0x7cd   : > { %v8450_v47 = vld [vmem:[#allocation3 + $0x78] sm:$0xf]  ;;  %13656 = vmatprep.mubr.msk.bf16.mxu1 %vm16753_vm10, %v21715_v48  ;;  %v7640_v25 = vshrl.u32 %v16111_v8, 16  ;;  %v7643_v4 = vshll.u32 %v16111_v8, 16  ;;  %v8451_v3 = vld [vmem:[#allocation3 + $0x7c] sm:$0xf] }
 0x7ce   : > { %6315 = vrot.lane.b32.xlu1 %v6193_v40, %s16751_s15  ;;  %v7209_v60 = vrot.slane %v16111_v8, 3  ;;  %v7637_v46 = vor.u32 %v7636_v53, %v7633_v37  ;;  %v8060_v61 = vor.u32 %v8059_v7, %v8058_v14  ;;  %v19619_v9 = vcombine.low %v8450_v47, %v8451_v3 }
 0x7cf   : > { %v6912_v49 = vpop.permute.xlu1 %6911  ;;  %v7642_v16 = vrot.slane %v7640_v25, 2  ;;  %v7645_v55 = vrot.slane %v7643_v4, 3  ;;  %v8062_v0 = vrot.slane %v7640_v25, 3  ;;  %v8063_v36 = vrot.slane %v7643_v4, 4 }
 0x7d0   : > { %7005 = vst.msk [vmem:[#allocation3 + $0x88] sm:$0xf] %vm6974_vm8, %v6912_v49  ;;  %21827 = vst [vmem:[#allocation96_spill] sm:$0xff] %v19619_v9  ;;  %v19622_v63 = vsel %vm921_vm3, %v7628_v45, %v7637_v46  ;;  %v19625_v40 = vsel %vm1473_vm4, %v8056_v59, %v8060_v61  ;;  %v7210_v14 = vsel %vm534_vm2, %v7207_v56, %v7209_v60  ;;  %v8453_v47 = vld [vmem:[#allocation3 + $0x84] sm:$0xf] }
 0x7d1   : > { %v16112_v33 = vld [vmem:[#allocation3 + $0x7c] sm:$0xff]   ;;  %21828 = vst [vmem:[#allocation97_spill] sm:$0xff] %v19622_v63  ;;  %21829 = vst [vmem:[#allocation98_spill] sm:$0xff] %v19625_v40  ;;  %v7646_v8 = vor.u32 %v7645_v55, %v7642_v16  ;;  %v8064_v49 = vor.u32 %v8063_v36, %v8062_v0 }
 0x7d2   : > { %v7649_v24 = vshrl.u32 %v16112_v33, 16  ;;  %v7652_v11 = vshll.u32 %v16112_v33, 16  ;;  %v8452_v37 = vld [vmem:[#allocation3 + $0x80] sm:$0xf]  ;;  %v7211_v36 = vrot.slane %v16112_v33, 3 }
 0x7d3   : > { %v19630_v45 = vsel %vm921_vm3, %v7637_v46, %v7646_v8  ;;  %v19635_v4 = vsel %vm1473_vm4, %v8060_v61, %v8064_v49  ;;  %v19637_v55 = vcombine.low %v8452_v37, %v8453_v47 }
 0x7d4   : > { %v7651_v7 = vrot.slane %v7649_v24, 2  ;;  %v7654_v53 = vrot.slane %v7652_v11, 3  ;;  %13657 = vmatmul.mubr.msk.bf16.gmra.mrb[52].mxu1 %vm7247_vm11, %v7210_v14  ;;  %21830 = vst [vmem:[#allocation99_spill] sm:$0xff] %v19630_v45  ;;  %v8066_v3 = vrot.slane %v7649_v24, 3  ;;  %v8067_v59 = vrot.slane %v7652_v11, 4  ;;  %21831 = vst [vmem:[#allocation100_spill] sm:$0xff] %v19635_v4 }
 0x7d5   : > { %13660 = vmatprep.mubr.msk.bf16.mxu1 %vm16753_vm10, %v21715_v48  ;;  %21832 = vst [vmem:[#allocation101_spill] sm:$0xff] %v19637_v55  ;;  %v7212_v61 = vsel %vm534_vm2, %v7209_v60, %v7211_v36 }
 0x7d6   : > { %v7655_v25 = vor.u32 %v7654_v53, %v7651_v7  ;;  %v8068_v56 = vor.u32 %v8067_v59, %v8066_v3 }
 0x7d7   : > { %v16113_v16 = vld [vmem:[#allocation3 + $0x84] sm:$0xff]  }
 0x7d8   : > { %v19640_v0 = vsel %vm921_vm3, %v7646_v8, %v7655_v25  ;;  %v7658_v14 = vshrl.u32 %v16113_v16, 16  ;;  %v7661_v46 = vshll.u32 %v16113_v16, 16  ;;  %v19643_v24 = vsel %vm1473_vm4, %v8064_v49, %v8068_v56  ;;  %v8454_v59 = vld [vmem:[#allocation3 + $0x88] sm:$0xf] }
 0x7d9   : > { %21833 = vst [vmem:[#allocation102_spill] sm:$0xff] %v19640_v0  ;;  %21834 = vst [vmem:[#allocation103_spill] sm:$0xff] %v19643_v24  ;;  %v7213_v47 = vrot.slane %v16113_v16, 3 }
 0x7da   : > { %v7660_v9 = vrot.slane %v7658_v14, 2  ;;  %v7663_v40 = vrot.slane %v7661_v46, 3  ;;  %v8070_v7 = vrot.slane %v7658_v14, 3  ;;  %v8071_v53 = vrot.slane %v7661_v46, 4 }
 0x7db   : > { %v6914_v11 = vpop.permute.xlu0 %6913  ;;  %v7214_v14 = vsel %vm534_vm2, %v7211_v36, %v7213_v47 }
 0x7dc   : > { %7006 = vst.msk [vmem:[#allocation3 + $0x8c] sm:$0xf] %vm6974_vm8, %v6914_v11  ;;  %13661 = vmatmul.mubr.msk.bf16.gmra.mrb[56].mxu1 %vm7247_vm11, %v7212_v61  ;;  %v7664_v33 = vor.u32 %v7663_v40, %v7660_v9  ;;  %v8072_v8 = vor.u32 %v8071_v53, %v8070_v7 }
 0x7dd   : > { %13664 = vmatprep.mubr.msk.bf16.mxu1 %vm16753_vm10, %v21715_v48 }
 0x7de   : > { %v19651_v49 = vsel %vm921_vm3, %v7655_v25, %v7664_v33  ;;  %v19655_v3 = vsel %vm1473_vm4, %v8068_v56, %v8072_v8 }
 0x7df   : > { %v6916_v37 = vpop.permute.xlu1 %6915  ;;  %21835 = vst [vmem:[#allocation104_spill] sm:$0xff] %v19651_v49  ;;  %21836 = vst [vmem:[#allocation105_spill] sm:$0xff] %v19655_v3 }
 0x7e0   : > { %7007 = vst.msk [vmem:[#allocation3 + $0x90] sm:$0xf] %vm6974_vm8, %v6916_v37 }
 0x7e3   : > { %v8455_v60 = vld [vmem:[#allocation3 + $0x8c] sm:$0xf] }
 0x7e4   : > { %v19658_v46 = vcombine.low %v8454_v59, %v8455_v60  ;;  %13665 = vmatmul.mubr.msk.bf16.gmra.mrb[60].mxu1 %vm7247_vm11, %v7214_v14  ;;  %v19682_v60 = vld [vmem:[#allocation3 + $0x48] sm:$0xff]   ;;  %v19686_v14 = vld [vmem:[#allocation3 + $0x58] sm:$0xff]  }
 0x7e5   : > { %13668 = vmatprep.mubr.msk.bf16.mxu1 %vm16753_vm10, %v21715_v48  ;;  %21839 = vst [vmem:[#allocation108_spill] sm:$0xff] %v19682_v60  ;;  %21841 = vst [vmem:[#allocation110_spill] sm:$0xff] %v19686_v14 }
 0x7e6   : > { %21837 = vst [vmem:[#allocation106_spill] sm:$0xff] %v19658_v46 }
 0x7e7   : > { %v19663_v9 = vld [vmem:[#allocation3 + $0x8c] sm:$0xff]  }
 0x7e8   : > { %v21568_v40 = vrot.slane %v19663_v9, 3  ;;  %v7667_v25 = vshrl.u32 %v19663_v9, 16  ;;  %v7670_v16 = vshll.u32 %v19663_v9, 16 }
 0x7ea   : > { %v7216_v56 = vsel %vm534_vm2, %v7213_v47, %v21568_v40  ;;  %v7669_v36 = vrot.slane %v7667_v25, 2  ;;  %v7672_v11 = vrot.slane %v7670_v16, 3  ;;  %v8074_v7 = vrot.slane %v7667_v25, 3  ;;  %v19684_v47 = vld [vmem:[#allocation3 + $0x50] sm:$0xff]  }
 0x7eb   : > { %v8075_v61 = vrot.slane %v7670_v16, 4  ;;  %21840 = vst [vmem:[#allocation109_spill] sm:$0xff] %v19684_v47  ;;  %v19692_v16 = vld [vmem:[#allocation3 + $0x40] sm:$0xff]   ;;  %v21571_v40 = vrot.slane %v19682_v60, 1  ;;  %v10615_v46 = vrot.slane %v19684_v47, 1 }
 0x7ec   : > { %13669 = vmatmul.mubr.msk.bf16.gmra.mrb[64].mxu1 %vm7247_vm11, %v7216_v56  ;;  %v19672_v53 = vor.u32 %v7672_v11, %v7669_v36  ;;  %21843 = vst [vmem:[#allocation112_spill] sm:$0xff] %v19692_v16  ;;  %v19694_v56 = vld [vmem:[#allocation3 + $0x60] sm:$0xff]   ;;  %v19696_v36 = vld [vmem:[#allocation3 + $0x68] sm:$0xff]   ;;  %v19698_v11 = vld [vmem:[#allocation3 + $0x70] sm:$0xff]  }
 0x7ed   : > { %13672 = vmatprep.mubr.msk.bf16.mxu1 %vm16753_vm10, %v21715_v48  ;;  %v19676_v37 = vor.u32 %v8075_v61, %v8074_v7  ;;  %21844 = vst [vmem:[#allocation113_spill] sm:$0xff] %v19694_v56  ;;  %21845 = vst [vmem:[#allocation114_spill] sm:$0xff] %v19696_v36  ;;  %v19702_v7 = vld [vmem:[#allocation3 + $0x80] sm:$0xff]   ;;  %v19704_v61 = vld [vmem:[#allocation3 + $0x88] sm:$0xff]   ;;  %v19718_v49 = vsel %vm4615_vm6, %v21571_v40, %v10615_v46  ;;  %v10619_v55 = vrot.slane %v19694_v56, 1  ;;  %v10621_v3 = vrot.slane %v19696_v36, 1 }
 0x7ee   : > { %v19680_v59 = vsel %vm921_vm3, %v7664_v33, %v19672_v53  ;;  %21846 = vst [vmem:[#allocation115_spill] sm:$0xff] %v19698_v11  ;;  %v19700_v33 = vld [vmem:[#allocation3 + $0x78] sm:$0xff]   ;;  %21848 = vst [vmem:[#allocation117_spill] sm:$0xff] %v19702_v7  ;;  %v10623_v24 = vrot.slane %v19698_v11, 1 }
 0x7ef   : > { %21838 = vst [vmem:[#allocation107_spill] sm:$0xff] %v19680_v59  ;;  %v19690_v25 = vsel %vm1473_vm4, %v8072_v8, %v19676_v37  ;;  %21847 = vst [vmem:[#allocation116_spill] sm:$0xff] %v19700_v33  ;;  %v10617_v8 = vrot.slane %v19686_v14, 1  ;;  %v10625_v4 = vrot.slane %v19700_v33, 1  ;;  %v10627_v59 = vrot.slane %v19702_v7, 1 }
 0x7f0   : > { %21842 = vst [vmem:[#allocation111_spill] sm:$0xff] %v19690_v25  ;;  %21849 = vst [vmem:[#allocation118_spill] sm:$0xff] %v19704_v61  ;;  %v21572_v25 = vrot.slane %v19704_v61, 1 }
 0x7f1   : > { %21850 = vst [vmem:[#allocation119_spill] sm:$0xff] %v19718_v49  ;;  %v19722_v45 = vsel %vm4615_vm6, %v10615_v46, %v10617_v8  ;;  %v19733_v0 = vsel %vm4615_vm6, %v10617_v8, %v10619_v55  ;;  %v19736_v46 = vsel %vm4615_vm6, %v10619_v55, %v10621_v3  ;;  %v19742_v63 = vsel %vm4615_vm6, %v10623_v24, %v10625_v4 }
 0x7f2   : > { %21851 = vst [vmem:[#allocation120_spill] sm:$0xff] %v19722_v45  ;;  %21852 = vst [vmem:[#allocation121_spill] sm:$0xff] %v19733_v0  ;;  %v19739_v45 = vsel %vm4615_vm6, %v10621_v3, %v10623_v24  ;;  %v19745_v52 = vsel %vm4615_vm6, %v10625_v4, %v10627_v59  ;;  %v19750_v40 = vsel %vm4615_vm6, %v10627_v59, %v21572_v25  ;;  %v21858_v24 = vshrl.u32 %v19692_v16, 16 }
 0x7f3   : > { %21853 = vst [vmem:[#allocation122_spill] sm:$0xff] %v19736_v46  ;;  %21854 = vst [vmem:[#allocation123_spill] sm:$0xff] %v19739_v45  ;;  %v21859_v4 = vshll.u32 %v19692_v16, 16  ;;  %v21860_v46 = vshrl.u32 %v19682_v60, 16  ;;  %v21861_v49 = vshll.u32 %v19682_v60, 16  ;;  %v21862_v3 = vshrl.u32 %v19684_v47, 16 }
 0x7f4   : > { %21855 = vst [vmem:[#allocation124_spill] sm:$0xff] %v19742_v63  ;;  %21856 = vst [vmem:[#allocation125_spill] sm:$0xff] %v19745_v52  ;;  %v11008_v63 = vrot.slane %v21858_v24, 1  ;;  %v21863_v0 = vshll.u32 %v19684_v47, 16  ;;  %v21864_v16 = vshrl.u32 %v19686_v14, 16  ;;  %v21866_v8 = vshll.u32 %v19686_v14, 16 }
 0x7f5   : > { %21857 = vst [vmem:[#allocation126_spill] sm:$0xff] %v19750_v40  ;;  %v11009_v52 = vrot.slane %v21859_v4, 2  ;;  %v11012_v59 = vrot.slane %v21860_v46, 1  ;;  %v11013_v55 = vrot.slane %v21861_v49, 2  ;;  %v11016_v40 = vrot.slane %v21862_v3, 1 }
 0x7f6   : > { %v11017_v4 = vrot.slane %v21863_v0, 2  ;;  %v11020_v46 = vrot.slane %v21864_v16, 1  ;;  %v11021_v60 = vrot.slane %v21866_v8, 2  ;;  %v21867_v49 = vshrl.u32 %v19694_v56, 16 }
 0x7f7   : > { %v19775_v31 = vor.u32 %v11009_v52, %v11008_v63  ;;  %v11014_v25 = vor.u32 %v11013_v55, %v11012_v59  ;;  %v21868_v47 = vshll.u32 %v19694_v56, 16  ;;  %v21870_v16 = vshrl.u32 %v19696_v36, 16 }
 0x7f8   : > { %v11024_v26 = vrot.slane %v21867_v49, 1  ;;  %v11018_v24 = vor.u32 %v11017_v4, %v11016_v40  ;;  %v11022_v63 = vor.u32 %v11021_v60, %v11020_v46  ;;  %v21871_v55 = vshll.u32 %v19696_v36, 16 }
 0x7f9   : > { %21865 = vst [vmem:[#allocation127_spill] sm:$0xff] %v19775_v31  ;;  %v11025_v0 = vrot.slane %v21868_v47, 2  ;;  %v19787_v52 = vsel %vm5102_vm7, %v19775_v31, %v11014_v25  ;;  %v11028_v8 = vrot.slane %v21870_v16, 1  ;;  %v21873_v47 = vshrl.u32 %v19698_v11, 16 }
 0x7fa   : > { %21869 = vst [vmem:[#allocation128_spill] sm:$0xff] %v19787_v52  ;;  %v11029_v59 = vrot.slane %v21871_v55, 2  ;;  %v19795_v49 = vsel %vm5102_vm7, %v11014_v25, %v11018_v24  ;;  %v21874_v3 = vshll.u32 %v19698_v11, 16  ;;  %v19802_v60 = vsel %vm5102_vm7, %v11018_v24, %v11022_v63 }
 0x7fb   : > { %21872 = vst [vmem:[#allocation129_spill] sm:$0xff] %v19795_v49  ;;  %v11026_v40 = vor.u32 %v11025_v0, %v11024_v26  ;;  %v11032_v4 = vrot.slane %v21873_v47, 1  ;;  %21875 = vst [vmem:[#allocation130_spill] sm:$0xff] %v19802_v60  ;;  %v21876_v16 = vshrl.u32 %v19700_v33, 16  ;;  %v21877_v55 = vshll.u32 %v19700_v33, 16 }
 0x7fc   : > { %v11033_v45 = vrot.slane %v21874_v3, 2  ;;  %v11030_v46 = vor.u32 %v11029_v59, %v11028_v8  ;;  %v21879_v0 = vshrl.u32 %v19702_v7, 16  ;;  %v21880_v49 = vshll.u32 %v19702_v7, 16 }
 0x7fd   : > { %v11036_v52 = vrot.slane %v21876_v16, 1  ;;  %v19809_v25 = vsel %vm5102_vm7, %v11022_v63, %v11026_v40  ;;  %v21882_v59 = vshrl.u32 %v19704_v61, 16 }
 0x7fe   : > { %21878 = vst [vmem:[#allocation131_spill] sm:$0xff] %v19809_v25  ;;  %v11034_v26 = vor.u32 %v11033_v45, %v11032_v4  ;;  %v11040_v47 = vrot.slane %v21879_v0, 1  ;;  %v11041_v3 = vrot.slane %v21880_v49, 2  ;;  %v19816_v24 = vsel %vm5102_vm7, %v11026_v40, %v11030_v46  ;;  %v19829_v0 = vld [vmem:[#allocation3 + $0x90] sm:$0xf] }
 0x7ff   : > { %21881 = vst [vmem:[#allocation132_spill] sm:$0xff] %v19816_v24  ;;  %v11044_v16 = vrot.slane %v21882_v59, 1 }
 0x800   : > { %v6918_v22 = vpop.permute.xlu0 %6917  ;;  %v19824_v45 = vsel %vm5102_vm7, %v11030_v46, %v11034_v26  ;;  %v11042_v63 = vor.u32 %v11041_v3, %v11040_v47 }
 0x801   : > { %7008 = vst.msk [vmem:[#allocation3 + $0x94] sm:$0xf] %vm6974_vm8, %v6918_v22  ;;  %v11037_v22 = vrot.slane %v21877_v55, 2  ;;  %v21883_v55 = vshll.u32 %v19704_v61, 16  ;;  %21884 = vst [vmem:[#allocation133_spill] sm:$0xff] %v19824_v45 }
 0x803   : > { %v11038_v8 = vor.u32 %v11037_v22, %v11036_v52  ;;  %v11045_v60 = vrot.slane %v21883_v55, 2  ;;  %v21891_v55 = vrot.slane %v19704_v61, 1 }
 0x804   : > { %v6920_v31 = vpop.permute.xlu1 %6919 }
 0x805   : > { %7009 = vst.msk [vmem:[#allocation3 + $0x98] sm:$0xf] %vm6974_vm8, %v6920_v31  ;;  %v19827_v4 = vsel %vm5102_vm7, %v11034_v26, %v11038_v8  ;;  %v11046_v49 = vor.u32 %v11045_v60, %v11044_v16  ;;  %v19832_v52 = vsel %vm5102_vm7, %v11038_v8, %v11042_v63 }
 0x806   : > { %21885 = vst [vmem:[#allocation134_spill] sm:$0xff] %v19827_v4  ;;  %21886 = vst [vmem:[#allocation135_spill] sm:$0xff] %v19832_v52  ;;  %v21893_v52 = vrot.slane %v19663_v9, 3 }
 0x807   : > { %v19837_v22 = vsel %vm5102_vm7, %v11042_v63, %v11046_v49 }
 0x808   : > { %v19834_v40 = vld [vmem:[#allocation3 + $0x94] sm:$0xf]  ;;  %21888 = vst [vmem:[#allocation137_spill] sm:$0xff] %v19837_v22 }
 0x809   : > { %21887 = vst [vmem:[#allocation136_spill] sm:$0xff] %v19834_v40  ;;  %v19841_v31 = vcombine.low %v19829_v0, %v19834_v40  ;;  %v19843_v46 = vld [vmem:[#allocation3 + $0x90] sm:$0xff]  }
 0x80a   : > { %21890 = vst [vmem:[#allocation139_spill] sm:$0xff] %v19843_v46  ;;  %v21582_v26 = vshrl.u32 %v19843_v46, 16  ;;  %v10631_v60 = vrot.slane %v19843_v46, 1 }
 0x80b   : > { %21889 = vst [vmem:[#allocation138_spill] sm:$0xff] %v19841_v31 }
 0x80c   : > { %v16116_v47 = vld [vmem:[#allocation3 + $0x94] sm:$0xff]   ;;  %v19851_v63 = vsel %vm4615_vm6, %v21891_v55, %v10631_v60  ;;  %v11048_v22 = vrot.slane %v21582_v26, 1  ;;  %v21894_v55 = vshll.u32 %v19843_v46, 16 }
 0x80d   : > { %v7217_v8 = vrot.slane %v16116_v47, 3  ;;  %v7676_v59 = vshrl.u32 %v16116_v47, 16  ;;  %v7679_v16 = vshll.u32 %v16116_v47, 16  ;;  %21892 = vst [vmem:[#allocation140_spill] sm:$0xff] %v19851_v63 }
 0x80e   : > { %v11049_v63 = vrot.slane %v21894_v55, 2 }
 0x80f   : > { %v7218_v4 = vsel %vm534_vm2, %v21893_v52, %v7217_v8  ;;  %v7678_v45 = vrot.slane %v7676_v59, 2  ;;  %v7681_v24 = vrot.slane %v7679_v16, 3  ;;  %v8078_v25 = vrot.slane %v7676_v59, 3 }
 0x810   : > { %13673 = vmatmul.mubr.msk.bf16.gmra.mrb[68].mxu1 %vm7247_vm11, %v7218_v4  ;;  %v8079_v3 = vrot.slane %v7679_v16, 4  ;;  %v11050_v9 = vor.u32 %v11049_v63, %v11048_v22 }
 0x811   : > { %13676 = vmatprep.mubr.msk.bf16.mxu1 %vm16753_vm10, %v21715_v48  ;;  %v7682_v47 = vor.u32 %v7681_v24, %v7678_v45  ;;  %v19876_v45 = vld [vmem:[#allocation3 + $0x98] sm:$0xf] }
 0x812   : > { %v8080_v61 = vor.u32 %v8079_v3, %v8078_v25  ;;  %v19872_v4 = vsel %vm5102_vm7, %v11046_v49, %v11050_v9  ;;  %21896 = vst [vmem:[#allocation142_spill] sm:$0xff] %v19876_v45 }
 0x813   : > { %v19865_v26 = vsel %vm921_vm3, %v19672_v53, %v7682_v47  ;;  %21895 = vst [vmem:[#allocation141_spill] sm:$0xff] %v19872_v4 }
 0x814   : > { %v19869_v52 = vsel %vm1473_vm4, %v19676_v37, %v8080_v61 }
 0x818   : > { %v6922_v59 = vpop.permute.xlu0 %6921 }
 0x819   : > { %7010 = vst.msk [vmem:[#allocation3 + $0x9c] sm:$0xf] %vm6974_vm8, %v6922_v59 }
 0x81c   : > { %v6924_v24 = vpop.permute.xlu1 %6923 }
 0x81d   : > { %7011 = vst.msk [vmem:[#allocation3 + $0xa0] sm:$0xf] %vm6974_vm8, %v6924_v24 }
 0x820   : > { %v19878_v25 = vld [vmem:[#allocation3 + $0x9c] sm:$0xf] }
 0x821   : > { %21897 = vst [vmem:[#allocation143_spill] sm:$0xff] %v19878_v25  ;;  %v19882_v53 = vcombine.low %v19876_v45, %v19878_v25  ;;  %v19884_v22 = vld [vmem:[#allocation3 + $0x98] sm:$0xff]  }
 0x822   : > { %21899 = vst [vmem:[#allocation145_spill] sm:$0xff] %v19884_v22  ;;  %v21595_v37 = vshrl.u32 %v19884_v22, 16  ;;  %v10633_v3 = vrot.slane %v19884_v22, 1 }
 0x823   : > { %21898 = vst [vmem:[#allocation144_spill] sm:$0xff] %v19882_v53 }
 0x824   : > { %v16118_v49 = vld [vmem:[#allocation3 + $0x9c] sm:$0xff]   ;;  %v19890_v24 = vsel %vm4615_vm6, %v10631_v60, %v10633_v3  ;;  %v11052_v4 = vrot.slane %v21595_v37, 1 }
 0x825   : > { %v7219_v63 = vrot.slane %v16118_v49, 3  ;;  %v7685_v55 = vshrl.u32 %v16118_v49, 16  ;;  %v7688_v59 = vshll.u32 %v16118_v49, 16  ;;  %21900 = vst [vmem:[#allocation146_spill] sm:$0xff] %v19890_v24  ;;  %v21901_v49 = vshll.u32 %v19884_v22, 16 }
 0x827   : > { %v7220_v46 = vsel %vm534_vm2, %v7217_v8, %v7219_v63  ;;  %v7687_v7 = vrot.slane %v7685_v55, 2  ;;  %v7690_v33 = vrot.slane %v7688_v59, 3  ;;  %v8082_v11 = vrot.slane %v7685_v55, 3 }
 0x828   : > { %13677 = vmatmul.mubr.msk.bf16.gmra.mrb[72].mxu1 %vm7247_vm11, %v7220_v46  ;;  %v8083_v36 = vrot.slane %v7688_v59, 4  ;;  %v11053_v56 = vrot.slane %v21901_v49, 2 }
 0x829   : > { %13680 = vmatprep.mubr.msk.bf16.mxu1 %vm16753_vm10, %v21715_v48  ;;  %v7691_v16 = vor.u32 %v7690_v33, %v7687_v7  ;;  %v19911_v33 = vld [vmem:[#allocation3 + $0xa0] sm:$0xf] }
 0x82a   : > { %v8084_v60 = vor.u32 %v8083_v36, %v8082_v11  ;;  %v11054_v37 = vor.u32 %v11053_v56, %v11052_v4  ;;  %21903 = vst [vmem:[#allocation148_spill] sm:$0xff] %v19911_v33 }
 0x82b   : > { %v19901_v24 = vsel %vm921_vm3, %v7682_v47, %v7691_v16 }
 0x82c   : > { %v19904_v8 = vsel %vm1473_vm4, %v8080_v61, %v8084_v60  ;;  %v19907_v55 = vsel %vm5102_vm7, %v11050_v9, %v11054_v37 }
 0x82d   : > { %21902 = vst [vmem:[#allocation147_spill] sm:$0xff] %v19907_v55 }
 0x830   : > { %v6926_v46 = vpop.permute.xlu0 %6925 }
 0x831   : > { %7012 = vst.msk [vmem:[#allocation3 + $0xa4] sm:$0xf] %vm6974_vm8, %v6926_v46 }
 0x834   : > { %v6928_v59 = vpop.permute.xlu1 %6927 }
 0x835   : > { %7013 = vst.msk [vmem:[#allocation3 + $0xa8] sm:$0xf] %vm6974_vm8, %v6928_v59 }
 0x838   : > { %v19913_v7 = vld [vmem:[#allocation3 + $0xa4] sm:$0xf] }
 0x839   : > { %21904 = vst [vmem:[#allocation149_spill] sm:$0xff] %v19913_v7  ;;  %v19917_v36 = vcombine.low %v19911_v33, %v19913_v7  ;;  %v19919_v56 = vld [vmem:[#allocation3 + $0xa0] sm:$0xff]  }
 0x83a   : > { %v7057_v11 = vld [vmem:[#allocation3 + $0xa4] sm:$0xf]  ;;  %v10230_v9 = vshll.u32 %v19919_v56, 16  ;;  %v21608_v4 = vshrl.u32 %v19919_v56, 16  ;;  %v10635_v31 = vrot.slane %v19919_v56, 1 }
 0x83b   : > { %21905 = vst [vmem:[#allocation150_spill] sm:$0xff] %v19917_v36 }
 0x83c   : > { %v7058_v61 = vld [vmem:[#allocation3 + $0xa8] sm:$0x1]  ;;  %v11056_v36 = vrot.slane %v21608_v4, 1  ;;  %v11057_v7 = vrot.slane %v10230_v9, 2 }
 0x83d   : > { %v7989_v47 = vld [vmem:[#allocation3 + $0xa8] sm:$0x3]  ;;  %v12937_v49 = vcombine.low %v7057_v11, %v7058_v61 }
 0x83e   : > { %v12997_v46 = vcombine.low %v7057_v11, %v7989_v47  ;;  %v19941_v4 = vor.u32 %v11057_v7, %v11056_v36 }
 0x83f   : > { %v7221_v59 = vrot.slane %v12937_v49, 3  ;;  %v7694_v55 = vshrl.u32 %v12937_v49, 16  ;;  %v7697_v22 = vshll.u32 %v12937_v49, 16 }
 0x840   : > { %v8087_v14 = vshrl.u32 %v12997_v46, 16  ;;  %v8090_v53 = vshll.u32 %v12997_v46, 16  ;;  %v19939_v46 = vsel %vm4615_vm6, %v10633_v3, %v10635_v31 }
 0x841   : > { %v6641_v25 = vpop.permute.xlu0 %6640  ;;  %v7222_v33 = vsel %vm534_vm2, %v7219_v63, %v7221_v59  ;;  %v7696_v40 = vrot.slane %v7694_v55, 2  ;;  %v7699_v45 = vrot.slane %v7697_v22, 3 }
 0x842   : > { %v8089_v61 = vrot.slane %v8087_v14, 3  ;;  %13681 = vmatmul.mubr.msk.bf16.gmra.mrb[76].mxu1 %vm7247_vm11, %v7222_v33  ;;  %v8092_v11 = vrot.slane %v8090_v53, 4  ;;  %vm6684_vm2 = vcmp.eq.s32.totalorder %v6641_v25, 1 }
 0x843   : > { %13684 = vmatprep.mubr.msk.bf16.mxu1 %vm16753_vm10, %v21715_v48  ;;  %v19932_v47 = vor.u32 %v7699_v45, %v7696_v40  ;;  %v19953_v40 = vsel %vm5102_vm7, %v11054_v37, %v19941_v4 }
 0x844   : > { %v19934_v49 = vor.u32 %v8092_v11, %v8089_v61 }
 0x845   : > { %v6068_v63 = vpop.permute.xlu0 %6067  ;;  %v6644_v22 = vpop.permute.xlu1 %6643  ;;  %v19945_v14 = vsel %vm921_vm3, %v7691_v16, %v19932_v47 }
 0x846   : > { %v19949_v53 = vsel %vm1473_vm4, %v8084_v60, %v19934_v49  ;;  %v6151_v45 = vmul.f32 %v19583_v6, %v6068_v63  ;;  %vm6685_vm3 = vcmp.eq.s32.totalorder %v6644_v22, 1  ;;  %v16120_v6 = vld [vmem:[%s21451_s4 + $0x40] sm:$0xff]  }
 0x849   : > { %v6070_v3 = vpop.permute.xlu1 %6069  ;;  %v6314_v55 = vpop.permute.xlu0 %6313 }
 0x84a   : > { %v6397_v33 = vadd.f32 %v6314_v55, %v6151_v45  ;;  %13685 = vmatmul.mubr.msk.bf16.gmra.mrb[80].mxu1 %vm7247_vm11, %v7221_v59  ;;  %v6152_v16 = vmul.f32 %v19601_v5, %v6070_v3  ;;  %v16121_v5 = vld [vmem:[%s21451_s4 + $0x48] sm:$0xff]   ;;  %v16127_v45 = vld [vmem:[%s21451_s4 + $0x78] sm:$0xff]   ;;  %v21923_v55 = vld [vmem:[#allocation23_spill] sm:$0xff] }
 0x84b   : > { %13696 = vmatprep.mubr.msk.bf16.mxu1 %vm16753_vm10, %v21715_v48  ;;  %v21922_v3 = vld [vmem:[#allocation56_spill] sm:$0xff] }
 0x84c   : > { %v19960_v7 = vsel %vm6684_vm2, %v6397_v33, 0.0  ;;  %v21924_v33 = vld [vmem:[#allocation58_spill] sm:$0xff] }
 0x84d   : > { %v13369_v60 = vpack.c.bf16 %v19960_v7, %v19960_v7  ;;  %v6316_v37 = vpop.permute.xlu1 %6315 }
 0x84e   : > { %v6398_v36 = vadd.f32 %v6316_v37, %v6152_v16  ;;  %v21925_v16 = vld [vmem:[#allocation37_spill] sm:$0xff]  ;;  %v21927_v37 = vld [vmem:[#allocation64_spill] sm:$0xff] }
 0x84f   : > { %6929 = vrot.lane.b32.xlu0 %v13369_v60, %s16751_s15  ;;  %v21926_v60 = vld [vmem:[#allocation51_spill] sm:$0xff] }
 0x850   : > { %v19968_v25 = vsel %vm6685_vm3, %v6398_v36, 0.0  ;;  %v21928_v36 = vld [vmem:[#allocation78_spill] sm:$0xff] }
 0x851   : > { %v13370_v59 = vpack.c.bf16 %v19968_v25, %v19968_v25 }
 0x852   : > { %13697 = vmatmul.mubr.msk.bf16.vlgmr.msra.gmra.mrb[0].mxu1 %vm7247_vm11, %v19315_v51 }
 0x853   : > { %13781 = vmatpush3.bf16.msra.mxu1 %v16120_v6  ;;  %12143 = vrot.lane.b32.xlu0 %v18944_v44, %s16751_s15  ;;  %v16122_v44 = vld [vmem:[%s21451_s4 + $0x50] sm:$0xff]   ;;  %v21929_v6 = vld [vmem:[#allocation74_spill] sm:$0xff] }
 0x854   : > { %6931 = vrot.lane.b32.xlu1 %v13370_v59, %s16751_s15  ;;  %13700 = vmatprep.mubr.msk.bf16.mxu1 %vm16753_vm10, %v21715_v48  ;;  %v21930_v59 = vld [vmem:[#allocation67_spill] sm:$0xff] }
 0x855   : > { %13782 = vmatprep.subr.bf16.mxu1 %v21715_v48 }
 0x857   : > { %12147 = vrot.lane.b32.xlu0 %v18977_v57, %s16751_s15  ;;  %13783 = vmatpush3.bf16.msra.mxu1 %v16121_v5  ;;  %v21906_v57 = vld [vmem:[#allocation18_spill] sm:$0xff]  ;;  %v21931_v5 = vld [vmem:[#allocation77_spill] sm:$0xff] }
 0x858   : > { %12145 = vrot.lane.b32.xlu1 %v18960_v1, %s16751_s15  ;;  %13784 = vmatprep.subr.bf16.mxu1 %v21715_v48  ;;  %v16123_v1 = vld [vmem:[%s21451_s4 + $0x58] sm:$0xff]  }
 0x85a   : > { %13701 = vmatmul.mubr.msk.bf16.gmra.mrb[4].mxu1 %vm7247_vm11, %v19342_v18 }
 0x85b   : > { %12151 = vrot.lane.b32.xlu0 %v19009_v30, %s16751_s15  ;;  %13704 = vmatprep.mubr.msk.bf16.mxu1 %vm16753_vm10, %v21715_v48  ;;  %v21908_v30 = vld [vmem:[#allocation40_spill] sm:$0xff] }
 0x85c   : > { %12149 = vrot.lane.b32.xlu1 %v18988_v62, %s16751_s15  ;;  %13785 = vmatpush3.bf16.msra.mxu1 %v16122_v44  ;;  %v21907_v62 = vld [vmem:[#allocation14_spill] sm:$0xff] }
 0x85d   : > { %13786 = vmatprep.subr.bf16.mxu1 %v21715_v48  ;;  %v21932_v44 = vld [vmem:[#allocation98_spill] sm:$0xff] }
 0x85f   : > { %12155 = vrot.lane.b32.xlu0 %v19037_v23, %s16751_s15  ;;  %v21910_v23 = vld [vmem:[#allocation19_spill] sm:$0xff] }
 0x860   : > { %12153 = vrot.lane.b32.xlu1 %v19017_v28, %s16751_s15  ;;  %13787 = vmatpush3.bf16.msra.mxu1 %v16123_v1  ;;  %v21909_v28 = vld [vmem:[#allocation47_spill] sm:$0xff]  ;;  %v21933_v1 = vld [vmem:[#allocation100_spill] sm:$0xff] }
 0x861   : > { %13872 = vmatprep.subr.bf16.mxu1 %v21715_v48 }
 0x862   : > { %13705 = vmatmul.mubr.msk.bf16.gmra.mrb[8].mxu1 %vm7247_vm11, %v19364_v10 }
 0x863   : > { %12159 = vrot.lane.b32.xlu0 %v19057_v2, %s16751_s15  ;;  %13708 = vmatprep.mubr.msk.bf16.mxu1 %vm16753_vm10, %v21715_v48  ;;  %v21912_v2 = vld [vmem:[#allocation57_spill] sm:$0xff] }
 0x864   : > { %12157 = vrot.lane.b32.xlu1 %v19043_v38, %s16751_s15  ;;  %v21911_v38 = vld [vmem:[#allocation80_spill] sm:$0xff] }
 0x867   : > { %12163 = vrot.lane.b32.xlu0 %v19081_v58, %s16751_s15  ;;  %v21914_v58 = vld [vmem:[#allocation83_spill] sm:$0xff] }
 0x868   : > { %12161 = vrot.lane.b32.xlu1 %v19064_v43, %s16751_s15  ;;  %v21913_v43 = vld [vmem:[#allocation89_spill] sm:$0xff] }
 0x86a   : > { %13709 = vmatmul.mubr.msk.bf16.gmra.mrb[12].mxu1 %vm7247_vm11, %v19386_v54  ;;  %v21919_v54 = vld [vmem:[#allocation107_spill] sm:$0xff] }
 0x86b   : > { %12167 = vrot.lane.b32.xlu0 %v19109_v34, %s16751_s15  ;;  %13712 = vmatprep.mubr.msk.bf16.mxu1 %vm16753_vm10, %v21715_v48  ;;  %v21916_v34 = vld [vmem:[#allocation99_spill] sm:$0xff] }
 0x86c   : > { %12165 = vrot.lane.b32.xlu1 %v19089_v13, %s16751_s15  ;;  %v21915_v13 = vld [vmem:[#allocation97_spill] sm:$0xff] }
 0x86f   : > { %12171 = vrot.lane.b32.xlu0 %v19127_v19, %s16751_s15  ;;  %v21917_v19 = vld [vmem:[#allocation102_spill] sm:$0xff] }
 0x870   : > { %12169 = vrot.lane.b32.xlu1 %v19115_v35, %s16751_s15 }
 0x872   : > { %13713 = vmatmul.mubr.msk.bf16.gmra.mrb[16].mxu1 %vm7247_vm11, %v19440_v32 }
 0x873   : > { %12175 = vrot.lane.b32.xlu0 %v19153_v21, %s16751_s15  ;;  %13716 = vmatprep.mubr.msk.bf16.mxu1 %vm16753_vm10, %v21715_v48 }
 0x874   : > { %12173 = vrot.lane.b32.xlu1 %v19139_v50, %s16751_s15 }
 0x877   : > { %12179 = vrot.lane.b32.xlu0 %v19181_v20, %s16751_s15 }
 0x878   : > { %12177 = vrot.lane.b32.xlu1 %v19161_v41, %s16751_s15  ;;  %v21918_v41 = vld [vmem:[#allocation104_spill] sm:$0xff] }
 0x87a   : > { %13717 = vmatmul.mubr.msk.bf16.gmra.mrb[20].mxu1 %vm7247_vm11, %v19458_v15 }
 0x87b   : > { %12183 = vrot.lane.b32.xlu0 %v19200_v29, %s16751_s15  ;;  %13720 = vmatprep.mubr.msk.bf16.mxu1 %vm16753_vm10, %v21715_v48 }
 0x87c   : > { %12181 = vrot.lane.b32.xlu1 %v19187_v12, %s16751_s15 }
 0x87f   : > { %12187 = vrot.lane.b32.xlu0 %v19223_v27, %s16751_s15 }
 0x880   : > { %12185 = vrot.lane.b32.xlu1 %v19207_v42, %s16751_s15 }
 0x882   : > { %13721 = vmatmul.mubr.msk.bf16.gmra.mrb[24].mxu1 %vm7247_vm11, %v19477_v17 }
 0x883   : > { %12191 = vrot.lane.b32.xlu0 %v19245_v39, %s16751_s15  ;;  %13724 = vmatprep.mubr.msk.bf16.mxu1 %vm16753_vm10, %v21715_v48 }
 0x884   : > { %12189 = vrot.lane.b32.xlu1 %v21906_v57, %s16751_s15  ;;  %v21934_v57 = vld [vmem:[#allocation103_spill] sm:$0xff] }
 0x887   : > { %12195 = vrot.lane.b32.xlu0 %v21907_v62, %s16751_s15  ;;  %v21935_v62 = vld [vmem:[#allocation105_spill] sm:$0xff] }
 0x888   : > { %12193 = vrot.lane.b32.xlu1 %v21908_v30, %s16751_s15  ;;  %v21936_v30 = vld [vmem:[#allocation111_spill] sm:$0xff] }
 0x88a   : > { %13725 = vmatmul.mubr.msk.bf16.gmra.mrb[28].mxu1 %vm7247_vm11, %v21909_v28  ;;  %v8423_v28 = vld [vmem:[#allocation3 + $0xc] sm:$0x8] }
 0x88b   : > { %13728 = vmatprep.mubr.msk.bf16.mxu1 %vm16753_vm10, %v21715_v48 }
 0x88c   : > { %12197 = vrot.lane.b32.xlu1 %v21910_v23, %s16751_s15  ;;  %v16706_v23 = vld [vmem:[#allocation3 + $0x14] sm:$0xf] }
 0x892   : > { %13729 = vmatmul.mubr.msk.bf16.gmra.mrb[32].mxu1 %vm7247_vm11, %v21911_v38  ;;  %v16707_v38 = vld [vmem:[#allocation3 + $0x18] sm:$0xf] }
 0x893   : > { %13732 = vmatprep.mubr.msk.bf16.mxu1 %vm16753_vm10, %v21715_v48 }
 0x89a   : > { %13733 = vmatmul.mubr.msk.bf16.gmra.mrb[36].mxu1 %vm7247_vm11, %v21912_v2  ;;  %v13032_v2 = vcombine.low %v16706_v23, %v16707_v38  ;;  %v16715_v38 = vld [vmem:[#allocation3 + $0x34] sm:$0xf] }
 0x89b   : > { %13736 = vmatprep.mubr.msk.bf16.mxu1 %vm16753_vm10, %v21715_v48 }
 0x8a2   : > { %13737 = vmatmul.mubr.msk.bf16.gmra.mrb[40].mxu1 %vm7247_vm11, %v21913_v43 }
 0x8a3   : > { %13740 = vmatprep.mubr.msk.bf16.mxu1 %vm16753_vm10, %v21715_v48 }
 0x8aa   : > { %13741 = vmatmul.mubr.msk.bf16.gmra.mrb[44].mxu1 %vm7247_vm11, %v21914_v58  ;;  %v8588_v58 = vshrl.u32 %v13032_v2, 16 }
 0x8ab   : > { %13744 = vmatprep.mubr.msk.bf16.mxu1 %vm16753_vm10, %v21715_v48 }
 0x8b2   : > { %13745 = vmatmul.mubr.msk.bf16.gmra.mrb[48].mxu1 %vm7247_vm11, %v21915_v13  ;;  %v8591_v13 = vshll.u32 %v13032_v2, 16  ;;  %v16716_v2 = vld [vmem:[#allocation3 + $0x38] sm:$0xf] }
 0x8b3   : > { %13748 = vmatprep.mubr.msk.bf16.mxu1 %vm16753_vm10, %v21715_v48 }
 0x8ba   : > { %13749 = vmatmul.mubr.msk.bf16.gmra.mrb[52].mxu1 %vm7247_vm11, %v21916_v34 }
 0x8bb   : > { %13752 = vmatprep.mubr.msk.bf16.mxu1 %vm16753_vm10, %v21715_v48 }
 0x8c1   : > { %v6930_v35 = vpop.permute.xlu0 %6929 }
 0x8c2   : > { %7014 = vst.msk [vmem:[#allocation3 + $0xac] sm:$0xf] %vm6974_vm8, %v6930_v35  ;;  %13753 = vmatmul.mubr.msk.bf16.gmra.mrb[56].mxu1 %vm7247_vm11, %v21917_v19  ;;  %v8593_v19 = vrot.slane %v8591_v13, 4 }
 0x8c3   : > { %13756 = vmatprep.mubr.msk.bf16.mxu1 %vm16753_vm10, %v21715_v48 }
 0x8c6   : > { %v6932_v50 = vpop.permute.xlu1 %6931 }
 0x8c7   : > { %7016 = vst.msk [vmem:[#allocation3 + $0xb0] sm:$0x3] %vm7015_vm15, %v6932_v50  ;;  %v16709_v50 = vld [vmem:[#allocation3 + $0x1c] sm:$0xf] }
 0x8c9   : > { %v20103_v21 = vld [vmem:[#allocation3 + $0xa8] sm:$0xff]  }
 0x8ca   : > { %13757 = vmatmul.mubr.msk.bf16.gmra.mrb[60].mxu1 %vm7247_vm11, %v21918_v41  ;;  %v10238_v20 = vshll.u32 %v20103_v21, 16  ;;  %v10242_v12 = vshrl.u32 %v20103_v21, 16  ;;  %v10637_v29 = vrot.slane %v20103_v21, 1  ;;  %v16710_v41 = vld [vmem:[#allocation3 + $0x20] sm:$0xf] }
 0x8cb   : > { %13760 = vmatprep.mubr.msk.bf16.mxu1 %vm16753_vm10, %v21715_v48 }
 0x8cc   : > { %v20115_v42 = vsel %vm4615_vm6, %v10635_v31, %v10637_v29  ;;  %v11060_v39 = vrot.slane %v10242_v12, 1  ;;  %v11061_v51 = vrot.slane %v10238_v20, 2 }
 0x8ce   : > { %v20117_v27 = vld [vmem:[#allocation3 + $0xb0] sm:$0xff]   ;;  %v11062_v32 = vor.u32 %v11061_v51, %v11060_v39 }
 0x8cf   : > { %v10246_v18 = vshll.u32 %v20117_v27, 16  ;;  %v10250_v10 = vshrl.u32 %v20117_v27, 16  ;;  %v10639_v15 = vrot.slane %v20117_v27, 1 }
 0x8d0   : > { %v20141_v11 = vsel %vm5102_vm7, %v19941_v4, %v11062_v32  ;;  %v16125_v4 = vld [vmem:[%s21451_s4 + $0x68] sm:$0xff]  }
 0x8d1   : > { %v11064_v17 = vrot.slane %v10250_v10, 1  ;;  %v11065_v31 = vrot.slane %v10246_v18, 2  ;;  %v20137_v61 = vsel %vm4615_vm6, %v10637_v29, %v10639_v15  ;;  %v13033_v29 = vcombine.low %v16709_v50, %v16710_v41  ;;  %v16718_v50 = vld [vmem:[#allocation3 + $0x40] sm:$0xf] }
 0x8d2   : > { %13761 = vmatmul.mubr.msk.bf16.gmra.mrb[64].mxu1 %vm7247_vm11, %v21919_v54 }
 0x8d3   : > { %13764 = vmatprep.mubr.msk.bf16.mxu1 %vm16753_vm10, %v21715_v48  ;;  %v20143_v63 = vor.u32 %v11065_v31, %v11064_v17  ;;  %v8597_v54 = vshrl.u32 %v13033_v29, 16  ;;  %v16130_v31 = vld [vmem:[%s21451_s4 + $0x80] sm:$0xff]  }
 0x8d5   : > { %v20147_v22 = vsel %vm5102_vm7, %v11062_v32, %v20143_v63  ;;  %v8600_v32 = vshll.u32 %v13033_v29, 16 }
 0x8da   : > { %13765 = vmatmul.mubr.msk.bf16.gmra.mrb[68].mxu1 %vm7247_vm11, %v19865_v26  ;;  %v16124_v26 = vld [vmem:[%s21451_s4 + $0x60] sm:$0xff]  }
 0x8db   : > { %13768 = vmatprep.mubr.msk.bf16.mxu1 %vm16753_vm10, %v21715_v48 }
 0x8e2   : > { %13769 = vmatmul.mubr.msk.bf16.gmra.mrb[72].mxu1 %vm7247_vm11, %v19901_v24  ;;  %v21920_v24 = vld [vmem:[#allocation32_spill] sm:$0xff] }
 0x8e3   : > { %13772 = vmatprep.mubr.msk.bf16.mxu1 %vm16753_vm10, %v21715_v48 }
 0x8ea   : > { %13773 = vmatmul.mubr.msk.bf16.gmra.mrb[76].mxu1 %vm7247_vm11, %v19945_v14  ;;  %v21921_v14 = vld [vmem:[#allocation27_spill] sm:$0xff] }
 0x8eb   : > { %13776 = vmatprep.mubr.msk.bf16.mxu1 %vm16753_vm10, %v21715_v48 }
 0x8f2   : > { %13777 = vmatmul.mubr.msk.bf16.gmra.mrb[80].mxu1 %vm7247_vm11, %v19932_v47  ;;  %v16126_v47 = vld [vmem:[%s21451_s4 + $0x70] sm:$0xff]  }
 0x8f3   : > { %13788 = vmatprep.mubr.msk.bf16.mxu1 %vm16753_vm10, %v21715_v48 }
 0x8fa   : > { %13789 = vmatmul.mubr.msk.bf16.vlgmr.msra.gmra.mrb[0].mxu1 %vm7247_vm11, %v21920_v24  ;;  %v8599_v24 = vrot.slane %v8597_v54, 3 }
 0x8fb   : > { %13873 = vmatpush3.bf16.msra.mxu1 %v16124_v26  ;;  %13792 = vmatprep.mubr.msk.bf16.mxu1 %vm16753_vm10, %v21715_v48 }
 0x8fc   : > { %13874 = vmatprep.subr.bf16.mxu1 %v21715_v48 }
 0x8ff   : > { %13875 = vmatpush3.bf16.msra.mxu1 %v16125_v4  ;;  %v8602_v4 = vrot.slane %v8600_v32, 4 }
 0x900   : > { %13876 = vmatprep.subr.bf16.mxu1 %v21715_v48 }
 0x902   : > { %13793 = vmatmul.mubr.msk.bf16.gmra.mrb[4].mxu1 %vm7247_vm11, %v21921_v14  ;;  %v16712_v14 = vld [vmem:[#allocation3 + $0x28] sm:$0xf] }
 0x903   : > { %13796 = vmatprep.mubr.msk.bf16.mxu1 %vm16753_vm10, %v21715_v48  ;;  %13877 = vmatpush3.bf16.msra.mxu1 %v16126_v47  ;;  %v16711_v47 = vld [vmem:[#allocation3 + $0x24] sm:$0xf] }
 0x904   : > { %13878 = vmatprep.subr.bf16.mxu1 %v21715_v48 }
 0x907   : > { %13879 = vmatpush3.bf16.msra.mxu1 %v16127_v45  ;;  %v16136_v45 = vld [vmem:[%s21451_s4 + $0x88] sm:$0xff]  }
 0x908   : > { %13964 = vmatprep.subr.bf16.mxu1 %v21715_v48 }
 0x90a   : > { %13797 = vmatmul.mubr.msk.bf16.gmra.mrb[8].mxu1 %vm7247_vm11, %v21922_v3  ;;  %v8603_v3 = vor.u32 %v8602_v4, %v8599_v24 }
 0x90b   : > { %13800 = vmatprep.mubr.msk.bf16.mxu1 %vm16753_vm10, %v21715_v48 }
 0x912   : > { %13801 = vmatmul.mubr.msk.bf16.gmra.mrb[12].mxu1 %vm7247_vm11, %v21923_v55 }
 0x913   : > { %13804 = vmatprep.mubr.msk.bf16.mxu1 %vm16753_vm10, %v21715_v48 }
 0x91a   : > { %13805 = vmatmul.mubr.msk.bf16.gmra.mrb[16].mxu1 %vm7247_vm11, %v21924_v33 }
 0x91b   : > { %13808 = vmatprep.mubr.msk.bf16.mxu1 %vm16753_vm10, %v21715_v48 }
 0x922   : > { %13809 = vmatmul.mubr.msk.bf16.gmra.mrb[20].mxu1 %vm7247_vm11, %v21925_v16  ;;  %v16142_v16 = vld [vmem:[%s21451_s4 + $0x90] sm:$0xff]  }
 0x923   : > { %13812 = vmatprep.mubr.msk.bf16.mxu1 %vm16753_vm10, %v21715_v48 }
 0x92a   : > { %13813 = vmatmul.mubr.msk.bf16.gmra.mrb[24].mxu1 %vm7247_vm11, %v21926_v60 }
 0x92b   : > { %13816 = vmatprep.mubr.msk.bf16.mxu1 %vm16753_vm10, %v21715_v48 }
 0x932   : > { %13817 = vmatmul.mubr.msk.bf16.gmra.mrb[28].mxu1 %vm7247_vm11, %v21927_v37 }
 0x933   : > { %13820 = vmatprep.mubr.msk.bf16.mxu1 %vm16753_vm10, %v21715_v48 }
 0x93a   : > { %13821 = vmatmul.mubr.msk.bf16.gmra.mrb[32].mxu1 %vm7247_vm11, %v21928_v36 }
 0x93b   : > { %13824 = vmatprep.mubr.msk.bf16.mxu1 %vm16753_vm10, %v21715_v48 }
 0x942   : > { %13825 = vmatmul.mubr.msk.bf16.gmra.mrb[36].mxu1 %vm7247_vm11, %v21929_v6  ;;  %v16713_v6 = vld [vmem:[#allocation3 + $0x2c] sm:$0xf] }
 0x943   : > { %13828 = vmatprep.mubr.msk.bf16.mxu1 %vm16753_vm10, %v21715_v48 }
 0x94a   : > { %13829 = vmatmul.mubr.msk.bf16.gmra.mrb[40].mxu1 %vm7247_vm11, %v21930_v59  ;;  %v16714_v59 = vld [vmem:[#allocation3 + $0x30] sm:$0xf] }
 0x94b   : > { %13832 = vmatprep.mubr.msk.bf16.mxu1 %vm16753_vm10, %v21715_v48 }
 0x952   : > { %13833 = vmatmul.mubr.msk.bf16.gmra.mrb[44].mxu1 %vm7247_vm11, %v21931_v5  ;;  %v13035_v5 = vcombine.low %v16713_v6, %v16714_v59 }
 0x953   : > { %13836 = vmatprep.mubr.msk.bf16.mxu1 %vm16753_vm10, %v21715_v48 }
 0x95a   : > { %13837 = vmatmul.mubr.msk.bf16.gmra.mrb[48].mxu1 %vm7247_vm11, %v21932_v44  ;;  %v16148_v44 = vld [vmem:[%s21451_s4 + $0x98] sm:$0xff]  }
 0x95b   : > { %13840 = vmatprep.mubr.msk.bf16.mxu1 %vm16753_vm10, %v21715_v48 }
 0x962   : > { %13841 = vmatmul.mubr.msk.bf16.gmra.mrb[52].mxu1 %vm7247_vm11, %v21933_v1 }
 0x963   : > { %13844 = vmatprep.mubr.msk.bf16.mxu1 %vm16753_vm10, %v21715_v48 }
 0x96a   : > { %13845 = vmatmul.mubr.msk.bf16.gmra.mrb[56].mxu1 %vm7247_vm11, %v21934_v57  ;;  %v8615_v57 = vshrl.u32 %v13035_v5, 16 }
 0x96b   : > { %13848 = vmatprep.mubr.msk.bf16.mxu1 %vm16753_vm10, %v21715_v48 }
 0x972   : > { %13849 = vmatmul.mubr.msk.bf16.gmra.mrb[60].mxu1 %vm7247_vm11, %v21935_v62  ;;  %v8618_v62 = vshll.u32 %v13035_v5, 16  ;;  %v16723_v5 = vld [vmem:[#allocation3 + $0x54] sm:$0xf] }
 0x973   : > { %13852 = vmatprep.mubr.msk.bf16.mxu1 %vm16753_vm10, %v21715_v48 }
 0x974   : > { %v8620_v23 = vrot.slane %v8618_v62, 4 }
 0x97a   : > { %13853 = vmatmul.mubr.msk.bf16.gmra.mrb[64].mxu1 %vm7247_vm11, %v21936_v30 }
 0x97b   : > { %13856 = vmatprep.mubr.msk.bf16.mxu1 %vm16753_vm10, %v21715_v48 }
 0x982   : > { %13857 = vmatmul.mubr.msk.bf16.gmra.mrb[68].mxu1 %vm7247_vm11, %v19869_v52  ;;  %v16708_v52 = vld [vmem:[#allocation3 + $0x10] sm:$0xf] }
 0x983   : > { %13860 = vmatprep.mubr.msk.bf16.mxu1 %vm16753_vm10, %v21715_v48  ;;  %v13031_v43 = vcombine.low %v8423_v28, %v16708_v52  ;;  %v8617_v28 = vrot.slane %v8615_v57, 3  ;;  %v13036_v52 = vcombine.low %v16715_v38, %v16716_v2  ;;  %v16725_v2 = vld [vmem:[#allocation3 + $0x5c] sm:$0xf] }
 0x985   : > { %v8580_v34 = vshrl.u32 %v13031_v43, 16  ;;  %v8583_v35 = vshll.u32 %v13031_v43, 16  ;;  %v8621_v43 = vor.u32 %v8620_v23, %v8617_v28  ;;  %v8627_v13 = vshll.u32 %v13036_v52, 16 }
 0x987   : > { %v8585_v39 = vrot.slane %v8583_v35, 4 }
 0x98a   : > { %13861 = vmatmul.mubr.msk.bf16.gmra.mrb[72].mxu1 %vm7247_vm11, %v19904_v8  ;;  %v8590_v8 = vrot.slane %v8588_v58, 3  ;;  %v8624_v58 = vshrl.u32 %v13036_v52, 16  ;;  %v16726_v52 = vld [vmem:[#allocation3 + $0x60] sm:$0xf] }
 0x98b   : > { %13864 = vmatprep.mubr.msk.bf16.mxu1 %vm16753_vm10, %v21715_v48 }
 0x98c   : > { %v8594_v51 = vor.u32 %v8593_v19, %v8590_v8  ;;  %v8626_v35 = vrot.slane %v8624_v58, 3  ;;  %v8629_v8 = vrot.slane %v8627_v13, 4  ;;  %v16717_v19 = vld [vmem:[#allocation3 + $0x3c] sm:$0xf] }
 0x98d   : > { %v13037_v41 = vcombine.low %v16717_v19, %v16718_v50  ;;  %v16727_v50 = vld [vmem:[#allocation3 + $0x64] sm:$0xf] }
 0x98e   : > { %v8604_v60 = vsel %vm1473_vm4, %v8594_v51, %v8603_v3  ;;  %v8630_v29 = vor.u32 %v8629_v8, %v8626_v35 }
 0x992   : > { %13865 = vmatmul.mubr.msk.bf16.gmra.mrb[76].mxu1 %vm7247_vm11, %v19949_v53  ;;  %v8582_v53 = vrot.slane %v8580_v34, 3 }
 0x993   : > { %13868 = vmatprep.mubr.msk.bf16.mxu1 %vm16753_vm10, %v21715_v48 }
 0x994   : > { %v8586_v17 = vor.u32 %v8585_v39, %v8582_v53  ;;  %v8633_v53 = vshrl.u32 %v13037_v41, 16  ;;  %v8636_v39 = vshll.u32 %v13037_v41, 16  ;;  %v16728_v41 = vld [vmem:[#allocation3 + $0x68] sm:$0xf] }
 0x996   : > { %v8595_v26 = vsel %vm1473_vm4, %v8586_v17, %v8594_v51  ;;  %v8631_v51 = vsel %vm1473_vm4, %v8621_v43, %v8630_v29  ;;  %v8635_v54 = vrot.slane %v8633_v53, 3  ;;  %v8638_v32 = vrot.slane %v8636_v39, 4  ;;  %v16719_v17 = vld [vmem:[#allocation3 + $0x44] sm:$0xf] }
 0x998   : > { %v8639_v24 = vor.u32 %v8638_v32, %v8635_v54 }
 0x99a   : > { %13869 = vmatmul.mubr.msk.bf16.gmra.mrb[80].mxu1 %vm7247_vm11, %v19934_v49  ;;  %v13034_v49 = vcombine.low %v16711_v47, %v16712_v14  ;;  %v8640_v14 = vsel %vm1473_vm4, %v8630_v29, %v8639_v24  ;;  %v13042_v29 = vcombine.low %v16727_v50, %v16728_v41  ;;  %v16737_v41 = vld [vmem:[#allocation3 + $0x8c] sm:$0xf] }
 0x99b   : > { %13880 = vmatprep.mubr.msk.bf16.mxu1 %vm16753_vm10, %v21715_v48 }
 0x99c   : > { %v8606_v55 = vshrl.u32 %v13034_v49, 16  ;;  %v8609_v33 = vshll.u32 %v13034_v49, 16  ;;  %v8678_v39 = vshrl.u32 %v13042_v29, 16 }
 0x99e   : > { %v8608_v37 = vrot.slane %v8606_v55, 3  ;;  %v8611_v36 = vrot.slane %v8609_v33, 4  ;;  %v16722_v55 = vld [vmem:[#allocation3 + $0x50] sm:$0xf]  ;;  %v8680_v32 = vrot.slane %v8678_v39, 3 }
 0x9a0   : > { %v8612_v1 = vor.u32 %v8611_v36, %v8608_v37 }
 0x9a2   : > { %13881 = vmatmul.mubr.msk.bf16.vlgmr.msra.gmra.mrb[0].mxu1 %vm7247_vm11, %v8595_v26  ;;  %v8613_v30 = vsel %vm1473_vm4, %v8603_v3, %v8612_v1  ;;  %v8622_v34 = vsel %vm1473_vm4, %v8612_v1, %v8621_v43  ;;  %v16721_v3 = vld [vmem:[#allocation3 + $0x4c] sm:$0xf]  ;;  %v13041_v43 = vcombine.low %v16725_v2, %v16726_v52  ;;  %v16735_v52 = vld [vmem:[#allocation3 + $0x84] sm:$0xf] }
 0x9a3   : > { %13965 = vmatpush3.bf16.msra.mxu1 %v16130_v31  ;;  %13884 = vmatprep.mubr.msk.bf16.mxu1 %vm16753_vm10, %v21715_v48  ;;  %v16720_v31 = vld [vmem:[#allocation3 + $0x48] sm:$0xf]  ;;  %v13039_v33 = vcombine.low %v16721_v3, %v16722_v55  ;;  %v16731_v55 = vld [vmem:[#allocation3 + $0x74] sm:$0xf] }
 0x9a4   : > { %13966 = vmatprep.subr.bf16.mxu1 %v21715_v48  ;;  %v13038_v26 = vcombine.low %v16719_v17, %v16720_v31  ;;  %v8669_v13 = vshrl.u32 %v13041_v43, 16  ;;  %v16729_v31 = vld [vmem:[#allocation3 + $0x6c] sm:$0xf] }
 0x9a5   : > { %v8654_v37 = vshll.u32 %v13039_v33, 16 }
 0x9a6   : > { %v8642_v4 = vshrl.u32 %v13038_v26, 16  ;;  %v8645_v47 = vshll.u32 %v13038_v26, 16  ;;  %v8671_v8 = vrot.slane %v8669_v13, 3  ;;  %v16730_v26 = vld [vmem:[#allocation3 + $0x70] sm:$0xf] }
 0x9a7   : > { %13967 = vmatpush3.bf16.msra.mxu1 %v16136_v45  ;;  %v8656_v59 = vrot.slane %v8654_v37, 4 }
 0x9a8   : > { %13968 = vmatprep.subr.bf16.mxu1 %v21715_v48  ;;  %v8644_v49 = vrot.slane %v8642_v4, 3  ;;  %v8647_v45 = vrot.slane %v8645_v47, 4 }
 0x9aa   : > { %13885 = vmatmul.mubr.msk.bf16.gmra.mrb[4].mxu1 %vm7247_vm11, %v8604_v60  ;;  %v8651_v60 = vshrl.u32 %v13039_v33, 16  ;;  %v16732_v33 = vld [vmem:[#allocation3 + $0x78] sm:$0xf] }
 0x9ab   : > { %13888 = vmatprep.mubr.msk.bf16.mxu1 %vm16753_vm10, %v21715_v48  ;;  %13969 = vmatpush3.bf16.msra.mxu1 %v16142_v16  ;;  %v8648_v16 = vor.u32 %v8647_v45, %v8644_v49 }
 0x9ac   : > { %13970 = vmatprep.subr.bf16.mxu1 %v21715_v48  ;;  %v8653_v6 = vrot.slane %v8651_v60, 3 }
 0x9ad   : > { %v8649_v36 = vsel %vm1473_vm4, %v8639_v24, %v8648_v16  ;;  %v13043_v24 = vcombine.low %v16729_v31, %v16730_v26  ;;  %v21937_v31 = vld [vmem:[#allocation142_spill] sm:$0xff]  ;;  %v21938_v26 = vld [vmem:[#allocation136_spill] sm:$0xff] }
 0x9ae   : > { %v8657_v57 = vor.u32 %v8656_v59, %v8653_v6 }
 0x9af   : > { %13971 = vmatpush3.bf16.msra.mxu1 %v16148_v44  ;;  %v16724_v44 = vld [vmem:[#allocation3 + $0x58] sm:$0xf]  ;;  %v8687_v47 = vshrl.u32 %v13043_v24, 16 }
 0x9b0   : > { %14056 = vmatprep.subr.bf16.mxu1 %v21715_v48  ;;  %v13040_v1 = vcombine.low %v16723_v5, %v16724_v44  ;;  %v8658_v28 = vsel %vm1473_vm4, %v8648_v16, %v8657_v57  ;;  %v13044_v16 = vcombine.low %v16731_v55, %v16732_v33  ;;  %v16733_v44 = vld [vmem:[#allocation3 + $0x7c] sm:$0xf] }
 0x9b1   : > { %v8689_v45 = vrot.slane %v8687_v47, 3  ;;  %v21940_v55 = vld [vmem:[#allocation143_spill] sm:$0xff] }
 0x9b2   : > { %13889 = vmatmul.mubr.msk.bf16.gmra.mrb[8].mxu1 %vm7247_vm11, %v8613_v30  ;;  %v8660_v62 = vshrl.u32 %v13040_v1, 16  ;;  %v8663_v30 = vshll.u32 %v13040_v1, 16  ;;  %v8696_v37 = vshrl.u32 %v13044_v16, 16  ;;  %v16734_v1 = vld [vmem:[#allocation3 + $0x80] sm:$0xf] }
 0x9b3   : > { %13892 = vmatprep.mubr.msk.bf16.mxu1 %vm16753_vm10, %v21715_v48 }
 0x9b4   : > { %v8662_v23 = vrot.slane %v8660_v62, 3  ;;  %v8665_v38 = vrot.slane %v8663_v30, 4  ;;  %v8698_v59 = vrot.slane %v8696_v37, 3 }
 0x9b6   : > { %v8666_v58 = vor.u32 %v8665_v38, %v8662_v23 }
 0x9b8   : > { %v8667_v35 = vsel %vm1473_vm4, %v8657_v57, %v8666_v58  ;;  %v13045_v57 = vcombine.low %v16733_v44, %v16734_v1  ;;  %v21941_v44 = vld [vmem:[#allocation149_spill] sm:$0xff] }
 0x9ba   : > { %13893 = vmatmul.mubr.msk.bf16.gmra.mrb[12].mxu1 %vm7247_vm11, %v8622_v34  ;;  %v8672_v34 = vshll.u32 %v13041_v43, 16  ;;  %v8705_v30 = vshrl.u32 %v13045_v57, 16  ;;  %v16736_v43 = vld [vmem:[#allocation3 + $0x88] sm:$0xf] }
 0x9bb   : > { %13896 = vmatprep.mubr.msk.bf16.mxu1 %vm16753_vm10, %v21715_v48 }
 0x9bc   : > { %v8674_v19 = vrot.slane %v8672_v34, 4  ;;  %v8707_v38 = vrot.slane %v8705_v30, 3 }
 0x9be   : > { %v8675_v53 = vor.u32 %v8674_v19, %v8671_v8 }
 0x9c0   : > { %v8676_v54 = vsel %vm1473_vm4, %v8666_v58, %v8675_v53  ;;  %v13046_v58 = vcombine.low %v16735_v52, %v16736_v43 }
 0x9c2   : > { %13897 = vmatmul.mubr.msk.bf16.gmra.mrb[16].mxu1 %vm7247_vm11, %v8631_v51  ;;  %v8681_v51 = vshll.u32 %v13042_v29, 16  ;;  %v8714_v34 = vshrl.u32 %v13046_v58, 16  ;;  %v13047_v29 = vcombine.low %v16737_v41, %v19829_v0 }
 0x9c3   : > { %13900 = vmatprep.mubr.msk.bf16.mxu1 %vm16753_vm10, %v21715_v48 }
 0x9c4   : > { %v8683_v17 = vrot.slane %v8681_v51, 4  ;;  %v8716_v19 = vrot.slane %v8714_v34, 3  ;;  %v8723_v39 = vshrl.u32 %v13047_v29, 16  ;;  %v8726_v51 = vshll.u32 %v13047_v29, 16  ;;  %v16154_v29 = vld [vmem:[%s21451_s4 + $0xa0] sm:$0xff]  }
 0x9c6   : > { %v8684_v4 = vor.u32 %v8683_v17, %v8680_v32  ;;  %v8725_v32 = vrot.slane %v8723_v39, 3  ;;  %v8728_v17 = vrot.slane %v8726_v51, 4  ;;  %v16160_v39 = vld [vmem:[%s21451_s4 + $0xa8] sm:$0xff]   ;;  %v16166_v51 = vld [vmem:[%s21451_s4 + $0xb0] sm:$0xff]  }
 0x9c8   : > { %v8685_v49 = vsel %vm1473_vm4, %v8675_v53, %v8684_v4  ;;  %v8729_v0 = vor.u32 %v8728_v17, %v8725_v32  ;;  %v16172_v32 = vld [vmem:[%s21451_s4 + $0xb8] sm:$0xff]   ;;  %v21944_v17 = vld [vmem:[#allocation53_spill] sm:$0xff] }
 0x9ca   : > { %13901 = vmatmul.mubr.msk.bf16.gmra.mrb[20].mxu1 %vm7247_vm11, %v8640_v14  ;;  %v8690_v14 = vshll.u32 %v13043_v24, 16  ;;  %v13048_v24 = vcombine.low %v21938_v26, %v21937_v31  ;;  %v21945_v31 = vld [vmem:[#allocation50_spill] sm:$0xff]  ;;  %v21946_v26 = vld [vmem:[#allocation43_spill] sm:$0xff] }
 0x9cb   : > { %13904 = vmatprep.mubr.msk.bf16.mxu1 %vm16753_vm10, %v21715_v48 }
 0x9cc   : > { %v8692_v3 = vrot.slane %v8690_v14, 4  ;;  %v8735_v47 = vshll.u32 %v13048_v24, 16 }
 0x9ce   : > { %v8693_v60 = vor.u32 %v8692_v3, %v8689_v45  ;;  %v8737_v45 = vrot.slane %v8735_v47, 4  ;;  %v21939_v3 = vld [vmem:[#allocation148_spill] sm:$0xff]  ;;  %v21950_v47 = vld [vmem:[#allocation63_spill] sm:$0xff] }
 0x9cf   : > { %v13049_v33 = vcombine.low %v21940_v55, %v21939_v3  ;;  %v21954_v3 = vld [vmem:[#allocation87_spill] sm:$0xff]  ;;  %v21955_v55 = vld [vmem:[#allocation96_spill] sm:$0xff] }
 0x9d0   : > { %v8694_v6 = vsel %vm1473_vm4, %v8684_v4, %v8693_v60  ;;  %v8732_v4 = vshrl.u32 %v13048_v24, 16  ;;  %v21947_v24 = vld [vmem:[#allocation69_spill] sm:$0xff] }
 0x9d1   : > { %v8744_v37 = vshll.u32 %v13049_v33, 16 }
 0x9d2   : > { %13905 = vmatmul.mubr.msk.bf16.gmra.mrb[24].mxu1 %vm7247_vm11, %v8649_v36  ;;  %v8699_v36 = vshll.u32 %v13044_v16, 16 }
 0x9d3   : > { %13908 = vmatprep.mubr.msk.bf16.mxu1 %vm16753_vm10, %v21715_v48 }
 0x9d4   : > { %v8701_v5 = vrot.slane %v8699_v36, 4  ;;  %v20350_v36 = vld [vmem:[#allocation3 + $0xa8] sm:$0xf] }
 0x9d5   : > { %v13050_v1 = vcombine.low %v21941_v44, %v20350_v36 }
 0x9d6   : > { %v8702_v62 = vor.u32 %v8701_v5, %v8698_v59  ;;  %v8746_v5 = vrot.slane %v8744_v37, 4  ;;  %v21959_v37 = vld [vmem:[#allocation144_spill] sm:$0xff] }
 0x9d7   : > { %v8753_v30 = vshll.u32 %v13050_v1, 16 }
 0x9d8   : > { %v8703_v23 = vsel %vm1473_vm4, %v8693_v60, %v8702_v62  ;;  %v8741_v60 = vshrl.u32 %v13049_v33, 16  ;;  %v21956_v33 = vld [vmem:[#allocation101_spill] sm:$0xff] }
 0x9d9   : > { %v8755_v52 = vrot.slane %v8753_v30, 4 }
 0x9da   : > { %13909 = vmatmul.mubr.msk.bf16.gmra.mrb[28].mxu1 %vm7247_vm11, %v8658_v28  ;;  %v8708_v28 = vshll.u32 %v13045_v57, 16  ;;  %v8743_v59 = vrot.slane %v8741_v60, 3  ;;  %v21958_v60 = vld [vmem:[#allocation138_spill] sm:$0xff] }
 0x9db   : > { %13912 = vmatprep.mubr.msk.bf16.mxu1 %vm16753_vm10, %v21715_v48 }
 0x9dc   : > { %v8710_v2 = vrot.slane %v8708_v28, 4  ;;  %v8747_v57 = vor.u32 %v8746_v5, %v8743_v59  ;;  %v20358_v28 = vld [vmem:[#allocation3 + $0xb0] sm:$0x3] }
 0x9dd   : > { %v13105_v44 = vcombine.low %v20358_v28, %v20358_v28 }
 0x9de   : > { %v8711_v13 = vor.u32 %v8710_v2, %v8707_v38 }
 0x9e0   : > { %v8712_v8 = vsel %vm1473_vm4, %v8702_v62, %v8711_v13  ;;  %v8750_v62 = vshrl.u32 %v13050_v1, 16 }
 0x9e2   : > { %13913 = vmatmul.mubr.msk.bf16.gmra.mrb[32].mxu1 %vm7247_vm11, %v8667_v35  ;;  %v8717_v35 = vshll.u32 %v13046_v58, 16  ;;  %v8752_v2 = vrot.slane %v8750_v62, 3 }
 0x9e3   : > { %13916 = vmatprep.mubr.msk.bf16.mxu1 %vm16753_vm10, %v21715_v48 }
 0x9e4   : > { %v8719_v50 = vrot.slane %v8717_v35, 4  ;;  %v8756_v58 = vor.u32 %v8755_v52, %v8752_v2  ;;  %v16179_v2 = vld [vmem:[%s21451_s4 + $0xc8] sm:$0xff]  }
 0x9e6   : > { %v8720_v53 = vor.u32 %v8719_v50, %v8716_v19  ;;  %v8757_v35 = vsel %vm1473_vm4, %v8747_v57, %v8756_v58 }
 0x9e8   : > { %v8730_v14 = vsel %vm1473_vm4, %v8720_v53, %v8729_v0 }
 0x9ea   : > { %13917 = vmatmul.mubr.msk.bf16.gmra.mrb[36].mxu1 %vm7247_vm11, %v8676_v54  ;;  %v8721_v54 = vsel %vm1473_vm4, %v8711_v13, %v8720_v53  ;;  %v21942_v53 = vld [vmem:[#allocation46_spill] sm:$0xff] }
 0x9eb   : > { %13920 = vmatprep.mubr.msk.bf16.mxu1 %vm16753_vm10, %v21715_v48  ;;  %v9468_v5 = vshll.u32 %v21942_v53, 16  ;;  %v9466_v62 = vshrl.u32 %v21942_v53, 16 }
 0x9f2   : > { %13921 = vmatmul.mubr.msk.bf16.gmra.mrb[40].mxu1 %vm7247_vm11, %v8685_v49  ;;  %v8734_v49 = vrot.slane %v8732_v4, 3  ;;  %v21949_v4 = vld [vmem:[#allocation70_spill] sm:$0xff] }
 0x9f3   : > { %13924 = vmatprep.mubr.msk.bf16.mxu1 %vm16753_vm10, %v21715_v48 }
 0x9f4   : > { %v8738_v16 = vor.u32 %v8737_v45, %v8734_v49  ;;  %v21952_v49 = vld [vmem:[#allocation86_spill] sm:$0xff]  ;;  %v21953_v45 = vld [vmem:[#allocation84_spill] sm:$0xff] }
 0x9f6   : > { %v8748_v38 = vsel %vm1473_vm4, %v8738_v16, %v8747_v57 }
 0x9fa   : > { %13925 = vmatmul.mubr.msk.bf16.gmra.mrb[44].mxu1 %vm7247_vm11, %v8694_v6  ;;  %v8739_v6 = vsel %vm1473_vm4, %v8729_v0, %v8738_v16  ;;  %v21948_v0 = vld [vmem:[#allocation54_spill] sm:$0xff] }
 0x9fb   : > { %13928 = vmatprep.mubr.msk.bf16.mxu1 %vm16753_vm10, %v21715_v48  ;;  %v21957_v16 = vld [vmem:[#allocation106_spill] sm:$0xff] }
 0xa02   : > { %13929 = vmatmul.mubr.msk.bf16.gmra.mrb[48].mxu1 %vm7247_vm11, %v8703_v23  ;;  %v20360_v23 = vld [vmem:[#allocation3 + $0xac] sm:$0xf] }
 0xa03   : > { %13932 = vmatprep.mubr.msk.bf16.mxu1 %vm16753_vm10, %v21715_v48  ;;  %v13051_v43 = vcombine.low %v20360_v23, %v20358_v28  ;;  %v20473_v59 = vcombine.low %v20350_v36, %v20360_v23  ;;  %v9470_v36 = vrot.slane %v9468_v5, 1  ;;  %v16178_v23 = vld [vmem:[%s21451_s4 + $0xc0] sm:$0xff]   ;;  %v9479_v28 = vshll.u32 %v21944_v17, 16 }
 0xa04   : > { %v9497_v5 = vshrl.u32 %v21946_v26, 16 }
 0xa05   : > { %v8759_v13 = vshrl.u32 %v13051_v43, 16  ;;  %v8762_v34 = vshll.u32 %v13051_v43, 16  ;;  %v9471_v30 = vor.u32 %v9470_v36, %v9466_v62  ;;  %v9481_v43 = vrot.slane %v9479_v28, 1 }
 0xa07   : > { %v8764_v19 = vrot.slane %v8762_v34, 4 }
 0xa0a   : > { %13933 = vmatmul.mubr.msk.bf16.gmra.mrb[52].mxu1 %vm7247_vm11, %v8712_v8  ;;  %v8761_v8 = vrot.slane %v8759_v13, 3  ;;  %v16180_v13 = vld [vmem:[%s21451_s4 + $0xd0] sm:$0xff]  }
 0xa0b   : > { %13936 = vmatprep.mubr.msk.bf16.mxu1 %vm16753_vm10, %v21715_v48 }
 0xa0c   : > { %v8765_v50 = vor.u32 %v8764_v19, %v8761_v8  ;;  %v16181_v8 = vld [vmem:[%s21451_s4 + $0xd8] sm:$0xff]   ;;  %v9483_v19 = vshrl.u32 %v21944_v17, 16 }
 0xa0e   : > { %v8766_v41 = vsel %vm1473_vm4, %v8756_v58, %v8765_v50  ;;  %vm12307_vm4 = vcmask 785408  }
 0xa12   : > { %13937 = vmatmul.mubr.msk.bf16.gmra.mrb[56].mxu1 %vm7247_vm11, %v8721_v54  ;;  %v21943_v54 = vld [vmem:[#allocation21_spill] sm:$0xff] }
 0xa13   : > { %13940 = vmatprep.mubr.msk.bf16.mxu1 %vm16753_vm10, %v21715_v48  ;;  %v9472_v1 = vshll.u32 %v21943_v54, 16  ;;  %v9476_v52 = vshrl.u32 %v21943_v54, 16 }
 0xa15   : > { %v9474_v57 = vrot.slane %v9472_v1, 1 }
 0xa17   : > { %v9478_v58 = vor.u32 %v9476_v52, %v9474_v57 }
 0xa19   : > { %v9482_v34 = vsel %vm3250_vm5, %v9478_v58, %v9481_v43 }
 0xa1a   : > { %13941 = vmatmul.mubr.msk.bf16.gmra.mrb[60].mxu1 %vm7247_vm11, %v8730_v14  ;;  %v21951_v14 = vld [vmem:[#allocation82_spill] sm:$0xff] }
 0xa1b   : > { %13944 = vmatprep.mubr.msk.bf16.mxu1 %vm16753_vm10, %v21715_v48 }
 0xa22   : > { %13945 = vmatmul.mubr.msk.bf16.gmra.mrb[64].mxu1 %vm7247_vm11, %v8739_v6  ;;  %v21960_v6 = vld [vmem:[#allocation150_spill] sm:$0xff] }
 0xa23   : > { %13948 = vmatprep.mubr.msk.bf16.mxu1 %vm16753_vm10, %v21715_v48 }
 0xa2a   : > { %13949 = vmatmul.mubr.msk.bf16.gmra.mrb[68].mxu1 %vm7247_vm11, %v8748_v38  ;;  %v9475_v38 = vsel %vm3250_vm5, %v9471_v30, %v9474_v57  ;;  %v9507_v57 = vshll.u32 %v21948_v0, 16 }
 0xa2b   : > { %13952 = vmatprep.mubr.msk.bf16.mxu1 %vm16753_vm10, %v21715_v48 }
 0xa2c   : > { %v9509_v62 = vrot.slane %v9507_v57, 1  ;;  %v9556_v57 = vshll.u32 %v21955_v55, 16 }
 0xa32   : > { %13953 = vmatmul.mubr.msk.bf16.gmra.mrb[72].mxu1 %vm7247_vm11, %v8757_v35  ;;  %v9486_v35 = vshll.u32 %v21945_v31, 16 }
 0xa33   : > { %13956 = vmatprep.mubr.msk.bf16.mxu1 %vm16753_vm10, %v21715_v48 }
 0xa3a   : > { %13957 = vmatmul.mubr.msk.bf16.gmra.mrb[76].mxu1 %vm7247_vm11, %v8766_v41  ;;  %v9485_v41 = vor.u32 %v9483_v19, %v9481_v43  ;;  %v9521_v43 = vshll.u32 %v21950_v47, 16 }
 0xa3b   : > { %13960 = vmatprep.mubr.msk.bf16.mxu1 %vm16753_vm10, %v21715_v48 }
 0xa3c   : > { %v9523_v58 = vrot.slane %v9521_v43, 1 }
 0xa42   : > { %13961 = vmatmul.mubr.msk.bf16.gmra.mrb[80].mxu1 %vm7247_vm11, %v8765_v50  ;;  %v9488_v50 = vrot.slane %v9486_v35, 1  ;;  %v9528_v35 = vshll.u32 %v21951_v14, 16 }
 0xa43   : > { %13972 = vmatprep.mubr.msk.bf16.mxu1 %vm16753_vm10, %v21715_v48 }
 0xa4a   : > { %13973 = vmatmul.mubr.msk.bf16.vlgmr.msra.gmra.mrb[0].mxu1 %vm7247_vm11, %v21942_v53  ;;  %v9493_v53 = vshll.u32 %v21946_v26, 16 }
 0xa4b   : > { %14057 = vmatpush3.bf16.msra.mxu1 %v16154_v29  ;;  %13976 = vmatprep.mubr.msk.bf16.mxu1 %vm16753_vm10, %v21715_v48  ;;  %v9489_v29 = vsel %vm3250_vm5, %v9485_v41, %v9488_v50  ;;  %v9535_v41 = vshll.u32 %v21952_v49, 16 }
 0xa4c   : > { %14058 = vmatprep.subr.bf16.mxu1 %v21715_v48 }
 0xa4f   : > { %14059 = vmatpush3.bf16.msra.mxu1 %v16160_v39  ;;  %v9490_v39 = vshrl.u32 %v21945_v31, 16 }
 0xa50   : > { %14060 = vmatprep.subr.bf16.mxu1 %v21715_v48 }
 0xa52   : > { %13977 = vmatmul.mubr.msk.bf16.gmra.mrb[4].mxu1 %vm7247_vm11, %v21943_v54  ;;  %v9492_v54 = vor.u32 %v9490_v39, %v9488_v50 }
 0xa53   : > { %13980 = vmatprep.mubr.msk.bf16.mxu1 %vm16753_vm10, %v21715_v48  ;;  %14061 = vmatpush3.bf16.msra.mxu1 %v16166_v51  ;;  %v9495_v51 = vrot.slane %v9493_v53, 1 }
 0xa54   : > { %14062 = vmatprep.subr.bf16.mxu1 %v21715_v48 }
 0xa55   : > { %v9499_v1 = vor.u32 %v9497_v5, %v9495_v51  ;;  %v9549_v5 = vshll.u32 %v21954_v3, 16 }
 0xa57   : > { %14063 = vmatpush3.bf16.msra.mxu1 %v16172_v32  ;;  %v9496_v32 = vsel %vm3250_vm5, %v9492_v54, %v9495_v51  ;;  %v9542_v51 = vshll.u32 %v21953_v45, 16 }
 0xa58   : > { %14148 = vmatprep.subr.bf16.mxu1 %v21715_v48 }
 0xa59   : > { %v9544_v54 = vrot.slane %v9542_v51, 1 }
 0xa5a   : > { %13981 = vmatmul.mubr.msk.bf16.gmra.mrb[8].mxu1 %vm7247_vm11, %v21944_v17  ;;  %v9500_v17 = vshll.u32 %v21947_v24, 16 }
 0xa5b   : > { %13984 = vmatprep.mubr.msk.bf16.mxu1 %vm16753_vm10, %v21715_v48 }
 0xa62   : > { %13985 = vmatmul.mubr.msk.bf16.gmra.mrb[12].mxu1 %vm7247_vm11, %v21945_v31  ;;  %v9504_v31 = vshrl.u32 %v21947_v24, 16 }
 0xa63   : > { %13988 = vmatprep.mubr.msk.bf16.mxu1 %vm16753_vm10, %v21715_v48 }
 0xa6a   : > { %13989 = vmatmul.mubr.msk.bf16.gmra.mrb[16].mxu1 %vm7247_vm11, %v21946_v26  ;;  %v9511_v26 = vshrl.u32 %v21948_v0, 16 }
 0xa6b   : > { %13992 = vmatprep.mubr.msk.bf16.mxu1 %vm16753_vm10, %v21715_v48 }
 0xa72   : > { %13993 = vmatmul.mubr.msk.bf16.gmra.mrb[20].mxu1 %vm7247_vm11, %v21947_v24  ;;  %v9518_v24 = vshrl.u32 %v21949_v4, 16 }
 0xa73   : > { %13996 = vmatprep.mubr.msk.bf16.mxu1 %vm16753_vm10, %v21715_v48 }
 0xa7a   : > { %13997 = vmatmul.mubr.msk.bf16.gmra.mrb[24].mxu1 %vm7247_vm11, %v21948_v0  ;;  %v9525_v0 = vshrl.u32 %v21950_v47, 16 }
 0xa7b   : > { %14000 = vmatprep.mubr.msk.bf16.mxu1 %vm16753_vm10, %v21715_v48 }
 0xa7c   : > { %v9527_v19 = vor.u32 %v9525_v0, %v9523_v58  ;;  %v9584_v0 = vshll.u32 %v21959_v37, 16 }
 0xa82   : > { %14001 = vmatmul.mubr.msk.bf16.gmra.mrb[28].mxu1 %vm7247_vm11, %v21949_v4 }
 0xa83   : > { %14004 = vmatprep.mubr.msk.bf16.mxu1 %vm16753_vm10, %v21715_v48 }
 0xa8a   : > { %14005 = vmatmul.mubr.msk.bf16.gmra.mrb[32].mxu1 %vm7247_vm11, %v21950_v47  ;;  %v9539_v47 = vshrl.u32 %v21952_v49, 16 }
 0xa8b   : > { %14008 = vmatprep.mubr.msk.bf16.mxu1 %vm16753_vm10, %v21715_v48 }
 0xa92   : > { %14009 = vmatmul.mubr.msk.bf16.gmra.mrb[36].mxu1 %vm7247_vm11, %v21951_v14 }
 0xa93   : > { %14012 = vmatprep.mubr.msk.bf16.mxu1 %vm16753_vm10, %v21715_v48 }
 0xa9a   : > { %14013 = vmatmul.mubr.msk.bf16.gmra.mrb[40].mxu1 %vm7247_vm11, %v21952_v49  ;;  %v9553_v49 = vshrl.u32 %v21954_v3, 16 }
 0xa9b   : > { %14016 = vmatprep.mubr.msk.bf16.mxu1 %vm16753_vm10, %v21715_v48 }
 0xaa2   : > { %14017 = vmatmul.mubr.msk.bf16.gmra.mrb[44].mxu1 %vm7247_vm11, %v21953_v45 }
 0xaa3   : > { %14020 = vmatprep.mubr.msk.bf16.mxu1 %vm16753_vm10, %v21715_v48 }
 0xaaa   : > { %14021 = vmatmul.mubr.msk.bf16.gmra.mrb[48].mxu1 %vm7247_vm11, %v21954_v3  ;;  %v9567_v3 = vshrl.u32 %v21956_v33, 16 }
 0xaab   : > { %14024 = vmatprep.mubr.msk.bf16.mxu1 %vm16753_vm10, %v21715_v48 }
 0xab2   : > { %14025 = vmatmul.mubr.msk.bf16.gmra.mrb[52].mxu1 %vm7247_vm11, %v21955_v55 }
 0xab3   : > { %14028 = vmatprep.mubr.msk.bf16.mxu1 %vm16753_vm10, %v21715_v48 }
 0xaba   : > { %14029 = vmatmul.mubr.msk.bf16.gmra.mrb[56].mxu1 %vm7247_vm11, %v21956_v33 }
 0xabb   : > { %14032 = vmatprep.mubr.msk.bf16.mxu1 %vm16753_vm10, %v21715_v48 }
 0xac2   : > { %14033 = vmatmul.mubr.msk.bf16.gmra.mrb[60].mxu1 %vm7247_vm11, %v21957_v16 }
 0xac3   : > { %14036 = vmatprep.mubr.msk.bf16.mxu1 %vm16753_vm10, %v21715_v48 }
 0xaca   : > { %14037 = vmatmul.mubr.msk.bf16.gmra.mrb[64].mxu1 %vm7247_vm11, %v21958_v60 }
 0xacb   : > { %14040 = vmatprep.mubr.msk.bf16.mxu1 %vm16753_vm10, %v21715_v48 }
 0xad2   : > { %14041 = vmatmul.mubr.msk.bf16.gmra.mrb[68].mxu1 %vm7247_vm11, %v21959_v37 }
 0xad3   : > { %14044 = vmatprep.mubr.msk.bf16.mxu1 %vm16753_vm10, %v21715_v48 }
 0xada   : > { %14045 = vmatmul.mubr.msk.bf16.gmra.mrb[72].mxu1 %vm7247_vm11, %v21960_v6 }
 0xadb   : > { %14048 = vmatprep.mubr.msk.bf16.mxu1 %vm16753_vm10, %v21715_v48 }
 0xae2   : > { %14049 = vmatmul.mubr.msk.bf16.gmra.mrb[76].mxu1 %vm7247_vm11, %v20473_v59 }
 0xae3   : > { %14052 = vmatprep.mubr.msk.bf16.mxu1 %vm16753_vm10, %v21715_v48 }
 0xaea   : > { %14053 = vmatmul.mubr.msk.bf16.gmra.mrb[80].mxu1 %vm7247_vm11, %v13105_v44  ;;  %v9502_v44 = vrot.slane %v9500_v17, 1 }
 0xaeb   : > { %14064 = vmatprep.mubr.msk.bf16.mxu1 %vm16753_vm10, %v21715_v48 }
 0xaec   : > { %v9503_v36 = vsel %vm3250_vm5, %v9499_v1, %v9502_v44  ;;  %v9506_v30 = vor.u32 %v9504_v31, %v9502_v44  ;;  %v9551_v44 = vrot.slane %v9549_v5, 1  ;;  %v9558_v31 = vrot.slane %v9556_v57, 1 }
 0xaf2   : > { %14065 = vmatmul.mubr.msk.bf16.vlgmr.msra.gmra.mrb[0].mxu1 %vm7247_vm11, %v9475_v38  ;;  %v9514_v38 = vshll.u32 %v21949_v4, 16  ;;  %v9532_v4 = vshrl.u32 %v21951_v14, 16  ;;  %v9546_v14 = vshrl.u32 %v21953_v45, 16  ;;  %v9560_v45 = vshrl.u32 %v21955_v55, 16 }
 0xaf3   : > { %14149 = vmatpush3.bf16.msra.mxu1 %v16178_v23  ;;  %14068 = vmatprep.mubr.msk.bf16.mxu1 %vm16753_vm10, %v21715_v48  ;;  %v9510_v23 = vsel %vm3250_vm5, %v9506_v30, %v9509_v62  ;;  %v9574_v55 = vshrl.u32 %v21957_v16, 16 }
 0xaf4   : > { %14150 = vmatprep.subr.bf16.mxu1 %v21715_v48  ;;  %v9516_v28 = vrot.slane %v9514_v38, 1  ;;  %v9548_v1 = vor.u32 %v9546_v14, %v9544_v54 }
 0xaf7   : > { %14151 = vmatpush3.bf16.msra.mxu1 %v16179_v2  ;;  %v9513_v2 = vor.u32 %v9511_v26, %v9509_v62  ;;  %v9555_v62 = vor.u32 %v9553_v49, %v9551_v44  ;;  %v9562_v26 = vor.u32 %v9560_v45, %v9558_v31 }
 0xaf8   : > { %14152 = vmatprep.subr.bf16.mxu1 %v21715_v48 }
 0xaf9   : > { %v9517_v52 = vsel %vm3250_vm5, %v9513_v2, %v9516_v28  ;;  %v9559_v30 = vsel %vm3250_vm5, %v9555_v62, %v9558_v31  ;;  %v9570_v2 = vshll.u32 %v21957_v16, 16  ;;  %v9588_v16 = vshrl.u32 %v21959_v37, 16 }
 0xafa   : > { %14069 = vmatmul.mubr.msk.bf16.gmra.mrb[4].mxu1 %vm7247_vm11, %v9482_v34  ;;  %v9602_v37 = vshrl.u32 %v20473_v59, 16 }
 0xafb   : > { %14072 = vmatprep.mubr.msk.bf16.mxu1 %vm16753_vm10, %v21715_v48  ;;  %14153 = vmatpush3.bf16.msra.mxu1 %v16180_v13  ;;  %v9520_v13 = vor.u32 %v9518_v24, %v9516_v28 }
 0xafc   : > { %14154 = vmatprep.subr.bf16.mxu1 %v21715_v48 }
 0xafd   : > { %v9524_v34 = vsel %vm3250_vm5, %v9520_v13, %v9523_v58  ;;  %v9577_v58 = vshll.u32 %v21958_v60, 16 }
 0xaff   : > { %14155 = vmatpush3.bf16.msra.mxu1 %v16181_v8  ;;  %v9530_v8 = vrot.slane %v9528_v35, 1  ;;  %v9579_v13 = vrot.slane %v9577_v58, 1 }
 0xb00   : > { %14240 = vmatprep.subr.bf16.mxu1 %v21715_v48 }
 0xb01   : > { %v9531_v50 = vsel %vm3250_vm5, %v9527_v19, %v9530_v8  ;;  %v9534_v53 = vor.u32 %v9532_v4, %v9530_v8  ;;  %v9586_v8 = vrot.slane %v9584_v0, 1  ;;  %v16203_v0 = vld [vmem:[%s21451_s4 + $0xf8] sm:$0xff]  }
 0xb02   : > { %14073 = vmatmul.mubr.msk.bf16.gmra.mrb[8].mxu1 %vm7247_vm11, %v9489_v29  ;;  %v9537_v29 = vrot.slane %v9535_v41, 1  ;;  %v9591_v41 = vshll.u32 %v21960_v6, 16 }
 0xb03   : > { %14076 = vmatprep.mubr.msk.bf16.mxu1 %vm16753_vm10, %v21715_v48 }
 0xb04   : > { %v9538_v39 = vsel %vm3250_vm5, %v9534_v53, %v9537_v29  ;;  %v9593_v4 = vrot.slane %v9591_v41, 1 }
 0xb0a   : > { %14077 = vmatmul.mubr.msk.bf16.gmra.mrb[12].mxu1 %vm7247_vm11, %v9496_v32  ;;  %v9541_v32 = vor.u32 %v9539_v47, %v9537_v29  ;;  %v9590_v29 = vor.u32 %v9588_v16, %v9586_v8  ;;  %v16182_v47 = vld [vmem:[#allocation3 + $0xb0] ss:$0 sps:$4 sm:$0x77]  }
 0xb0b   : > { %14080 = vmatprep.mubr.msk.bf16.mxu1 %vm16753_vm10, %v21715_v48  ;;  %v9610_v57 = vshrl.u32 %v16182_v47, 16 }
 0xb0c   : > { %v9545_v17 = vsel %vm3250_vm5, %v9541_v32, %v9544_v54  ;;  %v9594_v53 = vsel %vm3250_vm5, %v9590_v29, %v9593_v4 }
 0xb12   : > { %14081 = vmatmul.mubr.msk.bf16.gmra.mrb[16].mxu1 %vm7247_vm11, %v9503_v36  ;;  %v9552_v36 = vsel %vm3250_vm5, %v9548_v1, %v9551_v44  ;;  %v16738_v1 = vld [vmem:[#allocation3 + $0x1c] sm:$0xf] }
 0xb13   : > { %14084 = vmatprep.mubr.msk.bf16.mxu1 %vm16753_vm10, %v21715_v48 }
 0xb1a   : > { %14085 = vmatmul.mubr.msk.bf16.gmra.mrb[20].mxu1 %vm7247_vm11, %v9510_v23  ;;  %v9563_v23 = vshll.u32 %v21956_v33, 16  ;;  %v9581_v33 = vshrl.u32 %v21958_v60, 16  ;;  %v9595_v60 = vshrl.u32 %v21960_v6, 16  ;;  %v9941_v6 = vld [vmem:[#allocation3 + $0x18] sm:$0xf] }
 0xb1b   : > { %14088 = vmatprep.mubr.msk.bf16.mxu1 %vm16753_vm10, %v21715_v48 }
 0xb1c   : > { %v9565_v38 = vrot.slane %v9563_v23, 1  ;;  %v9583_v19 = vor.u32 %v9581_v33, %v9579_v13  ;;  %v9597_v54 = vor.u32 %v9595_v60, %v9593_v4 }
 0xb1e   : > { %v9566_v28 = vsel %vm3250_vm5, %v9562_v26, %v9565_v38  ;;  %v9569_v43 = vor.u32 %v9567_v3, %v9565_v38  ;;  %v16185_v26 = vld [vmem:[%s21451_s4 + $0xe0] sm:$0xff]  }
 0xb22   : > { %14089 = vmatmul.mubr.msk.bf16.gmra.mrb[24].mxu1 %vm7247_vm11, %v9517_v52  ;;  %v9572_v52 = vrot.slane %v9570_v2, 1  ;;  %v20629_v2 = vld [vmem:[#allocation3 + $0x28] sm:$0xff]  }
 0xb23   : > { %14092 = vmatprep.mubr.msk.bf16.mxu1 %vm16753_vm10, %v21715_v48  ;;  %v10110_v3 = vshll.u32 %v20629_v2, 16  ;;  %v10114_v33 = vshrl.u32 %v20629_v2, 16 }
 0xb24   : > { %v9573_v24 = vsel %vm3250_vm5, %v9569_v43, %v9572_v52 }
 0xb25   : > { %v10112_v43 = vrot.slane %v10110_v3, 1 }
 0xb2a   : > { %14093 = vmatmul.mubr.msk.bf16.gmra.mrb[28].mxu1 %vm7247_vm11, %v9524_v34  ;;  %v9576_v34 = vor.u32 %v9574_v55, %v9572_v52  ;;  %v16191_v52 = vld [vmem:[%s21451_s4 + $0xe8] sm:$0xff]  }
 0xb2b   : > { %14096 = vmatprep.mubr.msk.bf16.mxu1 %vm16753_vm10, %v21715_v48 }
 0xb2c   : > { %v9580_v35 = vsel %vm3250_vm5, %v9576_v34, %v9579_v13  ;;  %v16197_v13 = vld [vmem:[%s21451_s4 + $0xf0] sm:$0xff]  }
 0xb32   : > { %14097 = vmatmul.mubr.msk.bf16.gmra.mrb[32].mxu1 %vm7247_vm11, %v9531_v50  ;;  %v9587_v50 = vsel %vm3250_vm5, %v9583_v19, %v9586_v8  ;;  %v20661_v19 = vld [vmem:[#allocation3 + $0x38] sm:$0xff]  }
 0xb33   : > { %14100 = vmatprep.mubr.msk.bf16.mxu1 %vm16753_vm10, %v21715_v48  ;;  %v10126_v16 = vshll.u32 %v20661_v19, 16  ;;  %v10130_v60 = vshrl.u32 %v20661_v19, 16 }
 0xb35   : > { %v10128_v29 = vrot.slane %v10126_v16, 1 }
 0xb3a   : > { %14101 = vmatmul.mubr.msk.bf16.gmra.mrb[36].mxu1 %vm7247_vm11, %v9538_v39  ;;  %v9598_v39 = vshll.u32 %v20473_v59, 16 }
 0xb3b   : > { %14104 = vmatprep.mubr.msk.bf16.mxu1 %vm16753_vm10, %v21715_v48 }
 0xb3c   : > { %v9600_v51 = vrot.slane %v9598_v39, 1 }
 0xb3e   : > { %v9601_v32 = vsel %vm3250_vm5, %v9597_v54, %v9600_v51  ;;  %v9604_v5 = vor.u32 %v9602_v37, %v9600_v51  ;;  %v21964_v51 = vld [vmem:[#allocation112_spill] sm:$0xff] }
 0xb3f   : > { %v21966_v37 = vld [vmem:[#allocation108_spill] sm:$0xff] }
 0xb42   : > { %14105 = vmatmul.mubr.msk.bf16.gmra.mrb[40].mxu1 %vm7247_vm11, %v9545_v17  ;;  %v9606_v17 = vshll.u32 %v16182_v47, 16  ;;  %v21965_v47 = vshll.u32 %v21964_v51, 16 }
 0xb43   : > { %14108 = vmatprep.mubr.msk.bf16.mxu1 %vm16753_vm10, %v21715_v48 }
 0xb44   : > { %v9608_v14 = vrot.slane %v9606_v17, 1  ;;  %v10136_v54 = vrot.slane %v21965_v47, 1 }
 0xb46   : > { %v9609_v44 = vsel %vm3250_vm5, %v9604_v5, %v9608_v14  ;;  %v9612_v31 = vor.u32 %v9610_v57, %v9608_v14  ;;  %v21967_v5 = vshll.u32 %v21966_v37, 16 }
 0xb48   : > { %v10144_v14 = vrot.slane %v21967_v5, 1  ;;  %v21984_v5 = vld [vmem:[#allocation116_spill] sm:$0xff] }
 0xb4a   : > { %14109 = vmatmul.mubr.msk.bf16.gmra.mrb[44].mxu1 %vm7247_vm11, %v9552_v36  ;;  %v13173_v36 = vcombine.low %v9941_v6, %v16738_v1 }
 0xb4b   : > { %14112 = vmatprep.mubr.msk.bf16.mxu1 %vm16753_vm10, %v21715_v48 }
 0xb4c   : > { %v10097_v49 = vshll.u32 %v13173_v36, 16  ;;  %v10095_v62 = vshrl.u32 %v13173_v36, 16  ;;  %v21969_v36 = vld [vmem:[#allocation109_spill] sm:$0xff] }
 0xb4d   : > { %v21970_v57 = vshll.u32 %v21969_v36, 16 }
 0xb4e   : > { %v10099_v59 = vrot.slane %v10097_v49, 1 }
 0xb4f   : > { %v10152_v49 = vrot.slane %v21970_v57, 1  ;;  %v21987_v57 = vld [vmem:[#allocation117_spill] sm:$0xff] }
 0xb50   : > { %v10100_v38 = vor.u32 %v10099_v59, %v10095_v62 }
 0xb52   : > { %14113 = vmatmul.mubr.msk.bf16.gmra.mrb[48].mxu1 %vm7247_vm11, %v9559_v30  ;;  %v21961_v30 = vld [vmem:[#allocation38_spill] sm:$0xff] }
 0xb53   : > { %14116 = vmatprep.mubr.msk.bf16.mxu1 %vm16753_vm10, %v21715_v48  ;;  %v21962_v23 = vshll.u32 %v21961_v30, 16  ;;  %v21963_v58 = vshrl.u32 %v21961_v30, 16  ;;  %v21972_v30 = vld [vmem:[#allocation110_spill] sm:$0xff] }
 0xb55   : > { %v10104_v45 = vrot.slane %v21962_v23, 1  ;;  %v21973_v23 = vshll.u32 %v21972_v30, 16 }
 0xb57   : > { %v10108_v55 = vor.u32 %v21963_v58, %v10104_v45 }
 0xb59   : > { %v10113_v34 = vsel %vm3250_vm5, %v10108_v55, %v10112_v43  ;;  %v21977_v55 = vshrl.u32 %v21972_v30, 16 }
 0xb5a   : > { %14117 = vmatmul.mubr.msk.bf16.gmra.mrb[52].mxu1 %vm7247_vm11, %v9566_v28  ;;  %v10105_v28 = vsel %vm3250_vm5, %v10100_v38, %v10104_v45  ;;  %v10160_v45 = vrot.slane %v21973_v23, 1  ;;  %v21974_v38 = vshrl.u32 %v21969_v36, 16  ;;  %v21990_v23 = vld [vmem:[#allocation118_spill] sm:$0xff] }
 0xb5b   : > { %14120 = vmatprep.mubr.msk.bf16.mxu1 %vm16753_vm10, %v21715_v48 }
 0xb62   : > { %14121 = vmatmul.mubr.msk.bf16.gmra.mrb[56].mxu1 %vm7247_vm11, %v9573_v24  ;;  %v20641_v24 = vld [vmem:[#allocation3 + $0x30] sm:$0xff]  }
 0xb63   : > { %14124 = vmatprep.mubr.msk.bf16.mxu1 %vm16753_vm10, %v21715_v48  ;;  %v10122_v4 = vshrl.u32 %v20641_v24, 16 }
 0xb6a   : > { %14125 = vmatmul.mubr.msk.bf16.gmra.mrb[60].mxu1 %vm7247_vm11, %v9580_v35  ;;  %v10118_v35 = vshll.u32 %v20641_v24, 16 }
 0xb6b   : > { %14128 = vmatprep.mubr.msk.bf16.mxu1 %vm16753_vm10, %v21715_v48 }
 0xb6c   : > { %v10120_v8 = vrot.slane %v10118_v35, 1 }
 0xb72   : > { %14129 = vmatmul.mubr.msk.bf16.gmra.mrb[64].mxu1 %vm7247_vm11, %v9587_v50  ;;  %v10116_v50 = vor.u32 %v10114_v33, %v10112_v43 }
 0xb73   : > { %14132 = vmatprep.mubr.msk.bf16.mxu1 %vm16753_vm10, %v21715_v48 }
 0xb74   : > { %v10121_v41 = vsel %vm3250_vm5, %v10116_v50, %v10120_v8 }
 0xb7a   : > { %14133 = vmatmul.mubr.msk.bf16.gmra.mrb[68].mxu1 %vm7247_vm11, %v9594_v53  ;;  %v10124_v53 = vor.u32 %v10122_v4, %v10120_v8 }
 0xb7b   : > { %14136 = vmatprep.mubr.msk.bf16.mxu1 %vm16753_vm10, %v21715_v48 }
 0xb7c   : > { %v10129_v39 = vsel %vm3250_vm5, %v10124_v53, %v10128_v29 }
 0xb82   : > { %14137 = vmatmul.mubr.msk.bf16.gmra.mrb[72].mxu1 %vm7247_vm11, %v9601_v32  ;;  %v10132_v32 = vor.u32 %v10130_v60, %v10128_v29 }
 0xb83   : > { %14140 = vmatprep.mubr.msk.bf16.mxu1 %vm16753_vm10, %v21715_v48 }
 0xb84   : > { %v10137_v17 = vsel %vm3250_vm5, %v10132_v32, %v10136_v54 }
 0xb8a   : > { %14141 = vmatmul.mubr.msk.bf16.gmra.mrb[76].mxu1 %vm7247_vm11, %v9609_v44  ;;  %v21968_v44 = vshrl.u32 %v21964_v51, 16 }
 0xb8b   : > { %14144 = vmatprep.mubr.msk.bf16.mxu1 %vm16753_vm10, %v21715_v48 }
 0xb8c   : > { %v10140_v6 = vor.u32 %v21968_v44, %v10136_v54 }
 0xb8e   : > { %v10145_v1 = vsel %vm3250_vm5, %v10140_v6, %v10144_v14 }
 0xb92   : > { %14145 = vmatmul.mubr.msk.bf16.gmra.mrb[80].mxu1 %vm7247_vm11, %v9612_v31  ;;  %v21971_v31 = vshrl.u32 %v21966_v37, 16 }
 0xb93   : > { %14156 = vmatprep.mubr.msk.bf16.mxu1 %vm16753_vm10, %v21715_v48 }
 0xb94   : > { %v10148_v59 = vor.u32 %v21971_v31, %v10144_v14  ;;  %v21985_v14 = vshll.u32 %v21984_v5, 16 }
 0xb96   : > { %v10153_v62 = vsel %vm3250_vm5, %v10148_v59, %v10152_v49  ;;  %v10192_v44 = vrot.slane %v21985_v14, 1  ;;  %v21989_v59 = vshrl.u32 %v21984_v5, 16  ;;  %v22000_v5 = vshrl.u32 %v19919_v56, 16 }
 0xb9a   : > { %14157 = vmatmul.mubr.msk.bf16.vlgmr.msra.gmra.mrb[0].mxu1 %vm7247_vm11, %v10105_v28 }
 0xb9b   : > { %14241 = vmatpush3.bf16.msra.mxu1 %v16185_v26  ;;  %14160 = vmatprep.mubr.msk.bf16.mxu1 %vm16753_vm10, %v21715_v48  ;;  %v10156_v26 = vor.u32 %v21974_v38, %v10152_v49  ;;  %v21988_v49 = vshll.u32 %v21987_v57, 16 }
 0xb9c   : > { %14242 = vmatprep.subr.bf16.mxu1 %v21715_v48 }
 0xb9d   : > { %v10161_v28 = vsel %vm3250_vm5, %v10156_v26, %v10160_v45  ;;  %v10200_v31 = vrot.slane %v21988_v49, 1  ;;  %v21992_v26 = vshrl.u32 %v21987_v57, 16  ;;  %v22001_v49 = vld [vmem:[#allocation35_spill] sm:$0xff] }
 0xb9f   : > { %14243 = vmatpush3.bf16.msra.mxu1 %v16191_v52  ;;  %v21975_v52 = vld [vmem:[#allocation113_spill] sm:$0xff] }
 0xba0   : > { %14244 = vmatprep.subr.bf16.mxu1 %v21715_v48  ;;  %v21976_v43 = vshll.u32 %v21975_v52, 16 }
 0xba2   : > { %14161 = vmatmul.mubr.msk.bf16.gmra.mrb[4].mxu1 %vm7247_vm11, %v10113_v34  ;;  %v10168_v58 = vrot.slane %v21976_v43, 1  ;;  %v21993_v43 = vld [vmem:[#allocation139_spill] sm:$0xff] }
 0xba3   : > { %14164 = vmatprep.mubr.msk.bf16.mxu1 %vm16753_vm10, %v21715_v48  ;;  %14245 = vmatpush3.bf16.msra.mxu1 %v16197_v13  ;;  %v10164_v13 = vor.u32 %v21977_v55, %v10160_v45  ;;  %v21991_v45 = vshll.u32 %v21990_v23, 16 }
 0xba4   : > { %14246 = vmatprep.subr.bf16.mxu1 %v21715_v48 }
 0xba5   : > { %v10169_v34 = vsel %vm3250_vm5, %v10164_v13, %v10168_v58  ;;  %v10208_v38 = vrot.slane %v21991_v45, 1  ;;  %v21995_v13 = vshrl.u32 %v21990_v23, 16  ;;  %v10607_v23 = vrot.slane %v20641_v24, 1  ;;  %v22003_v45 = vld [vmem:[#allocation62_spill] sm:$0xff] }
 0xba7   : > { %14247 = vmatpush3.bf16.msra.mxu1 %v16203_v0  ;;  %v21978_v0 = vld [vmem:[#allocation114_spill] sm:$0xff] }
 0xba8   : > { %14332 = vmatprep.subr.bf16.mxu1 %v21715_v48  ;;  %v21979_v8 = vshll.u32 %v21978_v0, 16  ;;  %v21983_v54 = vshrl.u32 %v21978_v0, 16 }
 0xbaa   : > { %14165 = vmatmul.mubr.msk.bf16.gmra.mrb[8].mxu1 %vm7247_vm11, %v10121_v41  ;;  %v10176_v50 = vrot.slane %v21979_v8, 1  ;;  %v21980_v41 = vshrl.u32 %v21975_v52, 16  ;;  %v21996_v8 = vld [vmem:[#allocation145_spill] sm:$0xff] }
 0xbab   : > { %14168 = vmatprep.mubr.msk.bf16.mxu1 %vm16753_vm10, %v21715_v48 }
 0xbac   : > { %v10172_v29 = vor.u32 %v21980_v41, %v10168_v58  ;;  %v10180_v32 = vor.u32 %v21983_v54, %v10176_v50  ;;  %v21994_v58 = vshll.u32 %v21993_v43, 16 }
 0xbae   : > { %v10177_v53 = vsel %vm3250_vm5, %v10172_v29, %v10176_v50  ;;  %v10216_v55 = vrot.slane %v21994_v58, 1  ;;  %v21997_v50 = vshll.u32 %v21996_v8, 16  ;;  %v21998_v29 = vshrl.u32 %v21993_v43, 16  ;;  %v16740_v43 = vld [vmem:[#allocation3 + $0x40] sm:$0xff]  }
 0xbaf   : > { %v10611_v58 = vrot.slane %v16740_v43, 1 }
 0xbb0   : > { %v10224_v41 = vrot.slane %v21997_v50, 1  ;;  %v22009_v50 = vld [vmem:[#allocation122_spill] sm:$0xff] }
 0xbb2   : > { %14169 = vmatmul.mubr.msk.bf16.gmra.mrb[12].mxu1 %vm7247_vm11, %v10129_v39  ;;  %v21981_v39 = vld [vmem:[#allocation115_spill] sm:$0xff] }
 0xbb3   : > { %14172 = vmatprep.mubr.msk.bf16.mxu1 %vm16753_vm10, %v21715_v48  ;;  %v21982_v51 = vshll.u32 %v21981_v39, 16  ;;  %v21986_v6 = vshrl.u32 %v21981_v39, 16 }
 0xbb5   : > { %v10184_v47 = vrot.slane %v21982_v51, 1  ;;  %v10232_v51 = vrot.slane %v10230_v9, 1  ;;  %v10248_v9 = vrot.slane %v10246_v18, 1 }
 0xbb7   : > { %v10236_v14 = vor.u32 %v22000_v5, %v10232_v51  ;;  %v11000_v5 = vrot.slane %v10122_v4, 1  ;;  %v22018_v4 = vld [vmem:[#allocation127_spill] sm:$0xff] }
 0xbba   : > { %14173 = vmatmul.mubr.msk.bf16.gmra.mrb[16].mxu1 %vm7247_vm11, %v10137_v17  ;;  %v10185_v17 = vsel %vm3250_vm5, %v10180_v32, %v10184_v47 }
 0xbbb   : > { %14176 = vmatprep.mubr.msk.bf16.mxu1 %vm16753_vm10, %v21715_v48 }
 0xbc2   : > { %14177 = vmatmul.mubr.msk.bf16.gmra.mrb[20].mxu1 %vm7247_vm11, %v10145_v1  ;;  %v10188_v1 = vor.u32 %v21986_v6, %v10184_v47  ;;  %v21999_v47 = vshrl.u32 %v21996_v8, 16  ;;  %v22007_v8 = vld [vmem:[#allocation120_spill] sm:$0xff] }
 0xbc3   : > { %14180 = vmatprep.mubr.msk.bf16.mxu1 %vm16753_vm10, %v21715_v48 }
 0xbc4   : > { %v10193_v36 = vsel %vm3250_vm5, %v10188_v1, %v10192_v44  ;;  %v10228_v54 = vor.u32 %v21999_v47, %v10224_v41  ;;  %v20797_v1 = vld [vmem:[#allocation3 + $0xb8] ss:$0 sps:$4 sm:$0x77]  }
 0xbc5   : > { %v10254_v56 = vshll.u32 %v20797_v1, 16  ;;  %v10258_v21 = vshrl.u32 %v20797_v1, 16  ;;  %v22015_v47 = vld [vmem:[#allocation146_spill] sm:$0xff] }
 0xbc6   : > { %v10233_v32 = vsel %vm3250_vm5, %v10228_v54, %v10232_v51  ;;  %v22014_v51 = vld [vmem:[#allocation140_spill] sm:$0xff]  ;;  %v10641_v54 = vrot.slane %v20797_v1, 1 }
 0xbc7   : > { %v10256_v57 = vrot.slane %v10254_v56, 1  ;;  %v22023_v1 = vld [vmem:[#allocation132_spill] sm:$0xff]  ;;  %v22025_v56 = vld [vmem:[#allocation134_spill] sm:$0xff] }
 0xbca   : > { %14181 = vmatmul.mubr.msk.bf16.gmra.mrb[24].mxu1 %vm7247_vm11, %v10153_v62  ;;  %v10196_v62 = vor.u32 %v21989_v59, %v10192_v44  ;;  %v16211_v59 = vld [vmem:[%s21451_s4 + $0x110] sm:$0xff]  }
 0xbcb   : > { %14184 = vmatprep.mubr.msk.bf16.mxu1 %vm16753_vm10, %v21715_v48 }
 0xbcc   : > { %v10201_v30 = vsel %vm3250_vm5, %v10196_v62, %v10200_v31  ;;  %v22002_v62 = vld [vmem:[#allocation30_spill] sm:$0xff] }
 0xbd2   : > { %14185 = vmatmul.mubr.msk.bf16.gmra.mrb[28].mxu1 %vm7247_vm11, %v10161_v28  ;;  %v10204_v28 = vor.u32 %v21992_v26, %v10200_v31  ;;  %v16210_v31 = vld [vmem:[%s21451_s4 + $0x108] sm:$0xff]  }
 0xbd3   : > { %14188 = vmatprep.mubr.msk.bf16.mxu1 %vm16753_vm10, %v21715_v48 }
 0xbd4   : > { %v10209_v52 = vsel %vm3250_vm5, %v10204_v28, %v10208_v38  ;;  %v10609_v28 = vrot.slane %v20661_v19, 1  ;;  %v22019_v19 = vld [vmem:[#allocation128_spill] sm:$0xff] }
 0xbda   : > { %14189 = vmatmul.mubr.msk.bf16.gmra.mrb[32].mxu1 %vm7247_vm11, %v10169_v34  ;;  %v10212_v34 = vor.u32 %v21995_v13, %v10208_v38  ;;  %v22004_v38 = vrot.slane %v22003_v45, 1  ;;  %v22005_v13 = vrot.slane %v21966_v37, 1  ;;  %v22008_v37 = vld [vmem:[#allocation121_spill] sm:$0xff] }
 0xbdb   : > { %14192 = vmatprep.mubr.msk.bf16.mxu1 %vm16753_vm10, %v21715_v48 }
 0xbdc   : > { %v10217_v0 = vsel %vm3250_vm5, %v10212_v34, %v10216_v55  ;;  %v10608_v26 = vsel %vm4615_vm6, %v22004_v38, %v10607_v23  ;;  %v10614_v34 = vsel %vm4615_vm6, %v10611_v58, %v22005_v13 }
 0xbe2   : > { %14193 = vmatmul.mubr.msk.bf16.gmra.mrb[36].mxu1 %vm7247_vm11, %v10177_v53  ;;  %v10220_v53 = vor.u32 %v21998_v29, %v10216_v55  ;;  %v10612_v55 = vsel %vm4615_vm6, %v10609_v28, %v10611_v58  ;;  %v22011_v29 = vld [vmem:[#allocation124_spill] sm:$0xff] }
 0xbe3   : > { %14196 = vmatprep.mubr.msk.bf16.mxu1 %vm16753_vm10, %v21715_v48 }
 0xbe4   : > { %v10225_v39 = vsel %vm3250_vm5, %v10220_v53, %v10224_v41  ;;  %v22010_v41 = vld [vmem:[#allocation123_spill] sm:$0xff]  ;;  %v22012_v53 = vld [vmem:[#allocation125_spill] sm:$0xff] }
 0xbea   : > { %14197 = vmatmul.mubr.msk.bf16.gmra.mrb[40].mxu1 %vm7247_vm11, %v10185_v17  ;;  %v10240_v17 = vrot.slane %v10238_v20, 1 }
 0xbeb   : > { %14200 = vmatprep.mubr.msk.bf16.mxu1 %vm16753_vm10, %v21715_v48 }
 0xbec   : > { %v10241_v44 = vsel %vm3250_vm5, %v10236_v14, %v10240_v17  ;;  %v10244_v6 = vor.u32 %v10242_v12, %v10240_v17  ;;  %v10260_v12 = vor.u32 %v10258_v21, %v10256_v57  ;;  %v11001_v14 = vrot.slane %v10118_v35, 2  ;;  %v22029_v21 = vld [vmem:[#allocation147_spill] sm:$0xff] }
 0xbee   : > { %v10249_v20 = vsel %vm3250_vm5, %v10244_v6, %v10248_v9  ;;  %v11002_v2 = vor.u32 %v11001_v14, %v11000_v5  ;;  %v22022_v6 = vld [vmem:[#allocation131_spill] sm:$0xff] }
 0xbf2   : > { %14201 = vmatmul.mubr.msk.bf16.gmra.mrb[44].mxu1 %vm7247_vm11, %v10193_v36  ;;  %v10252_v36 = vor.u32 %v10250_v10, %v10248_v9  ;;  %v16209_v10 = vld [vmem:[%s21451_s4 + $0x100] sm:$0xff]  }
 0xbf3   : > { %14204 = vmatprep.mubr.msk.bf16.mxu1 %vm16753_vm10, %v21715_v48 }
 0xbf4   : > { %v10257_v18 = vsel %vm3250_vm5, %v10252_v36, %v10256_v57  ;;  %v22026_v36 = vld [vmem:[#allocation135_spill] sm:$0xff]  ;;  %v22027_v57 = vld [vmem:[#allocation137_spill] sm:$0xff] }
 0xbfa   : > { %14205 = vmatmul.mubr.msk.bf16.gmra.mrb[48].mxu1 %vm7247_vm11, %v10201_v30  ;;  %v16212_v30 = vld [vmem:[%s21451_s4 + $0x118] sm:$0xff]  }
 0xbfb   : > { %14208 = vmatprep.mubr.msk.bf16.mxu1 %vm16753_vm10, %v21715_v48 }
 0xc02   : > { %14209 = vmatmul.mubr.msk.bf16.gmra.mrb[52].mxu1 %vm7247_vm11, %v10209_v52  ;;  %v10610_v52 = vsel %vm4615_vm6, %v10607_v23, %v10609_v28 }
 0xc03   : > { %14212 = vmatprep.mubr.msk.bf16.mxu1 %vm16753_vm10, %v21715_v48 }
 0xc0a   : > { %14213 = vmatmul.mubr.msk.bf16.gmra.mrb[56].mxu1 %vm7247_vm11, %v10217_v0  ;;  %v22006_v0 = vld [vmem:[#allocation119_spill] sm:$0xff] }
 0xc0b   : > { %14216 = vmatprep.mubr.msk.bf16.mxu1 %vm16753_vm10, %v21715_v48 }
 0xc12   : > { %14217 = vmatmul.mubr.msk.bf16.gmra.mrb[60].mxu1 %vm7247_vm11, %v10225_v39  ;;  %v22013_v39 = vld [vmem:[#allocation126_spill] sm:$0xff] }
 0xc13   : > { %14220 = vmatprep.mubr.msk.bf16.mxu1 %vm16753_vm10, %v21715_v48 }
 0xc1a   : > { %14221 = vmatmul.mubr.msk.bf16.gmra.mrb[64].mxu1 %vm7247_vm11, %v10233_v32  ;;  %v22016_v32 = vld [vmem:[#allocation60_spill] sm:$0xff] }
 0xc1b   : > { %14224 = vmatprep.mubr.msk.bf16.mxu1 %vm16753_vm10, %v21715_v48 }
 0xc22   : > { %14225 = vmatmul.mubr.msk.bf16.gmra.mrb[68].mxu1 %vm7247_vm11, %v10241_v44  ;;  %v11005_v44 = vrot.slane %v10126_v16, 2  ;;  %v22020_v16 = vld [vmem:[#allocation129_spill] sm:$0xff] }
 0xc23   : > { %14228 = vmatprep.mubr.msk.bf16.mxu1 %vm16753_vm10, %v21715_v48 }
 0xc2a   : > { %14229 = vmatmul.mubr.msk.bf16.gmra.mrb[72].mxu1 %vm7247_vm11, %v10249_v20  ;;  %v22024_v20 = vld [vmem:[#allocation133_spill] sm:$0xff] }
 0xc2b   : > { %14232 = vmatprep.mubr.msk.bf16.mxu1 %vm16753_vm10, %v21715_v48 }
 0xc32   : > { %14233 = vmatmul.mubr.msk.bf16.gmra.mrb[76].mxu1 %vm7247_vm11, %v10257_v18  ;;  %v22028_v18 = vld [vmem:[#allocation141_spill] sm:$0xff] }
 0xc33   : > { %14236 = vmatprep.mubr.msk.bf16.mxu1 %vm16753_vm10, %v21715_v48 }
 0xc3a   : > { %14237 = vmatmul.mubr.msk.bf16.gmra.mrb[80].mxu1 %vm7247_vm11, %v10260_v12  ;;  %v16213_v12 = vld [vmem:[#allocation3 + $0xb8] ss:$0 sps:$4 sm:$0xff]  }
 0xc3b   : > { %14248 = vmatprep.mubr.msk.bf16.mxu1 %vm16753_vm10, %v21715_v48 }
 0xc42   : > { %14249 = vmatmul.mubr.msk.bf16.vlgmr.msra.gmra.mrb[0].mxu1 %vm7247_vm11, %v22001_v49  ;;  %v11072_v49 = vshll.u32 %v16213_v12, 16 }
 0xc43   : > { %14333 = vmatpush3.bf16.msra.mxu1 %v16209_v10  ;;  %14252 = vmatprep.mubr.msk.bf16.mxu1 %vm16753_vm10, %v21715_v48  ;;  %v11069_v10 = vshrl.u32 %v16213_v12, 16 }
 0xc44   : > { %14334 = vmatprep.subr.bf16.mxu1 %v21715_v48 }
 0xc47   : > { %14335 = vmatpush3.bf16.msra.mxu1 %v16210_v31  ;;  %v11071_v31 = vrot.slane %v11069_v10, 1 }
 0xc48   : > { %14336 = vmatprep.subr.bf16.mxu1 %v21715_v48 }
 0xc4a   : > { %14253 = vmatmul.mubr.msk.bf16.gmra.mrb[4].mxu1 %vm7247_vm11, %v22002_v62 }
 0xc4b   : > { %14256 = vmatprep.mubr.msk.bf16.mxu1 %vm16753_vm10, %v21715_v48  ;;  %14337 = vmatpush3.bf16.msra.mxu1 %v16211_v59  ;;  %v11074_v59 = vrot.slane %v11072_v49, 2 }
 0xc4c   : > { %14338 = vmatprep.subr.bf16.mxu1 %v21715_v48 }
 0xc4f   : > { %14339 = vmatpush3.bf16.msra.mxu1 %v16212_v30 }
 0xc52   : > { %14257 = vmatmul.mubr.msk.bf16.gmra.mrb[8].mxu1 %vm7247_vm11, %v10608_v26 }
 0xc53   : > { %14260 = vmatprep.mubr.msk.bf16.mxu1 %vm16753_vm10, %v21715_v48 }
 0xc5a   : > { %14261 = vmatmul.mubr.msk.bf16.gmra.mrb[12].mxu1 %vm7247_vm11, %v10610_v52 }
 0xc5b   : > { %14264 = vmatprep.mubr.msk.bf16.mxu1 %vm16753_vm10, %v21715_v48 }
 0xc62   : > { %14265 = vmatmul.mubr.msk.bf16.gmra.mrb[16].mxu1 %vm7247_vm11, %v10612_v55 }
 0xc63   : > { %14268 = vmatprep.mubr.msk.bf16.mxu1 %vm16753_vm10, %v21715_v48 }
 0xc6a   : > { %14269 = vmatmul.mubr.msk.bf16.gmra.mrb[20].mxu1 %vm7247_vm11, %v10614_v34 }
 0xc6b   : > { %14272 = vmatprep.mubr.msk.bf16.mxu1 %vm16753_vm10, %v21715_v48 }
 0xc72   : > { %14273 = vmatmul.mubr.msk.bf16.gmra.mrb[24].mxu1 %vm7247_vm11, %v22006_v0 }
 0xc73   : > { %14276 = vmatprep.mubr.msk.bf16.mxu1 %vm16753_vm10, %v21715_v48 }
 0xc7a   : > { %14277 = vmatmul.mubr.msk.bf16.gmra.mrb[28].mxu1 %vm7247_vm11, %v22007_v8 }
 0xc7b   : > { %14280 = vmatprep.mubr.msk.bf16.mxu1 %vm16753_vm10, %v21715_v48 }
 0xc82   : > { %14281 = vmatmul.mubr.msk.bf16.gmra.mrb[32].mxu1 %vm7247_vm11, %v22008_v37 }
 0xc83   : > { %14284 = vmatprep.mubr.msk.bf16.mxu1 %vm16753_vm10, %v21715_v48 }
 0xc8a   : > { %14285 = vmatmul.mubr.msk.bf16.gmra.mrb[36].mxu1 %vm7247_vm11, %v22009_v50 }
 0xc8b   : > { %14288 = vmatprep.mubr.msk.bf16.mxu1 %vm16753_vm10, %v21715_v48 }
 0xc92   : > { %14289 = vmatmul.mubr.msk.bf16.gmra.mrb[40].mxu1 %vm7247_vm11, %v22010_v41 }
 0xc93   : > { %14292 = vmatprep.mubr.msk.bf16.mxu1 %vm16753_vm10, %v21715_v48 }
 0xc9a   : > { %14293 = vmatmul.mubr.msk.bf16.gmra.mrb[44].mxu1 %vm7247_vm11, %v22011_v29 }
 0xc9b   : > { %14296 = vmatprep.mubr.msk.bf16.mxu1 %vm16753_vm10, %v21715_v48 }
 0xca2   : > { %14297 = vmatmul.mubr.msk.bf16.gmra.mrb[48].mxu1 %vm7247_vm11, %v22012_v53 }
 0xca3   : > { %14300 = vmatprep.mubr.msk.bf16.mxu1 %vm16753_vm10, %v21715_v48 }
 0xcaa   : > { %14301 = vmatmul.mubr.msk.bf16.gmra.mrb[52].mxu1 %vm7247_vm11, %v22013_v39  ;;  %v21031_v39 = vpop.permute.xlu0 %12143 }
 0xcab   : > { %14304 = vmatprep.mubr.msk.bf16.mxu1 %vm16753_vm10, %v21715_v48 }
 0xcb2   : > { %14305 = vmatmul.mubr.msk.bf16.gmra.mrb[56].mxu1 %vm7247_vm11, %v22014_v51 }
 0xcb3   : > { %14308 = vmatprep.mubr.msk.bf16.mxu1 %vm16753_vm10, %v21715_v48 }
 0xcba   : > { %14309 = vmatmul.mubr.msk.bf16.gmra.mrb[60].mxu1 %vm7247_vm11, %v22015_v47 }
 0xcbb   : > { %14312 = vmatprep.mubr.msk.bf16.mxu1 %vm16753_vm10, %v21715_v48 }
 0xcc2   : > { %14313 = vmatmul.mubr.msk.bf16.gmra.mrb[64].mxu1 %vm7247_vm11, %v19939_v46  ;;  %v10642_v46 = vsel %vm4615_vm6, %v10639_v15, %v10641_v54  ;;  %v22017_v15 = vld [vmem:[#allocation33_spill] sm:$0xff] }
 0xcc3   : > { %14316 = vmatprep.mubr.msk.bf16.mxu1 %vm16753_vm10, %v21715_v48 }
 0xcca   : > { %14317 = vmatmul.mubr.msk.bf16.gmra.mrb[68].mxu1 %vm7247_vm11, %v20115_v42  ;;  %v10996_v42 = vrot.slane %v10114_v33, 1  ;;  %v11004_v33 = vrot.slane %v10130_v60, 1  ;;  %v22021_v60 = vld [vmem:[#allocation130_spill] sm:$0xff] }
 0xccb   : > { %14320 = vmatprep.mubr.msk.bf16.mxu1 %vm16753_vm10, %v21715_v48 }
 0xccc   : > { %v11006_v24 = vor.u32 %v11005_v44, %v11004_v33 }
 0xcce   : > { %v11007_v35 = vsel %vm5102_vm7, %v11002_v2, %v11006_v24  ;;  %v11011_v9 = vsel %vm5102_vm7, %v11006_v24, %v22018_v4 }
 0xcd2   : > { %14321 = vmatmul.mubr.msk.bf16.gmra.mrb[72].mxu1 %vm7247_vm11, %v20137_v61  ;;  %v10997_v61 = vrot.slane %v10110_v3, 2 }
 0xcd3   : > { %14324 = vmatprep.mubr.msk.bf16.mxu1 %vm16753_vm10, %v21715_v48 }
 0xcd4   : > { %v10998_v27 = vor.u32 %v10997_v61, %v10996_v42 }
 0xcd6   : > { %v10999_v17 = vsel %vm5102_vm7, %v22017_v15, %v10998_v27  ;;  %v11003_v3 = vsel %vm5102_vm7, %v10998_v27, %v11002_v2 }
 0xcda   : > { %14325 = vmatmul.mubr.msk.bf16.gmra.mrb[76].mxu1 %vm7247_vm11, %v10642_v46 }
 0xcdb   : > { %14328 = vmatprep.mubr.msk.bf16.mxu1 %vm16753_vm10, %v21715_v48 }
 0xce2   : > { %14329 = vmatmul.mubr.msk.bf16.gmra.mrb[80].mxu1 %vm7247_vm11, %v10641_v54  ;;  %v21034_v54 = vpop.permute.xlu1 %12145 }
 0xce3   : > { %14340 = vmatprep.mubr.msk.bf16.mxu1 %vm16753_vm10, %v21715_v48 }
 0xce6   : > { %v21041_v15 = vpop.permute.xlu1 %12149 }
 0xcea   : > { %14341 = vmatmul.mubr.msk.bf16.vlgmr.msra.gmra.mrb[0].mxu1 %vm7247_vm11, %v22016_v32  ;;  %v21038_v32 = vpop.permute.xlu0 %12147  ;;  %v21048_v44 = vpop.permute.xlu1 %12153 }
 0xceb   : > { %14344 = vmatprep.mubr.msk.bf16.mxu1 %vm16753_vm10, %v21715_v48 }
 0xcf2   : > { %14345 = vmatmul.mubr.msk.bf16.gmra.mrb[4].mxu1 %vm7247_vm11, %v10999_v17 }
 0xcf3   : > { %14348 = vmatprep.mubr.msk.bf16.mxu1 %vm16753_vm10, %v21715_v48 }
 0xcfa   : > { %14349 = vmatmul.mubr.msk.bf16.gmra.mrb[8].mxu1 %vm7247_vm11, %v11003_v3  ;;  %v21045_v3 = vpop.permute.xlu0 %12151 }
 0xcfb   : > { %14352 = vmatprep.mubr.msk.bf16.mxu1 %vm16753_vm10, %v21715_v48 }
 0xd02   : > { %14353 = vmatmul.mubr.msk.bf16.gmra.mrb[12].mxu1 %vm7247_vm11, %v11007_v35 }
 0xd03   : > { %14356 = vmatprep.mubr.msk.bf16.mxu1 %vm16753_vm10, %v21715_v48 }
 0xd0a   : > { %14357 = vmatmul.mubr.msk.bf16.gmra.mrb[16].mxu1 %vm7247_vm11, %v11011_v9  ;;  %v21052_v9 = vpop.permute.xlu0 %12155 }
 0xd0b   : > { %14360 = vmatprep.mubr.msk.bf16.mxu1 %vm16753_vm10, %v21715_v48 }
 0xd12   : > { %14361 = vmatmul.mubr.msk.bf16.gmra.mrb[20].mxu1 %vm7247_vm11, %v22019_v19 }
 0xd13   : > { %14364 = vmatprep.mubr.msk.bf16.mxu1 %vm16753_vm10, %v21715_v48 }
 0xd1a   : > { %14365 = vmatmul.mubr.msk.bf16.gmra.mrb[24].mxu1 %vm7247_vm11, %v22020_v16 }
 0xd1b   : > { %14368 = vmatprep.mubr.msk.bf16.mxu1 %vm16753_vm10, %v21715_v48 }
 0xd22   : > { %14369 = vmatmul.mubr.msk.bf16.gmra.mrb[28].mxu1 %vm7247_vm11, %v22021_v60  ;;  %v21055_v60 = vpop.permute.xlu1 %12157 }
 0xd23   : > { %14372 = vmatprep.mubr.msk.bf16.mxu1 %vm16753_vm10, %v21715_v48 }
 0xd2a   : > { %14373 = vmatmul.mubr.msk.bf16.gmra.mrb[32].mxu1 %vm7247_vm11, %v22022_v6 }
 0xd2b   : > { %14376 = vmatprep.mubr.msk.bf16.mxu1 %vm16753_vm10, %v21715_v48 }
 0xd32   : > { %14377 = vmatmul.mubr.msk.bf16.gmra.mrb[36].mxu1 %vm7247_vm11, %v22023_v1 }
 0xd33   : > { %14380 = vmatprep.mubr.msk.bf16.mxu1 %vm16753_vm10, %v21715_v48 }
 0xd3a   : > { %14381 = vmatmul.mubr.msk.bf16.gmra.mrb[40].mxu1 %vm7247_vm11, %v22024_v20  ;;  %v21059_v20 = vpop.permute.xlu0 %12159 }
 0xd3b   : > { %14384 = vmatprep.mubr.msk.bf16.mxu1 %vm16753_vm10, %v21715_v48 }
 0xd3e   : > { %v21066_v10 = vpop.permute.xlu0 %12163 }
 0xd42   : > { %14385 = vmatmul.mubr.msk.bf16.gmra.mrb[44].mxu1 %vm7247_vm11, %v22025_v56 }
 0xd43   : > { %14388 = vmatprep.mubr.msk.bf16.mxu1 %vm16753_vm10, %v21715_v48 }
 0xd4a   : > { %14389 = vmatmul.mubr.msk.bf16.gmra.mrb[48].mxu1 %vm7247_vm11, %v22026_v36 }
 0xd4b   : > { %14392 = vmatprep.mubr.msk.bf16.mxu1 %vm16753_vm10, %v21715_v48 }
 0xd52   : > { %14393 = vmatmul.mubr.msk.bf16.gmra.mrb[52].mxu1 %vm7247_vm11, %v22027_v57  ;;  %v21062_v57 = vpop.permute.xlu1 %12161 }
 0xd53   : > { %14396 = vmatprep.mubr.msk.bf16.mxu1 %vm16753_vm10, %v21715_v48 }
 0xd5a   : > { %14397 = vmatmul.mubr.msk.bf16.gmra.mrb[56].mxu1 %vm7247_vm11, %v22028_v18 }
 0xd5b   : > { %14400 = vmatprep.mubr.msk.bf16.mxu1 %vm16753_vm10, %v21715_v48 }
 0xd62   : > { %14401 = vmatmul.mubr.msk.bf16.gmra.mrb[60].mxu1 %vm7247_vm11, %v22029_v21 }
 0xd63   : > { %14404 = vmatprep.mubr.msk.bf16.mxu1 %vm16753_vm10, %v21715_v48 }
 0xd6a   : > { %14405 = vmatmul.mubr.msk.bf16.gmra.mrb[64].mxu1 %vm7247_vm11, %v19953_v40  ;;  %v11075_v40 = vor.u32 %v11074_v59, %v11071_v31  ;;  %v21069_v31 = vpop.permute.xlu1 %12165 }
 0xd6b   : > { %14408 = vmatprep.mubr.msk.bf16.mxu1 %vm16753_vm10, %v21715_v48 }
 0xd6c   : > { %v11076_v62 = vsel %vm5102_vm7, %v20143_v63, %v11075_v40 }
 0xd72   : > { %14409 = vmatmul.mubr.msk.bf16.gmra.mrb[68].mxu1 %vm7247_vm11, %v20141_v11 }
 0xd73   : > { %14412 = vmatprep.mubr.msk.bf16.mxu1 %vm16753_vm10, %v21715_v48 }
 0xd7a   : > { %14413 = vmatmul.mubr.msk.bf16.gmra.mrb[72].mxu1 %vm7247_vm11, %v20147_v22 }
 0xd7b   : > { %14416 = vmatprep.mubr.msk.bf16.mxu1 %vm16753_vm10, %v21715_v48 }
 0xd82   : > { %14417 = vmatmul.mubr.msk.bf16.gmra.mrb[76].mxu1 %vm7247_vm11, %v11076_v62 }
 0xd83   : > { %14420 = vmatprep.mubr.msk.bf16.mxu1 %vm16753_vm10, %v21715_v48 }
 0xd8a   : > { %14421 = vmatmul.mubr.msk.bf16.gmra.mrb[80].mxu1 %vm7247_vm11, %v11075_v40 }
 0xdbd   : > { %v11198_v11 = vpop.f32.mrb[0].mxu1 }
 0xdbe   : > { %11446 = vrot.lane.b32.xlu0 %v11198_v11, %s16751_s15  ;;  %v14342_v30 = vpop.f32.mrb[1].mxu1 }
 0xdbf   : > { %v11201_v23 = vpop.f32.mrb[2].mxu1  ;;  %v21073_v30 = vpop.permute.xlu0 %12167 }
 0xdc0   : > { %16460 = vtanh.f32 %v11201_v23  ;;  %11448 = vrot.lane.b32.xlu1 %v11201_v23, %s16751_s15  ;;  %v14343_v22 = vpop.f32.mrb[3].mxu1 }
 0xdc1   : > { %16462 = vtanh.f32 %v11198_v11  ;;  %v21076_v22 = vpop.permute.xlu1 %12169 }
 0xdc5   : > { %v11206_v45 = vpop.f32.mrb[4].mxu1 }
 0xdc6   : > { %11450 = vrot.lane.b32.xlu0 %v11206_v45, %s16751_s15  ;;  %v14346_v63 = vpop.f32.mrb[5].mxu1 }
 0xdc7   : > { %v11209_v38 = vpop.f32.mrb[6].mxu1 }
 0xdc8   : > { %16464 = vtanh.f32 %v11209_v38  ;;  %11452 = vrot.lane.b32.xlu1 %v11209_v38, %s16751_s15  ;;  %v14347_v48 = vpop.f32.mrb[7].mxu1 }
 0xdc9   : > { %16466 = vtanh.f32 %v11206_v45  ;;  %v21080_v48 = vpop.permute.xlu0 %12171 }
 0xdca   : > { %v16461_v26 = vpop.eup %16460 }
 0xdcb   : > { %v16463_v28 = vpop.eup %16462  ;;  %11940 = vrot.lane.b32.xlu0 %v16461_v26, %s16754_s21 }
 0xdcc   : > { %11938 = vrot.lane.b32.xlu1 %v16463_v28, %s16754_s21 }
 0xdcd   : > { %v11214_v52 = vpop.f32.mrb[8].mxu1 }
 0xdce   : > { %v14350_v43 = vpop.f32.mrb[9].mxu1 }
 0xdcf   : > { %11454 = vrot.lane.b32.xlu0 %v11214_v52, %s16751_s15  ;;  %v11217_v58 = vpop.f32.mrb[10].mxu1 }
 0xdd0   : > { %16468 = vtanh.f32 %v11217_v58  ;;  %11456 = vrot.lane.b32.xlu1 %v11217_v58, %s16751_s15  ;;  %v14351_v55 = vpop.f32.mrb[11].mxu1 }
 0xdd1   : > { %16470 = vtanh.f32 %v11214_v52  ;;  %v21083_v52 = vpop.permute.xlu1 %12173  ;;  %v21087_v55 = vpop.permute.xlu0 %12175 }
 0xdd2   : > { %v16465_v13 = vpop.eup %16464 }
 0xdd3   : > { %v16467_v34 = vpop.eup %16466  ;;  %11944 = vrot.lane.b32.xlu0 %v16465_v13, %s16754_s21 }
 0xdd4   : > { %11942 = vrot.lane.b32.xlu1 %v16467_v34, %s16754_s21 }
 0xdd5   : > { %v11222_v0 = vpop.f32.mrb[12].mxu1 }
 0xdd6   : > { %v14354_v8 = vpop.f32.mrb[13].mxu1 }
 0xdd7   : > { %11458 = vrot.lane.b32.xlu0 %v11222_v0, %s16751_s15  ;;  %v11225_v37 = vpop.f32.mrb[14].mxu1 }
 0xdd8   : > { %16472 = vtanh.f32 %v11225_v37  ;;  %11460 = vrot.lane.b32.xlu1 %v11225_v37, %s16751_s15  ;;  %v14355_v50 = vpop.f32.mrb[15].mxu1 }
 0xdd9   : > { %16474 = vtanh.f32 %v11222_v0  ;;  %v21090_v0 = vpop.permute.xlu1 %12177 }
 0xdda   : > { %v16469_v41 = vpop.eup %16468 }
 0xddb   : > { %v16471_v29 = vpop.eup %16470  ;;  %11948 = vrot.lane.b32.xlu0 %v16469_v41, %s16754_s21  ;;  %v21094_v41 = vpop.permute.xlu0 %12179 }
 0xddc   : > { %11946 = vrot.lane.b32.xlu1 %v16471_v29, %s16754_s21 }
 0xddd   : > { %v11230_v53 = vpop.f32.mrb[16].mxu1 }
 0xdde   : > { %v14358_v51 = vpop.f32.mrb[17].mxu1 }
 0xddf   : > { %11462 = vrot.lane.b32.xlu0 %v11230_v53, %s16751_s15  ;;  %v11233_v47 = vpop.f32.mrb[18].mxu1 }
 0xde0   : > { %16476 = vtanh.f32 %v11233_v47  ;;  %11464 = vrot.lane.b32.xlu1 %v11233_v47, %s16751_s15  ;;  %v14359_v46 = vpop.f32.mrb[19].mxu1 }
 0xde1   : > { %16478 = vtanh.f32 %v11230_v53  ;;  %v21097_v53 = vpop.permute.xlu1 %12181 }
 0xde2   : > { %v16473_v42 = vpop.eup %16472 }
 0xde3   : > { %v16475_v61 = vpop.eup %16474  ;;  %11952 = vrot.lane.b32.xlu0 %v16473_v42, %s16754_s21 }
 0xde4   : > { %11950 = vrot.lane.b32.xlu1 %v16475_v61, %s16754_s21  ;;  %v21101_v61 = vpop.permute.xlu0 %12183 }
 0xde5   : > { %v11238_v27 = vpop.f32.mrb[20].mxu1 }
 0xde6   : > { %v14362_v17 = vpop.f32.mrb[21].mxu1 }
 0xde7   : > { %11466 = vrot.lane.b32.xlu0 %v11238_v27, %s16751_s15  ;;  %v11241_v5 = vpop.f32.mrb[22].mxu1  ;;  %v21104_v17 = vpop.permute.xlu1 %12185 }
 0xde8   : > { %16480 = vtanh.f32 %v11241_v5  ;;  %11468 = vrot.lane.b32.xlu1 %v11241_v5, %s16751_s15  ;;  %v14363_v14 = vpop.f32.mrb[23].mxu1 }
 0xde9   : > { %16482 = vtanh.f32 %v11238_v27 }
 0xdea   : > { %v16477_v2 = vpop.eup %16476 }
 0xdeb   : > { %v16479_v33 = vpop.eup %16478  ;;  %11956 = vrot.lane.b32.xlu0 %v16477_v2, %s16754_s21 }
 0xdec   : > { %11954 = vrot.lane.b32.xlu1 %v16479_v33, %s16754_s21  ;;  %v21108_v33 = vpop.permute.xlu0 %12187 }
 0xded   : > { %v11246_v24 = vpop.f32.mrb[24].mxu1 }
 0xdee   : > { %v14366_v35 = vpop.f32.mrb[25].mxu1 }
 0xdef   : > { %11470 = vrot.lane.b32.xlu0 %v11246_v24, %s16751_s15  ;;  %v11249_v4 = vpop.f32.mrb[26].mxu1 }
 0xdf0   : > { %16484 = vtanh.f32 %v11249_v4  ;;  %11472 = vrot.lane.b32.xlu1 %v11249_v4, %s16751_s15  ;;  %v14367_v19 = vpop.f32.mrb[27].mxu1  ;;  %v21111_v4 = vpop.permute.xlu1 %12189 }
 0xdf1   : > { %16486 = vtanh.f32 %v11246_v24 }
 0xdf2   : > { %v16481_v16 = vpop.eup %16480 }
 0xdf3   : > { %v16483_v6 = vpop.eup %16482  ;;  %11960 = vrot.lane.b32.xlu0 %v16481_v16, %s16754_s21 }
 0xdf4   : > { %11958 = vrot.lane.b32.xlu1 %v16483_v6, %s16754_s21  ;;  %v21115_v6 = vpop.permute.xlu0 %12191 }
 0xdf5   : > { %v11254_v1 = vpop.f32.mrb[28].mxu1 }
 0xdf6   : > { %v14370_v56 = vpop.f32.mrb[29].mxu1 }
 0xdf7   : > { %11474 = vrot.lane.b32.xlu0 %v11254_v1, %s16751_s15  ;;  %v11257_v36 = vpop.f32.mrb[30].mxu1 }
 0xdf8   : > { %16488 = vtanh.f32 %v11257_v36  ;;  %11476 = vrot.lane.b32.xlu1 %v11257_v36, %s16751_s15  ;;  %v14371_v18 = vpop.f32.mrb[31].mxu1  ;;  %v21118_v36 = vpop.permute.xlu1 %12193 }
 0xdf9   : > { %16490 = vtanh.f32 %v11254_v1 }
 0xdfa   : > { %v16485_v21 = vpop.eup %16484 }
 0xdfb   : > { %v16487_v12 = vpop.eup %16486  ;;  %11964 = vrot.lane.b32.xlu0 %v16485_v21, %s16754_s21 }
 0xdfc   : > { %11962 = vrot.lane.b32.xlu1 %v16487_v12, %s16754_s21 }
 0xdfd   : > { %v11262_v49 = vpop.f32.mrb[32].mxu1 }
 0xdfe   : > { %v14374_v59 = vpop.f32.mrb[33].mxu1 }
 0xdff   : > { %11478 = vrot.lane.b32.xlu0 %v11262_v49, %s16751_s15  ;;  %v11265_v40 = vpop.f32.mrb[34].mxu1 }
 0xe00   : > { %16492 = vtanh.f32 %v11265_v40  ;;  %11480 = vrot.lane.b32.xlu1 %v11265_v40, %s16751_s15  ;;  %v14375_v62 = vpop.f32.mrb[35].mxu1  ;;  %v21125_v40 = vpop.permute.xlu1 %12197 }
 0xe01   : > { %16494 = vtanh.f32 %v11262_v49  ;;  %v21122_v49 = vpop.permute.xlu0 %12195 }
 0xe02   : > { %v16489_v11 = vpop.eup %16488 }
 0xe03   : > { %v16491_v23 = vpop.eup %16490  ;;  %11968 = vrot.lane.b32.xlu0 %v16489_v11, %s16754_s21 }
 0xe04   : > { %11966 = vrot.lane.b32.xlu1 %v16491_v23, %s16754_s21 }
 0xe05   : > { %v11270_v45 = vpop.f32.mrb[36].mxu1 }
 0xe06   : > { %v14378_v63 = vpop.f32.mrb[37].mxu1 }
 0xe07   : > { %11482 = vrot.lane.b32.xlu0 %v11270_v45, %s16751_s15  ;;  %v11273_v38 = vpop.f32.mrb[38].mxu1  ;;  %v22030_v63 = vld [vmem:[#allocation4_spill] sm:$0xff] }
 0xe08   : > { %16496 = vtanh.f32 %v11273_v38  ;;  %11484 = vrot.lane.b32.xlu1 %v11273_v38, %s16751_s15  ;;  %v14379_v26 = vpop.f32.mrb[39].mxu1 }
 0xe09   : > { %16498 = vtanh.f32 %v11270_v45 }
 0xe0a   : > { %v16493_v28 = vpop.eup %16492 }
 0xe0b   : > { %v16495_v43 = vpop.eup %16494  ;;  %11972 = vrot.lane.b32.xlu0 %v16493_v28, %s16754_s21 }
 0xe0c   : > { %11970 = vrot.lane.b32.xlu1 %v16495_v43, %s16754_s21 }
 0xe0d   : > { %v11278_v58 = vpop.f32.mrb[40].mxu1 }
 0xe0e   : > { %v14382_v13 = vpop.f32.mrb[41].mxu1 }
 0xe0f   : > { %11486 = vrot.lane.b32.xlu0 %v11278_v58, %s16751_s15  ;;  %v11281_v34 = vpop.f32.mrb[42].mxu1  ;;  %v22031_v13 = vld [vmem:[#allocation5_spill] sm:$0xff] }
 0xe10   : > { %16500 = vtanh.f32 %v11281_v34  ;;  %11488 = vrot.lane.b32.xlu1 %v11281_v34, %s16751_s15  ;;  %v14383_v8 = vpop.f32.mrb[43].mxu1 }
 0xe11   : > { %16502 = vtanh.f32 %v11278_v58 }
 0xe12   : > { %v16497_v37 = vpop.eup %16496 }
 0xe13   : > { %v16499_v50 = vpop.eup %16498  ;;  %11976 = vrot.lane.b32.xlu0 %v16497_v37, %s16754_s21 }
 0xe14   : > { %11974 = vrot.lane.b32.xlu1 %v16499_v50, %s16754_s21 }
 0xe15   : > { %v11286_v29 = vpop.f32.mrb[44].mxu1 }
 0xe16   : > { %v14386_v51 = vpop.f32.mrb[45].mxu1 }
 0xe17   : > { %11490 = vrot.lane.b32.xlu0 %v11286_v29, %s16751_s15  ;;  %v11289_v47 = vpop.f32.mrb[46].mxu1 }
 0xe18   : > { %16504 = vtanh.f32 %v11289_v47  ;;  %11492 = vrot.lane.b32.xlu1 %v11289_v47, %s16751_s15  ;;  %v14387_v46 = vpop.f32.mrb[47].mxu1 }
 0xe19   : > { %16506 = vtanh.f32 %v11286_v29  ;;  %v22032_v46 = vld [vmem:[#allocation6_spill] sm:$0xff] }
 0xe1a   : > { %v16501_v42 = vpop.eup %16500 }
 0xe1b   : > { %v16503_v27 = vpop.eup %16502  ;;  %11980 = vrot.lane.b32.xlu0 %v16501_v42, %s16754_s21 }
 0xe1c   : > { %11978 = vrot.lane.b32.xlu1 %v16503_v27, %s16754_s21 }
 0xe1d   : > { %v11294_v5 = vpop.f32.mrb[48].mxu1 }
 0xe1e   : > { %v14390_v14 = vpop.f32.mrb[49].mxu1 }
 0xe1f   : > { %11494 = vrot.lane.b32.xlu0 %v11294_v5, %s16751_s15  ;;  %v11297_v2 = vpop.f32.mrb[50].mxu1 }
 0xe20   : > { %16508 = vtanh.f32 %v11297_v2  ;;  %11496 = vrot.lane.b32.xlu1 %v11297_v2, %s16751_s15  ;;  %v14391_v24 = vpop.f32.mrb[51].mxu1 }
 0xe21   : > { %16510 = vtanh.f32 %v11294_v5  ;;  %v22033_v24 = vld [vmem:[#allocation7_spill] sm:$0xff] }
 0xe22   : > { %v16505_v35 = vpop.eup %16504 }
 0xe23   : > { %v16507_v19 = vpop.eup %16506  ;;  %11984 = vrot.lane.b32.xlu0 %v16505_v35, %s16754_s21 }
 0xe24   : > { %11982 = vrot.lane.b32.xlu1 %v16507_v19, %s16754_s21 }
 0xe25   : > { %v11302_v16 = vpop.f32.mrb[52].mxu1 }
 0xe26   : > { %v14394_v1 = vpop.f32.mrb[53].mxu1 }
 0xe27   : > { %11498 = vrot.lane.b32.xlu0 %v11302_v16, %s16751_s15  ;;  %v11305_v56 = vpop.f32.mrb[54].mxu1 }
 0xe28   : > { %16512 = vtanh.f32 %v11305_v56  ;;  %11500 = vrot.lane.b32.xlu1 %v11305_v56, %s16751_s15  ;;  %v14395_v18 = vpop.f32.mrb[55].mxu1 }
 0xe29   : > { %16514 = vtanh.f32 %v11302_v16 }
 0xe2a   : > { %v16509_v21 = vpop.eup %16508 }
 0xe2b   : > { %v16511_v12 = vpop.eup %16510  ;;  %11988 = vrot.lane.b32.xlu0 %v16509_v21, %s16754_s21 }
 0xe2c   : > { %11986 = vrot.lane.b32.xlu1 %v16511_v12, %s16754_s21 }
 0xe2d   : > { %v11310_v59 = vpop.f32.mrb[56].mxu1 }
 0xe2e   : > { %v14398_v62 = vpop.f32.mrb[57].mxu1 }
 0xe2f   : > { %11502 = vrot.lane.b32.xlu0 %v11310_v59, %s16751_s15  ;;  %v11313_v11 = vpop.f32.mrb[58].mxu1 }
 0xe30   : > { %16516 = vtanh.f32 %v11313_v11  ;;  %v11447_v23 = vpop.permute.xlu0 %11446  ;;  %11504 = vrot.lane.b32.xlu1 %v11313_v11, %s16751_s15  ;;  %v14399_v45 = vpop.f32.mrb[59].mxu1 }
 0xe31   : > { %16518 = vtanh.f32 %v11310_v59  ;;  %v11569_v38 = vadd.f32 %v11447_v23, %v22030_v63 }
 0xe32   : > { %v16513_v26 = vpop.eup %16512  ;;  %v11449_v28 = vpop.permute.xlu1 %11448 }
 0xe33   : > { %v16515_v43 = vpop.eup %16514  ;;  %v13287_v58 = vmul.f32 -1.442695, %v11569_v38  ;;  %v11570_v34 = vadd.f32 %v11449_v28, %v22031_v13  ;;  %11992 = vrot.lane.b32.xlu0 %v16513_v26, %s16754_s21  ;;  %v22034_v38 = vld [vmem:[#allocation8_spill] sm:$0xff] }
 0xe34   : > { %11990 = vrot.lane.b32.xlu1 %v16515_v43, %s16754_s21 }
 0xe35   : > { %16520 = vpow2.f32 %v13287_v58  ;;  %v13288_v8 = vmul.f32 -1.442695, %v11570_v34  ;;  %v11318_v37 = vpop.f32.mrb[60].mxu1  ;;  %v22035_v58 = vld [vmem:[#allocation9_spill] sm:$0xff] }
 0xe36   : > { %v14402_v50 = vpop.f32.mrb[61].mxu1 }
 0xe37   : > { %16522 = vpow2.f32 %v13288_v8  ;;  %11506 = vrot.lane.b32.xlu0 %v11318_v37, %s16751_s15  ;;  %v11321_v29 = vpop.f32.mrb[62].mxu1 }
 0xe38   : > { %16524 = vtanh.f32 %v11321_v29  ;;  %v11451_v51 = vpop.permute.xlu0 %11450  ;;  %11508 = vrot.lane.b32.xlu1 %v11321_v29, %s16751_s15  ;;  %v14403_v47 = vpop.f32.mrb[63].mxu1 }
 0xe39   : > { %16526 = vtanh.f32 %v11318_v37  ;;  %v11571_v42 = vadd.f32 %v11451_v51, %v22032_v46 }
 0xe3a   : > { %v16517_v27 = vpop.eup %16516  ;;  %v11453_v5 = vpop.permute.xlu1 %11452 }
 0xe3b   : > { %v16519_v14 = vpop.eup %16518  ;;  %v13289_v2 = vmul.f32 -1.442695, %v11571_v42  ;;  %v11572_v35 = vadd.f32 %v11453_v5, %v22033_v24  ;;  %11996 = vrot.lane.b32.xlu0 %v16517_v27, %s16754_s21 }
 0xe3c   : > { %11994 = vrot.lane.b32.xlu1 %v16519_v14, %s16754_s21 }
 0xe3d   : > { %16528 = vpow2.f32 %v13289_v2  ;;  %v13290_v19 = vmul.f32 -1.442695, %v11572_v35  ;;  %v21139_v16 = vpop.permute.xlu0 %11940  ;;  %v11326_v1 = vpop.f32.mrb[64].mxu1  ;;  %v22036_v35 = vld [vmem:[#allocation10_spill] sm:$0xff] }
 0xe3e   : > { %v14406_v56 = vpop.f32.mrb[65].mxu1  ;;  %v11939_v18 = vpop.permute.xlu1 %11938 }
 0xe3f   : > { %v16521_v21 = vpop.eup %16520  ;;  %16530 = vpow2.f32 %v13290_v19  ;;  %11510 = vrot.lane.b32.xlu0 %v11326_v1, %s16751_s15  ;;  %v11329_v12 = vpop.f32.mrb[66].mxu1 }
 0xe40   : > { %v11733_v59 = vadd.f32 1.0, %v16521_v21  ;;  %16532 = vtanh.f32 %v11329_v12  ;;  %11512 = vrot.lane.b32.xlu1 %v11329_v12, %s16751_s15  ;;  %v14407_v62 = vpop.f32.mrb[67].mxu1  ;;  %v22037_v21 = vld [vmem:[#allocation11_spill] sm:$0xff] }
 0xe41   : > { %v16523_v11 = vpop.eup %16522  ;;  %16534 = vtanh.f32 %v11326_v1  ;;  %v11455_v23 = vpop.permute.xlu0 %11454 }
 0xe42   : > { %v16525_v45 = vpop.eup %16524  ;;  %16536 = vrcp.f32 %v11733_v59  ;;  %v11734_v63 = vadd.f32 1.0, %v16523_v11  ;;  %v11573_v26 = vadd.f32 %v11455_v23, %v22034_v38  ;;  %v11457_v28 = vpop.permute.xlu1 %11456 }
 0xe43   : > { %v16527_v43 = vpop.eup %16526  ;;  %v11574_v13 = vadd.f32 %v11457_v28, %v22035_v58  ;;  %12000 = vrot.lane.b32.xlu0 %v16525_v45, %s16754_s21 }
 0xe44   : > { %16538 = vrcp.f32 %v11734_v63  ;;  %v13291_v34 = vmul.f32 -1.442695, %v11573_v26  ;;  %11998 = vrot.lane.b32.xlu1 %v16527_v43, %s16754_s21 }
 0xe45   : > { %v13292_v8 = vmul.f32 -1.442695, %v11574_v13  ;;  %v21147_v37 = vpop.permute.xlu0 %11944  ;;  %v11334_v50 = vpop.f32.mrb[68].mxu1 }
 0xe46   : > { %16540 = vpow2.f32 %v13291_v34  ;;  %v14410_v29 = vpop.f32.mrb[69].mxu1  ;;  %v21149_v51 = vpop.permute.xlu1 %11942 }
 0xe47   : > { %v16529_v47 = vpop.eup %16528  ;;  %16542 = vpow2.f32 %v13292_v8  ;;  %11514 = vrot.lane.b32.xlu0 %v11334_v50, %s16751_s15  ;;  %v11337_v46 = vpop.f32.mrb[70].mxu1 }
 0xe48   : > { %v11735_v42 = vadd.f32 1.0, %v16529_v47  ;;  %16544 = vtanh.f32 %v11334_v50  ;;  %11516 = vrot.lane.b32.xlu1 %v11337_v46, %s16751_s15  ;;  %v14411_v27 = vpop.f32.mrb[71].mxu1 }
 0xe49   : > { %v16531_v5 = vpop.eup %16530  ;;  %16546 = vtanh.f32 %v11337_v46  ;;  %v11459_v14 = vpop.permute.xlu0 %11458  ;;  %v22038_v27 = vld [vmem:[#allocation12_spill] sm:$0xff] }
 0xe4a   : > { %v16533_v2 = vpop.eup %16532  ;;  %16548 = vrcp.f32 %v11735_v42  ;;  %v11736_v24 = vadd.f32 1.0, %v16531_v5  ;;  %v11575_v19 = vadd.f32 %v11459_v14, %v22036_v35  ;;  %v11461_v1 = vpop.permute.xlu1 %11460 }
 0xe4b   : > { %v16535_v56 = vpop.eup %16534  ;;  %v11576_v12 = vadd.f32 %v11461_v1, %v22037_v21  ;;  %12004 = vrot.lane.b32.xlu0 %v16533_v2, %s16754_s21 }
 0xe4c   : > { %v16537_v59 = vpop.eup %16536  ;;  %16550 = vrcp.f32 %v11736_v24  ;;  %v13293_v62 = vmul.f32 -1.442695, %v11575_v19  ;;  %12002 = vrot.lane.b32.xlu1 %v16535_v56, %s16754_s21  ;;  %v22039_v24 = vld [vmem:[#allocation13_spill] sm:$0xff] }
 0xe4d   : > { %v12061_v11 = vmul.f32 %v16537_v59, %v11939_v18  ;;  %v13294_v23 = vmul.f32 -1.442695, %v11576_v12  ;;  %v21157_v45 = vpop.permute.xlu0 %11948  ;;  %v11342_v63 = vpop.f32.mrb[72].mxu1 }
 0xe4e   : > { %v16539_v38 = vpop.eup %16538  ;;  %16552 = vpow2.f32 %v13293_v62  ;;  %v14414_v26 = vpop.f32.mrb[73].mxu1 }
 0xe4f   : > { %v21159_v28 = vpop.permute.xlu1 %11946  ;;  %v12062_v43 = vmul.f32 %v16539_v38, %v21139_v16  ;;  %v12266_v58 = vsel %vm7247_vm11, %v21031_v39, %v12061_v11  ;;  %16554 = vpow2.f32 %v13294_v23  ;;  %11518 = vrot.lane.b32.xlu0 %v11342_v63, %s16751_s15  ;;  %v11345_v13 = vpop.f32.mrb[74].mxu1 }
 0xe50   : > { %v16541_v18 = vpop.eup %16540  ;;  %v12308_v34 = vsel %vm12307_vm4, %v12266_v58, 0.0  ;;  %16556 = vtanh.f32 %v11342_v63  ;;  %v14415_v8 = vpop.f32.mrb[75].mxu1  ;;  %11520 = vrot.lane.b32.xlu1 %v11345_v13, %s16751_s15 }
 0xe51   : > { %v16543_v50 = vpop.eup %16542  ;;  %v12267_v29 = vsel %vm7247_vm11, %v21034_v54, %v12062_v43  ;;  %12349 = vst [vmem:[%s16806_s6] sm:$0xff] %v12308_v34  ;;  %v11737_v16 = vadd.f32 1.0, %v16541_v18  ;;  %16558 = vtanh.f32 %v11345_v13  ;;  %v11463_v39 = vpop.permute.xlu0 %11462 }
 0xe52   : > { %v16545_v47 = vpop.eup %16544  ;;  %v12309_v46 = vsel %vm12307_vm4, %v12267_v29, 0.0  ;;  %v11738_v42 = vadd.f32 1.0, %v16543_v50  ;;  %v11577_v5 = vadd.f32 %v11463_v39, %v22038_v27  ;;  %v22040_v50 = vld [vmem:[#allocation15_spill] sm:$0xff] }
 0xe53   : > { %v11465_v14 = vpop.permute.xlu1 %11464  ;;  %v16547_v2 = vpop.eup %16546  ;;  %12350 = vst [vmem:[%s16806_s6 + $0x8] sm:$0xff] %v12309_v46  ;;  %16560 = vrcp.f32 %v11737_v16 }
 0xe54   : > { %v11578_v35 = vadd.f32 %v11465_v14, %v22039_v24  ;;  %v16549_v19 = vpop.eup %16548  ;;  %16562 = vrcp.f32 %v11738_v42  ;;  %v13295_v1 = vmul.f32 -1.442695, %v11577_v5  ;;  %12008 = vrot.lane.b32.xlu0 %v16547_v2, %s16754_s21  ;;  %12006 = vrot.lane.b32.xlu1 %v16545_v47, %s16754_s21  ;;  %v22041_v47 = vld [vmem:[#allocation17_spill] sm:$0xff] }
 0xe55   : > { %v12063_v54 = vmul.f32 %v16549_v19, %v21149_v51  ;;  %v21177_v21 = vpop.permute.xlu0 %11952  ;;  %v21179_v12 = vpop.f32.mrb[76].mxu1 }
 0xe56   : > { %v13296_v56 = vmul.f32 -1.442695, %v11578_v35  ;;  %v16551_v59 = vpop.eup %16550  ;;  %16564 = vpow2.f32 %v13295_v1  ;;  %v14418_v62 = vpop.f32.mrb[77].mxu1 }
 0xe57   : > { %v21181_v11 = vpop.permute.xlu1 %11950  ;;  %v12064_v23 = vmul.f32 %v16551_v59, %v21147_v37  ;;  %v12268_v63 = vsel %vm7247_vm11, %v21038_v32, %v12063_v54  ;;  %v21186_v38 = vpop.f32.mrb[78].mxu1 }
 0xe58   : > { %16566 = vpow2.f32 %v13296_v56  ;;  %v16553_v51 = vpop.eup %16552  ;;  %v12310_v26 = vsel %vm12307_vm4, %v12268_v63, 0.0  ;;  %11522 = vrot.lane.b32.xlu0 %v21179_v12, %s16751_s15  ;;  %v14419_v43 = vpop.f32.mrb[79].mxu1  ;;  %11524 = vrot.lane.b32.xlu1 %v21186_v38, %s16751_s15 }
 0xe59   : > { %v16555_v58 = vpop.eup %16554  ;;  %v12269_v37 = vsel %vm7247_vm11, %v21041_v15, %v12064_v23  ;;  %12351 = vst [vmem:[%s16806_s6 + $0x10] sm:$0xff] %v12310_v26  ;;  %v11739_v32 = vadd.f32 1.0, %v16553_v51  ;;  %v11467_v13 = vpop.permute.xlu0 %11466  ;;  %v22042_v23 = vld [vmem:[#allocation16_spill] sm:$0xff] }
 0xe5a   : > { %v16557_v18 = vpop.eup %16556  ;;  %v12311_v34 = vsel %vm12307_vm4, %v12269_v37, 0.0  ;;  %v11740_v8 = vadd.f32 1.0, %v16555_v58  ;;  %v11579_v29 = vadd.f32 %v11467_v13, %v22040_v50  ;;  %v22043_v37 = vld [vmem:[#allocation20_spill] sm:$0xff]  ;;  %v22044_v13 = vld [vmem:[#allocation22_spill] sm:$0xff] }
 0xe5b   : > { %v11469_v16 = vpop.permute.xlu1 %11468  ;;  %v16559_v39 = vpop.eup %16558  ;;  %12352 = vst [vmem:[%s16806_s6 + $0x18] sm:$0xff] %v12311_v34  ;;  %16568 = vrcp.f32 %v11739_v32 }
 0xe5c   : > { %v11580_v46 = vadd.f32 %v11469_v16, %v22041_v47  ;;  %16570 = vrcp.f32 %v11740_v8  ;;  %v13297_v42 = vmul.f32 -1.442695, %v11579_v29  ;;  %12012 = vrot.lane.b32.xlu0 %v16559_v39, %s16754_s21  ;;  %12010 = vrot.lane.b32.xlu1 %v16557_v18, %s16754_s21  ;;  %v22045_v8 = vld [vmem:[#allocation42_spill] sm:$0xff] }
 0xe5d   : > { %v16561_v15 = vpop.eup %16560  ;;  %v21202_v5 = vpop.permute.xlu0 %11956 }
 0xe5e   : > { %v13298_v27 = vmul.f32 -1.442695, %v11580_v46  ;;  %v11358_v14 = vpop.f32.mrb[80].mxu1  ;;  %v16563_v2 = vpop.eup %16562  ;;  %v12065_v24 = vmul.f32 %v16561_v15, %v21159_v28  ;;  %16572 = vpow2.f32 %v13297_v42 }
 0xe5f   : > { %v14422_v35 = vpop.f32.mrb[81].mxu1  ;;  %v11955_v19 = vpop.permute.xlu1 %11954  ;;  %v12066_v1 = vmul.f32 %v16563_v2, %v21157_v45  ;;  %v22047_v2 = vld [vmem:[#allocation24_spill] sm:$0xff] }
 0xe60   : > { %16574 = vpow2.f32 %v13298_v27  ;;  %v11361_v54 = vpop.f32.mrb[82].mxu1  ;;  %v16565_v56 = vpop.eup %16564  ;;  %v12270_v59 = vsel %vm7247_vm11, %v21045_v3, %v12065_v24  ;;  %11526 = vrot.lane.b32.xlu0 %v11358_v14, %s16751_s15  ;;  %12201 = vrot.lane.b32.xlu1 %v22042_v23, %s16751_s15  ;;  %v22048_v24 = vld [vmem:[#allocation44_spill] sm:$0xff] }
 0xe61   : > { %v14423_v62 = vpop.f32.mrb[83].mxu1  ;;  %v12271_v63 = vsel %vm7247_vm11, %v21048_v44, %v12066_v1  ;;  %v12312_v51 = vsel %vm12307_vm4, %v12270_v59, 0.0  ;;  %v11741_v45 = vadd.f32 1.0, %v16565_v56  ;;  %v11471_v26 = vpop.permute.xlu0 %11470  ;;  %v22046_v44 = vld [vmem:[#allocation49_spill] sm:$0xff] }
 0xe62   : > { %v16567_v28 = vpop.eup %16566  ;;  %v12313_v43 = vsel %vm12307_vm4, %v12271_v63, 0.0  ;;  %12353 = vst [vmem:[%s16806_s6 + $0x20] sm:$0xff] %v12312_v51  ;;  %v11581_v3 = vadd.f32 %v11471_v26, %v22043_v37  ;;  %v22049_v59 = vld [vmem:[#allocation25_spill] sm:$0xff] }
 0xe63   : > { %v11742_v58 = vadd.f32 1.0, %v16567_v28  ;;  %v11473_v32 = vpop.permute.xlu1 %11472  ;;  %12354 = vst [vmem:[%s16806_s6 + $0x28] sm:$0xff] %v12313_v43  ;;  %16576 = vrcp.f32 %v11741_v45  ;;  %v22050_v28 = vld [vmem:[#allocation26_spill] sm:$0xff] }
 0xe64   : > { %v11582_v18 = vadd.f32 %v11473_v32, %v22044_v13  ;;  %v13299_v34 = vmul.f32 -1.442695, %v11581_v3  ;;  %12199 = vrot.lane.b32.xlu0 %v22045_v8, %s16751_s15  ;;  %12205 = vrot.lane.b32.xlu1 %v22046_v44, %s16751_s15 }
 0xe65   : > { %16578 = vrcp.f32 %v11742_v58  ;;  %v16569_v50 = vpop.eup %16568  ;;  %v21223_v16 = vpop.permute.xlu0 %11960 }
 0xe66   : > { %v13300_v29 = vmul.f32 -1.442695, %v11582_v18  ;;  %v16571_v39 = vpop.eup %16570  ;;  %v12067_v47 = vmul.f32 %v16569_v50, %v21181_v11  ;;  %16580 = vpow2.f32 %v13299_v34  ;;  %v22053_v34 = vld [vmem:[#allocation66_spill] sm:$0xff] }
 0xe67   : > { %v11959_v46 = vpop.permute.xlu1 %11958  ;;  %v12068_v42 = vmul.f32 %v16571_v39, %v21177_v21  ;;  %v22055_v39 = vld [vmem:[#allocation29_spill] sm:$0xff] }
 0xe68   : > { %16582 = vpow2.f32 %v13300_v29  ;;  %v16573_v15 = vpop.eup %16572  ;;  %v12272_v27 = vsel %vm7247_vm11, %v21052_v9, %v12067_v47  ;;  %12203 = vrot.lane.b32.xlu0 %v22047_v2, %s16751_s15  ;;  %12209 = vrot.lane.b32.xlu1 %v22048_v24, %s16751_s15 }
 0xe69   : > { %v12273_v11 = vsel %vm7247_vm11, %v21055_v60, %v12068_v42  ;;  %16584 = vtanh.f32 %v21179_v12  ;;  %v12314_v21 = vsel %vm12307_vm4, %v12272_v27, 0.0  ;;  %v11743_v1 = vadd.f32 1.0, %v16573_v15  ;;  %v11475_v54 = vpop.permute.xlu0 %11474  ;;  %v22051_v60 = vld [vmem:[#allocation28_spill] sm:$0xff]  ;;  %v22052_v12 = vld [vmem:[#allocation73_spill] sm:$0xff]  ;;  %v22056_v27 = vld [vmem:[#allocation31_spill] sm:$0xff] }
 0xe6a   : > { %v16575_v35 = vpop.eup %16574  ;;  %v12315_v56 = vsel %vm12307_vm4, %v12273_v11, 0.0  ;;  %12355 = vst [vmem:[%s16806_s6 + $0x30] sm:$0xff] %v12314_v21  ;;  %v11583_v62 = vadd.f32 %v11475_v54, %v22049_v59 }
 0xe6b   : > { %v11744_v9 = vadd.f32 1.0, %v16575_v35  ;;  %v11477_v23 = vpop.permute.xlu1 %11476  ;;  %12356 = vst [vmem:[%s16806_s6 + $0x38] sm:$0xff] %v12315_v56  ;;  %16586 = vrcp.f32 %v11743_v1 }
 0xe6c   : > { %v11584_v63 = vadd.f32 %v11477_v23, %v22050_v28  ;;  %v13301_v51 = vmul.f32 -1.442695, %v11583_v62  ;;  %12207 = vrot.lane.b32.xlu0 %v22051_v60, %s16751_s15  ;;  %12213 = vrot.lane.b32.xlu1 %v22052_v12, %s16751_s15  ;;  %v22058_v23 = vld [vmem:[#allocation90_spill] sm:$0xff] }
 0xe6d   : > { %16588 = vrcp.f32 %v11744_v9  ;;  %v16577_v45 = vpop.eup %16576  ;;  %v21246_v43 = vpop.permute.xlu0 %11964 }
 0xe6e   : > { %16590 = vtanh.f32 %v11358_v14  ;;  %v13302_v26 = vmul.f32 -1.442695, %v11584_v63  ;;  %v12069_v37 = vmul.f32 %v16577_v45, %v11955_v19  ;;  %v22054_v14 = vld [vmem:[#allocation71_spill] sm:$0xff]  ;;  %v22059_v45 = vld [vmem:[#allocation34_spill] sm:$0xff] }
 0xe6f   : > { %v16579_v58 = vpop.eup %16578  ;;  %16592 = vpow2.f32 %v13301_v51  ;;  %v11963_v3 = vpop.permute.xlu1 %11962 }
 0xe70   : > { %v12070_v32 = vmul.f32 %v16579_v58, %v21202_v5  ;;  %16594 = vpow2.f32 %v13302_v26  ;;  %v16581_v13 = vpop.eup %16580  ;;  %v12274_v18 = vsel %vm7247_vm11, %v21059_v20, %v12069_v37  ;;  %12211 = vrot.lane.b32.xlu0 %v22053_v34, %s16751_s15  ;;  %12217 = vrot.lane.b32.xlu1 %v22054_v14, %s16751_s15  ;;  %v22060_v37 = vld [vmem:[#allocation36_spill] sm:$0xff] }
 0xe71   : > { %16596 = vtanh.f32 %v21186_v38  ;;  %v12316_v5 = vsel %vm12307_vm4, %v12274_v18, 0.0  ;;  %v11745_v44 = vadd.f32 1.0, %v16581_v13  ;;  %v11479_v50 = vpop.permute.xlu0 %11478 }
 0xe72   : > { %v16583_v8 = vpop.eup %16582  ;;  %v12275_v19 = vsel %vm7247_vm11, %v21062_v57, %v12070_v32  ;;  %12357 = vst [vmem:[%s16806_s6 + $0x40] sm:$0xff] %v12316_v5  ;;  %v11585_v47 = vadd.f32 %v11479_v50, %v22055_v39  ;;  %v22057_v57 = vld [vmem:[#allocation76_spill] sm:$0xff] }
 0xe73   : > { %v12317_v29 = vsel %vm12307_vm4, %v12275_v19, 0.0  ;;  %v11746_v20 = vadd.f32 1.0, %v16583_v8  ;;  %v11481_v42 = vpop.permute.xlu1 %11480  ;;  %v16585_v15 = vpop.eup %16584  ;;  %16598 = vrcp.f32 %v11745_v44 }
 0xe74   : > { %12358 = vst [vmem:[%s16806_s6 + $0x48] sm:$0xff] %v12317_v29  ;;  %v11586_v2 = vadd.f32 %v11481_v42, %v22056_v27  ;;  %v13303_v38 = vmul.f32 -1.442695, %v11585_v47  ;;  %12215 = vrot.lane.b32.xlu0 %v22057_v57, %s16751_s15  ;;  %12014 = vrot.lane.b32.xlu1 %v16585_v15, %s16754_s21  ;;  %v22061_v42 = vld [vmem:[#allocation39_spill] sm:$0xff] }
 0xe75   : > { %16600 = vrcp.f32 %v11746_v20  ;;  %v16587_v24 = vpop.eup %16586  ;;  %v21267_v11 = vpop.permute.xlu0 %11968 }
 0xe76   : > { %v13304_v35 = vmul.f32 -1.442695, %v11586_v2  ;;  %v12071_v1 = vmul.f32 %v16587_v24, %v11959_v46  ;;  %16602 = vpow2.f32 %v13303_v38 }
 0xe77   : > { %v16589_v21 = vpop.eup %16588  ;;  %v11967_v54 = vpop.permute.xlu1 %11966 }
 0xe78   : > { %v16591_v56 = vpop.eup %16590  ;;  %v12072_v9 = vmul.f32 %v16589_v21, %v21223_v16  ;;  %16604 = vpow2.f32 %v13304_v35  ;;  %v12276_v62 = vsel %vm7247_vm11, %v21066_v10, %v12071_v1  ;;  %12219 = vrot.lane.b32.xlu0 %v22058_v23, %s16751_s15 }
 0xe79   : > { %v16593_v59 = vpop.eup %16592  ;;  %12018 = vrot.lane.b32.xlu1 %v16591_v56, %s16754_s21  ;;  %v12318_v63 = vsel %vm12307_vm4, %v12276_v62, 0.0  ;;  %v11483_v60 = vpop.permute.xlu0 %11482 }
 0xe7a   : > { %v16595_v28 = vpop.eup %16594  ;;  %v12277_v46 = vsel %vm7247_vm11, %v21069_v31, %v12072_v9  ;;  %v11747_v51 = vadd.f32 1.0, %v16593_v59  ;;  %12359 = vst [vmem:[%s16806_s6 + $0x50] sm:$0xff] %v12318_v63  ;;  %v11587_v26 = vadd.f32 %v11483_v60, %v22059_v45 }
 0xe7b   : > { %v12319_v16 = vsel %vm12307_vm4, %v12277_v46, 0.0  ;;  %v11748_v12 = vadd.f32 1.0, %v16595_v28  ;;  %v11485_v10 = vpop.permute.xlu1 %11484  ;;  %v16597_v58 = vpop.eup %16596 }
 0xe7c   : > { %12360 = vst [vmem:[%s16806_s6 + $0x58] sm:$0xff] %v12319_v16  ;;  %16606 = vrcp.f32 %v11747_v51  ;;  %v11588_v32 = vadd.f32 %v11485_v10, %v22060_v37  ;;  %v13305_v13 = vmul.f32 -1.442695, %v11587_v26  ;;  %12016 = vrot.lane.b32.xlu0 %v16597_v58, %s16754_s21  ;;  %v22063_v51 = vld [vmem:[#allocation45_spill] sm:$0xff]  ;;  %v22064_v16 = vld [vmem:[#allocation48_spill] sm:$0xff] }
 0xe7d   : > { %16608 = vrcp.f32 %v11748_v12  ;;  %12221 = vrot.lane.b32.xlu1 %v19960_v7, %s16751_s15  ;;  %v16599_v31 = vpop.eup %16598  ;;  %v11973_v34 = vpop.permute.xlu0 %11972 }
 0xe7e   : > { %v13306_v18 = vmul.f32 -1.442695, %v11588_v32  ;;  %v12073_v8 = vmul.f32 %v16599_v31, %v11963_v3  ;;  %16610 = vpow2.f32 %v13305_v13 }
 0xe7f   : > { %v16601_v14 = vpop.eup %16600  ;;  %v11971_v19 = vpop.permute.xlu1 %11970 }
 0xe80   : > { %v12074_v5 = vmul.f32 %v16601_v14, %v21246_v43  ;;  %16612 = vpow2.f32 %v13306_v18  ;;  %v16603_v44 = vpop.eup %16602  ;;  %v12278_v50 = vsel %vm7247_vm11, %v21073_v30, %v12073_v8  ;;  %12223 = vrot.lane.b32.xlu0 %v19968_v25, %s16751_s15  ;;  %v22062_v30 = vld [vmem:[#allocation41_spill] sm:$0xff] }
 0xe81   : > { %v12320_v20 = vsel %vm12307_vm4, %v12278_v50, 0.0  ;;  %v11749_v3 = vadd.f32 1.0, %v16603_v44  ;;  %v11487_v39 = vpop.permute.xlu0 %11486 }
 0xe82   : > { %v16605_v7 = vpop.eup %16604  ;;  %v12279_v29 = vsel %vm7247_vm11, %v21076_v22, %v12074_v5  ;;  %12361 = vst [vmem:[%s16806_s6 + $0x60] sm:$0xff] %v12320_v20  ;;  %v11589_v15 = vadd.f32 %v11487_v39, %v22061_v42  ;;  %v22066_v20 = vld [vmem:[#allocation55_spill] sm:$0xff] }
 0xe83   : > { %v12321_v47 = vsel %vm12307_vm4, %v12279_v29, 0.0  ;;  %v11750_v43 = vadd.f32 1.0, %v16605_v7  ;;  %v11489_v27 = vpop.permute.xlu1 %11488  ;;  %16614 = vrcp.f32 %v11749_v3  ;;  %v22065_v7 = vld [vmem:[#allocation52_spill] sm:$0xff] }
 0xe84   : > { %12362 = vst [vmem:[%s16806_s6 + $0x68] sm:$0xff] %v12321_v47  ;;  %v11590_v2 = vadd.f32 %v11489_v27, %v22062_v30  ;;  %v13307_v25 = vmul.f32 -1.442695, %v11589_v15 }
 0xe85   : > { %16616 = vrcp.f32 %v11750_v43  ;;  %v11977_v22 = vpop.permute.xlu0 %11976 }
 0xe86   : > { %v16607_v38 = vpop.eup %16606  ;;  %v13308_v57 = vmul.f32 -1.442695, %v11590_v2  ;;  %16618 = vpow2.f32 %v13307_v25 }
 0xe87   : > { %v16609_v24 = vpop.eup %16608  ;;  %v12075_v35 = vmul.f32 %v16607_v38, %v11967_v54  ;;  %v11975_v21 = vpop.permute.xlu1 %11974 }
 0xe88   : > { %v12076_v1 = vmul.f32 %v16609_v24, %v21267_v11  ;;  %16620 = vpow2.f32 %v13308_v57  ;;  %v16611_v56 = vpop.eup %16610 }
 0xe89   : > { %v12280_v9 = vsel %vm7247_vm11, %v21080_v48, %v12075_v35  ;;  %v11751_v28 = vadd.f32 1.0, %v16611_v56  ;;  %v11491_v46 = vpop.permute.xlu0 %11490  ;;  %v22067_v56 = vld [vmem:[#allocation59_spill] sm:$0xff] }
 0xe8a   : > { %v16613_v59 = vpop.eup %16612  ;;  %v12281_v62 = vsel %vm7247_vm11, %v21083_v52, %v12076_v1  ;;  %v12322_v23 = vsel %vm12307_vm4, %v12280_v9, 0.0  ;;  %v11591_v60 = vadd.f32 %v11491_v46, %v22063_v51 }
 0xe8b   : > { %v12323_v54 = vsel %vm12307_vm4, %v12281_v62, 0.0  ;;  %12363 = vst [vmem:[%s16806_s6 + $0x70] sm:$0xff] %v12322_v23  ;;  %v11752_v63 = vadd.f32 1.0, %v16613_v59  ;;  %v11493_v11 = vpop.permute.xlu1 %11492  ;;  %16622 = vrcp.f32 %v11751_v28  ;;  %v22068_v59 = vld [vmem:[#allocation61_spill] sm:$0xff] }
 0xe8c   : > { %12364 = vst [vmem:[%s16806_s6 + $0x78] sm:$0xff] %v12323_v54  ;;  %v11592_v12 = vadd.f32 %v11493_v11, %v22064_v16  ;;  %v13309_v48 = vmul.f32 -1.442695, %v11591_v60 }
 0xe8d   : > { %16624 = vrcp.f32 %v11752_v63  ;;  %v16615_v45 = vpop.eup %16614  ;;  %v11981_v52 = vpop.permute.xlu0 %11980 }
 0xe8e   : > { %v13310_v26 = vmul.f32 -1.442695, %v11592_v12  ;;  %v12077_v58 = vmul.f32 %v16615_v45, %v11971_v19  ;;  %16626 = vpow2.f32 %v13309_v48 }
 0xe8f   : > { %v16617_v10 = vpop.eup %16616  ;;  %v11979_v37 = vpop.permute.xlu1 %11978 }
 0xe90   : > { %v12078_v32 = vmul.f32 %v16617_v10, %v11973_v34  ;;  %16628 = vpow2.f32 %v13310_v26  ;;  %v16619_v13 = vpop.eup %16618  ;;  %v12282_v31 = vsel %vm7247_vm11, %v21087_v55, %v12077_v58 }
 0xe91   : > { %v12324_v8 = vsel %vm12307_vm4, %v12282_v31, 0.0  ;;  %v11753_v5 = vadd.f32 1.0, %v16619_v13  ;;  %v11495_v44 = vpop.permute.xlu0 %11494 }
 0xe92   : > { %v16621_v18 = vpop.eup %16620  ;;  %v12283_v14 = vsel %vm7247_vm11, %v21090_v0, %v12078_v32  ;;  %12365 = vst [vmem:[%s16806_s6 + $0x80] sm:$0xff] %v12324_v8  ;;  %v11593_v29 = vadd.f32 %v11495_v44, %v22065_v7 }
 0xe93   : > { %v12325_v50 = vsel %vm12307_vm4, %v12283_v14, 0.0  ;;  %v11754_v19 = vadd.f32 1.0, %v16621_v18  ;;  %v11497_v34 = vpop.permute.xlu1 %11496  ;;  %16630 = vrcp.f32 %v11753_v5 }
 0xe94   : > { %12366 = vst [vmem:[%s16806_s6 + $0x88] sm:$0xff] %v12325_v50  ;;  %v11594_v3 = vadd.f32 %v11497_v34, %v22066_v20  ;;  %v13311_v55 = vmul.f32 -1.442695, %v11593_v29  ;;  %v22069_v20 = vld [vmem:[#allocation68_spill] sm:$0xff] }
 0xe95   : > { %16632 = vrcp.f32 %v11754_v19  ;;  %v16623_v39 = vpop.eup %16622  ;;  %v11985_v0 = vpop.permute.xlu0 %11984 }
 0xe96   : > { %v13312_v47 = vmul.f32 -1.442695, %v11594_v3  ;;  %v12079_v42 = vmul.f32 %v16623_v39, %v11975_v21  ;;  %16634 = vpow2.f32 %v13311_v55  ;;  %v22070_v55 = vld [vmem:[#allocation65_spill] sm:$0xff] }
 0xe97   : > { %v16625_v43 = vpop.eup %16624  ;;  %v11983_v15 = vpop.permute.xlu1 %11982 }
 0xe98   : > { %v12080_v27 = vmul.f32 %v16625_v43, %v11977_v22  ;;  %16636 = vpow2.f32 %v13312_v47  ;;  %v16627_v30 = vpop.eup %16626  ;;  %v12284_v2 = vsel %vm7247_vm11, %v21094_v41, %v12079_v42 }
 0xe99   : > { %v12326_v57 = vsel %vm12307_vm4, %v12284_v2, 0.0  ;;  %v11755_v24 = vadd.f32 1.0, %v16627_v30  ;;  %v11499_v35 = vpop.permute.xlu0 %11498 }
 0xe9a   : > { %v16629_v25 = vpop.eup %16628  ;;  %v12285_v38 = vsel %vm7247_vm11, %v21097_v53, %v12080_v27  ;;  %12367 = vst [vmem:[%s16806_s6 + $0x90] sm:$0xff] %v12326_v57  ;;  %v11595_v9 = vadd.f32 %v11499_v35, %v22067_v56  ;;  %v22071_v27 = vld [vmem:[#allocation75_spill] sm:$0xff] }
 0xe9b   : > { %v12327_v1 = vsel %vm12307_vm4, %v12285_v38, 0.0  ;;  %v11756_v21 = vadd.f32 1.0, %v16629_v25  ;;  %v11501_v22 = vpop.permute.xlu1 %11500  ;;  %16638 = vrcp.f32 %v11755_v24 }
 0xe9c   : > { %12368 = vst [vmem:[%s16806_s6 + $0x98] sm:$0xff] %v12327_v1  ;;  %v11596_v62 = vadd.f32 %v11501_v22, %v22068_v59  ;;  %v13313_v41 = vmul.f32 -1.442695, %v11595_v9  ;;  %v22072_v1 = vld [vmem:[#allocation72_spill] sm:$0xff]  ;;  %v22073_v22 = vld [vmem:[#allocation81_spill] sm:$0xff] }
 0xe9d   : > { %16640 = vrcp.f32 %v11756_v21  ;;  %v16631_v23 = vpop.eup %16630  ;;  %v11989_v53 = vpop.permute.xlu0 %11988 }
 0xe9e   : > { %v13314_v28 = vmul.f32 -1.442695, %v11596_v62  ;;  %v12081_v54 = vmul.f32 %v16631_v23, %v11979_v37  ;;  %16642 = vpow2.f32 %v13313_v41  ;;  %v22074_v62 = vld [vmem:[#allocation79_spill] sm:$0xff] }
 0xe9f   : > { %v16633_v46 = vpop.eup %16632  ;;  %v11987_v63 = vpop.permute.xlu1 %11986 }
 0xea0   : > { %v12082_v51 = vmul.f32 %v16633_v46, %v11981_v52  ;;  %16644 = vpow2.f32 %v13314_v28  ;;  %v16635_v60 = vpop.eup %16634  ;;  %v12286_v11 = vsel %vm7247_vm11, %v21101_v61, %v12081_v54 }
 0xea1   : > { %v12328_v48 = vsel %vm12307_vm4, %v12286_v11, 0.0  ;;  %v11757_v45 = vadd.f32 1.0, %v16635_v60  ;;  %v11503_v26 = vpop.permute.xlu0 %11502 }
 0xea2   : > { %v16637_v16 = vpop.eup %16636  ;;  %v12287_v12 = vsel %vm7247_vm11, %v21104_v17, %v12082_v51  ;;  %12369 = vst [vmem:[%s16806_s6 + $0xa0] sm:$0xff] %v12328_v48 }
 0xea3   : > { %v12329_v10 = vsel %vm12307_vm4, %v12287_v12, 0.0  ;;  %v11758_v58 = vadd.f32 1.0, %v16637_v16  ;;  %v11505_v37 = vpop.permute.xlu1 %11504  ;;  %16646 = vrcp.f32 %v11757_v45  ;;  %v22075_v45 = vld [vmem:[#allocation85_spill] sm:$0xff] }
 0xea4   : > { %12370 = vst [vmem:[%s16806_s6 + $0xa8] sm:$0xff] %v12329_v10  ;;  %v11598_v3 = vadd.f32 %v11505_v37, %v22069_v20 }
 0xea5   : > { %16648 = vrcp.f32 %v11758_v58  ;;  %v16639_v52 = vpop.eup %16638  ;;  %v11993_v32 = vpop.permute.xlu0 %11992  ;;  %v22076_v58 = vld [vmem:[#allocation88_spill] sm:$0xff] }
 0xea6   : > { %v12083_v13 = vmul.f32 %v16639_v52, %v11983_v15  ;;  %v13316_v15 = vmul.f32 -1.442695, %v11598_v3 }
 0xea7   : > { %v16641_v61 = vpop.eup %16640  ;;  %v11991_v31 = vpop.permute.xlu1 %11990 }
 0xea8   : > { %v12084_v17 = vmul.f32 %v16641_v61, %v11985_v0  ;;  %v16643_v18 = vpop.eup %16642  ;;  %v12288_v14 = vsel %vm7247_vm11, %v21108_v33, %v12083_v13  ;;  %v11597_v33 = vadd.f32 %v11503_v26, %v22070_v55 }
 0xea9   : > { %v12330_v44 = vsel %vm12307_vm4, %v12288_v14, 0.0  ;;  %v11759_v50 = vadd.f32 1.0, %v16643_v18  ;;  %v11507_v19 = vpop.permute.xlu0 %11506 }
 0xeaa   : > { %v16645_v8 = vpop.eup %16644  ;;  %v12289_v5 = vsel %vm7247_vm11, %v21111_v4, %v12084_v17  ;;  %12371 = vst [vmem:[%s16806_s6 + $0xb0] sm:$0xff] %v12330_v44  ;;  %v13315_v25 = vmul.f32 -1.442695, %v11597_v33  ;;  %v11599_v21 = vadd.f32 %v11507_v19, %v22072_v1 }
 0xeab   : > { %v12331_v7 = vsel %vm12307_vm4, %v12289_v5, 0.0  ;;  %v11760_v29 = vadd.f32 1.0, %v16645_v8  ;;  %v11509_v34 = vpop.permute.xlu1 %11508  ;;  %16650 = vrcp.f32 %v11759_v50  ;;  %v22077_v8 = vld [vmem:[#allocation91_spill] sm:$0xff]  ;;  %v22078_v50 = vld [vmem:[#allocation92_spill] sm:$0xff] }
 0xeac   : > { %12372 = vst [vmem:[%s16806_s6 + $0xb8] sm:$0xff] %v12331_v7  ;;  %v11600_v30 = vadd.f32 %v11509_v34, %v22071_v27 }
 0xead   : > { %16652 = vrcp.f32 %v11760_v29  ;;  %v16647_v39 = vpop.eup %16646  ;;  %v21348_v47 = vpop.permute.xlu0 %11996 }
 0xeae   : > { %v12085_v0 = vmul.f32 %v16647_v39, %v11987_v63  ;;  %16654 = vpow2.f32 %v13316_v15  ;;  %v13318_v9 = vmul.f32 -1.442695, %v11600_v30 }
 0xeaf   : > { %v16649_v4 = vpop.eup %16648  ;;  %v21350_v43 = vpop.permute.xlu1 %11994  ;;  %16656 = vpow2.f32 %v13315_v25 }
 0xeb0   : > { %v12086_v42 = vmul.f32 %v16649_v4, %v11989_v53  ;;  %v12290_v2 = vsel %vm7247_vm11, %v21115_v6, %v12085_v0  ;;  %v13317_v53 = vmul.f32 -1.442695, %v11599_v21  ;;  %16658 = vpow2.f32 %v13318_v9 }
 0xeb1   : > { %v12332_v57 = vsel %vm12307_vm4, %v12290_v2, 0.0  ;;  %v11511_v24 = vpop.permute.xlu0 %11510  ;;  %v22079_v2 = vld [vmem:[#allocation93_spill] sm:$0xff] }
 0xeb2   : > { %v12291_v38 = vsel %vm7247_vm11, %v21118_v36, %v12086_v42  ;;  %12373 = vst [vmem:[%s16806_s6 + $0xc0] sm:$0xff] %v12332_v57  ;;  %v11601_v41 = vadd.f32 %v11511_v24, %v22074_v62  ;;  %16660 = vpow2.f32 %v13317_v53 }
 0xeb3   : > { %v12333_v35 = vsel %vm12307_vm4, %v12291_v38, 0.0  ;;  %v11513_v56 = vpop.permute.xlu1 %11512  ;;  %v22080_v38 = vld [vmem:[#allocation94_spill] sm:$0xff] }
 0xeb4   : > { %12374 = vst [vmem:[%s16806_s6 + $0xc8] sm:$0xff] %v12333_v35  ;;  %v11602_v59 = vadd.f32 %v11513_v56, %v22073_v22  ;;  %v13319_v16 = vmul.f32 -1.442695, %v11601_v41 }
 0xeb5   : > { %v16651_v6 = vpop.eup %16650  ;;  %v21364_v36 = vpop.permute.xlu0 %12000 }
 0xeb6   : > { %v12087_v28 = vmul.f32 %v16651_v6, %v11991_v31  ;;  %v13320_v63 = vmul.f32 -1.442695, %v11602_v59 }
 0xeb7   : > { %v16653_v23 = vpop.eup %16652  ;;  %v21366_v46 = vpop.permute.xlu1 %11998 }
 0xeb8   : > { %v12088_v54 = vmul.f32 %v16653_v23, %v11993_v32  ;;  %v12292_v51 = vsel %vm7247_vm11, %v21122_v49, %v12087_v28  ;;  %16662 = vpow2.f32 %v13320_v63  ;;  %v16655_v52 = vpop.eup %16654 }
 0xeb9   : > { %v12334_v11 = vsel %vm12307_vm4, %v12292_v51, 0.0  ;;  %v11515_v12 = vpop.permute.xlu0 %11514  ;;  %16664 = vpow2.f32 %v13319_v16  ;;  %v11762_v31 = vadd.f32 1.0, %v16655_v52  ;;  %v22081_v51 = vld [vmem:[#allocation95_spill] sm:$0xff] }
 0xeba   : > { %v12293_v60 = vsel %vm7247_vm11, %v21125_v40, %v12088_v54  ;;  %12375 = vst [vmem:[%s16806_s6 + $0xd0] sm:$0xff] %v12334_v11  ;;  %v11603_v26 = vadd.f32 %v11515_v12, %v22075_v45  ;;  %v16657_v40 = vpop.eup %16656 }
 0xebb   : > { %v12335_v48 = vsel %vm12307_vm4, %v12293_v60, 0.0  ;;  %v11517_v10 = vpop.permute.xlu1 %11516  ;;  %v16659_v17 = vpop.eup %16658  ;;  %v11761_v18 = vadd.f32 1.0, %v16657_v40 }
 0xebc   : > { %12376 = vst [vmem:[%s16806_s6 + $0xd8] sm:$0xff] %v12335_v48  ;;  %v11604_v37 = vadd.f32 %v11517_v10, %v22076_v58  ;;  %v13321_v61 = vmul.f32 -1.442695, %v11603_v26  ;;  %v16661_v7 = vpop.eup %16660  ;;  %v11764_v29 = vadd.f32 1.0, %v16659_v17 }
 0xebd   : > { %v21378_v32 = vpop.permute.xlu0 %12004  ;;  %v11763_v4 = vadd.f32 1.0, %v16661_v7 }
 0xebe   : > { %v13322_v49 = vmul.f32 -1.442695, %v11604_v37 }
 0xebf   : > { %v21380_v13 = vpop.permute.xlu1 %12002 }
 0xec0   : > { %16666 = vpow2.f32 %v13322_v49 }
 0xec1   : > { %v11519_v14 = vpop.permute.xlu0 %11518  ;;  %16668 = vpow2.f32 %v13321_v61 }
 0xec2   : > { %v11605_v5 = vadd.f32 %v11519_v14, %v22077_v8  ;;  %16670 = vrcp.f32 %v11762_v31  ;;  %v16663_v20 = vpop.eup %16662 }
 0xec3   : > { %v11521_v44 = vpop.permute.xlu1 %11520  ;;  %16672 = vrcp.f32 %v11761_v18  ;;  %v16665_v39 = vpop.eup %16664  ;;  %v11766_v0 = vadd.f32 1.0, %v16663_v20 }
 0xec4   : > { %v11606_v19 = vadd.f32 %v11521_v44, %v22078_v50  ;;  %v13323_v34 = vmul.f32 -1.442695, %v11605_v5  ;;  %v11765_v15 = vadd.f32 1.0, %v16665_v39 }
 0xec6   : > { %v13324_v3 = vmul.f32 -1.442695, %v11606_v19  ;;  %16674 = vpow2.f32 %v13323_v34  ;;  %v21384_v55 = vpop.permute.xlu0 %12008 }
 0xec7   : > { %v21386_v33 = vpop.permute.xlu1 %12006 }
 0xec8   : > { %16676 = vpow2.f32 %v13324_v3 }
 0xec9   : > { %16678 = vrcp.f32 %v11764_v29 }
 0xeca   : > { %v16667_v42 = vpop.eup %16666  ;;  %v11523_v27 = vpop.permute.xlu0 %11522  ;;  %16680 = vrcp.f32 %v11763_v4 }
 0xecb   : > { %v11525_v30 = vpop.permute.xlu1 %11524  ;;  %v11607_v25 = vadd.f32 %v11523_v27, %v22079_v2  ;;  %v16669_v24 = vpop.eup %16668  ;;  %16682 = vrcp.f32 %v11766_v0  ;;  %v11768_v35 = vadd.f32 1.0, %v16667_v42 }
 0xecc   : > { %v11608_v57 = vadd.f32 %v11525_v30, %v22080_v38  ;;  %v16671_v21 = vpop.eup %16670  ;;  %16684 = vrcp.f32 %v11765_v15  ;;  %v11767_v6 = vadd.f32 1.0, %v16669_v24 }
 0xecd   : > { %v13325_v1 = vmul.f32 -1.442695, %v11607_v25  ;;  %v16673_v59 = vpop.eup %16672  ;;  %v12090_v23 = vmul.f32 %v16671_v21, %v21348_v47 }
 0xece   : > { %v13326_v56 = vmul.f32 -1.442695, %v11608_v57  ;;  %v21390_v9 = vpop.permute.xlu0 %12012  ;;  %v12089_v45 = vmul.f32 %v16673_v59, %v21350_v43 }
 0xecf   : > { %v21392_v22 = vpop.permute.xlu1 %12010  ;;  %16686 = vpow2.f32 %v13325_v1 }
 0xed0   : > { %v16675_v62 = vpop.eup %16674  ;;  %16688 = vrcp.f32 %v11768_v35 }
 0xed1   : > { %16690 = vpow2.f32 %v13326_v56  ;;  %v11769_v16 = vadd.f32 1.0, %v16675_v62 }
 0xed2   : > { %v16677_v41 = vpop.eup %16676  ;;  %v11527_v54 = vpop.permute.xlu0 %11526  ;;  %16692 = vrcp.f32 %v11767_v6 }
 0xed3   : > { %v16679_v28 = vpop.eup %16678  ;;  %v11770_v53 = vadd.f32 1.0, %v16677_v41  ;;  %v12202_v63 = vpop.permute.xlu1 %12201  ;;  %v11609_v60 = vadd.f32 %v11527_v54, %v22081_v51 }
 0xed4   : > { %v12295_v11 = vsel %vm7247_vm11, %v12202_v63, %v12090_v23  ;;  %v16681_v48 = vpop.eup %16680  ;;  %v12092_v47 = vmul.f32 %v16679_v28, %v21364_v36 }
 0xed5   : > { %16694 = vrcp.f32 %v11770_v53  ;;  %v12337_v12 = vsel %vm12307_vm4, %v12295_v11, 0.0  ;;  %v13327_v26 = vmul.f32 -1.442695, %v11609_v60  ;;  %v16683_v10 = vpop.eup %16682  ;;  %v12091_v36 = vmul.f32 %v16681_v48, %v21366_v46 }
 0xed6   : > { %12378 = vst [vmem:[%s16806_s6 + $0xe8] sm:$0xff] %v12337_v12  ;;  %v12200_v58 = vpop.permute.xlu0 %12199  ;;  %v16685_v40 = vpop.eup %16684  ;;  %v12094_v17 = vmul.f32 %v16683_v10, %v21378_v32 }
 0xed7   : > { %v12206_v37 = vpop.permute.xlu1 %12205  ;;  %16696 = vpow2.f32 %v13327_v26  ;;  %v12294_v52 = vsel %vm7247_vm11, %v12200_v58, %v12089_v45  ;;  %v12093_v32 = vmul.f32 %v16685_v40, %v21380_v13 }
 0xed8   : > { %v12297_v49 = vsel %vm7247_vm11, %v12206_v37, %v12092_v47  ;;  %16698 = vrcp.f32 %v11769_v16  ;;  %v12336_v61 = vsel %vm12307_vm4, %v12294_v52, 0.0 }
 0xed9   : > { %v12339_v43 = vsel %vm12307_vm4, %v12297_v49, 0.0  ;;  %v16687_v31 = vpop.eup %16686  ;;  %12377 = vst [vmem:[%s16806_s6 + $0xe0] sm:$0xff] %v12336_v61 }
 0xeda   : > { %12380 = vst [vmem:[%s16806_s6 + $0xf8] sm:$0xff] %v12339_v43  ;;  %v16689_v18 = vpop.eup %16688  ;;  %v11771_v14 = vadd.f32 1.0, %v16687_v31  ;;  %v12204_v8 = vpop.permute.xlu0 %12203 }
 0xedb   : > { %v12210_v5 = vpop.permute.xlu1 %12209  ;;  %v12296_v44 = vsel %vm7247_vm11, %v12204_v8, %v12091_v36  ;;  %v16691_v19 = vpop.eup %16690  ;;  %v12096_v34 = vmul.f32 %v16689_v18, %v21384_v55 }
 0xedc   : > { %v12299_v50 = vsel %vm7247_vm11, %v12210_v5, %v12094_v17  ;;  %16700 = vrcp.f32 %v11771_v14  ;;  %v12338_v7 = vsel %vm12307_vm4, %v12296_v44, 0.0  ;;  %v16693_v29 = vpop.eup %16692  ;;  %v11772_v4 = vadd.f32 1.0, %v16691_v19 }
 0xedd   : > { %v12341_v46 = vsel %vm12307_vm4, %v12299_v50, 0.0  ;;  %12379 = vst [vmem:[%s16806_s6 + $0xf0] sm:$0xff] %v12338_v7  ;;  %v12095_v13 = vmul.f32 %v16693_v29, %v21386_v33 }
 0xede   : > { %12382 = vst [vmem:[%s16806_s6 + $0x108] sm:$0xff] %v12341_v46  ;;  %v12208_v3 = vpop.permute.xlu0 %12207  ;;  %16702 = vrcp.f32 %v11772_v4 }
 0xedf   : > { %v16695_v20 = vpop.eup %16694  ;;  %v12214_v39 = vpop.permute.xlu1 %12213  ;;  %v12298_v0 = vsel %vm7247_vm11, %v12208_v3, %v12093_v32 }
 0xee0   : > { %v12301_v42 = vsel %vm7247_vm11, %v12214_v39, %v12096_v34  ;;  %v12340_v15 = vsel %vm12307_vm4, %v12298_v0, 0.0  ;;  %v12098_v55 = vmul.f32 %v16695_v20, %v21390_v9 }
 0xee1   : > { %v12343_v27 = vsel %vm12307_vm4, %v12301_v42, 0.0  ;;  %v16697_v30 = vpop.eup %16696  ;;  %12381 = vst [vmem:[%s16806_s6 + $0x100] sm:$0xff] %v12340_v15 }
 0xee2   : > { %12384 = vst [vmem:[%s16806_s6 + $0x118] sm:$0xff] %v12343_v27  ;;  %v16699_v2 = vpop.eup %16698  ;;  %v11773_v25 = vadd.f32 1.0, %v16697_v30  ;;  %v12212_v38 = vpop.permute.xlu0 %12211 }
 0xee3   : > { %v12218_v57 = vpop.permute.xlu1 %12217  ;;  %v12300_v24 = vsel %vm7247_vm11, %v12212_v38, %v12095_v13  ;;  %v12097_v21 = vmul.f32 %v16699_v2, %v21392_v22 }
 0xee4   : > { %v12303_v35 = vsel %vm7247_vm11, %v12218_v57, %v12098_v55  ;;  %16704 = vrcp.f32 %v11773_v25  ;;  %v12342_v1 = vsel %vm12307_vm4, %v12300_v24, 0.0 }
 0xee5   : > { %v12345_v33 = vsel %vm12307_vm4, %v12303_v35, 0.0  ;;  %12383 = vst [vmem:[%s16806_s6 + $0x110] sm:$0xff] %v12342_v1 }
 0xee6   : > { %12386 = vst [vmem:[%s16806_s6 + $0x128] sm:$0xff] %v12345_v33  ;;  %v16701_v56 = vpop.eup %16700  ;;  %v12216_v9 = vpop.permute.xlu0 %12215 }
 0xee7   : > { %v12015_v59 = vpop.permute.xlu1 %12014  ;;  %v12302_v6 = vsel %vm7247_vm11, %v12216_v9, %v12097_v21 }
 0xee8   : > { %v12099_v62 = vmul.f32 %v16701_v56, %v12015_v59  ;;  %v12344_v41 = vsel %vm12307_vm4, %v12302_v6, 0.0  ;;  %v16703_v22 = vpop.eup %16702 }
 0xee9   : > { %12385 = vst [vmem:[%s16806_s6 + $0x120] sm:$0xff] %v12344_v41 }
 0xeea   : > { %v12220_v23 = vpop.permute.xlu0 %12219 }
 0xeeb   : > { %v12019_v28 = vpop.permute.xlu1 %12018  ;;  %v12304_v53 = vsel %vm7247_vm11, %v12220_v23, %v12099_v62 }
 0xeec   : > { %v12346_v54 = vsel %vm12307_vm4, %v12304_v53, 0.0 }
 0xeed   : > { %12387 = vst [vmem:[%s16806_s6 + $0x130] sm:$0xff] %v12346_v54 }
 0xeee   : > { %v16705_v63 = vpop.eup %16704  ;;  %v12017_v51 = vpop.permute.xlu0 %12016 }
 0xeef   : > { %v12222_v60 = vpop.permute.xlu1 %12221  ;;  %v12100_v11 = vmul.f32 %v16703_v22, %v12017_v51  ;;  %v12101_v16 = vmul.f32 %v16705_v63, %v12019_v28 }
 0xef1   : > { %v12305_v12 = vsel %vm7247_vm11, %v12222_v60, %v12100_v11 }
 0xef2   : > { %v12347_v48 = vsel %vm12307_vm4, %v12305_v12, 0.0  ;;  %v12224_v45 = vpop.permute.xlu0 %12223 }
 0xef3   : > { %12388 = vst [vmem:[%s16806_s6 + $0x138] sm:$0xff] %v12347_v48  ;;  %v12306_v47 = vsel %vm7247_vm11, %v12224_v45, %v12101_v16 }
 0xef4   : > { %v12348_v26 = vsel %vm12307_vm4, %v12306_v47, 0.0 }
 0xef5   : > { %12389 = vst [vmem:[%s16806_s6 + $0x140] sm:$0xf] %v12348_v26 }
 0xef6 PF: > { %s15_s18 = sadd.s32 1, %s16747_s18  }
 0xef7   : > { %p12_p5 = scmp.ge.s32.totalorder %s15_s18, 4  }
 0xef9   :  { %14 = sbr.rel (!%p12_p5) target bundleno = 1 (0x1), region = 93 }

</bundles_post_ra>
